<compile_context>
chip_gen: v7x
topology: tpu7x:2x2x1
jax: 0.10.0
libtpu: 0.0.40
codegen_flags: <defaults>
</compile_context>

<pallas_src>
import jax
import jax.numpy as jnp
from jax.experimental import pallas as pl
from jax.experimental.pallas import tpu as pltpu

NUM_CLASSES = 10          # hyperparameters['number of classes']
BN_EPS = 1e-5
CW = 32                   # uniform in-kernel channel width (max channels = 32)

# mini vgg19_bn "features" config: ('C', cin, cout) conv-bn-relu, ('M',) maxpool2
FEATURE_CFG = (
    ('C', 3, 8), ('C', 8, 8), ('M',),
    ('C', 8, 16), ('C', 16, 16), ('M',),
    ('C', 16, 32), ('M',),
)
# classifier: (in, out, relu); Dropout layers are identity in eval mode
CLASSIFIER_CFG = ((128, 64, True), (64, 64, True), (64, NUM_CLASSES, False))
HID1 = CLASSIFIER_CFG[0][1]

# flat padded-image geometry (per image): rows are (h, w) of the (H+2)x(W+2)
# zero-padded image in row-major order; G guard rows on each side keep the
# nine shifted conv reads in bounds (guards are zeroed, never used for
# interior outputs).
H16, WP16, R16, G16 = 16, 18, 18 * 18, 19
H8,  WP8,  R8,  G8  = 8,  10, 10 * 10, 11
H4,  WP4,  R4,  G4  = 4,  6,  6 * 6,   7


# ----------------------------------------------------------------------------
# In-kernel building blocks (traced inside the fused kernel body)
# ----------------------------------------------------------------------------
def _conv_bn_relu_inplace(a_ref, g, wp, r, w_ref, s_ref, b_ref, m_ref):
    """3x3 SAME conv as 9 shifted bf16 matmuls (f32 acc) + folded BN + ReLU.

    a_ref holds a zero-padded activation image in flat (h*wp + w, channel)
    layout at rows [g, g+r); result (border rows re-zeroed via m_ref) is
    written back in place.
    """
    acc = jnp.zeros((r, CW), jnp.float32)
    for dy in range(3):
        for dx in range(3):
            shift = (dy - 1) * wp + (dx - 1)
            patch = a_ref[pl.ds(g + shift, r), :].astype(jnp.bfloat16)
            acc = acc + jnp.dot(patch, w_ref[dy * 3 + dx],
                                preferred_element_type=jnp.float32)
    y = jnp.maximum(acc * s_ref[...] + b_ref[...], 0.0) * m_ref[...]
    a_ref[pl.ds(g, r), :] = y


def _maxpool2_flat(a_ref, ga, wpa, h, b_ref, gb, wpb):
    """2x2/stride-2 maxpool from flat padded buffer a_ref to b_ref interior."""
    ho = wo = h // 2
    for i in range(ho):
        vals = []
        for dy in range(2):
            for dx in range(2):
                start = ga + (1 + 2 * i + dy) * wpa + (1 + dx)
                vals.append(a_ref[pl.ds(start, wo, stride=2), :])
        m = jnp.maximum(jnp.maximum(vals[0], vals[1]),
                        jnp.maximum(vals[2], vals[3]))
        b_ref[pl.ds(gb + (1 + i) * wpb + 1, wo), :] = m


def _final_pool_fc1(a_ref, g, wp, h, w1_ref, b1_ref):
    """Final 2x2 maxpool fused with the first classifier linear.

    w1_ref is packed as (4, CW, HID1) where index k = h'*2 + w' addresses the
    weight block for pooled spatial position k (pre-permuted from PyTorch's
    NCHW flatten order). Returns relu(pooled @ W1 + b1) of shape (1, HID1).
    """
    ho = wo = h // 2
    h1 = jnp.zeros((1, HID1), jnp.float32)
    for i in range(ho):
        vals = []
        for dy in range(2):
            for dx in range(2):
                start = g + (1 + 2 * i + dy) * wp + (1 + dx)
                vals.append(a_ref[pl.ds(start, wo, stride=2), :])
        m = jnp.maximum(jnp.maximum(vals[0], vals[1]),
                        jnp.maximum(vals[2], vals[3]))          # (wo, CW) f32
        mb = m.astype(jnp.bfloat16)
        for j in range(wo):
            h1 = h1 + jnp.dot(mb[j:j + 1, :], w1_ref[i * wo + j],
                              preferred_element_type=jnp.float32)
    return jnp.maximum(h1 + b1_ref[...], 0.0)


# ----------------------------------------------------------------------------
# The fused kernel: one image per grid step
# ----------------------------------------------------------------------------
def _multimodel_kernel(
        x_ref, m16_ref, m8_ref, m4_ref,
        cw0, cs0, cb0, cw1, cs1, cb1, cw2, cs2, cb2,
        cw3, cs3, cb3, cw4, cs4, cb4,
        lw1, lb1, lw2, lb2, lw3, lb3,
        o_ref,
        a16, a8, a4):
    # ---- scratch init -------------------------------------------------
    # a16 interior (incl. its zero padding ring) is fully overwritten by the
    # already-padded input image, so only the guard rows need zeroing.
    zg = jnp.zeros((G16, CW), jnp.float32)
    a16[pl.ds(0, G16), :] = zg
    a16[pl.ds(G16 + R16, G16), :] = zg
    # a8 / a4 padding rings & guards are never written by the pools -> zero all.
    a8[...] = jnp.zeros_like(a8)
    a4[...] = jnp.zeros_like(a4)

    # ---- features: 16x16 stage ----
    a16[pl.ds(G16, R16), :] = x_ref[0]
    _conv_bn_relu_inplace(a16, G16, WP16, R16, cw0, cs0, cb0, m16_ref)
    _conv_bn_relu_inplace(a16, G16, WP16, R16, cw1, cs1, cb1, m16_ref)
    _maxpool2_flat(a16, G16, WP16, H16, a8, G8, WP8)

    # ---- features: 8x8 stage ----
    _conv_bn_relu_inplace(a8, G8, WP8, R8, cw2, cs2, cb2, m8_ref)
    _conv_bn_relu_inplace(a8, G8, WP8, R8, cw3, cs3, cb3, m8_ref)
    _maxpool2_flat(a8, G8, WP8, H8, a4, G4, WP4)

    # ---- features: 4x4 stage ----
    _conv_bn_relu_inplace(a4, G4, WP4, R4, cw4, cs4, cb4, m4_ref)
    # AdaptiveAvgPool2d: target spatial equals current spatial -> identity.

    # ---- classifier (Dropout = identity in eval mode); final pool fused in ----
    h1 = _final_pool_fc1(a4, G4, WP4, H4, lw1, lb1)
    h2 = jnp.maximum(
        jnp.dot(h1.astype(jnp.bfloat16), lw2[...],
                preferred_element_type=jnp.float32) + lb2[...], 0.0)
    out = jnp.dot(h2.astype(jnp.bfloat16), lw3[...],
                  preferred_element_type=jnp.float32) + lb3[...]
    o_ref[0] = out


# ----------------------------------------------------------------------------
# One-time parameter packing (weight padding to CW, BN folding, w1 permutation)
# ----------------------------------------------------------------------------
def _interior_mask(h):
    hp = h + 2
    hh = jnp.arange(hp)[:, None]
    ww = jnp.arange(hp)[None, :]
    inter = ((hh >= 1) & (hh <= h) & (ww >= 1) & (ww <= h)).astype(jnp.float32)
    return jnp.broadcast_to(inter.reshape(hp * hp, 1), (hp * hp, CW))


def pack_params(params):
    packed = {'mask16': _interior_mask(16),
              'mask8': _interior_mask(8),
              'mask4': _interior_mask(4)}
    convs = []
    for p in params['features']:
        w = p['w']                               # [3,3,cin,cout] HWIO
        cin, cout = w.shape[2], w.shape[3]
        wk = jnp.zeros((9, CW, CW), jnp.float32).at[:, :cin, :cout].set(
            w.reshape(9, cin, cout))
        scale = p['gamma'] / jnp.sqrt(p['var'] + BN_EPS)
        bias = (p['b'] - p['mean']) * scale + p['beta']   # conv bias folded in
        convs.append(dict(
            w=wk.astype(jnp.bfloat16),
            s=jnp.zeros((1, CW), jnp.float32).at[0, :cout].set(scale),
            b=jnp.zeros((1, CW), jnp.float32).at[0, :cout].set(bias)))
    packed['convs'] = convs

    c0, c1, c2 = params['classifier']
    # Permute first linear's rows from NCHW-flatten index (c*4 + k) to the
    # kernel's (k, c) order, k = h*2 + w, and reshape to (4, CW, HID1) so the
    # kernel indexes weight blocks statically (one-time init cost).
    k_idx = jnp.arange(4)[:, None]
    c_idx = jnp.arange(CW)[None, :]
    perm = (c_idx * 4 + k_idx).reshape(-1)
    packed.update(
        lw1=c0['w'][perm, :].reshape(4, CW, HID1).astype(jnp.bfloat16),
        lb1=c0['b'].reshape(1, -1).astype(jnp.float32),
        lw2=c1['w'].astype(jnp.bfloat16),
        lb2=c1['b'].reshape(1, -1).astype(jnp.float32),
        lw3=c2['w'].astype(jnp.bfloat16),
        lb3=c2['b'].reshape(1, -1).astype(jnp.float32))
    return packed


# ----------------------------------------------------------------------------
# MultiModel forward (single fused Pallas call)
# ----------------------------------------------------------------------------
@jax.jit
def multimodel_forward(packed, x_nchw):
    n = x_nchw.shape[0]
    x = jnp.transpose(x_nchw, (0, 2, 3, 1)).astype(jnp.float32)     # NCHW->NHWC
    # zero-pad spatial (+1) and channels (3 -> CW), flatten to per-image rows
    xp = jnp.pad(x, ((0, 0), (1, 1), (1, 1), (0, CW - x.shape[-1])))
    x_flat = xp.reshape(n, R16, CW)

    inputs = [x_flat, packed['mask16'], packed['mask8'], packed['mask4']]
    for c in packed['convs']:
        inputs += [c['w'], c['s'], c['b']]
    inputs += [packed['lw1'], packed['lb1'], packed['lw2'], packed['lb2'],
               packed['lw3'], packed['lb3']]

    in_specs = [pl.BlockSpec((1, R16, CW), lambda i: (i, 0, 0))]
    for a in inputs[1:]:
        in_specs.append(pl.BlockSpec(a.shape, lambda i, nd=a.ndim: (0,) * nd))

    out = pl.pallas_call(
        _multimodel_kernel,
        out_shape=jax.ShapeDtypeStruct((n, 1, NUM_CLASSES), jnp.float32),
        grid=(n,),
        in_specs=in_specs,
        out_specs=pl.BlockSpec((1, 1, NUM_CLASSES), lambda i: (i, 0, 0)),
        scratch_shapes=[
            pltpu.VMEM((2 * G16 + R16, CW), jnp.float32),   # 16x16 stage
            pltpu.VMEM((2 * G8 + R8, CW), jnp.float32),     # 8x8 stage
            pltpu.VMEM((2 * G4 + R4, CW), jnp.float32),     # 4x4 stage
        ],
        compiler_params=pltpu.CompilerParams(
            dimension_semantics=("parallel",)),
    )(*inputs)
    return out.reshape(n, NUM_CLASSES)


# ----------------------------------------------------------------------------
# Pure-JAX reference (bf16-in / f32-acc matmuls, matching kernel numerics)
# ----------------------------------------------------------------------------
def ref_forward(params, x_nchw):
    x = jnp.transpose(x_nchw, (0, 2, 3, 1)).astype(jnp.float32)
    ci = 0
    for layer in FEATURE_CFG:
        if layer[0] == 'C':
            p = params['features'][ci]
            ci += 1
            y = jax.lax.conv_general_dilated(
                x.astype(jnp.bfloat16), p['w'].astype(jnp.bfloat16),
                (1, 1), 'SAME',
                dimension_numbers=('NHWC', 'HWIO', 'NHWC'),
                preferred_element_type=jnp.float32)
            scale = p['gamma'] / jnp.sqrt(p['var'] + BN_EPS)
            bias = (p['b'] - p['mean']) * scale + p['beta']
            x = jnp.maximum(y * scale + bias, 0.0)
        else:
            nb, h, w, c = x.shape
            x = jnp.max(x.reshape(nb, h // 2, 2, w // 2, 2, c), axis=(2, 4))
    x = jnp.transpose(x, (0, 3, 1, 2)).reshape(x.shape[0], -1)   # NCHW flatten
    for li, (_, _, relu) in enumerate(CLASSIFIER_CFG):
        lp = params['classifier'][li]
        x = jnp.dot(x.astype(jnp.bfloat16), lp['w'].astype(jnp.bfloat16),
                    preferred_element_type=jnp.float32) + lp['b']
        if relu:
            x = jnp.maximum(x, 0.0)
    return x


# ----------------------------------------------------------------------------
# Deterministic parameter init
# ----------------------------------------------------------------------------
def _conv_block_params(key, cin, cout):
    kw, kb, kg, kbt, km, kv = jax.random.split(key, 6)
    return dict(
        w=jax.random.normal(kw, (3, 3, cin, cout), jnp.float32)
          * (1.0 / jnp.sqrt(9.0 * cin)),
        b=0.1 * jax.random.normal(kb, (cout,), jnp.float32),
        gamma=1.0 + 0.1 * jax.random.normal(kg, (cout,), jnp.float32),
        beta=0.1 * jax.random.normal(kbt, (cout,), jnp.float32),
        mean=0.1 * jax.random.normal(km, (cout,), jnp.float32),
        var=1.0 + 0.1 * jax.random.uniform(kv, (cout,), jnp.float32),
    )


def _linear_params(key, din, dout):
    kw, kb = jax.random.split(key)
    return dict(
        w=jax.random.normal(kw, (din, dout), jnp.float32) * (1.0 / jnp.sqrt(din)),
        b=0.1 * jax.random.normal(kb, (dout,), jnp.float32),
    )


def init_params(key):
    feats = []
    for layer in FEATURE_CFG:
        if layer[0] == 'C':
            key, sub = jax.random.split(key)
            feats.append(_conv_block_params(sub, layer[1], layer[2]))
    cls = []
    for din, dout, _ in CLASSIFIER_CFG:
        key, sub = jax.random.split(key)
        cls.append(_linear_params(sub, din, dout))
    return dict(features=feats, classifier=cls)


# ----------------------------------------------------------------------------
if __name__ == "__main__":
    key = jax.random.PRNGKey(0)
    pkey, xkey = jax.random.split(key)
    params = init_params(pkey)
    packed = pack_params(params)                                # one-time repack
    x = jax.random.normal(xkey, (2, 3, 16, 16), jnp.float32)    # NCHW input

    out = multimodel_forward(packed, x)
    out = jax.block_until_ready(out)
    assert out.shape == (2, NUM_CLASSES), out.shape

    ref = jax.block_until_ready(ref_forward(params, x))
    assert jnp.allclose(out, ref, atol=2e-2, rtol=2e-2), (
        float(jnp.max(jnp.abs(out - ref))))

    print("KERNEL_OK")
</pallas_src>

<mosaic_0001>
module attributes {stable_mosaic.version = 11 : i64} {
  func.func @_multimodel_kernel(%arg0: i32, %arg1: memref<1x324x32xf32, #tpu.memory_space<vmem>>, %arg2: memref<324x32xf32, #tpu.memory_space<vmem>>, %arg3: memref<100x32xf32, #tpu.memory_space<vmem>>, %arg4: memref<36x32xf32, #tpu.memory_space<vmem>>, %arg5: memref<9x32x32xbf16, #tpu.memory_space<vmem>>, %arg6: memref<1x32xf32, #tpu.memory_space<vmem>>, %arg7: memref<1x32xf32, #tpu.memory_space<vmem>>, %arg8: memref<9x32x32xbf16, #tpu.memory_space<vmem>>, %arg9: memref<1x32xf32, #tpu.memory_space<vmem>>, %arg10: memref<1x32xf32, #tpu.memory_space<vmem>>, %arg11: memref<9x32x32xbf16, #tpu.memory_space<vmem>>, %arg12: memref<1x32xf32, #tpu.memory_space<vmem>>, %arg13: memref<1x32xf32, #tpu.memory_space<vmem>>, %arg14: memref<9x32x32xbf16, #tpu.memory_space<vmem>>, %arg15: memref<1x32xf32, #tpu.memory_space<vmem>>, %arg16: memref<1x32xf32, #tpu.memory_space<vmem>>, %arg17: memref<9x32x32xbf16, #tpu.memory_space<vmem>>, %arg18: memref<1x32xf32, #tpu.memory_space<vmem>>, %arg19: memref<1x32xf32, #tpu.memory_space<vmem>>, %arg20: memref<4x32x64xbf16, #tpu.memory_space<vmem>>, %arg21: memref<1x64xf32, #tpu.memory_space<vmem>>, %arg22: memref<64x64xbf16, #tpu.memory_space<vmem>>, %arg23: memref<1x64xf32, #tpu.memory_space<vmem>>, %arg24: memref<64x10xbf16, #tpu.memory_space<vmem>>, %arg25: memref<1x10xf32, #tpu.memory_space<vmem>>, %arg26: memref<1x1x10xf32, #tpu.memory_space<vmem>>, %arg27: memref<362x32xf32, #tpu.memory_space<vmem>>, %arg28: memref<122x32xf32, #tpu.memory_space<vmem>>, %arg29: memref<50x32xf32, #tpu.memory_space<vmem>>) attributes {dimension_semantics = [#tpu.dimension_semantics<parallel>], iteration_bounds = array<i64: 2>, scalar_prefetch = 0 : i64, scratch_operands = 3 : i64, tpu.core_type = #tpu.core_type<tc>, window_params = [{transform_indices = @transform_0, window_bounds = array<i64: 1, 324, 32>}, {pipeline_mode = #tpu.pipeline_mode<synchronous>, transform_indices = @transform_1, window_bounds = array<i64: 324, 32>}, {pipeline_mode = #tpu.pipeline_mode<synchronous>, transform_indices = @transform_2, window_bounds = array<i64: 100, 32>}, {pipeline_mode = #tpu.pipeline_mode<synchronous>, transform_indices = @transform_3, window_bounds = array<i64: 36, 32>}, {pipeline_mode = #tpu.pipeline_mode<synchronous>, transform_indices = @transform_4, window_bounds = array<i64: 9, 32, 32>}, {pipeline_mode = #tpu.pipeline_mode<synchronous>, transform_indices = @transform_5, window_bounds = array<i64: 1, 32>}, {pipeline_mode = #tpu.pipeline_mode<synchronous>, transform_indices = @transform_6, window_bounds = array<i64: 1, 32>}, {pipeline_mode = #tpu.pipeline_mode<synchronous>, transform_indices = @transform_7, window_bounds = array<i64: 9, 32, 32>}, {pipeline_mode = #tpu.pipeline_mode<synchronous>, transform_indices = @transform_8, window_bounds = array<i64: 1, 32>}, {pipeline_mode = #tpu.pipeline_mode<synchronous>, transform_indices = @transform_9, window_bounds = array<i64: 1, 32>}, {pipeline_mode = #tpu.pipeline_mode<synchronous>, transform_indices = @transform_10, window_bounds = array<i64: 9, 32, 32>}, {pipeline_mode = #tpu.pipeline_mode<synchronous>, transform_indices = @transform_11, window_bounds = array<i64: 1, 32>}, {pipeline_mode = #tpu.pipeline_mode<synchronous>, transform_indices = @transform_12, window_bounds = array<i64: 1, 32>}, {pipeline_mode = #tpu.pipeline_mode<synchronous>, transform_indices = @transform_13, window_bounds = array<i64: 9, 32, 32>}, {pipeline_mode = #tpu.pipeline_mode<synchronous>, transform_indices = @transform_14, window_bounds = array<i64: 1, 32>}, {pipeline_mode = #tpu.pipeline_mode<synchronous>, transform_indices = @transform_15, window_bounds = array<i64: 1, 32>}, {pipeline_mode = #tpu.pipeline_mode<synchronous>, transform_indices = @transform_16, window_bounds = array<i64: 9, 32, 32>}, {pipeline_mode = #tpu.pipeline_mode<synchronous>, transform_indices = @transform_17, window_bounds = array<i64: 1, 32>}, {pipeline_mode = #tpu.pipeline_mode<synchronous>, transform_indices = @transform_18, window_bounds = array<i64: 1, 32>}, {pipeline_mode = #tpu.pipeline_mode<synchronous>, transform_indices = @transform_19, window_bounds = array<i64: 4, 32, 64>}, {pipeline_mode = #tpu.pipeline_mode<synchronous>, transform_indices = @transform_20, window_bounds = array<i64: 1, 64>}, {pipeline_mode = #tpu.pipeline_mode<synchronous>, transform_indices = @transform_21, window_bounds = array<i64: 64, 64>}, {pipeline_mode = #tpu.pipeline_mode<synchronous>, transform_indices = @transform_22, window_bounds = array<i64: 1, 64>}, {pipeline_mode = #tpu.pipeline_mode<synchronous>, transform_indices = @transform_23, window_bounds = array<i64: 64, 10>}, {pipeline_mode = #tpu.pipeline_mode<synchronous>, transform_indices = @transform_24, window_bounds = array<i64: 1, 10>}, {transform_indices = @transform_25, window_bounds = array<i64: 1, 1, 10>}]} {
    %cst = arith.constant 0.000000e+00 : f32
    %0 = vector.broadcast %cst : f32 to vector<19x32xf32>
    %c0 = arith.constant 0 : index
    %c0_0 = arith.constant 0 : index
    %1 = vector.load %arg27[%c0, %c0_0] : memref<362x32xf32, #tpu.memory_space<vmem>>, vector<19x32xf32>
    tpu.vector_store %arg27[%c0, %c0_0], %0 {strides = array<i32>} : memref<362x32xf32, #tpu.memory_space<vmem>>, vector<19x32xf32>,
    %c343 = arith.constant 343 : index
    %c0_1 = arith.constant 0 : index
    %2 = vector.load %arg27[%c343, %c0_1] : memref<362x32xf32, #tpu.memory_space<vmem>>, vector<19x32xf32>
    tpu.vector_store %arg27[%c343, %c0_1], %0 {strides = array<i32>} : memref<362x32xf32, #tpu.memory_space<vmem>>, vector<19x32xf32>,
    %cst_2 = arith.constant 0.000000e+00 : f32
    %3 = vector.broadcast %cst_2 : f32 to vector<122x32xf32>
    %c0_3 = arith.constant 0 : index
    %c0_4 = arith.constant 0 : index
    %4 = vector.load %arg28[%c0_3, %c0_4] : memref<122x32xf32, #tpu.memory_space<vmem>>, vector<122x32xf32>
    tpu.vector_store %arg28[%c0_3, %c0_4], %3 {strides = array<i32>} : memref<122x32xf32, #tpu.memory_space<vmem>>, vector<122x32xf32>,
    %cst_5 = arith.constant 0.000000e+00 : f32
    %5 = vector.broadcast %cst_5 : f32 to vector<50x32xf32>
    %c0_6 = arith.constant 0 : index
    %c0_7 = arith.constant 0 : index
    %6 = vector.load %arg29[%c0_6, %c0_7] : memref<50x32xf32, #tpu.memory_space<vmem>>, vector<50x32xf32>
    tpu.vector_store %arg29[%c0_6, %c0_7], %5 {strides = array<i32>} : memref<50x32xf32, #tpu.memory_space<vmem>>, vector<50x32xf32>,
    %c0_8 = arith.constant 0 : index
    %c0_9 = arith.constant 0 : index
    %c0_10 = arith.constant 0 : index
    %7 = vector.load %arg1[%c0_8, %c0_9, %c0_10] : memref<1x324x32xf32, #tpu.memory_space<vmem>>, vector<1x324x32xf32>
    %8 = vector.shape_cast %7 : vector<1x324x32xf32> to vector<324x32xf32>
    %c19 = arith.constant 19 : index
    %c0_11 = arith.constant 0 : index
    %9 = vector.load %arg27[%c19, %c0_11] : memref<362x32xf32, #tpu.memory_space<vmem>>, vector<324x32xf32>
    tpu.vector_store %arg27[%c19, %c0_11], %8 {strides = array<i32>} : memref<362x32xf32, #tpu.memory_space<vmem>>, vector<324x32xf32>,
    %cst_12 = arith.constant 0.000000e+00 : f32
    %10 = vector.broadcast %cst_12 : f32 to vector<324x32xf32>
    %c0_13 = arith.constant 0 : index
    %c0_14 = arith.constant 0 : index
    %11 = vector.load %arg27[%c0_13, %c0_14] : memref<362x32xf32, #tpu.memory_space<vmem>>, vector<324x32xf32>
    %12 = arith.truncf %11 : vector<324x32xf32> to vector<324x32xbf16>
    %c0_15 = arith.constant 0 : index
    %c0_16 = arith.constant 0 : index
    %c0_17 = arith.constant 0 : index
    %13 = vector.load %arg5[%c0_15, %c0_16, %c0_17] : memref<9x32x32xbf16, #tpu.memory_space<vmem>>, vector<1x32x32xbf16>
    %14 = vector.shape_cast %13 : vector<1x32x32xbf16> to vector<32x32xbf16>
    %cst_18 = arith.constant dense<0.000000e+00> : vector<324x32xf32>
    %15 = tpu.matmul %12, %14, %cst_18 {dimension_numbers = #tpu.dot_dimension_numbers<[1], [0], [0], [1], [0, 0, 1, 1], [], []>} : vector<324x32xbf16>, vector<32x32xbf16>, vector<324x32xf32> -> vector<324x32xf32>
    %16 = arith.addf %10, %15 : vector<324x32xf32>
    %c1 = arith.constant 1 : index
    %c0_19 = arith.constant 0 : index
    %17 = vector.load %arg27[%c1, %c0_19] : memref<362x32xf32, #tpu.memory_space<vmem>>, vector<324x32xf32>
    %18 = arith.truncf %17 : vector<324x32xf32> to vector<324x32xbf16>
    %c1_20 = arith.constant 1 : index
    %c0_21 = arith.constant 0 : index
    %c0_22 = arith.constant 0 : index
    %19 = vector.load %arg5[%c1_20, %c0_21, %c0_22] : memref<9x32x32xbf16, #tpu.memory_space<vmem>>, vector<1x32x32xbf16>
    %20 = vector.shape_cast %19 : vector<1x32x32xbf16> to vector<32x32xbf16>
    %cst_23 = arith.constant dense<0.000000e+00> : vector<324x32xf32>
    %21 = tpu.matmul %18, %20, %cst_23 {dimension_numbers = #tpu.dot_dimension_numbers<[1], [0], [0], [1], [0, 0, 1, 1], [], []>} : vector<324x32xbf16>, vector<32x32xbf16>, vector<324x32xf32> -> vector<324x32xf32>
    %22 = arith.addf %16, %21 : vector<324x32xf32>
    %c2 = arith.constant 2 : index
    %c0_24 = arith.constant 0 : index
    %23 = vector.load %arg27[%c2, %c0_24] : memref<362x32xf32, #tpu.memory_space<vmem>>, vector<324x32xf32>
    %24 = arith.truncf %23 : vector<324x32xf32> to vector<324x32xbf16>
    %c2_25 = arith.constant 2 : index
    %c0_26 = arith.constant 0 : index
    %c0_27 = arith.constant 0 : index
    %25 = vector.load %arg5[%c2_25, %c0_26, %c0_27] : memref<9x32x32xbf16, #tpu.memory_space<vmem>>, vector<1x32x32xbf16>
    %26 = vector.shape_cast %25 : vector<1x32x32xbf16> to vector<32x32xbf16>
    %cst_28 = arith.constant dense<0.000000e+00> : vector<324x32xf32>
    %27 = tpu.matmul %24, %26, %cst_28 {dimension_numbers = #tpu.dot_dimension_numbers<[1], [0], [0], [1], [0, 0, 1, 1], [], []>} : vector<324x32xbf16>, vector<32x32xbf16>, vector<324x32xf32> -> vector<324x32xf32>
    %28 = arith.addf %22, %27 : vector<324x32xf32>
    %c18 = arith.constant 18 : index
    %c0_29 = arith.constant 0 : index
    %29 = vector.load %arg27[%c18, %c0_29] : memref<362x32xf32, #tpu.memory_space<vmem>>, vector<324x32xf32>
    %30 = arith.truncf %29 : vector<324x32xf32> to vector<324x32xbf16>
    %c3 = arith.constant 3 : index
    %c0_30 = arith.constant 0 : index
    %c0_31 = arith.constant 0 : index
    %31 = vector.load %arg5[%c3, %c0_30, %c0_31] : memref<9x32x32xbf16, #tpu.memory_space<vmem>>, vector<1x32x32xbf16>
    %32 = vector.shape_cast %31 : vector<1x32x32xbf16> to vector<32x32xbf16>
    %cst_32 = arith.constant dense<0.000000e+00> : vector<324x32xf32>
    %33 = tpu.matmul %30, %32, %cst_32 {dimension_numbers = #tpu.dot_dimension_numbers<[1], [0], [0], [1], [0, 0, 1, 1], [], []>} : vector<324x32xbf16>, vector<32x32xbf16>, vector<324x32xf32> -> vector<324x32xf32>
    %34 = arith.addf %28, %33 : vector<324x32xf32>
    %c19_33 = arith.constant 19 : index
    %c0_34 = arith.constant 0 : index
    %35 = vector.load %arg27[%c19_33, %c0_34] : memref<362x32xf32, #tpu.memory_space<vmem>>, vector<324x32xf32>
    %36 = arith.truncf %35 : vector<324x32xf32> to vector<324x32xbf16>
    %c4 = arith.constant 4 : index
    %c0_35 = arith.constant 0 : index
    %c0_36 = arith.constant 0 : index
    %37 = vector.load %arg5[%c4, %c0_35, %c0_36] : memref<9x32x32xbf16, #tpu.memory_space<vmem>>, vector<1x32x32xbf16>
    %38 = vector.shape_cast %37 : vector<1x32x32xbf16> to vector<32x32xbf16>
    %cst_37 = arith.constant dense<0.000000e+00> : vector<324x32xf32>
    %39 = tpu.matmul %36, %38, %cst_37 {dimension_numbers = #tpu.dot_dimension_numbers<[1], [0], [0], [1], [0, 0, 1, 1], [], []>} : vector<324x32xbf16>, vector<32x32xbf16>, vector<324x32xf32> -> vector<324x32xf32>
    %40 = arith.addf %34, %39 : vector<324x32xf32>
    %c20 = arith.constant 20 : index
    %c0_38 = arith.constant 0 : index
    %41 = vector.load %arg27[%c20, %c0_38] : memref<362x32xf32, #tpu.memory_space<vmem>>, vector<324x32xf32>
    %42 = arith.truncf %41 : vector<324x32xf32> to vector<324x32xbf16>
    %c5 = arith.constant 5 : index
    %c0_39 = arith.constant 0 : index
    %c0_40 = arith.constant 0 : index
    %43 = vector.load %arg5[%c5, %c0_39, %c0_40] : memref<9x32x32xbf16, #tpu.memory_space<vmem>>, vector<1x32x32xbf16>
    %44 = vector.shape_cast %43 : vector<1x32x32xbf16> to vector<32x32xbf16>
    %cst_41 = arith.constant dense<0.000000e+00> : vector<324x32xf32>
    %45 = tpu.matmul %42, %44, %cst_41 {dimension_numbers = #tpu.dot_dimension_numbers<[1], [0], [0], [1], [0, 0, 1, 1], [], []>} : vector<324x32xbf16>, vector<32x32xbf16>, vector<324x32xf32> -> vector<324x32xf32>
    %46 = arith.addf %40, %45 : vector<324x32xf32>
    %c36 = arith.constant 36 : index
    %c0_42 = arith.constant 0 : index
    %47 = vector.load %arg27[%c36, %c0_42] : memref<362x32xf32, #tpu.memory_space<vmem>>, vector<324x32xf32>
    %48 = arith.truncf %47 : vector<324x32xf32> to vector<324x32xbf16>
    %c6 = arith.constant 6 : index
    %c0_43 = arith.constant 0 : index
    %c0_44 = arith.constant 0 : index
    %49 = vector.load %arg5[%c6, %c0_43, %c0_44] : memref<9x32x32xbf16, #tpu.memory_space<vmem>>, vector<1x32x32xbf16>
    %50 = vector.shape_cast %49 : vector<1x32x32xbf16> to vector<32x32xbf16>
    %cst_45 = arith.constant dense<0.000000e+00> : vector<324x32xf32>
    %51 = tpu.matmul %48, %50, %cst_45 {dimension_numbers = #tpu.dot_dimension_numbers<[1], [0], [0], [1], [0, 0, 1, 1], [], []>} : vector<324x32xbf16>, vector<32x32xbf16>, vector<324x32xf32> -> vector<324x32xf32>
    %52 = arith.addf %46, %51 : vector<324x32xf32>
    %c37 = arith.constant 37 : index
    %c0_46 = arith.constant 0 : index
    %53 = vector.load %arg27[%c37, %c0_46] : memref<362x32xf32, #tpu.memory_space<vmem>>, vector<324x32xf32>
    %54 = arith.truncf %53 : vector<324x32xf32> to vector<324x32xbf16>
    %c7 = arith.constant 7 : index
    %c0_47 = arith.constant 0 : index
    %c0_48 = arith.constant 0 : index
    %55 = vector.load %arg5[%c7, %c0_47, %c0_48] : memref<9x32x32xbf16, #tpu.memory_space<vmem>>, vector<1x32x32xbf16>
    %56 = vector.shape_cast %55 : vector<1x32x32xbf16> to vector<32x32xbf16>
    %cst_49 = arith.constant dense<0.000000e+00> : vector<324x32xf32>
    %57 = tpu.matmul %54, %56, %cst_49 {dimension_numbers = #tpu.dot_dimension_numbers<[1], [0], [0], [1], [0, 0, 1, 1], [], []>} : vector<324x32xbf16>, vector<32x32xbf16>, vector<324x32xf32> -> vector<324x32xf32>
    %58 = arith.addf %52, %57 : vector<324x32xf32>
    %c38 = arith.constant 38 : index
    %c0_50 = arith.constant 0 : index
    %59 = vector.load %arg27[%c38, %c0_50] : memref<362x32xf32, #tpu.memory_space<vmem>>, vector<324x32xf32>
    %60 = arith.truncf %59 : vector<324x32xf32> to vector<324x32xbf16>
    %c8 = arith.constant 8 : index
    %c0_51 = arith.constant 0 : index
    %c0_52 = arith.constant 0 : index
    %61 = vector.load %arg5[%c8, %c0_51, %c0_52] : memref<9x32x32xbf16, #tpu.memory_space<vmem>>, vector<1x32x32xbf16>
    %62 = vector.shape_cast %61 : vector<1x32x32xbf16> to vector<32x32xbf16>
    %cst_53 = arith.constant dense<0.000000e+00> : vector<324x32xf32>
    %63 = tpu.matmul %60, %62, %cst_53 {dimension_numbers = #tpu.dot_dimension_numbers<[1], [0], [0], [1], [0, 0, 1, 1], [], []>} : vector<324x32xbf16>, vector<32x32xbf16>, vector<324x32xf32> -> vector<324x32xf32>
    %64 = arith.addf %58, %63 : vector<324x32xf32>
    %c0_54 = arith.constant 0 : index
    %c0_55 = arith.constant 0 : index
    %65 = vector.load %arg6[%c0_54, %c0_55] : memref<1x32xf32, #tpu.memory_space<vmem>>, vector<1x32xf32>
    %66 = vector.broadcast %65 : vector<1x32xf32> to vector<324x32xf32>
    %67 = arith.mulf %64, %66 : vector<324x32xf32>
    %c0_56 = arith.constant 0 : index
    %c0_57 = arith.constant 0 : index
    %68 = vector.load %arg7[%c0_56, %c0_57] : memref<1x32xf32, #tpu.memory_space<vmem>>, vector<1x32xf32>
    %69 = vector.broadcast %68 : vector<1x32xf32> to vector<324x32xf32>
    %70 = arith.addf %67, %69 : vector<324x32xf32>
    %cst_58 = arith.constant 0.000000e+00 : f32
    %71 = vector.broadcast %cst_58 : f32 to vector<324x32xf32>
    %72 = arith.maximumf %70, %71 : vector<324x32xf32>
    %c0_59 = arith.constant 0 : index
    %c0_60 = arith.constant 0 : index
    %73 = vector.load %arg2[%c0_59, %c0_60] : memref<324x32xf32, #tpu.memory_space<vmem>>, vector<324x32xf32>
    %74 = arith.mulf %72, %73 : vector<324x32xf32>
    %c19_61 = arith.constant 19 : index
    %c0_62 = arith.constant 0 : index
    %75 = vector.load %arg27[%c19_61, %c0_62] : memref<362x32xf32, #tpu.memory_space<vmem>>, vector<324x32xf32>
    tpu.vector_store %arg27[%c19_61, %c0_62], %74 {strides = array<i32>} : memref<362x32xf32, #tpu.memory_space<vmem>>, vector<324x32xf32>,
    %cst_63 = arith.constant 0.000000e+00 : f32
    %76 = vector.broadcast %cst_63 : f32 to vector<324x32xf32>
    %c0_64 = arith.constant 0 : index
    %c0_65 = arith.constant 0 : index
    %77 = vector.load %arg27[%c0_64, %c0_65] : memref<362x32xf32, #tpu.memory_space<vmem>>, vector<324x32xf32>
    %78 = arith.truncf %77 : vector<324x32xf32> to vector<324x32xbf16>
    %c0_66 = arith.constant 0 : index
    %c0_67 = arith.constant 0 : index
    %c0_68 = arith.constant 0 : index
    %79 = vector.load %arg8[%c0_66, %c0_67, %c0_68] : memref<9x32x32xbf16, #tpu.memory_space<vmem>>, vector<1x32x32xbf16>
    %80 = vector.shape_cast %79 : vector<1x32x32xbf16> to vector<32x32xbf16>
    %cst_69 = arith.constant dense<0.000000e+00> : vector<324x32xf32>
    %81 = tpu.matmul %78, %80, %cst_69 {dimension_numbers = #tpu.dot_dimension_numbers<[1], [0], [0], [1], [0, 0, 1, 1], [], []>} : vector<324x32xbf16>, vector<32x32xbf16>, vector<324x32xf32> -> vector<324x32xf32>
    %82 = arith.addf %76, %81 : vector<324x32xf32>
    %c1_70 = arith.constant 1 : index
    %c0_71 = arith.constant 0 : index
    %83 = vector.load %arg27[%c1_70, %c0_71] : memref<362x32xf32, #tpu.memory_space<vmem>>, vector<324x32xf32>
    %84 = arith.truncf %83 : vector<324x32xf32> to vector<324x32xbf16>
    %c1_72 = arith.constant 1 : index
    %c0_73 = arith.constant 0 : index
    %c0_74 = arith.constant 0 : index
    %85 = vector.load %arg8[%c1_72, %c0_73, %c0_74] : memref<9x32x32xbf16, #tpu.memory_space<vmem>>, vector<1x32x32xbf16>
    %86 = vector.shape_cast %85 : vector<1x32x32xbf16> to vector<32x32xbf16>
    %cst_75 = arith.constant dense<0.000000e+00> : vector<324x32xf32>
    %87 = tpu.matmul %84, %86, %cst_75 {dimension_numbers = #tpu.dot_dimension_numbers<[1], [0], [0], [1], [0, 0, 1, 1], [], []>} : vector<324x32xbf16>, vector<32x32xbf16>, vector<324x32xf32> -> vector<324x32xf32>
    %88 = arith.addf %82, %87 : vector<324x32xf32>
    %c2_76 = arith.constant 2 : index
    %c0_77 = arith.constant 0 : index
    %89 = vector.load %arg27[%c2_76, %c0_77] : memref<362x32xf32, #tpu.memory_space<vmem>>, vector<324x32xf32>
    %90 = arith.truncf %89 : vector<324x32xf32> to vector<324x32xbf16>
    %c2_78 = arith.constant 2 : index
    %c0_79 = arith.constant 0 : index
    %c0_80 = arith.constant 0 : index
    %91 = vector.load %arg8[%c2_78, %c0_79, %c0_80] : memref<9x32x32xbf16, #tpu.memory_space<vmem>>, vector<1x32x32xbf16>
    %92 = vector.shape_cast %91 : vector<1x32x32xbf16> to vector<32x32xbf16>
    %cst_81 = arith.constant dense<0.000000e+00> : vector<324x32xf32>
    %93 = tpu.matmul %90, %92, %cst_81 {dimension_numbers = #tpu.dot_dimension_numbers<[1], [0], [0], [1], [0, 0, 1, 1], [], []>} : vector<324x32xbf16>, vector<32x32xbf16>, vector<324x32xf32> -> vector<324x32xf32>
    %94 = arith.addf %88, %93 : vector<324x32xf32>
    %c18_82 = arith.constant 18 : index
    %c0_83 = arith.constant 0 : index
    %95 = vector.load %arg27[%c18_82, %c0_83] : memref<362x32xf32, #tpu.memory_space<vmem>>, vector<324x32xf32>
    %96 = arith.truncf %95 : vector<324x32xf32> to vector<324x32xbf16>
    %c3_84 = arith.constant 3 : index
    %c0_85 = arith.constant 0 : index
    %c0_86 = arith.constant 0 : index
    %97 = vector.load %arg8[%c3_84, %c0_85, %c0_86] : memref<9x32x32xbf16, #tpu.memory_space<vmem>>, vector<1x32x32xbf16>
    %98 = vector.shape_cast %97 : vector<1x32x32xbf16> to vector<32x32xbf16>
    %cst_87 = arith.constant dense<0.000000e+00> : vector<324x32xf32>
    %99 = tpu.matmul %96, %98, %cst_87 {dimension_numbers = #tpu.dot_dimension_numbers<[1], [0], [0], [1], [0, 0, 1, 1], [], []>} : vector<324x32xbf16>, vector<32x32xbf16>, vector<324x32xf32> -> vector<324x32xf32>
    %100 = arith.addf %94, %99 : vector<324x32xf32>
    %c19_88 = arith.constant 19 : index
    %c0_89 = arith.constant 0 : index
    %101 = vector.load %arg27[%c19_88, %c0_89] : memref<362x32xf32, #tpu.memory_space<vmem>>, vector<324x32xf32>
    %102 = arith.truncf %101 : vector<324x32xf32> to vector<324x32xbf16>
    %c4_90 = arith.constant 4 : index
    %c0_91 = arith.constant 0 : index
    %c0_92 = arith.constant 0 : index
    %103 = vector.load %arg8[%c4_90, %c0_91, %c0_92] : memref<9x32x32xbf16, #tpu.memory_space<vmem>>, vector<1x32x32xbf16>
    %104 = vector.shape_cast %103 : vector<1x32x32xbf16> to vector<32x32xbf16>
    %cst_93 = arith.constant dense<0.000000e+00> : vector<324x32xf32>
    %105 = tpu.matmul %102, %104, %cst_93 {dimension_numbers = #tpu.dot_dimension_numbers<[1], [0], [0], [1], [0, 0, 1, 1], [], []>} : vector<324x32xbf16>, vector<32x32xbf16>, vector<324x32xf32> -> vector<324x32xf32>
    %106 = arith.addf %100, %105 : vector<324x32xf32>
    %c20_94 = arith.constant 20 : index
    %c0_95 = arith.constant 0 : index
    %107 = vector.load %arg27[%c20_94, %c0_95] : memref<362x32xf32, #tpu.memory_space<vmem>>, vector<324x32xf32>
    %108 = arith.truncf %107 : vector<324x32xf32> to vector<324x32xbf16>
    %c5_96 = arith.constant 5 : index
    %c0_97 = arith.constant 0 : index
    %c0_98 = arith.constant 0 : index
    %109 = vector.load %arg8[%c5_96, %c0_97, %c0_98] : memref<9x32x32xbf16, #tpu.memory_space<vmem>>, vector<1x32x32xbf16>
    %110 = vector.shape_cast %109 : vector<1x32x32xbf16> to vector<32x32xbf16>
    %cst_99 = arith.constant dense<0.000000e+00> : vector<324x32xf32>
    %111 = tpu.matmul %108, %110, %cst_99 {dimension_numbers = #tpu.dot_dimension_numbers<[1], [0], [0], [1], [0, 0, 1, 1], [], []>} : vector<324x32xbf16>, vector<32x32xbf16>, vector<324x32xf32> -> vector<324x32xf32>
    %112 = arith.addf %106, %111 : vector<324x32xf32>
    %c36_100 = arith.constant 36 : index
    %c0_101 = arith.constant 0 : index
    %113 = vector.load %arg27[%c36_100, %c0_101] : memref<362x32xf32, #tpu.memory_space<vmem>>, vector<324x32xf32>
    %114 = arith.truncf %113 : vector<324x32xf32> to vector<324x32xbf16>
    %c6_102 = arith.constant 6 : index
    %c0_103 = arith.constant 0 : index
    %c0_104 = arith.constant 0 : index
    %115 = vector.load %arg8[%c6_102, %c0_103, %c0_104] : memref<9x32x32xbf16, #tpu.memory_space<vmem>>, vector<1x32x32xbf16>
    %116 = vector.shape_cast %115 : vector<1x32x32xbf16> to vector<32x32xbf16>
    %cst_105 = arith.constant dense<0.000000e+00> : vector<324x32xf32>
    %117 = tpu.matmul %114, %116, %cst_105 {dimension_numbers = #tpu.dot_dimension_numbers<[1], [0], [0], [1], [0, 0, 1, 1], [], []>} : vector<324x32xbf16>, vector<32x32xbf16>, vector<324x32xf32> -> vector<324x32xf32>
    %118 = arith.addf %112, %117 : vector<324x32xf32>
    %c37_106 = arith.constant 37 : index
    %c0_107 = arith.constant 0 : index
    %119 = vector.load %arg27[%c37_106, %c0_107] : memref<362x32xf32, #tpu.memory_space<vmem>>, vector<324x32xf32>
    %120 = arith.truncf %119 : vector<324x32xf32> to vector<324x32xbf16>
    %c7_108 = arith.constant 7 : index
    %c0_109 = arith.constant 0 : index
    %c0_110 = arith.constant 0 : index
    %121 = vector.load %arg8[%c7_108, %c0_109, %c0_110] : memref<9x32x32xbf16, #tpu.memory_space<vmem>>, vector<1x32x32xbf16>
    %122 = vector.shape_cast %121 : vector<1x32x32xbf16> to vector<32x32xbf16>
    %cst_111 = arith.constant dense<0.000000e+00> : vector<324x32xf32>
    %123 = tpu.matmul %120, %122, %cst_111 {dimension_numbers = #tpu.dot_dimension_numbers<[1], [0], [0], [1], [0, 0, 1, 1], [], []>} : vector<324x32xbf16>, vector<32x32xbf16>, vector<324x32xf32> -> vector<324x32xf32>
    %124 = arith.addf %118, %123 : vector<324x32xf32>
    %c38_112 = arith.constant 38 : index
    %c0_113 = arith.constant 0 : index
    %125 = vector.load %arg27[%c38_112, %c0_113] : memref<362x32xf32, #tpu.memory_space<vmem>>, vector<324x32xf32>
    %126 = arith.truncf %125 : vector<324x32xf32> to vector<324x32xbf16>
    %c8_114 = arith.constant 8 : index
    %c0_115 = arith.constant 0 : index
    %c0_116 = arith.constant 0 : index
    %127 = vector.load %arg8[%c8_114, %c0_115, %c0_116] : memref<9x32x32xbf16, #tpu.memory_space<vmem>>, vector<1x32x32xbf16>
    %128 = vector.shape_cast %127 : vector<1x32x32xbf16> to vector<32x32xbf16>
    %cst_117 = arith.constant dense<0.000000e+00> : vector<324x32xf32>
    %129 = tpu.matmul %126, %128, %cst_117 {dimension_numbers = #tpu.dot_dimension_numbers<[1], [0], [0], [1], [0, 0, 1, 1], [], []>} : vector<324x32xbf16>, vector<32x32xbf16>, vector<324x32xf32> -> vector<324x32xf32>
    %130 = arith.addf %124, %129 : vector<324x32xf32>
    %c0_118 = arith.constant 0 : index
    %c0_119 = arith.constant 0 : index
    %131 = vector.load %arg9[%c0_118, %c0_119] : memref<1x32xf32, #tpu.memory_space<vmem>>, vector<1x32xf32>
    %132 = vector.broadcast %131 : vector<1x32xf32> to vector<324x32xf32>
    %133 = arith.mulf %130, %132 : vector<324x32xf32>
    %c0_120 = arith.constant 0 : index
    %c0_121 = arith.constant 0 : index
    %134 = vector.load %arg10[%c0_120, %c0_121] : memref<1x32xf32, #tpu.memory_space<vmem>>, vector<1x32xf32>
    %135 = vector.broadcast %134 : vector<1x32xf32> to vector<324x32xf32>
    %136 = arith.addf %133, %135 : vector<324x32xf32>
    %cst_122 = arith.constant 0.000000e+00 : f32
    %137 = vector.broadcast %cst_122 : f32 to vector<324x32xf32>
    %138 = arith.maximumf %136, %137 : vector<324x32xf32>
    %c0_123 = arith.constant 0 : index
    %c0_124 = arith.constant 0 : index
    %139 = vector.load %arg2[%c0_123, %c0_124] : memref<324x32xf32, #tpu.memory_space<vmem>>, vector<324x32xf32>
    %140 = arith.mulf %138, %139 : vector<324x32xf32>
    %c19_125 = arith.constant 19 : index
    %c0_126 = arith.constant 0 : index
    %141 = vector.load %arg27[%c19_125, %c0_126] : memref<362x32xf32, #tpu.memory_space<vmem>>, vector<324x32xf32>
    tpu.vector_store %arg27[%c19_125, %c0_126], %140 {strides = array<i32>} : memref<362x32xf32, #tpu.memory_space<vmem>>, vector<324x32xf32>,
    %c38_127 = arith.constant 38 : index
    %c0_128 = arith.constant 0 : index
    %142 = tpu.strided_load %arg27[%c38_127, %c0_128] {strides = array<i32: 2, 1>} : memref<362x32xf32, #tpu.memory_space<vmem>>, vector<8x32xf32>
    %c39 = arith.constant 39 : index
    %c0_129 = arith.constant 0 : index
    %143 = tpu.strided_load %arg27[%c39, %c0_129] {strides = array<i32: 2, 1>} : memref<362x32xf32, #tpu.memory_space<vmem>>, vector<8x32xf32>
    %c56 = arith.constant 56 : index
    %c0_130 = arith.constant 0 : index
    %144 = tpu.strided_load %arg27[%c56, %c0_130] {strides = array<i32: 2, 1>} : memref<362x32xf32, #tpu.memory_space<vmem>>, vector<8x32xf32>
    %c57 = arith.constant 57 : index
    %c0_131 = arith.constant 0 : index
    %145 = tpu.strided_load %arg27[%c57, %c0_131] {strides = array<i32: 2, 1>} : memref<362x32xf32, #tpu.memory_space<vmem>>, vector<8x32xf32>
    %146 = arith.maximumf %142, %143 : vector<8x32xf32>
    %147 = arith.maximumf %144, %145 : vector<8x32xf32>
    %148 = arith.maximumf %146, %147 : vector<8x32xf32>
    %c22 = arith.constant 22 : index
    %c0_132 = arith.constant 0 : index
    %149 = vector.load %arg28[%c22, %c0_132] : memref<122x32xf32, #tpu.memory_space<vmem>>, vector<8x32xf32>
    tpu.vector_store %arg28[%c22, %c0_132], %148 {strides = array<i32>} : memref<122x32xf32, #tpu.memory_space<vmem>>, vector<8x32xf32>,
    %c74 = arith.constant 74 : index
    %c0_133 = arith.constant 0 : index
    %150 = tpu.strided_load %arg27[%c74, %c0_133] {strides = array<i32: 2, 1>} : memref<362x32xf32, #tpu.memory_space<vmem>>, vector<8x32xf32>
    %c75 = arith.constant 75 : index
    %c0_134 = arith.constant 0 : index
    %151 = tpu.strided_load %arg27[%c75, %c0_134] {strides = array<i32: 2, 1>} : memref<362x32xf32, #tpu.memory_space<vmem>>, vector<8x32xf32>
    %c92 = arith.constant 92 : index
    %c0_135 = arith.constant 0 : index
    %152 = tpu.strided_load %arg27[%c92, %c0_135] {strides = array<i32: 2, 1>} : memref<362x32xf32, #tpu.memory_space<vmem>>, vector<8x32xf32>
    %c93 = arith.constant 93 : index
    %c0_136 = arith.constant 0 : index
    %153 = tpu.strided_load %arg27[%c93, %c0_136] {strides = array<i32: 2, 1>} : memref<362x32xf32, #tpu.memory_space<vmem>>, vector<8x32xf32>
    %154 = arith.maximumf %150, %151 : vector<8x32xf32>
    %155 = arith.maximumf %152, %153 : vector<8x32xf32>
    %156 = arith.maximumf %154, %155 : vector<8x32xf32>
    %c32 = arith.constant 32 : index
    %c0_137 = arith.constant 0 : index
    %157 = vector.load %arg28[%c32, %c0_137] : memref<122x32xf32, #tpu.memory_space<vmem>>, vector<8x32xf32>
    tpu.vector_store %arg28[%c32, %c0_137], %156 {strides = array<i32>} : memref<122x32xf32, #tpu.memory_space<vmem>>, vector<8x32xf32>,
    %c110 = arith.constant 110 : index
    %c0_138 = arith.constant 0 : index
    %158 = tpu.strided_load %arg27[%c110, %c0_138] {strides = array<i32: 2, 1>} : memref<362x32xf32, #tpu.memory_space<vmem>>, vector<8x32xf32>
    %c111 = arith.constant 111 : index
    %c0_139 = arith.constant 0 : index
    %159 = tpu.strided_load %arg27[%c111, %c0_139] {strides = array<i32: 2, 1>} : memref<362x32xf32, #tpu.memory_space<vmem>>, vector<8x32xf32>
    %c128 = arith.constant 128 : index
    %c0_140 = arith.constant 0 : index
    %160 = tpu.strided_load %arg27[%c128, %c0_140] {strides = array<i32: 2, 1>} : memref<362x32xf32, #tpu.memory_space<vmem>>, vector<8x32xf32>
    %c129 = arith.constant 129 : index
    %c0_141 = arith.constant 0 : index
    %161 = tpu.strided_load %arg27[%c129, %c0_141] {strides = array<i32: 2, 1>} : memref<362x32xf32, #tpu.memory_space<vmem>>, vector<8x32xf32>
    %162 = arith.maximumf %158, %159 : vector<8x32xf32>
    %163 = arith.maximumf %160, %161 : vector<8x32xf32>
    %164 = arith.maximumf %162, %163 : vector<8x32xf32>
    %c42 = arith.constant 42 : index
    %c0_142 = arith.constant 0 : index
    %165 = vector.load %arg28[%c42, %c0_142] : memref<122x32xf32, #tpu.memory_space<vmem>>, vector<8x32xf32>
    tpu.vector_store %arg28[%c42, %c0_142], %164 {strides = array<i32>} : memref<122x32xf32, #tpu.memory_space<vmem>>, vector<8x32xf32>,
    %c146 = arith.constant 146 : index
    %c0_143 = arith.constant 0 : index
    %166 = tpu.strided_load %arg27[%c146, %c0_143] {strides = array<i32: 2, 1>} : memref<362x32xf32, #tpu.memory_space<vmem>>, vector<8x32xf32>
    %c147 = arith.constant 147 : index
    %c0_144 = arith.constant 0 : index
    %167 = tpu.strided_load %arg27[%c147, %c0_144] {strides = array<i32: 2, 1>} : memref<362x32xf32, #tpu.memory_space<vmem>>, vector<8x32xf32>
    %c164 = arith.constant 164 : index
    %c0_145 = arith.constant 0 : index
    %168 = tpu.strided_load %arg27[%c164, %c0_145] {strides = array<i32: 2, 1>} : memref<362x32xf32, #tpu.memory_space<vmem>>, vector<8x32xf32>
    %c165 = arith.constant 165 : index
    %c0_146 = arith.constant 0 : index
    %169 = tpu.strided_load %arg27[%c165, %c0_146] {strides = array<i32: 2, 1>} : memref<362x32xf32, #tpu.memory_space<vmem>>, vector<8x32xf32>
    %170 = arith.maximumf %166, %167 : vector<8x32xf32>
    %171 = arith.maximumf %168, %169 : vector<8x32xf32>
    %172 = arith.maximumf %170, %171 : vector<8x32xf32>
    %c52 = arith.constant 52 : index
    %c0_147 = arith.constant 0 : index
    %173 = vector.load %arg28[%c52, %c0_147] : memref<122x32xf32, #tpu.memory_space<vmem>>, vector<8x32xf32>
    tpu.vector_store %arg28[%c52, %c0_147], %172 {strides = array<i32>} : memref<122x32xf32, #tpu.memory_space<vmem>>, vector<8x32xf32>,
    %c182 = arith.constant 182 : index
    %c0_148 = arith.constant 0 : index
    %174 = tpu.strided_load %arg27[%c182, %c0_148] {strides = array<i32: 2, 1>} : memref<362x32xf32, #tpu.memory_space<vmem>>, vector<8x32xf32>
    %c183 = arith.constant 183 : index
    %c0_149 = arith.constant 0 : index
    %175 = tpu.strided_load %arg27[%c183, %c0_149] {strides = array<i32: 2, 1>} : memref<362x32xf32, #tpu.memory_space<vmem>>, vector<8x32xf32>
    %c200 = arith.constant 200 : index
    %c0_150 = arith.constant 0 : index
    %176 = tpu.strided_load %arg27[%c200, %c0_150] {strides = array<i32: 2, 1>} : memref<362x32xf32, #tpu.memory_space<vmem>>, vector<8x32xf32>
    %c201 = arith.constant 201 : index
    %c0_151 = arith.constant 0 : index
    %177 = tpu.strided_load %arg27[%c201, %c0_151] {strides = array<i32: 2, 1>} : memref<362x32xf32, #tpu.memory_space<vmem>>, vector<8x32xf32>
    %178 = arith.maximumf %174, %175 : vector<8x32xf32>
    %179 = arith.maximumf %176, %177 : vector<8x32xf32>
    %180 = arith.maximumf %178, %179 : vector<8x32xf32>
    %c62 = arith.constant 62 : index
    %c0_152 = arith.constant 0 : index
    %181 = vector.load %arg28[%c62, %c0_152] : memref<122x32xf32, #tpu.memory_space<vmem>>, vector<8x32xf32>
    tpu.vector_store %arg28[%c62, %c0_152], %180 {strides = array<i32>} : memref<122x32xf32, #tpu.memory_space<vmem>>, vector<8x32xf32>,
    %c218 = arith.constant 218 : index
    %c0_153 = arith.constant 0 : index
    %182 = tpu.strided_load %arg27[%c218, %c0_153] {strides = array<i32: 2, 1>} : memref<362x32xf32, #tpu.memory_space<vmem>>, vector<8x32xf32>
    %c219 = arith.constant 219 : index
    %c0_154 = arith.constant 0 : index
    %183 = tpu.strided_load %arg27[%c219, %c0_154] {strides = array<i32: 2, 1>} : memref<362x32xf32, #tpu.memory_space<vmem>>, vector<8x32xf32>
    %c236 = arith.constant 236 : index
    %c0_155 = arith.constant 0 : index
    %184 = tpu.strided_load %arg27[%c236, %c0_155] {strides = array<i32: 2, 1>} : memref<362x32xf32, #tpu.memory_space<vmem>>, vector<8x32xf32>
    %c237 = arith.constant 237 : index
    %c0_156 = arith.constant 0 : index
    %185 = tpu.strided_load %arg27[%c237, %c0_156] {strides = array<i32: 2, 1>} : memref<362x32xf32, #tpu.memory_space<vmem>>, vector<8x32xf32>
    %186 = arith.maximumf %182, %183 : vector<8x32xf32>
    %187 = arith.maximumf %184, %185 : vector<8x32xf32>
    %188 = arith.maximumf %186, %187 : vector<8x32xf32>
    %c72 = arith.constant 72 : index
    %c0_157 = arith.constant 0 : index
    %189 = vector.load %arg28[%c72, %c0_157] : memref<122x32xf32, #tpu.memory_space<vmem>>, vector<8x32xf32>
    tpu.vector_store %arg28[%c72, %c0_157], %188 {strides = array<i32>} : memref<122x32xf32, #tpu.memory_space<vmem>>, vector<8x32xf32>,
    %c254 = arith.constant 254 : index
    %c0_158 = arith.constant 0 : index
    %190 = tpu.strided_load %arg27[%c254, %c0_158] {strides = array<i32: 2, 1>} : memref<362x32xf32, #tpu.memory_space<vmem>>, vector<8x32xf32>
    %c255 = arith.constant 255 : index
    %c0_159 = arith.constant 0 : index
    %191 = tpu.strided_load %arg27[%c255, %c0_159] {strides = array<i32: 2, 1>} : memref<362x32xf32, #tpu.memory_space<vmem>>, vector<8x32xf32>
    %c272 = arith.constant 272 : index
    %c0_160 = arith.constant 0 : index
    %192 = tpu.strided_load %arg27[%c272, %c0_160] {strides = array<i32: 2, 1>} : memref<362x32xf32, #tpu.memory_space<vmem>>, vector<8x32xf32>
    %c273 = arith.constant 273 : index
    %c0_161 = arith.constant 0 : index
    %193 = tpu.strided_load %arg27[%c273, %c0_161] {strides = array<i32: 2, 1>} : memref<362x32xf32, #tpu.memory_space<vmem>>, vector<8x32xf32>
    %194 = arith.maximumf %190, %191 : vector<8x32xf32>
    %195 = arith.maximumf %192, %193 : vector<8x32xf32>
    %196 = arith.maximumf %194, %195 : vector<8x32xf32>
    %c82 = arith.constant 82 : index
    %c0_162 = arith.constant 0 : index
    %197 = vector.load %arg28[%c82, %c0_162] : memref<122x32xf32, #tpu.memory_space<vmem>>, vector<8x32xf32>
    tpu.vector_store %arg28[%c82, %c0_162], %196 {strides = array<i32>} : memref<122x32xf32, #tpu.memory_space<vmem>>, vector<8x32xf32>,
    %c290 = arith.constant 290 : index
    %c0_163 = arith.constant 0 : index
    %198 = tpu.strided_load %arg27[%c290, %c0_163] {strides = array<i32: 2, 1>} : memref<362x32xf32, #tpu.memory_space<vmem>>, vector<8x32xf32>
    %c291 = arith.constant 291 : index
    %c0_164 = arith.constant 0 : index
    %199 = tpu.strided_load %arg27[%c291, %c0_164] {strides = array<i32: 2, 1>} : memref<362x32xf32, #tpu.memory_space<vmem>>, vector<8x32xf32>
    %c308 = arith.constant 308 : index
    %c0_165 = arith.constant 0 : index
    %200 = tpu.strided_load %arg27[%c308, %c0_165] {strides = array<i32: 2, 1>} : memref<362x32xf32, #tpu.memory_space<vmem>>, vector<8x32xf32>
    %c309 = arith.constant 309 : index
    %c0_166 = arith.constant 0 : index
    %201 = tpu.strided_load %arg27[%c309, %c0_166] {strides = array<i32: 2, 1>} : memref<362x32xf32, #tpu.memory_space<vmem>>, vector<8x32xf32>
    %202 = arith.maximumf %198, %199 : vector<8x32xf32>
    %203 = arith.maximumf %200, %201 : vector<8x32xf32>
    %204 = arith.maximumf %202, %203 : vector<8x32xf32>
    %c92_167 = arith.constant 92 : index
    %c0_168 = arith.constant 0 : index
    %205 = vector.load %arg28[%c92_167, %c0_168] : memref<122x32xf32, #tpu.memory_space<vmem>>, vector<8x32xf32>
    tpu.vector_store %arg28[%c92_167, %c0_168], %204 {strides = array<i32>} : memref<122x32xf32, #tpu.memory_space<vmem>>, vector<8x32xf32>,
    %cst_169 = arith.constant 0.000000e+00 : f32
    %206 = vector.broadcast %cst_169 : f32 to vector<100x32xf32>
    %c0_170 = arith.constant 0 : index
    %c0_171 = arith.constant 0 : index
    %207 = vector.load %arg28[%c0_170, %c0_171] : memref<122x32xf32, #tpu.memory_space<vmem>>, vector<100x32xf32>
    %208 = arith.truncf %207 : vector<100x32xf32> to vector<100x32xbf16>
    %c0_172 = arith.constant 0 : index
    %c0_173 = arith.constant 0 : index
    %c0_174 = arith.constant 0 : index
    %209 = vector.load %arg11[%c0_172, %c0_173, %c0_174] : memref<9x32x32xbf16, #tpu.memory_space<vmem>>, vector<1x32x32xbf16>
    %210 = vector.shape_cast %209 : vector<1x32x32xbf16> to vector<32x32xbf16>
    %cst_175 = arith.constant dense<0.000000e+00> : vector<100x32xf32>
    %211 = tpu.matmul %208, %210, %cst_175 {dimension_numbers = #tpu.dot_dimension_numbers<[1], [0], [0], [1], [0, 0, 1, 1], [], []>} : vector<100x32xbf16>, vector<32x32xbf16>, vector<100x32xf32> -> vector<100x32xf32>
    %212 = arith.addf %206, %211 : vector<100x32xf32>
    %c1_176 = arith.constant 1 : index
    %c0_177 = arith.constant 0 : index
    %213 = vector.load %arg28[%c1_176, %c0_177] : memref<122x32xf32, #tpu.memory_space<vmem>>, vector<100x32xf32>
    %214 = arith.truncf %213 : vector<100x32xf32> to vector<100x32xbf16>
    %c1_178 = arith.constant 1 : index
    %c0_179 = arith.constant 0 : index
    %c0_180 = arith.constant 0 : index
    %215 = vector.load %arg11[%c1_178, %c0_179, %c0_180] : memref<9x32x32xbf16, #tpu.memory_space<vmem>>, vector<1x32x32xbf16>
    %216 = vector.shape_cast %215 : vector<1x32x32xbf16> to vector<32x32xbf16>
    %cst_181 = arith.constant dense<0.000000e+00> : vector<100x32xf32>
    %217 = tpu.matmul %214, %216, %cst_181 {dimension_numbers = #tpu.dot_dimension_numbers<[1], [0], [0], [1], [0, 0, 1, 1], [], []>} : vector<100x32xbf16>, vector<32x32xbf16>, vector<100x32xf32> -> vector<100x32xf32>
    %218 = arith.addf %212, %217 : vector<100x32xf32>
    %c2_182 = arith.constant 2 : index
    %c0_183 = arith.constant 0 : index
    %219 = vector.load %arg28[%c2_182, %c0_183] : memref<122x32xf32, #tpu.memory_space<vmem>>, vector<100x32xf32>
    %220 = arith.truncf %219 : vector<100x32xf32> to vector<100x32xbf16>
    %c2_184 = arith.constant 2 : index
    %c0_185 = arith.constant 0 : index
    %c0_186 = arith.constant 0 : index
    %221 = vector.load %arg11[%c2_184, %c0_185, %c0_186] : memref<9x32x32xbf16, #tpu.memory_space<vmem>>, vector<1x32x32xbf16>
    %222 = vector.shape_cast %221 : vector<1x32x32xbf16> to vector<32x32xbf16>
    %cst_187 = arith.constant dense<0.000000e+00> : vector<100x32xf32>
    %223 = tpu.matmul %220, %222, %cst_187 {dimension_numbers = #tpu.dot_dimension_numbers<[1], [0], [0], [1], [0, 0, 1, 1], [], []>} : vector<100x32xbf16>, vector<32x32xbf16>, vector<100x32xf32> -> vector<100x32xf32>
    %224 = arith.addf %218, %223 : vector<100x32xf32>
    %c10 = arith.constant 10 : index
    %c0_188 = arith.constant 0 : index
    %225 = vector.load %arg28[%c10, %c0_188] : memref<122x32xf32, #tpu.memory_space<vmem>>, vector<100x32xf32>
    %226 = arith.truncf %225 : vector<100x32xf32> to vector<100x32xbf16>
    %c3_189 = arith.constant 3 : index
    %c0_190 = arith.constant 0 : index
    %c0_191 = arith.constant 0 : index
    %227 = vector.load %arg11[%c3_189, %c0_190, %c0_191] : memref<9x32x32xbf16, #tpu.memory_space<vmem>>, vector<1x32x32xbf16>
    %228 = vector.shape_cast %227 : vector<1x32x32xbf16> to vector<32x32xbf16>
    %cst_192 = arith.constant dense<0.000000e+00> : vector<100x32xf32>
    %229 = tpu.matmul %226, %228, %cst_192 {dimension_numbers = #tpu.dot_dimension_numbers<[1], [0], [0], [1], [0, 0, 1, 1], [], []>} : vector<100x32xbf16>, vector<32x32xbf16>, vector<100x32xf32> -> vector<100x32xf32>
    %230 = arith.addf %224, %229 : vector<100x32xf32>
    %c11 = arith.constant 11 : index
    %c0_193 = arith.constant 0 : index
    %231 = vector.load %arg28[%c11, %c0_193] : memref<122x32xf32, #tpu.memory_space<vmem>>, vector<100x32xf32>
    %232 = arith.truncf %231 : vector<100x32xf32> to vector<100x32xbf16>
    %c4_194 = arith.constant 4 : index
    %c0_195 = arith.constant 0 : index
    %c0_196 = arith.constant 0 : index
    %233 = vector.load %arg11[%c4_194, %c0_195, %c0_196] : memref<9x32x32xbf16, #tpu.memory_space<vmem>>, vector<1x32x32xbf16>
    %234 = vector.shape_cast %233 : vector<1x32x32xbf16> to vector<32x32xbf16>
    %cst_197 = arith.constant dense<0.000000e+00> : vector<100x32xf32>
    %235 = tpu.matmul %232, %234, %cst_197 {dimension_numbers = #tpu.dot_dimension_numbers<[1], [0], [0], [1], [0, 0, 1, 1], [], []>} : vector<100x32xbf16>, vector<32x32xbf16>, vector<100x32xf32> -> vector<100x32xf32>
    %236 = arith.addf %230, %235 : vector<100x32xf32>
    %c12 = arith.constant 12 : index
    %c0_198 = arith.constant 0 : index
    %237 = vector.load %arg28[%c12, %c0_198] : memref<122x32xf32, #tpu.memory_space<vmem>>, vector<100x32xf32>
    %238 = arith.truncf %237 : vector<100x32xf32> to vector<100x32xbf16>
    %c5_199 = arith.constant 5 : index
    %c0_200 = arith.constant 0 : index
    %c0_201 = arith.constant 0 : index
    %239 = vector.load %arg11[%c5_199, %c0_200, %c0_201] : memref<9x32x32xbf16, #tpu.memory_space<vmem>>, vector<1x32x32xbf16>
    %240 = vector.shape_cast %239 : vector<1x32x32xbf16> to vector<32x32xbf16>
    %cst_202 = arith.constant dense<0.000000e+00> : vector<100x32xf32>
    %241 = tpu.matmul %238, %240, %cst_202 {dimension_numbers = #tpu.dot_dimension_numbers<[1], [0], [0], [1], [0, 0, 1, 1], [], []>} : vector<100x32xbf16>, vector<32x32xbf16>, vector<100x32xf32> -> vector<100x32xf32>
    %242 = arith.addf %236, %241 : vector<100x32xf32>
    %c20_203 = arith.constant 20 : index
    %c0_204 = arith.constant 0 : index
    %243 = vector.load %arg28[%c20_203, %c0_204] : memref<122x32xf32, #tpu.memory_space<vmem>>, vector<100x32xf32>
    %244 = arith.truncf %243 : vector<100x32xf32> to vector<100x32xbf16>
    %c6_205 = arith.constant 6 : index
    %c0_206 = arith.constant 0 : index
    %c0_207 = arith.constant 0 : index
    %245 = vector.load %arg11[%c6_205, %c0_206, %c0_207] : memref<9x32x32xbf16, #tpu.memory_space<vmem>>, vector<1x32x32xbf16>
    %246 = vector.shape_cast %245 : vector<1x32x32xbf16> to vector<32x32xbf16>
    %cst_208 = arith.constant dense<0.000000e+00> : vector<100x32xf32>
    %247 = tpu.matmul %244, %246, %cst_208 {dimension_numbers = #tpu.dot_dimension_numbers<[1], [0], [0], [1], [0, 0, 1, 1], [], []>} : vector<100x32xbf16>, vector<32x32xbf16>, vector<100x32xf32> -> vector<100x32xf32>
    %248 = arith.addf %242, %247 : vector<100x32xf32>
    %c21 = arith.constant 21 : index
    %c0_209 = arith.constant 0 : index
    %249 = vector.load %arg28[%c21, %c0_209] : memref<122x32xf32, #tpu.memory_space<vmem>>, vector<100x32xf32>
    %250 = arith.truncf %249 : vector<100x32xf32> to vector<100x32xbf16>
    %c7_210 = arith.constant 7 : index
    %c0_211 = arith.constant 0 : index
    %c0_212 = arith.constant 0 : index
    %251 = vector.load %arg11[%c7_210, %c0_211, %c0_212] : memref<9x32x32xbf16, #tpu.memory_space<vmem>>, vector<1x32x32xbf16>
    %252 = vector.shape_cast %251 : vector<1x32x32xbf16> to vector<32x32xbf16>
    %cst_213 = arith.constant dense<0.000000e+00> : vector<100x32xf32>
    %253 = tpu.matmul %250, %252, %cst_213 {dimension_numbers = #tpu.dot_dimension_numbers<[1], [0], [0], [1], [0, 0, 1, 1], [], []>} : vector<100x32xbf16>, vector<32x32xbf16>, vector<100x32xf32> -> vector<100x32xf32>
    %254 = arith.addf %248, %253 : vector<100x32xf32>
    %c22_214 = arith.constant 22 : index
    %c0_215 = arith.constant 0 : index
    %255 = vector.load %arg28[%c22_214, %c0_215] : memref<122x32xf32, #tpu.memory_space<vmem>>, vector<100x32xf32>
    %256 = arith.truncf %255 : vector<100x32xf32> to vector<100x32xbf16>
    %c8_216 = arith.constant 8 : index
    %c0_217 = arith.constant 0 : index
    %c0_218 = arith.constant 0 : index
    %257 = vector.load %arg11[%c8_216, %c0_217, %c0_218] : memref<9x32x32xbf16, #tpu.memory_space<vmem>>, vector<1x32x32xbf16>
    %258 = vector.shape_cast %257 : vector<1x32x32xbf16> to vector<32x32xbf16>
    %cst_219 = arith.constant dense<0.000000e+00> : vector<100x32xf32>
    %259 = tpu.matmul %256, %258, %cst_219 {dimension_numbers = #tpu.dot_dimension_numbers<[1], [0], [0], [1], [0, 0, 1, 1], [], []>} : vector<100x32xbf16>, vector<32x32xbf16>, vector<100x32xf32> -> vector<100x32xf32>
    %260 = arith.addf %254, %259 : vector<100x32xf32>
    %c0_220 = arith.constant 0 : index
    %c0_221 = arith.constant 0 : index
    %261 = vector.load %arg12[%c0_220, %c0_221] : memref<1x32xf32, #tpu.memory_space<vmem>>, vector<1x32xf32>
    %262 = vector.broadcast %261 : vector<1x32xf32> to vector<100x32xf32>
    %263 = arith.mulf %260, %262 : vector<100x32xf32>
    %c0_222 = arith.constant 0 : index
    %c0_223 = arith.constant 0 : index
    %264 = vector.load %arg13[%c0_222, %c0_223] : memref<1x32xf32, #tpu.memory_space<vmem>>, vector<1x32xf32>
    %265 = vector.broadcast %264 : vector<1x32xf32> to vector<100x32xf32>
    %266 = arith.addf %263, %265 : vector<100x32xf32>
    %cst_224 = arith.constant 0.000000e+00 : f32
    %267 = vector.broadcast %cst_224 : f32 to vector<100x32xf32>
    %268 = arith.maximumf %266, %267 : vector<100x32xf32>
    %c0_225 = arith.constant 0 : index
    %c0_226 = arith.constant 0 : index
    %269 = vector.load %arg3[%c0_225, %c0_226] : memref<100x32xf32, #tpu.memory_space<vmem>>, vector<100x32xf32>
    %270 = arith.mulf %268, %269 : vector<100x32xf32>
    %c11_227 = arith.constant 11 : index
    %c0_228 = arith.constant 0 : index
    %271 = vector.load %arg28[%c11_227, %c0_228] : memref<122x32xf32, #tpu.memory_space<vmem>>, vector<100x32xf32>
    tpu.vector_store %arg28[%c11_227, %c0_228], %270 {strides = array<i32>} : memref<122x32xf32, #tpu.memory_space<vmem>>, vector<100x32xf32>,
    %cst_229 = arith.constant 0.000000e+00 : f32
    %272 = vector.broadcast %cst_229 : f32 to vector<100x32xf32>
    %c0_230 = arith.constant 0 : index
    %c0_231 = arith.constant 0 : index
    %273 = vector.load %arg28[%c0_230, %c0_231] : memref<122x32xf32, #tpu.memory_space<vmem>>, vector<100x32xf32>
    %274 = arith.truncf %273 : vector<100x32xf32> to vector<100x32xbf16>
    %c0_232 = arith.constant 0 : index
    %c0_233 = arith.constant 0 : index
    %c0_234 = arith.constant 0 : index
    %275 = vector.load %arg14[%c0_232, %c0_233, %c0_234] : memref<9x32x32xbf16, #tpu.memory_space<vmem>>, vector<1x32x32xbf16>
    %276 = vector.shape_cast %275 : vector<1x32x32xbf16> to vector<32x32xbf16>
    %cst_235 = arith.constant dense<0.000000e+00> : vector<100x32xf32>
    %277 = tpu.matmul %274, %276, %cst_235 {dimension_numbers = #tpu.dot_dimension_numbers<[1], [0], [0], [1], [0, 0, 1, 1], [], []>} : vector<100x32xbf16>, vector<32x32xbf16>, vector<100x32xf32> -> vector<100x32xf32>
    %278 = arith.addf %272, %277 : vector<100x32xf32>
    %c1_236 = arith.constant 1 : index
    %c0_237 = arith.constant 0 : index
    %279 = vector.load %arg28[%c1_236, %c0_237] : memref<122x32xf32, #tpu.memory_space<vmem>>, vector<100x32xf32>
    %280 = arith.truncf %279 : vector<100x32xf32> to vector<100x32xbf16>
    %c1_238 = arith.constant 1 : index
    %c0_239 = arith.constant 0 : index
    %c0_240 = arith.constant 0 : index
    %281 = vector.load %arg14[%c1_238, %c0_239, %c0_240] : memref<9x32x32xbf16, #tpu.memory_space<vmem>>, vector<1x32x32xbf16>
    %282 = vector.shape_cast %281 : vector<1x32x32xbf16> to vector<32x32xbf16>
    %cst_241 = arith.constant dense<0.000000e+00> : vector<100x32xf32>
    %283 = tpu.matmul %280, %282, %cst_241 {dimension_numbers = #tpu.dot_dimension_numbers<[1], [0], [0], [1], [0, 0, 1, 1], [], []>} : vector<100x32xbf16>, vector<32x32xbf16>, vector<100x32xf32> -> vector<100x32xf32>
    %284 = arith.addf %278, %283 : vector<100x32xf32>
    %c2_242 = arith.constant 2 : index
    %c0_243 = arith.constant 0 : index
    %285 = vector.load %arg28[%c2_242, %c0_243] : memref<122x32xf32, #tpu.memory_space<vmem>>, vector<100x32xf32>
    %286 = arith.truncf %285 : vector<100x32xf32> to vector<100x32xbf16>
    %c2_244 = arith.constant 2 : index
    %c0_245 = arith.constant 0 : index
    %c0_246 = arith.constant 0 : index
    %287 = vector.load %arg14[%c2_244, %c0_245, %c0_246] : memref<9x32x32xbf16, #tpu.memory_space<vmem>>, vector<1x32x32xbf16>
    %288 = vector.shape_cast %287 : vector<1x32x32xbf16> to vector<32x32xbf16>
    %cst_247 = arith.constant dense<0.000000e+00> : vector<100x32xf32>
    %289 = tpu.matmul %286, %288, %cst_247 {dimension_numbers = #tpu.dot_dimension_numbers<[1], [0], [0], [1], [0, 0, 1, 1], [], []>} : vector<100x32xbf16>, vector<32x32xbf16>, vector<100x32xf32> -> vector<100x32xf32>
    %290 = arith.addf %284, %289 : vector<100x32xf32>
    %c10_248 = arith.constant 10 : index
    %c0_249 = arith.constant 0 : index
    %291 = vector.load %arg28[%c10_248, %c0_249] : memref<122x32xf32, #tpu.memory_space<vmem>>, vector<100x32xf32>
    %292 = arith.truncf %291 : vector<100x32xf32> to vector<100x32xbf16>
    %c3_250 = arith.constant 3 : index
    %c0_251 = arith.constant 0 : index
    %c0_252 = arith.constant 0 : index
    %293 = vector.load %arg14[%c3_250, %c0_251, %c0_252] : memref<9x32x32xbf16, #tpu.memory_space<vmem>>, vector<1x32x32xbf16>
    %294 = vector.shape_cast %293 : vector<1x32x32xbf16> to vector<32x32xbf16>
    %cst_253 = arith.constant dense<0.000000e+00> : vector<100x32xf32>
    %295 = tpu.matmul %292, %294, %cst_253 {dimension_numbers = #tpu.dot_dimension_numbers<[1], [0], [0], [1], [0, 0, 1, 1], [], []>} : vector<100x32xbf16>, vector<32x32xbf16>, vector<100x32xf32> -> vector<100x32xf32>
    %296 = arith.addf %290, %295 : vector<100x32xf32>
    %c11_254 = arith.constant 11 : index
    %c0_255 = arith.constant 0 : index
    %297 = vector.load %arg28[%c11_254, %c0_255] : memref<122x32xf32, #tpu.memory_space<vmem>>, vector<100x32xf32>
    %298 = arith.truncf %297 : vector<100x32xf32> to vector<100x32xbf16>
    %c4_256 = arith.constant 4 : index
    %c0_257 = arith.constant 0 : index
    %c0_258 = arith.constant 0 : index
    %299 = vector.load %arg14[%c4_256, %c0_257, %c0_258] : memref<9x32x32xbf16, #tpu.memory_space<vmem>>, vector<1x32x32xbf16>
    %300 = vector.shape_cast %299 : vector<1x32x32xbf16> to vector<32x32xbf16>
    %cst_259 = arith.constant dense<0.000000e+00> : vector<100x32xf32>
    %301 = tpu.matmul %298, %300, %cst_259 {dimension_numbers = #tpu.dot_dimension_numbers<[1], [0], [0], [1], [0, 0, 1, 1], [], []>} : vector<100x32xbf16>, vector<32x32xbf16>, vector<100x32xf32> -> vector<100x32xf32>
    %302 = arith.addf %296, %301 : vector<100x32xf32>
    %c12_260 = arith.constant 12 : index
    %c0_261 = arith.constant 0 : index
    %303 = vector.load %arg28[%c12_260, %c0_261] : memref<122x32xf32, #tpu.memory_space<vmem>>, vector<100x32xf32>
    %304 = arith.truncf %303 : vector<100x32xf32> to vector<100x32xbf16>
    %c5_262 = arith.constant 5 : index
    %c0_263 = arith.constant 0 : index
    %c0_264 = arith.constant 0 : index
    %305 = vector.load %arg14[%c5_262, %c0_263, %c0_264] : memref<9x32x32xbf16, #tpu.memory_space<vmem>>, vector<1x32x32xbf16>
    %306 = vector.shape_cast %305 : vector<1x32x32xbf16> to vector<32x32xbf16>
    %cst_265 = arith.constant dense<0.000000e+00> : vector<100x32xf32>
    %307 = tpu.matmul %304, %306, %cst_265 {dimension_numbers = #tpu.dot_dimension_numbers<[1], [0], [0], [1], [0, 0, 1, 1], [], []>} : vector<100x32xbf16>, vector<32x32xbf16>, vector<100x32xf32> -> vector<100x32xf32>
    %308 = arith.addf %302, %307 : vector<100x32xf32>
    %c20_266 = arith.constant 20 : index
    %c0_267 = arith.constant 0 : index
    %309 = vector.load %arg28[%c20_266, %c0_267] : memref<122x32xf32, #tpu.memory_space<vmem>>, vector<100x32xf32>
    %310 = arith.truncf %309 : vector<100x32xf32> to vector<100x32xbf16>
    %c6_268 = arith.constant 6 : index
    %c0_269 = arith.constant 0 : index
    %c0_270 = arith.constant 0 : index
    %311 = vector.load %arg14[%c6_268, %c0_269, %c0_270] : memref<9x32x32xbf16, #tpu.memory_space<vmem>>, vector<1x32x32xbf16>
    %312 = vector.shape_cast %311 : vector<1x32x32xbf16> to vector<32x32xbf16>
    %cst_271 = arith.constant dense<0.000000e+00> : vector<100x32xf32>
    %313 = tpu.matmul %310, %312, %cst_271 {dimension_numbers = #tpu.dot_dimension_numbers<[1], [0], [0], [1], [0, 0, 1, 1], [], []>} : vector<100x32xbf16>, vector<32x32xbf16>, vector<100x32xf32> -> vector<100x32xf32>
    %314 = arith.addf %308, %313 : vector<100x32xf32>
    %c21_272 = arith.constant 21 : index
    %c0_273 = arith.constant 0 : index
    %315 = vector.load %arg28[%c21_272, %c0_273] : memref<122x32xf32, #tpu.memory_space<vmem>>, vector<100x32xf32>
    %316 = arith.truncf %315 : vector<100x32xf32> to vector<100x32xbf16>
    %c7_274 = arith.constant 7 : index
    %c0_275 = arith.constant 0 : index
    %c0_276 = arith.constant 0 : index
    %317 = vector.load %arg14[%c7_274, %c0_275, %c0_276] : memref<9x32x32xbf16, #tpu.memory_space<vmem>>, vector<1x32x32xbf16>
    %318 = vector.shape_cast %317 : vector<1x32x32xbf16> to vector<32x32xbf16>
    %cst_277 = arith.constant dense<0.000000e+00> : vector<100x32xf32>
    %319 = tpu.matmul %316, %318, %cst_277 {dimension_numbers = #tpu.dot_dimension_numbers<[1], [0], [0], [1], [0, 0, 1, 1], [], []>} : vector<100x32xbf16>, vector<32x32xbf16>, vector<100x32xf32> -> vector<100x32xf32>
    %320 = arith.addf %314, %319 : vector<100x32xf32>
    %c22_278 = arith.constant 22 : index
    %c0_279 = arith.constant 0 : index
    %321 = vector.load %arg28[%c22_278, %c0_279] : memref<122x32xf32, #tpu.memory_space<vmem>>, vector<100x32xf32>
    %322 = arith.truncf %321 : vector<100x32xf32> to vector<100x32xbf16>
    %c8_280 = arith.constant 8 : index
    %c0_281 = arith.constant 0 : index
    %c0_282 = arith.constant 0 : index
    %323 = vector.load %arg14[%c8_280, %c0_281, %c0_282] : memref<9x32x32xbf16, #tpu.memory_space<vmem>>, vector<1x32x32xbf16>
    %324 = vector.shape_cast %323 : vector<1x32x32xbf16> to vector<32x32xbf16>
    %cst_283 = arith.constant dense<0.000000e+00> : vector<100x32xf32>
    %325 = tpu.matmul %322, %324, %cst_283 {dimension_numbers = #tpu.dot_dimension_numbers<[1], [0], [0], [1], [0, 0, 1, 1], [], []>} : vector<100x32xbf16>, vector<32x32xbf16>, vector<100x32xf32> -> vector<100x32xf32>
    %326 = arith.addf %320, %325 : vector<100x32xf32>
    %c0_284 = arith.constant 0 : index
    %c0_285 = arith.constant 0 : index
    %327 = vector.load %arg15[%c0_284, %c0_285] : memref<1x32xf32, #tpu.memory_space<vmem>>, vector<1x32xf32>
    %328 = vector.broadcast %327 : vector<1x32xf32> to vector<100x32xf32>
    %329 = arith.mulf %326, %328 : vector<100x32xf32>
    %c0_286 = arith.constant 0 : index
    %c0_287 = arith.constant 0 : index
    %330 = vector.load %arg16[%c0_286, %c0_287] : memref<1x32xf32, #tpu.memory_space<vmem>>, vector<1x32xf32>
    %331 = vector.broadcast %330 : vector<1x32xf32> to vector<100x32xf32>
    %332 = arith.addf %329, %331 : vector<100x32xf32>
    %cst_288 = arith.constant 0.000000e+00 : f32
    %333 = vector.broadcast %cst_288 : f32 to vector<100x32xf32>
    %334 = arith.maximumf %332, %333 : vector<100x32xf32>
    %c0_289 = arith.constant 0 : index
    %c0_290 = arith.constant 0 : index
    %335 = vector.load %arg3[%c0_289, %c0_290] : memref<100x32xf32, #tpu.memory_space<vmem>>, vector<100x32xf32>
    %336 = arith.mulf %334, %335 : vector<100x32xf32>
    %c11_291 = arith.constant 11 : index
    %c0_292 = arith.constant 0 : index
    %337 = vector.load %arg28[%c11_291, %c0_292] : memref<122x32xf32, #tpu.memory_space<vmem>>, vector<100x32xf32>
    tpu.vector_store %arg28[%c11_291, %c0_292], %336 {strides = array<i32>} : memref<122x32xf32, #tpu.memory_space<vmem>>, vector<100x32xf32>,
    %c22_293 = arith.constant 22 : index
    %c0_294 = arith.constant 0 : index
    %338 = tpu.strided_load %arg28[%c22_293, %c0_294] {strides = array<i32: 2, 1>} : memref<122x32xf32, #tpu.memory_space<vmem>>, vector<4x32xf32>
    %c23 = arith.constant 23 : index
    %c0_295 = arith.constant 0 : index
    %339 = tpu.strided_load %arg28[%c23, %c0_295] {strides = array<i32: 2, 1>} : memref<122x32xf32, #tpu.memory_space<vmem>>, vector<4x32xf32>
    %c32_296 = arith.constant 32 : index
    %c0_297 = arith.constant 0 : index
    %340 = tpu.strided_load %arg28[%c32_296, %c0_297] {strides = array<i32: 2, 1>} : memref<122x32xf32, #tpu.memory_space<vmem>>, vector<4x32xf32>
    %c33 = arith.constant 33 : index
    %c0_298 = arith.constant 0 : index
    %341 = tpu.strided_load %arg28[%c33, %c0_298] {strides = array<i32: 2, 1>} : memref<122x32xf32, #tpu.memory_space<vmem>>, vector<4x32xf32>
    %342 = arith.maximumf %338, %339 : vector<4x32xf32>
    %343 = arith.maximumf %340, %341 : vector<4x32xf32>
    %344 = arith.maximumf %342, %343 : vector<4x32xf32>
    %c14 = arith.constant 14 : index
    %c0_299 = arith.constant 0 : index
    %345 = vector.load %arg29[%c14, %c0_299] : memref<50x32xf32, #tpu.memory_space<vmem>>, vector<4x32xf32>
    tpu.vector_store %arg29[%c14, %c0_299], %344 {strides = array<i32>} : memref<50x32xf32, #tpu.memory_space<vmem>>, vector<4x32xf32>,
    %c42_300 = arith.constant 42 : index
    %c0_301 = arith.constant 0 : index
    %346 = tpu.strided_load %arg28[%c42_300, %c0_301] {strides = array<i32: 2, 1>} : memref<122x32xf32, #tpu.memory_space<vmem>>, vector<4x32xf32>
    %c43 = arith.constant 43 : index
    %c0_302 = arith.constant 0 : index
    %347 = tpu.strided_load %arg28[%c43, %c0_302] {strides = array<i32: 2, 1>} : memref<122x32xf32, #tpu.memory_space<vmem>>, vector<4x32xf32>
    %c52_303 = arith.constant 52 : index
    %c0_304 = arith.constant 0 : index
    %348 = tpu.strided_load %arg28[%c52_303, %c0_304] {strides = array<i32: 2, 1>} : memref<122x32xf32, #tpu.memory_space<vmem>>, vector<4x32xf32>
    %c53 = arith.constant 53 : index
    %c0_305 = arith.constant 0 : index
    %349 = tpu.strided_load %arg28[%c53, %c0_305] {strides = array<i32: 2, 1>} : memref<122x32xf32, #tpu.memory_space<vmem>>, vector<4x32xf32>
    %350 = arith.maximumf %346, %347 : vector<4x32xf32>
    %351 = arith.maximumf %348, %349 : vector<4x32xf32>
    %352 = arith.maximumf %350, %351 : vector<4x32xf32>
    %c20_306 = arith.constant 20 : index
    %c0_307 = arith.constant 0 : index
    %353 = vector.load %arg29[%c20_306, %c0_307] : memref<50x32xf32, #tpu.memory_space<vmem>>, vector<4x32xf32>
    tpu.vector_store %arg29[%c20_306, %c0_307], %352 {strides = array<i32>} : memref<50x32xf32, #tpu.memory_space<vmem>>, vector<4x32xf32>,
    %c62_308 = arith.constant 62 : index
    %c0_309 = arith.constant 0 : index
    %354 = tpu.strided_load %arg28[%c62_308, %c0_309] {strides = array<i32: 2, 1>} : memref<122x32xf32, #tpu.memory_space<vmem>>, vector<4x32xf32>
    %c63 = arith.constant 63 : index
    %c0_310 = arith.constant 0 : index
    %355 = tpu.strided_load %arg28[%c63, %c0_310] {strides = array<i32: 2, 1>} : memref<122x32xf32, #tpu.memory_space<vmem>>, vector<4x32xf32>
    %c72_311 = arith.constant 72 : index
    %c0_312 = arith.constant 0 : index
    %356 = tpu.strided_load %arg28[%c72_311, %c0_312] {strides = array<i32: 2, 1>} : memref<122x32xf32, #tpu.memory_space<vmem>>, vector<4x32xf32>
    %c73 = arith.constant 73 : index
    %c0_313 = arith.constant 0 : index
    %357 = tpu.strided_load %arg28[%c73, %c0_313] {strides = array<i32: 2, 1>} : memref<122x32xf32, #tpu.memory_space<vmem>>, vector<4x32xf32>
    %358 = arith.maximumf %354, %355 : vector<4x32xf32>
    %359 = arith.maximumf %356, %357 : vector<4x32xf32>
    %360 = arith.maximumf %358, %359 : vector<4x32xf32>
    %c26 = arith.constant 26 : index
    %c0_314 = arith.constant 0 : index
    %361 = vector.load %arg29[%c26, %c0_314] : memref<50x32xf32, #tpu.memory_space<vmem>>, vector<4x32xf32>
    tpu.vector_store %arg29[%c26, %c0_314], %360 {strides = array<i32>} : memref<50x32xf32, #tpu.memory_space<vmem>>, vector<4x32xf32>,
    %c82_315 = arith.constant 82 : index
    %c0_316 = arith.constant 0 : index
    %362 = tpu.strided_load %arg28[%c82_315, %c0_316] {strides = array<i32: 2, 1>} : memref<122x32xf32, #tpu.memory_space<vmem>>, vector<4x32xf32>
    %c83 = arith.constant 83 : index
    %c0_317 = arith.constant 0 : index
    %363 = tpu.strided_load %arg28[%c83, %c0_317] {strides = array<i32: 2, 1>} : memref<122x32xf32, #tpu.memory_space<vmem>>, vector<4x32xf32>
    %c92_318 = arith.constant 92 : index
    %c0_319 = arith.constant 0 : index
    %364 = tpu.strided_load %arg28[%c92_318, %c0_319] {strides = array<i32: 2, 1>} : memref<122x32xf32, #tpu.memory_space<vmem>>, vector<4x32xf32>
    %c93_320 = arith.constant 93 : index
    %c0_321 = arith.constant 0 : index
    %365 = tpu.strided_load %arg28[%c93_320, %c0_321] {strides = array<i32: 2, 1>} : memref<122x32xf32, #tpu.memory_space<vmem>>, vector<4x32xf32>
    %366 = arith.maximumf %362, %363 : vector<4x32xf32>
    %367 = arith.maximumf %364, %365 : vector<4x32xf32>
    %368 = arith.maximumf %366, %367 : vector<4x32xf32>
    %c32_322 = arith.constant 32 : index
    %c0_323 = arith.constant 0 : index
    %369 = vector.load %arg29[%c32_322, %c0_323] : memref<50x32xf32, #tpu.memory_space<vmem>>, vector<4x32xf32>
    tpu.vector_store %arg29[%c32_322, %c0_323], %368 {strides = array<i32>} : memref<50x32xf32, #tpu.memory_space<vmem>>, vector<4x32xf32>,
    %cst_324 = arith.constant 0.000000e+00 : f32
    %370 = vector.broadcast %cst_324 : f32 to vector<36x32xf32>
    %c0_325 = arith.constant 0 : index
    %c0_326 = arith.constant 0 : index
    %371 = vector.load %arg29[%c0_325, %c0_326] : memref<50x32xf32, #tpu.memory_space<vmem>>, vector<36x32xf32>
    %372 = arith.truncf %371 : vector<36x32xf32> to vector<36x32xbf16>
    %c0_327 = arith.constant 0 : index
    %c0_328 = arith.constant 0 : index
    %c0_329 = arith.constant 0 : index
    %373 = vector.load %arg17[%c0_327, %c0_328, %c0_329] : memref<9x32x32xbf16, #tpu.memory_space<vmem>>, vector<1x32x32xbf16>
    %374 = vector.shape_cast %373 : vector<1x32x32xbf16> to vector<32x32xbf16>
    %cst_330 = arith.constant dense<0.000000e+00> : vector<36x32xf32>
    %375 = tpu.matmul %372, %374, %cst_330 {dimension_numbers = #tpu.dot_dimension_numbers<[1], [0], [0], [1], [0, 0, 1, 1], [], []>} : vector<36x32xbf16>, vector<32x32xbf16>, vector<36x32xf32> -> vector<36x32xf32>
    %376 = arith.addf %370, %375 : vector<36x32xf32>
    %c1_331 = arith.constant 1 : index
    %c0_332 = arith.constant 0 : index
    %377 = vector.load %arg29[%c1_331, %c0_332] : memref<50x32xf32, #tpu.memory_space<vmem>>, vector<36x32xf32>
    %378 = arith.truncf %377 : vector<36x32xf32> to vector<36x32xbf16>
    %c1_333 = arith.constant 1 : index
    %c0_334 = arith.constant 0 : index
    %c0_335 = arith.constant 0 : index
    %379 = vector.load %arg17[%c1_333, %c0_334, %c0_335] : memref<9x32x32xbf16, #tpu.memory_space<vmem>>, vector<1x32x32xbf16>
    %380 = vector.shape_cast %379 : vector<1x32x32xbf16> to vector<32x32xbf16>
    %cst_336 = arith.constant dense<0.000000e+00> : vector<36x32xf32>
    %381 = tpu.matmul %378, %380, %cst_336 {dimension_numbers = #tpu.dot_dimension_numbers<[1], [0], [0], [1], [0, 0, 1, 1], [], []>} : vector<36x32xbf16>, vector<32x32xbf16>, vector<36x32xf32> -> vector<36x32xf32>
    %382 = arith.addf %376, %381 : vector<36x32xf32>
    %c2_337 = arith.constant 2 : index
    %c0_338 = arith.constant 0 : index
    %383 = vector.load %arg29[%c2_337, %c0_338] : memref<50x32xf32, #tpu.memory_space<vmem>>, vector<36x32xf32>
    %384 = arith.truncf %383 : vector<36x32xf32> to vector<36x32xbf16>
    %c2_339 = arith.constant 2 : index
    %c0_340 = arith.constant 0 : index
    %c0_341 = arith.constant 0 : index
    %385 = vector.load %arg17[%c2_339, %c0_340, %c0_341] : memref<9x32x32xbf16, #tpu.memory_space<vmem>>, vector<1x32x32xbf16>
    %386 = vector.shape_cast %385 : vector<1x32x32xbf16> to vector<32x32xbf16>
    %cst_342 = arith.constant dense<0.000000e+00> : vector<36x32xf32>
    %387 = tpu.matmul %384, %386, %cst_342 {dimension_numbers = #tpu.dot_dimension_numbers<[1], [0], [0], [1], [0, 0, 1, 1], [], []>} : vector<36x32xbf16>, vector<32x32xbf16>, vector<36x32xf32> -> vector<36x32xf32>
    %388 = arith.addf %382, %387 : vector<36x32xf32>
    %c6_343 = arith.constant 6 : index
    %c0_344 = arith.constant 0 : index
    %389 = vector.load %arg29[%c6_343, %c0_344] : memref<50x32xf32, #tpu.memory_space<vmem>>, vector<36x32xf32>
    %390 = arith.truncf %389 : vector<36x32xf32> to vector<36x32xbf16>
    %c3_345 = arith.constant 3 : index
    %c0_346 = arith.constant 0 : index
    %c0_347 = arith.constant 0 : index
    %391 = vector.load %arg17[%c3_345, %c0_346, %c0_347] : memref<9x32x32xbf16, #tpu.memory_space<vmem>>, vector<1x32x32xbf16>
    %392 = vector.shape_cast %391 : vector<1x32x32xbf16> to vector<32x32xbf16>
    %cst_348 = arith.constant dense<0.000000e+00> : vector<36x32xf32>
    %393 = tpu.matmul %390, %392, %cst_348 {dimension_numbers = #tpu.dot_dimension_numbers<[1], [0], [0], [1], [0, 0, 1, 1], [], []>} : vector<36x32xbf16>, vector<32x32xbf16>, vector<36x32xf32> -> vector<36x32xf32>
    %394 = arith.addf %388, %393 : vector<36x32xf32>
    %c7_349 = arith.constant 7 : index
    %c0_350 = arith.constant 0 : index
    %395 = vector.load %arg29[%c7_349, %c0_350] : memref<50x32xf32, #tpu.memory_space<vmem>>, vector<36x32xf32>
    %396 = arith.truncf %395 : vector<36x32xf32> to vector<36x32xbf16>
    %c4_351 = arith.constant 4 : index
    %c0_352 = arith.constant 0 : index
    %c0_353 = arith.constant 0 : index
    %397 = vector.load %arg17[%c4_351, %c0_352, %c0_353] : memref<9x32x32xbf16, #tpu.memory_space<vmem>>, vector<1x32x32xbf16>
    %398 = vector.shape_cast %397 : vector<1x32x32xbf16> to vector<32x32xbf16>
    %cst_354 = arith.constant dense<0.000000e+00> : vector<36x32xf32>
    %399 = tpu.matmul %396, %398, %cst_354 {dimension_numbers = #tpu.dot_dimension_numbers<[1], [0], [0], [1], [0, 0, 1, 1], [], []>} : vector<36x32xbf16>, vector<32x32xbf16>, vector<36x32xf32> -> vector<36x32xf32>
    %400 = arith.addf %394, %399 : vector<36x32xf32>
    %c8_355 = arith.constant 8 : index
    %c0_356 = arith.constant 0 : index
    %401 = vector.load %arg29[%c8_355, %c0_356] : memref<50x32xf32, #tpu.memory_space<vmem>>, vector<36x32xf32>
    %402 = arith.truncf %401 : vector<36x32xf32> to vector<36x32xbf16>
    %c5_357 = arith.constant 5 : index
    %c0_358 = arith.constant 0 : index
    %c0_359 = arith.constant 0 : index
    %403 = vector.load %arg17[%c5_357, %c0_358, %c0_359] : memref<9x32x32xbf16, #tpu.memory_space<vmem>>, vector<1x32x32xbf16>
    %404 = vector.shape_cast %403 : vector<1x32x32xbf16> to vector<32x32xbf16>
    %cst_360 = arith.constant dense<0.000000e+00> : vector<36x32xf32>
    %405 = tpu.matmul %402, %404, %cst_360 {dimension_numbers = #tpu.dot_dimension_numbers<[1], [0], [0], [1], [0, 0, 1, 1], [], []>} : vector<36x32xbf16>, vector<32x32xbf16>, vector<36x32xf32> -> vector<36x32xf32>
    %406 = arith.addf %400, %405 : vector<36x32xf32>
    %c12_361 = arith.constant 12 : index
    %c0_362 = arith.constant 0 : index
    %407 = vector.load %arg29[%c12_361, %c0_362] : memref<50x32xf32, #tpu.memory_space<vmem>>, vector<36x32xf32>
    %408 = arith.truncf %407 : vector<36x32xf32> to vector<36x32xbf16>
    %c6_363 = arith.constant 6 : index
    %c0_364 = arith.constant 0 : index
    %c0_365 = arith.constant 0 : index
    %409 = vector.load %arg17[%c6_363, %c0_364, %c0_365] : memref<9x32x32xbf16, #tpu.memory_space<vmem>>, vector<1x32x32xbf16>
    %410 = vector.shape_cast %409 : vector<1x32x32xbf16> to vector<32x32xbf16>
    %cst_366 = arith.constant dense<0.000000e+00> : vector<36x32xf32>
    %411 = tpu.matmul %408, %410, %cst_366 {dimension_numbers = #tpu.dot_dimension_numbers<[1], [0], [0], [1], [0, 0, 1, 1], [], []>} : vector<36x32xbf16>, vector<32x32xbf16>, vector<36x32xf32> -> vector<36x32xf32>
    %412 = arith.addf %406, %411 : vector<36x32xf32>
    %c13 = arith.constant 13 : index
    %c0_367 = arith.constant 0 : index
    %413 = vector.load %arg29[%c13, %c0_367] : memref<50x32xf32, #tpu.memory_space<vmem>>, vector<36x32xf32>
    %414 = arith.truncf %413 : vector<36x32xf32> to vector<36x32xbf16>
    %c7_368 = arith.constant 7 : index
    %c0_369 = arith.constant 0 : index
    %c0_370 = arith.constant 0 : index
    %415 = vector.load %arg17[%c7_368, %c0_369, %c0_370] : memref<9x32x32xbf16, #tpu.memory_space<vmem>>, vector<1x32x32xbf16>
    %416 = vector.shape_cast %415 : vector<1x32x32xbf16> to vector<32x32xbf16>
    %cst_371 = arith.constant dense<0.000000e+00> : vector<36x32xf32>
    %417 = tpu.matmul %414, %416, %cst_371 {dimension_numbers = #tpu.dot_dimension_numbers<[1], [0], [0], [1], [0, 0, 1, 1], [], []>} : vector<36x32xbf16>, vector<32x32xbf16>, vector<36x32xf32> -> vector<36x32xf32>
    %418 = arith.addf %412, %417 : vector<36x32xf32>
    %c14_372 = arith.constant 14 : index
    %c0_373 = arith.constant 0 : index
    %419 = vector.load %arg29[%c14_372, %c0_373] : memref<50x32xf32, #tpu.memory_space<vmem>>, vector<36x32xf32>
    %420 = arith.truncf %419 : vector<36x32xf32> to vector<36x32xbf16>
    %c8_374 = arith.constant 8 : index
    %c0_375 = arith.constant 0 : index
    %c0_376 = arith.constant 0 : index
    %421 = vector.load %arg17[%c8_374, %c0_375, %c0_376] : memref<9x32x32xbf16, #tpu.memory_space<vmem>>, vector<1x32x32xbf16>
    %422 = vector.shape_cast %421 : vector<1x32x32xbf16> to vector<32x32xbf16>
    %cst_377 = arith.constant dense<0.000000e+00> : vector<36x32xf32>
    %423 = tpu.matmul %420, %422, %cst_377 {dimension_numbers = #tpu.dot_dimension_numbers<[1], [0], [0], [1], [0, 0, 1, 1], [], []>} : vector<36x32xbf16>, vector<32x32xbf16>, vector<36x32xf32> -> vector<36x32xf32>
    %424 = arith.addf %418, %423 : vector<36x32xf32>
    %c0_378 = arith.constant 0 : index
    %c0_379 = arith.constant 0 : index
    %425 = vector.load %arg18[%c0_378, %c0_379] : memref<1x32xf32, #tpu.memory_space<vmem>>, vector<1x32xf32>
    %426 = vector.broadcast %425 : vector<1x32xf32> to vector<36x32xf32>
    %427 = arith.mulf %424, %426 : vector<36x32xf32>
    %c0_380 = arith.constant 0 : index
    %c0_381 = arith.constant 0 : index
    %428 = vector.load %arg19[%c0_380, %c0_381] : memref<1x32xf32, #tpu.memory_space<vmem>>, vector<1x32xf32>
    %429 = vector.broadcast %428 : vector<1x32xf32> to vector<36x32xf32>
    %430 = arith.addf %427, %429 : vector<36x32xf32>
    %cst_382 = arith.constant 0.000000e+00 : f32
    %431 = vector.broadcast %cst_382 : f32 to vector<36x32xf32>
    %432 = arith.maximumf %430, %431 : vector<36x32xf32>
    %c0_383 = arith.constant 0 : index
    %c0_384 = arith.constant 0 : index
    %433 = vector.load %arg4[%c0_383, %c0_384] : memref<36x32xf32, #tpu.memory_space<vmem>>, vector<36x32xf32>
    %434 = arith.mulf %432, %433 : vector<36x32xf32>
    %c7_385 = arith.constant 7 : index
    %c0_386 = arith.constant 0 : index
    %435 = vector.load %arg29[%c7_385, %c0_386] : memref<50x32xf32, #tpu.memory_space<vmem>>, vector<36x32xf32>
    tpu.vector_store %arg29[%c7_385, %c0_386], %434 {strides = array<i32>} : memref<50x32xf32, #tpu.memory_space<vmem>>, vector<36x32xf32>,
    %cst_387 = arith.constant 0.000000e+00 : f32
    %436 = vector.broadcast %cst_387 : f32 to vector<1x64xf32>
    %c14_388 = arith.constant 14 : index
    %c0_389 = arith.constant 0 : index
    %437 = tpu.strided_load %arg29[%c14_388, %c0_389] {strides = array<i32: 2, 1>} : memref<50x32xf32, #tpu.memory_space<vmem>>, vector<2x32xf32>
    %c15 = arith.constant 15 : index
    %c0_390 = arith.constant 0 : index
    %438 = tpu.strided_load %arg29[%c15, %c0_390] {strides = array<i32: 2, 1>} : memref<50x32xf32, #tpu.memory_space<vmem>>, vector<2x32xf32>
    %c20_391 = arith.constant 20 : index
    %c0_392 = arith.constant 0 : index
    %439 = tpu.strided_load %arg29[%c20_391, %c0_392] {strides = array<i32: 2, 1>} : memref<50x32xf32, #tpu.memory_space<vmem>>, vector<2x32xf32>
    %c21_393 = arith.constant 21 : index
    %c0_394 = arith.constant 0 : index
    %440 = tpu.strided_load %arg29[%c21_393, %c0_394] {strides = array<i32: 2, 1>} : memref<50x32xf32, #tpu.memory_space<vmem>>, vector<2x32xf32>
    %441 = arith.maximumf %437, %438 : vector<2x32xf32>
    %442 = arith.maximumf %439, %440 : vector<2x32xf32>
    %443 = arith.maximumf %441, %442 : vector<2x32xf32>
    %444 = arith.truncf %443 : vector<2x32xf32> to vector<2x32xbf16>
    %445 = vector.extract_strided_slice %444 {offsets = [0, 0], sizes = [1, 32], strides = [1, 1]} : vector<2x32xbf16> to vector<1x32xbf16>
    %c0_395 = arith.constant 0 : index
    %c0_396 = arith.constant 0 : index
    %c0_397 = arith.constant 0 : index
    %446 = vector.load %arg20[%c0_395, %c0_396, %c0_397] : memref<4x32x64xbf16, #tpu.memory_space<vmem>>, vector<1x32x64xbf16>
    %447 = vector.shape_cast %446 : vector<1x32x64xbf16> to vector<32x64xbf16>
    %cst_398 = arith.constant dense<0.000000e+00> : vector<1x64xf32>
    %448 = tpu.matmul %445, %447, %cst_398 {dimension_numbers = #tpu.dot_dimension_numbers<[1], [0], [0], [1], [0, 0, 1, 1], [], []>} : vector<1x32xbf16>, vector<32x64xbf16>, vector<1x64xf32> -> vector<1x64xf32>
    %449 = arith.addf %436, %448 : vector<1x64xf32>
    %450 = vector.extract_strided_slice %444 {offsets = [1, 0], sizes = [1, 32], strides = [1, 1]} : vector<2x32xbf16> to vector<1x32xbf16>
    %c1_399 = arith.constant 1 : index
    %c0_400 = arith.constant 0 : index
    %c0_401 = arith.constant 0 : index
    %451 = vector.load %arg20[%c1_399, %c0_400, %c0_401] : memref<4x32x64xbf16, #tpu.memory_space<vmem>>, vector<1x32x64xbf16>
    %452 = vector.shape_cast %451 : vector<1x32x64xbf16> to vector<32x64xbf16>
    %cst_402 = arith.constant dense<0.000000e+00> : vector<1x64xf32>
    %453 = tpu.matmul %450, %452, %cst_402 {dimension_numbers = #tpu.dot_dimension_numbers<[1], [0], [0], [1], [0, 0, 1, 1], [], []>} : vector<1x32xbf16>, vector<32x64xbf16>, vector<1x64xf32> -> vector<1x64xf32>
    %454 = arith.addf %449, %453 : vector<1x64xf32>
    %c26_403 = arith.constant 26 : index
    %c0_404 = arith.constant 0 : index
    %455 = tpu.strided_load %arg29[%c26_403, %c0_404] {strides = array<i32: 2, 1>} : memref<50x32xf32, #tpu.memory_space<vmem>>, vector<2x32xf32>
    %c27 = arith.constant 27 : index
    %c0_405 = arith.constant 0 : index
    %456 = tpu.strided_load %arg29[%c27, %c0_405] {strides = array<i32: 2, 1>} : memref<50x32xf32, #tpu.memory_space<vmem>>, vector<2x32xf32>
    %c32_406 = arith.constant 32 : index
    %c0_407 = arith.constant 0 : index
    %457 = tpu.strided_load %arg29[%c32_406, %c0_407] {strides = array<i32: 2, 1>} : memref<50x32xf32, #tpu.memory_space<vmem>>, vector<2x32xf32>
    %c33_408 = arith.constant 33 : index
    %c0_409 = arith.constant 0 : index
    %458 = tpu.strided_load %arg29[%c33_408, %c0_409] {strides = array<i32: 2, 1>} : memref<50x32xf32, #tpu.memory_space<vmem>>, vector<2x32xf32>
    %459 = arith.maximumf %455, %456 : vector<2x32xf32>
    %460 = arith.maximumf %457, %458 : vector<2x32xf32>
    %461 = arith.maximumf %459, %460 : vector<2x32xf32>
    %462 = arith.truncf %461 : vector<2x32xf32> to vector<2x32xbf16>
    %463 = vector.extract_strided_slice %462 {offsets = [0, 0], sizes = [1, 32], strides = [1, 1]} : vector<2x32xbf16> to vector<1x32xbf16>
    %c2_410 = arith.constant 2 : index
    %c0_411 = arith.constant 0 : index
    %c0_412 = arith.constant 0 : index
    %464 = vector.load %arg20[%c2_410, %c0_411, %c0_412] : memref<4x32x64xbf16, #tpu.memory_space<vmem>>, vector<1x32x64xbf16>
    %465 = vector.shape_cast %464 : vector<1x32x64xbf16> to vector<32x64xbf16>
    %cst_413 = arith.constant dense<0.000000e+00> : vector<1x64xf32>
    %466 = tpu.matmul %463, %465, %cst_413 {dimension_numbers = #tpu.dot_dimension_numbers<[1], [0], [0], [1], [0, 0, 1, 1], [], []>} : vector<1x32xbf16>, vector<32x64xbf16>, vector<1x64xf32> -> vector<1x64xf32>
    %467 = arith.addf %454, %466 : vector<1x64xf32>
    %468 = vector.extract_strided_slice %462 {offsets = [1, 0], sizes = [1, 32], strides = [1, 1]} : vector<2x32xbf16> to vector<1x32xbf16>
    %c3_414 = arith.constant 3 : index
    %c0_415 = arith.constant 0 : index
    %c0_416 = arith.constant 0 : index
    %469 = vector.load %arg20[%c3_414, %c0_415, %c0_416] : memref<4x32x64xbf16, #tpu.memory_space<vmem>>, vector<1x32x64xbf16>
    %470 = vector.shape_cast %469 : vector<1x32x64xbf16> to vector<32x64xbf16>
    %cst_417 = arith.constant dense<0.000000e+00> : vector<1x64xf32>
    %471 = tpu.matmul %468, %470, %cst_417 {dimension_numbers = #tpu.dot_dimension_numbers<[1], [0], [0], [1], [0, 0, 1, 1], [], []>} : vector<1x32xbf16>, vector<32x64xbf16>, vector<1x64xf32> -> vector<1x64xf32>
    %472 = arith.addf %467, %471 : vector<1x64xf32>
    %c0_418 = arith.constant 0 : index
    %c0_419 = arith.constant 0 : index
    %473 = vector.load %arg21[%c0_418, %c0_419] : memref<1x64xf32, #tpu.memory_space<vmem>>, vector<1x64xf32>
    %474 = arith.addf %472, %473 : vector<1x64xf32>
    %cst_420 = arith.constant 0.000000e+00 : f32
    %475 = vector.broadcast %cst_420 : f32 to vector<1x64xf32>
    %476 = arith.maximumf %474, %475 : vector<1x64xf32>
    %477 = arith.truncf %476 : vector<1x64xf32> to vector<1x64xbf16>
    %c0_421 = arith.constant 0 : index
    %c0_422 = arith.constant 0 : index
    %478 = vector.load %arg22[%c0_421, %c0_422] : memref<64x64xbf16, #tpu.memory_space<vmem>>, vector<64x64xbf16>
    %cst_423 = arith.constant dense<0.000000e+00> : vector<1x64xf32>
    %479 = tpu.matmul %477, %478, %cst_423 {dimension_numbers = #tpu.dot_dimension_numbers<[1], [0], [0], [1], [0, 0, 1, 1], [], []>} : vector<1x64xbf16>, vector<64x64xbf16>, vector<1x64xf32> -> vector<1x64xf32>
    %c0_424 = arith.constant 0 : index
    %c0_425 = arith.constant 0 : index
    %480 = vector.load %arg23[%c0_424, %c0_425] : memref<1x64xf32, #tpu.memory_space<vmem>>, vector<1x64xf32>
    %481 = arith.addf %479, %480 : vector<1x64xf32>
    %cst_426 = arith.constant 0.000000e+00 : f32
    %482 = vector.broadcast %cst_426 : f32 to vector<1x64xf32>
    %483 = arith.maximumf %481, %482 : vector<1x64xf32>
    %484 = arith.truncf %483 : vector<1x64xf32> to vector<1x64xbf16>
    %c0_427 = arith.constant 0 : index
    %c0_428 = arith.constant 0 : index
    %485 = vector.load %arg24[%c0_427, %c0_428] : memref<64x10xbf16, #tpu.memory_space<vmem>>, vector<64x10xbf16>
    %cst_429 = arith.constant dense<0.000000e+00> : vector<1x10xf32>
    %486 = tpu.matmul %484, %485, %cst_429 {dimension_numbers = #tpu.dot_dimension_numbers<[1], [0], [0], [1], [0, 0, 1, 1], [], []>} : vector<1x64xbf16>, vector<64x10xbf16>, vector<1x10xf32> -> vector<1x10xf32>
    %c0_430 = arith.constant 0 : index
    %c0_431 = arith.constant 0 : index
    %487 = vector.load %arg25[%c0_430, %c0_431] : memref<1x10xf32, #tpu.memory_space<vmem>>, vector<1x10xf32>
    %488 = arith.addf %486, %487 : vector<1x10xf32>
    %c0_432 = arith.constant 0 : index
    %c0_433 = arith.constant 0 : index
    %c0_434 = arith.constant 0 : index
    %489 = vector.load %arg26[%c0_432, %c0_433, %c0_434] : memref<1x1x10xf32, #tpu.memory_space<vmem>>, vector<1x1x10xf32>
    %490 = vector.shape_cast %489 : vector<1x1x10xf32> to vector<1x10xf32>
    %491 = vector.shape_cast %488 : vector<1x10xf32> to vector<1x1x10xf32>
    tpu.vector_store %arg26[%c0_432, %c0_433, %c0_434], %491 {strides = array<i32>} : memref<1x1x10xf32, #tpu.memory_space<vmem>>, vector<1x1x10xf32>,
    return
  }
  func.func @transform_0(%arg0: i32) -> (i32, i32, i32) {
    %c0_i32 = arith.constant 0 : i32
    %c0_i32_0 = arith.constant 0 : i32
    %c0_i32_1 = arith.constant 0 : i32
    return %arg0, %c0_i32, %c0_i32_0 : i32, i32, i32
  }
  func.func @transform_1(%arg0: i32) -> (i32, i32) {
    %c0_i32 = arith.constant 0 : i32
    %c0_i32_0 = arith.constant 0 : i32
    %c0_i32_1 = arith.constant 0 : i32
    return %c0_i32, %c0_i32_0 : i32, i32
  }
  func.func @transform_2(%arg0: i32) -> (i32, i32) {
    %c0_i32 = arith.constant 0 : i32
    %c0_i32_0 = arith.constant 0 : i32
    %c0_i32_1 = arith.constant 0 : i32
    return %c0_i32, %c0_i32_0 : i32, i32
  }
  func.func @transform_3(%arg0: i32) -> (i32, i32) {
    %c0_i32 = arith.constant 0 : i32
    %c0_i32_0 = arith.constant 0 : i32
    %c0_i32_1 = arith.constant 0 : i32
    return %c0_i32, %c0_i32_0 : i32, i32
  }
  func.func @transform_4(%arg0: i32) -> (i32, i32, i32) {
    %c0_i32 = arith.constant 0 : i32
    %c0_i32_0 = arith.constant 0 : i32
    %c0_i32_1 = arith.constant 0 : i32
    %c0_i32_2 = arith.constant 0 : i32
    return %c0_i32, %c0_i32_0, %c0_i32_1 : i32, i32, i32
  }
  func.func @transform_5(%arg0: i32) -> (i32, i32) {
    %c0_i32 = arith.constant 0 : i32
    %c0_i32_0 = arith.constant 0 : i32
    %c0_i32_1 = arith.constant 0 : i32
    return %c0_i32, %c0_i32_0 : i32, i32
  }
  func.func @transform_6(%arg0: i32) -> (i32, i32) {
    %c0_i32 = arith.constant 0 : i32
    %c0_i32_0 = arith.constant 0 : i32
    %c0_i32_1 = arith.constant 0 : i32
    return %c0_i32, %c0_i32_0 : i32, i32
  }
  func.func @transform_7(%arg0: i32) -> (i32, i32, i32) {
    %c0_i32 = arith.constant 0 : i32
    %c0_i32_0 = arith.constant 0 : i32
    %c0_i32_1 = arith.constant 0 : i32
    %c0_i32_2 = arith.constant 0 : i32
    return %c0_i32, %c0_i32_0, %c0_i32_1 : i32, i32, i32
  }
  func.func @transform_8(%arg0: i32) -> (i32, i32) {
    %c0_i32 = arith.constant 0 : i32
    %c0_i32_0 = arith.constant 0 : i32
    %c0_i32_1 = arith.constant 0 : i32
    return %c0_i32, %c0_i32_0 : i32, i32
  }
  func.func @transform_9(%arg0: i32) -> (i32, i32) {
    %c0_i32 = arith.constant 0 : i32
    %c0_i32_0 = arith.constant 0 : i32
    %c0_i32_1 = arith.constant 0 : i32
    return %c0_i32, %c0_i32_0 : i32, i32
  }
  func.func @transform_10(%arg0: i32) -> (i32, i32, i32) {
    %c0_i32 = arith.constant 0 : i32
    %c0_i32_0 = arith.constant 0 : i32
    %c0_i32_1 = arith.constant 0 : i32
    %c0_i32_2 = arith.constant 0 : i32
    return %c0_i32, %c0_i32_0, %c0_i32_1 : i32, i32, i32
  }
  func.func @transform_11(%arg0: i32) -> (i32, i32) {
    %c0_i32 = arith.constant 0 : i32
    %c0_i32_0 = arith.constant 0 : i32
    %c0_i32_1 = arith.constant 0 : i32
    return %c0_i32, %c0_i32_0 : i32, i32
  }
  func.func @transform_12(%arg0: i32) -> (i32, i32) {
    %c0_i32 = arith.constant 0 : i32
    %c0_i32_0 = arith.constant 0 : i32
    %c0_i32_1 = arith.constant 0 : i32
    return %c0_i32, %c0_i32_0 : i32, i32
  }
  func.func @transform_13(%arg0: i32) -> (i32, i32, i32) {
    %c0_i32 = arith.constant 0 : i32
    %c0_i32_0 = arith.constant 0 : i32
    %c0_i32_1 = arith.constant 0 : i32
    %c0_i32_2 = arith.constant 0 : i32
    return %c0_i32, %c0_i32_0, %c0_i32_1 : i32, i32, i32
  }
  func.func @transform_14(%arg0: i32) -> (i32, i32) {
    %c0_i32 = arith.constant 0 : i32
    %c0_i32_0 = arith.constant 0 : i32
    %c0_i32_1 = arith.constant 0 : i32
    return %c0_i32, %c0_i32_0 : i32, i32
  }
  func.func @transform_15(%arg0: i32) -> (i32, i32) {
    %c0_i32 = arith.constant 0 : i32
    %c0_i32_0 = arith.constant 0 : i32
    %c0_i32_1 = arith.constant 0 : i32
    return %c0_i32, %c0_i32_0 : i32, i32
  }
  func.func @transform_16(%arg0: i32) -> (i32, i32, i32) {
    %c0_i32 = arith.constant 0 : i32
    %c0_i32_0 = arith.constant 0 : i32
    %c0_i32_1 = arith.constant 0 : i32
    %c0_i32_2 = arith.constant 0 : i32
    return %c0_i32, %c0_i32_0, %c0_i32_1 : i32, i32, i32
  }
  func.func @transform_17(%arg0: i32) -> (i32, i32) {
    %c0_i32 = arith.constant 0 : i32
    %c0_i32_0 = arith.constant 0 : i32
    %c0_i32_1 = arith.constant 0 : i32
    return %c0_i32, %c0_i32_0 : i32, i32
  }
  func.func @transform_18(%arg0: i32) -> (i32, i32) {
    %c0_i32 = arith.constant 0 : i32
    %c0_i32_0 = arith.constant 0 : i32
    %c0_i32_1 = arith.constant 0 : i32
    return %c0_i32, %c0_i32_0 : i32, i32
  }
  func.func @transform_19(%arg0: i32) -> (i32, i32, i32) {
    %c0_i32 = arith.constant 0 : i32
    %c0_i32_0 = arith.constant 0 : i32
    %c0_i32_1 = arith.constant 0 : i32
    %c0_i32_2 = arith.constant 0 : i32
    return %c0_i32, %c0_i32_0, %c0_i32_1 : i32, i32, i32
  }
  func.func @transform_20(%arg0: i32) -> (i32, i32) {
    %c0_i32 = arith.constant 0 : i32
    %c0_i32_0 = arith.constant 0 : i32
    %c0_i32_1 = arith.constant 0 : i32
    return %c0_i32, %c0_i32_0 : i32, i32
  }
  func.func @transform_21(%arg0: i32) -> (i32, i32) {
    %c0_i32 = arith.constant 0 : i32
    %c0_i32_0 = arith.constant 0 : i32
    %c0_i32_1 = arith.constant 0 : i32
    return %c0_i32, %c0_i32_0 : i32, i32
  }
  func.func @transform_22(%arg0: i32) -> (i32, i32) {
    %c0_i32 = arith.constant 0 : i32
    %c0_i32_0 = arith.constant 0 : i32
    %c0_i32_1 = arith.constant 0 : i32
    return %c0_i32, %c0_i32_0 : i32, i32
  }
  func.func @transform_23(%arg0: i32) -> (i32, i32) {
    %c0_i32 = arith.constant 0 : i32
    %c0_i32_0 = arith.constant 0 : i32
    %c0_i32_1 = arith.constant 0 : i32
    return %c0_i32, %c0_i32_0 : i32, i32
  }
  func.func @transform_24(%arg0: i32) -> (i32, i32) {
    %c0_i32 = arith.constant 0 : i32
    %c0_i32_0 = arith.constant 0 : i32
    %c0_i32_1 = arith.constant 0 : i32
    return %c0_i32, %c0_i32_0 : i32, i32
  }
  func.func @transform_25(%arg0: i32) -> (i32, i32, i32) {
    %c0_i32 = arith.constant 0 : i32
    %c0_i32_0 = arith.constant 0 : i32
    %c0_i32_1 = arith.constant 0 : i32
    return %arg0, %c0_i32, %c0_i32_0 : i32, i32, i32
  }
}

</mosaic_0001>

<bundles_post_ra>
// kernel: multimodel_forward.1
= control target key start
LH: loop header
LB: loop body
LE: loop exit
PB: predicated region body
PF: predicated region fallthrough
CT: control target
= control target key end

     0   :  { %s22039_s0 = inlined_call_operand.vmem [shape: f32[2,324,32], index: 0, kind: input, shape index: {}]   ;;  %s22040_s1 = inlined_call_operand.vmem [shape: f32[324,32], index: 1, kind: input, shape index: {}]   ;;  %s22041_s2 = inlined_call_operand.vmem [shape: f32[100,32], index: 2, kind: input, shape index: {}]   ;;  %s22042_s3 = inlined_call_operand.vmem [shape: f32[36,32], index: 3, kind: input, shape index: {}]   ;;  %s22043_s4 = inlined_call_operand.vmem [shape: bf16[9,32,32], index: 4, kind: input, shape index: {}]   ;;  %s22044_s5 = inlined_call_operand.vmem [shape: f32[1,32], index: 5, kind: input, shape index: {}]   ;;  %s22045_s6 = inlined_call_operand.vmem [shape: f32[1,32], index: 6, kind: input, shape index: {}]   ;;  %s22046_s7 = inlined_call_operand.vmem [shape: bf16[9,32,32], index: 7, kind: input, shape index: {}]   ;;  %s22047_s8 = inlined_call_operand.vmem [shape: f32[1,32], index: 8, kind: input, shape index: {}]   ;;  %s22048_s9 = inlined_call_operand.vmem [shape: f32[1,32], index: 9, kind: input, shape index: {}]   ;;  %s22049_s10 = inlined_call_operand.vmem [shape: bf16[9,32,32], index: 10, kind: input, shape index: {}]   ;;  %s22050_s11 = inlined_call_operand.vmem [shape: f32[1,32], index: 11, kind: input, shape index: {}]   ;;  %s22051_s12 = inlined_call_operand.vmem [shape: f32[1,32], index: 12, kind: input, shape index: {}]   ;;  %s22052_s13 = inlined_call_operand.vmem [shape: bf16[9,32,32], index: 13, kind: input, shape index: {}]   ;;  %s22053_s14 = inlined_call_operand.vmem [shape: f32[1,32], index: 14, kind: input, shape index: {}]   ;;  %s22054_s15 = inlined_call_operand.vmem [shape: f32[1,32], index: 15, kind: input, shape index: {}]   ;;  %s22055_s16 = inlined_call_operand.vmem [shape: bf16[9,32,32], index: 16, kind: input, shape index: {}]   ;;  %s22056_s17 = inlined_call_operand.vmem [shape: f32[1,32], index: 17, kind: input, shape index: {}]   ;;  %s22057_s18 = inlined_call_operand.vmem [shape: f32[1,32], index: 18, kind: input, shape index: {}]   ;;  %s22058_s19 = inlined_call_operand.vmem [shape: bf16[4,32,64], index: 19, kind: input, shape index: {}]   ;;  %s22059_s20 = inlined_call_operand.vmem [shape: f32[1,64], index: 20, kind: input, shape index: {}]   ;;  %s22060_s21 = inlined_call_operand.vmem [shape: bf16[64,64], index: 21, kind: input, shape index: {}]   ;;  %s22061_s22 = inlined_call_operand.vmem [shape: f32[1,64], index: 22, kind: input, shape index: {}]   ;;  %s22062_s23 = inlined_call_operand.vmem [shape: bf16[64,10], index: 23, kind: input, shape index: {}]   ;;  %s22063_s24 = inlined_call_operand.vmem [shape: f32[1,10], index: 24, kind: input, shape index: {}]   ;;  %s22064_s25 = inlined_call_operand.hbm [shape: f32[2,1,10], index: 25, kind: output, shape index: {}]  }
   0x1   :  { %22078 = sst [smem:[#allocation11_spill]] %s22039_s0 }
   0x2   :  { %22079 = sst [smem:[#allocation12_spill]] %s22040_s1 }
   0x3   :  { %22080 = sst [smem:[#allocation13_spill]] %s22041_s2 }
   0x4   :  { %22081 = sst [smem:[#allocation14_spill]] %s22042_s3 }
   0x5   :  { %22082 = sst [smem:[#allocation15_spill]] %s22043_s4 }
   0x6   :  { %22083 = sst [smem:[#allocation16_spill]] %s22044_s5 }
   0x7   :  { %22084 = sst [smem:[#allocation17_spill]] %s22045_s6 }
   0x8   :  { %22085 = sst [smem:[#allocation18_spill]] %s22046_s7 }
   0x9   :  { %22086 = sst [smem:[#allocation19_spill]] %s22047_s8 }
   0xa   :  { %22087 = sst [smem:[#allocation20_spill]] %s22048_s9 }
   0xb   :  { %22088 = sst [smem:[#allocation21_spill]] %s22049_s10 }
   0xc   :  { %30 = vsyncpa [#allocation6], 0 }
   0xd   :  { %32 = vsyncpa [#allocation6 + $0x1], 0  ;;  %s18702_s29 = smov 0   ;;  %s18704_s2 = smov 0  }
   0xe   :  { %s18706_s6 = smov 0   ;;  %s18708_s30 = smov 0  }
   0xf LB: > { %22089 = sst [smem:[#allocation8_spill]] %s18563_s6  ;;  %s18723_s7 = sadd.s32 4294967295, %s18567_s30   ;;  %s18567_s30 = sphi %s18708_s30, %s22105_s30   ;;  %s18563_s6 = sphi %s18706_s6, %s22107_s6   ;;  %s18559_s2 = sphi %s18704_s2, %s22109_s2   ;;  %s18555_s29 = sphi %s18702_s29, %s22108_s29  }
  0x10   : > { %s12648_s3 = sadd.s32 4294967294, %s18567_s30   ;;  %s18727_s26 = sadd.s32 1, %s18567_s30  }
  0x11   : > { %22090 = sst [smem:[#allocation9_spill]] %s18727_s26  ;;  %s575_s1 = sadd.s32 1, %s18563_s6 }
  0x12   : > { %s572_s8 = ssub.s32 %s18567_s30, %s18727_s26  ;;  %p585_p0 = scmp.ne.s32.totalorder %s18563_s6, %s18559_s2 }
  0x13   : > { %p573_p1 = scmp.eq.s32.totalorder %s572_s8, 0  ;;  %p586_p2 = scmp.eq.s32.totalorder %s18723_s7, 1 }
  0x14   : > { %p591_p3 = scmp.ne.s32.totalorder %s18559_s2, %s18555_s29  ;;  %p592_p4 = scmp.eq.s32.totalorder %s12648_s3, 1 }
  0x15   : > { %s18738_s27 = scalar_select %p573_p1, %s18563_s6, %s575_s1  }
  0x16   : > { %p18740_p5 = por %p586_p2, %p585_p0  ;;  %p18744_p6 = por %p592_p4, %p591_p3 }
  0x17   : > { %22091 = sst [smem:[#allocation10_spill]] %s18738_s27  ;;  %p12651_p7 = scmp.ge.s32.totalorder %s18567_s30, 1 }
  0x18   : > { %p690_p8 = scmp.lt.s32.totalorder %s18567_s30, 3 }
  0x1a   : > { %p691_p9 = pnand %p12651_p7, %p690_p8 }
  0x1b   : > { %s22094_s0 = sld [smem:[#allocation15_spill]] (!%p691_p9)  ;;  %v18569_v1 = vmov (!%p691_p9), 0.0   ;;  %vm18570_vm0 = vmmov (!%p691_p9), 0   ;;  %vm763_vm1 = vcmask (!%p691_p9), 261120   ;;  %vm766_vm2 = vcmask (!%p691_p9), 256000   ;;  %p757_p10 = scmp.lt.s32.totalorder (!%p691_p9), %s18723_s7, 1 }
  0x1c   : > { %694 = sbr.rel (%p691_p9) target bundleno = 5770 (0x168a), region = 120  ;;  %14124 = vmatprep.subr.bf16.mxu0 (!%p691_p9), %v18569_v1  ;;  %16484 = vmatprep.subr.bf16.mxu1 (!%p691_p9), %v18569_v1  ;;  %764 = vst.msk [vmem:[#allocation2] sm:$0xff] (!%p691_p9), %vm763_vm1, %v18569_v1  ;;  %765 = vst.msk [vmem:[#allocation2 + $0x8] sm:$0xff] (!%p691_p9), %vm763_vm1, %v18569_v1  ;;  %s22095_s6 = sld [smem:[#allocation11_spill]] (!%p691_p9)  ;;  %vm876_vm3 = vcmask (!%p691_p9), 257024   ;;  %vm786_vm4 = vcmask (!%p691_p9), 254976  }
  0x1d   : > { %14128 = vmatprep.mubr.msk.bf16.mxu0 (!%p691_p9), %vm18570_vm0, %v18569_v1  ;;  %767 = vst.msk [vmem:[#allocation2 + $0x10] sm:$0x7] (!%p691_p9), %vm766_vm2, %v18569_v1  ;;  %770 = vst.msk [vmem:[#allocation2 + $0x167] sm:$0x7] (!%p691_p9), %vm766_vm2, %v18569_v1  ;;  %14176 = vmatprep.mubr.msk.bf16.mxu1 (!%p691_p9), %vm18570_vm0, %v18569_v1  ;;  %s22096_s27 = sld [smem:[#allocation18_spill]] (!%p691_p9)  ;;  %s22098_s1 = sld [smem:[#allocation17_spill]] (!%p691_p9) }
  0x1e   : > { %768 = vst.msk [vmem:[#allocation2 + $0x157] sm:$0xff] (!%p691_p9), %vm763_vm1, %v18569_v1  ;;  %769 = vst.msk [vmem:[#allocation2 + $0x15f] sm:$0xff] (!%p691_p9), %vm763_vm1, %v18569_v1  ;;  %s22100_s10 = sld [smem:[#allocation21_spill]] (!%p691_p9)  ;;  %s22104_s3 = sld [smem:[#allocation14_spill]] (!%p691_p9)  ;;  %vm12456_vm5 = vcmask (!%p691_p9), 523264   ;;  %vm12578_vm6 = vcmask (!%p691_p9), 73728  }
  0x1f   : > { %771 = vst.msk [vmem:[#allocation3] sm:$0xff] (!%p691_p9), %vm763_vm1, %v18569_v1  ;;  %772 = vst.msk [vmem:[#allocation3 + $0x8] sm:$0xff] (!%p691_p9), %vm763_vm1, %v18569_v1 }
  0x20   : > { %773 = vst.msk [vmem:[#allocation3 + $0x10] sm:$0xff] (!%p691_p9), %vm763_vm1, %v18569_v1  ;;  %774 = vst.msk [vmem:[#allocation3 + $0x18] sm:$0xff] (!%p691_p9), %vm763_vm1, %v18569_v1 }
  0x21   : > { %v18399_v0 = vld [vmem:[%s22094_s0 + $0x10] sm:$0xff] (!%p691_p9)   ;;  %v18400_v2 = vld [vmem:[%s22094_s0 + $0x18] sm:$0xff] (!%p691_p9)   ;;  %775 = vst.msk [vmem:[#allocation3 + $0x20] sm:$0xff] (!%p691_p9), %vm763_vm1, %v18569_v1  ;;  %776 = vst.msk [vmem:[#allocation3 + $0x28] sm:$0xff] (!%p691_p9), %vm763_vm1, %v18569_v1 }
  0x22   : > { %14125 = vmatpush3.bf16.msra.mxu0 (!%p691_p9), %v18399_v0  ;;  %777 = vst.msk [vmem:[#allocation3 + $0x30] sm:$0xff] (!%p691_p9), %vm763_vm1, %v18569_v1  ;;  %778 = vst.msk [vmem:[#allocation3 + $0x38] sm:$0xff] (!%p691_p9), %vm763_vm1, %v18569_v1  ;;  %16486 = vmatpush3.bf16.msra.mxu1 (!%p691_p9), %v18399_v0  ;;  %v18401_v3 = vld [vmem:[%s22094_s0] sm:$0xff] (!%p691_p9)   ;;  %v18402_v14 = vld [vmem:[%s22094_s0 + $0x8] sm:$0xff] (!%p691_p9)  }
  0x23   : > { %14126 = vmatprep.subr.bf16.mxu0 %v18569_v1  ;;  %779 = vst.msk [vmem:[#allocation3 + $0x40] sm:$0xff] %vm763_vm1, %v18569_v1  ;;  %780 = vst.msk [vmem:[#allocation3 + $0x48] sm:$0xff] %vm763_vm1, %v18569_v1  ;;  %16485 = vmatprep.subr.bf16.mxu1 %v18569_v1  ;;  %s758_s8 = scalar_select %p757_p10, %s18723_s7, 1  ;;  %v944_v4 = vld [vmem:[#allocation2 + $0x1] sm:$0xff] }
  0x24   : > { %781 = vst.msk [vmem:[#allocation3 + $0x50] sm:$0xff] %vm763_vm1, %v18569_v1  ;;  %782 = vst.msk [vmem:[#allocation3 + $0x58] sm:$0xff] %vm763_vm1, %v18569_v1  ;;  %v945_v5 = vld [vmem:[#allocation2 + $0x9] sm:$0xff] }
  0x25   : > { %783 = vst.msk [vmem:[#allocation3 + $0x60] sm:$0xff] %vm763_vm1, %v18569_v1  ;;  %784 = vst.msk [vmem:[#allocation3 + $0x68] sm:$0xff] %vm763_vm1, %v18569_v1  ;;  %s18357_s9 = smul.u32 328, %s758_s8  ;;  %v985_v7 = vpack.c.bf16 %v945_v5, %v944_v4  ;;  %s22099_s8 = sld [smem:[#allocation12_spill]] }
  0x26   : > { %785 = vst.msk [vmem:[#allocation3 + $0x70] sm:$0xff] %vm763_vm1, %v18569_v1  ;;  %788 = vst.msk [vmem:[#allocation4] sm:$0xff] %vm763_vm1, %v18569_v1  ;;  %14127 = vmatpush3.bf16.msra.mxu0 %v18400_v2  ;;  %16487 = vmatpush3.bf16.msra.mxu1 %v18400_v2 }
  0x27   : > { %789 = vst.msk [vmem:[#allocation4 + $0x8] sm:$0xff] %vm763_vm1, %v18569_v1  ;;  %790 = vst.msk [vmem:[#allocation4 + $0x10] sm:$0xff] %vm763_vm1, %v18569_v1  ;;  %14212 = vmatprep.subr.bf16.mxu0 %v18569_v1  ;;  %14916 = vmatprep.subr.bf16.mxu1 %v18569_v1  ;;  %s18826_s26 = scalar_lea.vmem %s22095_s6, %s18357_s9  ;;  %s22097_s9 = sld [smem:[#allocation16_spill]] }
  0x28   : > { %791 = vst.msk [vmem:[#allocation4 + $0x18] sm:$0xff] %vm763_vm1, %v18569_v1  ;;  %792 = vst.msk [vmem:[#allocation4 + $0x20] sm:$0xff] %vm763_vm1, %v18569_v1  ;;  %v795_v6 = vld [vmem:[%s18826_s26] sm:$0xff]  ;;  %v796_v8 = vld [vmem:[%s18826_s26 + $0x8] sm:$0xff] }
  0x29   : > { %793 = vst.msk [vmem:[#allocation4 + $0x28] sm:$0xff] %vm763_vm1, %v18569_v1  ;;  %836 = vst.msk [vmem:[#allocation2 + $0x13] sm:$0xff] %vm763_vm1, %v795_v6  ;;  %v797_v9 = vld [vmem:[%s18826_s26 + $0x10] sm:$0xff]  ;;  %v798_v10 = vld [vmem:[%s18826_s26 + $0x18] sm:$0xff]  ;;  %14129 = vmatmul.mubr.msk.bf16.vlgmr.msra.gmra.mrb[0].mxu0 %vm763_vm1, %v985_v7 }
  0x2a   : > { %837 = vst.msk [vmem:[#allocation2 + $0x1b] sm:$0xff] %vm763_vm1, %v796_v8  ;;  %838 = vst.msk [vmem:[#allocation2 + $0x23] sm:$0xff] %vm763_vm1, %v797_v9  ;;  %v799_v11 = vld [vmem:[%s18826_s26 + $0x20] sm:$0xff]  ;;  %v800_v12 = vld [vmem:[%s18826_s26 + $0x28] sm:$0xff]  ;;  %14213 = vmatpush3.bf16.msra.mxu0 %v18401_v3  ;;  %14132 = vmatprep.mubr.msk.bf16.mxu0 %vm18570_vm0, %v18569_v1 }
  0x2b   : > { %839 = vst.msk [vmem:[#allocation2 + $0x2b] sm:$0xff] %vm763_vm1, %v798_v10  ;;  %v801_v13 = vld [vmem:[%s18826_s26 + $0x30] sm:$0xff]  ;;  %840 = vst.msk [vmem:[#allocation2 + $0x33] sm:$0xff] %vm763_vm1, %v799_v11  ;;  %v802_v15 = vld [vmem:[%s18826_s26 + $0x38] sm:$0xff]  ;;  %14214 = vmatprep.subr.bf16.mxu0 %v18569_v1 }
  0x2c   : > { %841 = vst.msk [vmem:[#allocation2 + $0x3b] sm:$0xff] %vm763_vm1, %v800_v12  ;;  %842 = vst.msk [vmem:[#allocation2 + $0x43] sm:$0xff] %vm763_vm1, %v801_v13  ;;  %v803_v16 = vld [vmem:[%s18826_s26 + $0x40] sm:$0xff]  ;;  %v804_v17 = vld [vmem:[%s18826_s26 + $0x48] sm:$0xff] }
  0x2d   : > { %843 = vst.msk [vmem:[#allocation2 + $0x4b] sm:$0xff] %vm763_vm1, %v802_v15  ;;  %844 = vst.msk [vmem:[#allocation2 + $0x53] sm:$0xff] %vm763_vm1, %v803_v16  ;;  %v805_v18 = vld [vmem:[%s18826_s26 + $0x50] sm:$0xff]  ;;  %v806_v19 = vld [vmem:[%s18826_s26 + $0x58] sm:$0xff] }
  0x2e   : > { %845 = vst.msk [vmem:[#allocation2 + $0x5b] sm:$0xff] %vm763_vm1, %v804_v17  ;;  %v807_v20 = vld [vmem:[%s18826_s26 + $0x60] sm:$0xff]  ;;  %846 = vst.msk [vmem:[#allocation2 + $0x63] sm:$0xff] %vm763_vm1, %v805_v18  ;;  %v808_v21 = vld [vmem:[%s18826_s26 + $0x68] sm:$0xff]  ;;  %14215 = vmatpush3.bf16.msra.mxu0 %v18402_v14 }
  0x2f   : > { %847 = vst.msk [vmem:[#allocation2 + $0x6b] sm:$0xff] %vm763_vm1, %v806_v19  ;;  %848 = vst.msk [vmem:[#allocation2 + $0x73] sm:$0xff] %vm763_vm1, %v807_v20  ;;  %v809_v22 = vld [vmem:[%s18826_s26 + $0x70] sm:$0xff]  ;;  %v810_v23 = vld [vmem:[%s18826_s26 + $0x78] sm:$0xff]  ;;  %14300 = vmatprep.subr.bf16.mxu0 %v18569_v1 }
  0x30   : > { %849 = vst.msk [vmem:[#allocation2 + $0x7b] sm:$0xff] %vm763_vm1, %v808_v21  ;;  %850 = vst.msk [vmem:[#allocation2 + $0x83] sm:$0xff] %vm763_vm1, %v809_v22  ;;  %v811_v24 = vld [vmem:[%s18826_s26 + $0x80] sm:$0xff]  ;;  %v812_v25 = vld [vmem:[%s18826_s26 + $0x88] sm:$0xff] }
  0x31   : > { %851 = vst.msk [vmem:[#allocation2 + $0x8b] sm:$0xff] %vm763_vm1, %v810_v23  ;;  %v813_v26 = vld [vmem:[%s18826_s26 + $0x90] sm:$0xff]  ;;  %852 = vst.msk [vmem:[#allocation2 + $0x93] sm:$0xff] %vm763_vm1, %v811_v24  ;;  %v814_v27 = vld [vmem:[%s18826_s26 + $0x98] sm:$0xff] }
  0x32   : > { %853 = vst.msk [vmem:[#allocation2 + $0x9b] sm:$0xff] %vm763_vm1, %v812_v25  ;;  %854 = vst.msk [vmem:[#allocation2 + $0xa3] sm:$0xff] %vm763_vm1, %v813_v26  ;;  %v815_v28 = vld [vmem:[%s18826_s26 + $0xa0] sm:$0xff]  ;;  %v816_v29 = vld [vmem:[%s18826_s26 + $0xa8] sm:$0xff] }
  0x33   : > { %v946_v30 = vld [vmem:[#allocation2 + $0x11] sm:$0xff]  ;;  %855 = vst.msk [vmem:[#allocation2 + $0xab] sm:$0xff] %vm763_vm1, %v814_v27  ;;  %856 = vst.msk [vmem:[#allocation2 + $0xb3] sm:$0xff] %vm763_vm1, %v815_v28  ;;  %v947_v31 = vld [vmem:[#allocation2 + $0x19] sm:$0xff] }
  0x34   : > { %857 = vst.msk [vmem:[#allocation2 + $0xbb] sm:$0xff] %vm763_vm1, %v816_v29  ;;  %v986_v32 = vpack.c.bf16 %v947_v31, %v946_v30  ;;  %v948_v33 = vld [vmem:[#allocation2 + $0x21] sm:$0xff]  ;;  %v949_v34 = vld [vmem:[#allocation2 + $0x29] sm:$0xff]  ;;  %v950_v36 = vld [vmem:[#allocation2 + $0x31] sm:$0xff] }
  0x35   : > { %v987_v35 = vpack.c.bf16 %v949_v34, %v948_v33  ;;  %v951_v37 = vld [vmem:[#allocation2 + $0x39] sm:$0xff]  ;;  %v952_v39 = vld [vmem:[#allocation2 + $0x41] sm:$0xff]  ;;  %v953_v40 = vld [vmem:[#allocation2 + $0x49] sm:$0xff]  ;;  %787 = vst.msk [vmem:[#allocation3 + $0x78] sm:$0x3] %vm786_vm4, %v18569_v1 }
  0x36   : > { %14133 = vmatmul.mubr.msk.bf16.gmra.mrb[4].mxu0 %vm763_vm1, %v986_v32  ;;  %v988_v38 = vpack.c.bf16 %v951_v37, %v950_v36  ;;  %v989_v41 = vpack.c.bf16 %v953_v40, %v952_v39  ;;  %v954_v42 = vld [vmem:[#allocation2 + $0x51] sm:$0xff]  ;;  %v955_v43 = vld [vmem:[#allocation2 + $0x59] sm:$0xff]  ;;  %v956_v45 = vld [vmem:[#allocation2 + $0x61] sm:$0xff]  ;;  %794 = vst.msk [vmem:[#allocation4 + $0x30] sm:$0x3] %vm786_vm4, %v18569_v1 }
  0x37   : > { %14136 = vmatprep.mubr.msk.bf16.mxu0 %vm18570_vm0, %v18569_v1  ;;  %v990_v44 = vpack.c.bf16 %v955_v43, %v954_v42  ;;  %v957_v46 = vld [vmem:[#allocation2 + $0x69] sm:$0xff]  ;;  %v958_v48 = vld [vmem:[#allocation2 + $0x71] sm:$0xff]  ;;  %v959_v49 = vld [vmem:[#allocation2 + $0x79] sm:$0xff] }
  0x38   : > { %v991_v47 = vpack.c.bf16 %v957_v46, %v956_v45  ;;  %v992_v50 = vpack.c.bf16 %v959_v49, %v958_v48  ;;  %v817_v51 = vld [vmem:[%s18826_s26 + $0xb0] sm:$0xff]  ;;  %v818_v52 = vld [vmem:[%s18826_s26 + $0xb8] sm:$0xff]  ;;  %v960_v53 = vld [vmem:[#allocation2 + $0x81] sm:$0xff] }
  0x39   : > { %858 = vst.msk [vmem:[#allocation2 + $0xc3] sm:$0xff] %vm763_vm1, %v817_v51  ;;  %859 = vst.msk [vmem:[#allocation2 + $0xcb] sm:$0xff] %vm763_vm1, %v818_v52  ;;  %v961_v54 = vld [vmem:[#allocation2 + $0x89] sm:$0xff]  ;;  %v819_v56 = vld [vmem:[%s18826_s26 + $0xc0] sm:$0xff] }
  0x3a   : > { %v993_v55 = vpack.c.bf16 %v961_v54, %v960_v53  ;;  %v820_v57 = vld [vmem:[%s18826_s26 + $0xc8] sm:$0xff]  ;;  %860 = vst.msk [vmem:[#allocation2 + $0xd3] sm:$0xff] %vm763_vm1, %v819_v56  ;;  %v962_v58 = vld [vmem:[#allocation2 + $0x91] sm:$0xff]  ;;  %v963_v59 = vld [vmem:[#allocation2 + $0x99] sm:$0xff] }
  0x3b   : > { %861 = vst.msk [vmem:[#allocation2 + $0xdb] sm:$0xff] %vm763_vm1, %v820_v57  ;;  %v994_v60 = vpack.c.bf16 %v963_v59, %v962_v58  ;;  %v821_v61 = vld [vmem:[%s18826_s26 + $0xd0] sm:$0xff]  ;;  %v822_v62 = vld [vmem:[%s18826_s26 + $0xd8] sm:$0xff]  ;;  %v964_v63 = vld [vmem:[#allocation2 + $0xa1] sm:$0xff] }
  0x3c   : > { %862 = vst.msk [vmem:[#allocation2 + $0xe3] sm:$0xff] %vm763_vm1, %v821_v61  ;;  %863 = vst.msk [vmem:[#allocation2 + $0xeb] sm:$0xff] %vm763_vm1, %v822_v62  ;;  %v965_v0 = vld [vmem:[#allocation2 + $0xa9] sm:$0xff]  ;;  %v823_v3 = vld [vmem:[%s18826_s26 + $0xe0] sm:$0xff] }
  0x3d   : > { %v995_v2 = vpack.c.bf16 %v965_v0, %v964_v63  ;;  %v824_v4 = vld [vmem:[%s18826_s26 + $0xe8] sm:$0xff]  ;;  %864 = vst.msk [vmem:[#allocation2 + $0xf3] sm:$0xff] %vm763_vm1, %v823_v3  ;;  %v966_v5 = vld [vmem:[#allocation2 + $0xb1] sm:$0xff]  ;;  %v967_v6 = vld [vmem:[#allocation2 + $0xb9] sm:$0xff] }
  0x3e   : > { %14137 = vmatmul.mubr.msk.bf16.gmra.mrb[8].mxu0 %vm763_vm1, %v987_v35  ;;  %865 = vst.msk [vmem:[#allocation2 + $0xfb] sm:$0xff] %vm763_vm1, %v824_v4  ;;  %v996_v7 = vpack.c.bf16 %v967_v6, %v966_v5  ;;  %v825_v8 = vld [vmem:[%s18826_s26 + $0xf0] sm:$0xff]  ;;  %v826_v9 = vld [vmem:[%s18826_s26 + $0xf8] sm:$0xff]  ;;  %v878_v10 = vld [vmem:[#allocation2] sm:$0xff] }
  0x3f   : > { %14140 = vmatprep.mubr.msk.bf16.mxu0 %vm18570_vm0, %v18569_v1  ;;  %866 = vst.msk [vmem:[#allocation2 + $0x103] sm:$0xff] %vm763_vm1, %v825_v8  ;;  %867 = vst.msk [vmem:[#allocation2 + $0x10b] sm:$0xff] %vm763_vm1, %v826_v9  ;;  %v879_v11 = vld [vmem:[#allocation2 + $0x8] sm:$0xff]  ;;  %v18403_v13 = vld [vmem:[%s22094_s0 + $0x20] sm:$0xff]  }
  0x40   : > { %v919_v12 = vpack.c.bf16 %v879_v11, %v878_v10  ;;  %v827_v14 = vld [vmem:[%s18826_s26 + $0x100] sm:$0xff]  ;;  %v828_v15 = vld [vmem:[%s18826_s26 + $0x108] sm:$0xff]  ;;  %v880_v16 = vld [vmem:[#allocation2 + $0x10] sm:$0xff] }
  0x41   : > { %868 = vst.msk [vmem:[#allocation2 + $0x113] sm:$0xff] %vm763_vm1, %v827_v14  ;;  %869 = vst.msk [vmem:[#allocation2 + $0x11b] sm:$0xff] %vm763_vm1, %v828_v15  ;;  %v881_v17 = vld [vmem:[#allocation2 + $0x18] sm:$0xff]  ;;  %v18404_v18 = vld [vmem:[%s22094_s0 + $0x28] sm:$0xff]  }
  0x42   : > { %v920_v19 = vpack.c.bf16 %v881_v17, %v880_v16  ;;  %v829_v20 = vld [vmem:[%s18826_s26 + $0x110] sm:$0xff]  ;;  %v830_v21 = vld [vmem:[%s18826_s26 + $0x118] sm:$0xff]  ;;  %v882_v22 = vld [vmem:[#allocation2 + $0x20] sm:$0xff] }
  0x43   : > { %870 = vst.msk [vmem:[#allocation2 + $0x123] sm:$0xff] %vm763_vm1, %v829_v20  ;;  %871 = vst.msk [vmem:[#allocation2 + $0x12b] sm:$0xff] %vm763_vm1, %v830_v21  ;;  %v883_v23 = vld [vmem:[#allocation2 + $0x28] sm:$0xff]  ;;  %v831_v25 = vld [vmem:[%s18826_s26 + $0x120] sm:$0xff] }
  0x44   : > { %v921_v24 = vpack.c.bf16 %v883_v23, %v882_v22  ;;  %v832_v26 = vld [vmem:[%s18826_s26 + $0x128] sm:$0xff]  ;;  %872 = vst.msk [vmem:[#allocation2 + $0x133] sm:$0xff] %vm763_vm1, %v831_v25  ;;  %v884_v27 = vld [vmem:[#allocation2 + $0x30] sm:$0xff]  ;;  %v885_v28 = vld [vmem:[#allocation2 + $0x38] sm:$0xff] }
  0x45   : > { %873 = vst.msk [vmem:[#allocation2 + $0x13b] sm:$0xff] %vm763_vm1, %v832_v26  ;;  %v922_v29 = vpack.c.bf16 %v885_v28, %v884_v27  ;;  %v833_v30 = vld [vmem:[%s18826_s26 + $0x130] sm:$0xff]  ;;  %v886_v31 = vld [vmem:[#allocation2 + $0x40] sm:$0xff]  ;;  %v887_v32 = vld [vmem:[#allocation2 + $0x48] sm:$0xff] }
  0x46   : > { %14141 = vmatmul.mubr.msk.bf16.gmra.mrb[12].mxu0 %vm763_vm1, %v988_v38  ;;  %874 = vst.msk [vmem:[#allocation2 + $0x143] sm:$0xff] %vm763_vm1, %v833_v30  ;;  %v923_v33 = vpack.c.bf16 %v887_v32, %v886_v31  ;;  %v888_v34 = vld [vmem:[#allocation2 + $0x50] sm:$0xff]  ;;  %v889_v35 = vld [vmem:[#allocation2 + $0x58] sm:$0xff]  ;;  %v890_v37 = vld [vmem:[#allocation2 + $0x60] sm:$0xff] }
  0x47   : > { %14144 = vmatprep.mubr.msk.bf16.mxu0 %vm18570_vm0, %v18569_v1  ;;  %v924_v36 = vpack.c.bf16 %v889_v35, %v888_v34  ;;  %v891_v38 = vld [vmem:[#allocation2 + $0x68] sm:$0xff]  ;;  %v892_v40 = vld [vmem:[#allocation2 + $0x70] sm:$0xff]  ;;  %v894_v43 = vld [vmem:[#allocation2 + $0x80] sm:$0xff] }
  0x48   : > { %v925_v39 = vpack.c.bf16 %v891_v38, %v890_v37  ;;  %v896_v46 = vld [vmem:[#allocation2 + $0x90] sm:$0xff]  ;;  %v898_v49 = vld [vmem:[#allocation2 + $0xa0] sm:$0xff]  ;;  %v901_v53 = vld [vmem:[#allocation2 + $0xb8] sm:$0xff] }
  0x49   : > { %v900_v52 = vld [vmem:[#allocation2 + $0xb0] sm:$0xff]  ;;  %v903_v56 = vld [vmem:[#allocation2 + $0xc8] sm:$0xff]  ;;  %v905_v59 = vld [vmem:[#allocation2 + $0xd8] sm:$0xff] }
  0x4a   : > { %v930_v54 = vpack.c.bf16 %v901_v53, %v900_v52  ;;  %v904_v58 = vld [vmem:[#allocation2 + $0xd0] sm:$0xff]  ;;  %v906_v61 = vld [vmem:[#allocation2 + $0xe0] sm:$0xff]  ;;  %v907_v62 = vld [vmem:[#allocation2 + $0xe8] sm:$0xff] }
  0x4b   : > { %v933_v63 = vpack.c.bf16 %v907_v62, %v906_v61  ;;  %v908_v0 = vld [vmem:[#allocation2 + $0xf0] sm:$0xff]  ;;  %v910_v4 = vld [vmem:[#allocation2 + $0x100] sm:$0xff]  ;;  %v911_v5 = vld [vmem:[#allocation2 + $0x108] sm:$0xff] }
  0x4c   : > { %v935_v6 = vpack.c.bf16 %v911_v5, %v910_v4  ;;  %v913_v8 = vld [vmem:[#allocation2 + $0x118] sm:$0xff]  ;;  %v914_v10 = vld [vmem:[#allocation2 + $0x120] sm:$0xff]  ;;  %v915_v11 = vld [vmem:[#allocation2 + $0x128] sm:$0xff] }
  0x4d   : > { %v917_v14 = vld [vmem:[#allocation2 + $0x138] sm:$0xff]  ;;  %v918_v16 = vld [vmem:[#allocation2 + $0x140] sm:$0xf]  ;;  %v18405_v21 = vld [vmem:[%s22094_s0 + $0x30] sm:$0xff]  }
  0x4e   : > { %14145 = vmatmul.mubr.msk.bf16.gmra.mrb[16].mxu0 %vm763_vm1, %v989_v41  ;;  %v893_v41 = vld [vmem:[#allocation2 + $0x78] sm:$0xff]  ;;  %v939_v17 = vpack.c.bf16 %v918_v16, %v918_v16  ;;  %v1565_v26 = vld [vmem:[#allocation2 + $0x22] sm:$0xff]  ;;  %v1566_v27 = vld [vmem:[#allocation2 + $0x2a] sm:$0xff] }
  0x4f   : > { %14148 = vmatprep.mubr.msk.bf16.mxu0 %vm18570_vm0, %v18569_v1  ;;  %v926_v42 = vpack.c.bf16 %v893_v41, %v892_v40  ;;  %v1563_v22 = vld [vmem:[#allocation2 + $0x12] sm:$0xff]  ;;  %v1564_v23 = vld [vmem:[#allocation2 + $0x1a] sm:$0xff]  ;;  %v19035_v28 = vpack.c.bf16 %v1566_v27, %v1565_v26  ;;  %v1569_v32 = vld [vmem:[#allocation2 + $0x42] sm:$0xff] }
  0x50   : > { %v19028_v25 = vpack.c.bf16 %v1564_v23, %v1563_v22  ;;  %v1568_v30 = vld [vmem:[#allocation2 + $0x3a] sm:$0xff]  ;;  %v1571_v35 = vld [vmem:[#allocation2 + $0x52] sm:$0xff]  ;;  %v1573_v38 = vld [vmem:[#allocation2 + $0x62] sm:$0xff] }
  0x51   : > { %v1575_v41 = vld [vmem:[#allocation2 + $0x72] sm:$0xff]  ;;  %v1589_v62 = vld [vmem:[#allocation2 + $0xe2] sm:$0xff] }
  0x52   : > { %v1583_v53 = vld [vmem:[#allocation2 + $0xb2] sm:$0xff]  ;;  %v1593_v5 = vld [vmem:[#allocation2 + $0x102] sm:$0xff] }
  0x53   : > { %v835_v22 = vld [vmem:[%s18826_s26 + $0x140] sm:$0xf] }
  0x54   : > { %877 = vst.msk [vmem:[#allocation2 + $0x153] sm:$0xf] %vm876_vm3, %v835_v22  ;;  %v1982_v23 = vld [vmem:[#allocation2 + $0x142] sm:$0xff] }
  0x55   : > { %v2364_v22 = vld [vmem:[#allocation2 + $0x13b] sm:$0xff] }
  0x56   : > { %14149 = vmatmul.mubr.msk.bf16.gmra.mrb[20].mxu0 %vm763_vm1, %v990_v44  ;;  %v895_v44 = vld [vmem:[#allocation2 + $0x88] sm:$0xff] }
  0x57   : > { %14152 = vmatprep.mubr.msk.bf16.mxu0 %vm18570_vm0, %v18569_v1  ;;  %v927_v45 = vpack.c.bf16 %v895_v44, %v894_v43  ;;  %v1577_v44 = vld [vmem:[#allocation2 + $0x82] sm:$0xff] }
  0x5e   : > { %14153 = vmatmul.mubr.msk.bf16.gmra.mrb[24].mxu0 %vm763_vm1, %v991_v47  ;;  %v897_v47 = vld [vmem:[#allocation2 + $0x98] sm:$0xff] }
  0x5f   : > { %14156 = vmatprep.mubr.msk.bf16.mxu0 %vm18570_vm0, %v18569_v1  ;;  %v928_v48 = vpack.c.bf16 %v897_v47, %v896_v46  ;;  %v1579_v47 = vld [vmem:[#allocation2 + $0x92] sm:$0xff] }
  0x66   : > { %14157 = vmatmul.mubr.msk.bf16.gmra.mrb[28].mxu0 %vm763_vm1, %v992_v50  ;;  %v899_v50 = vld [vmem:[#allocation2 + $0xa8] sm:$0xff] }
  0x67   : > { %14160 = vmatprep.mubr.msk.bf16.mxu0 %vm18570_vm0, %v18569_v1  ;;  %v929_v51 = vpack.c.bf16 %v899_v50, %v898_v49  ;;  %v1581_v50 = vld [vmem:[#allocation2 + $0xa2] sm:$0xff] }
  0x6e   : > { %14161 = vmatmul.mubr.msk.bf16.gmra.mrb[32].mxu0 %vm763_vm1, %v993_v55  ;;  %v902_v55 = vld [vmem:[#allocation2 + $0xc0] sm:$0xff] }
  0x6f   : > { %14164 = vmatprep.mubr.msk.bf16.mxu0 %vm18570_vm0, %v18569_v1  ;;  %v931_v57 = vpack.c.bf16 %v903_v56, %v902_v55  ;;  %v1585_v56 = vld [vmem:[#allocation2 + $0xc2] sm:$0xff] }
  0x76   : > { %14165 = vmatmul.mubr.msk.bf16.gmra.mrb[36].mxu0 %vm763_vm1, %v994_v60  ;;  %v932_v60 = vpack.c.bf16 %v905_v59, %v904_v58  ;;  %v1587_v59 = vld [vmem:[#allocation2 + $0xd2] sm:$0xff] }
  0x77   : > { %14168 = vmatprep.mubr.msk.bf16.mxu0 %vm18570_vm0, %v18569_v1 }
  0x7e   : > { %14169 = vmatmul.mubr.msk.bf16.gmra.mrb[40].mxu0 %vm763_vm1, %v995_v2  ;;  %v909_v2 = vld [vmem:[#allocation2 + $0xf8] sm:$0xff] }
  0x7f   : > { %14172 = vmatprep.mubr.msk.bf16.mxu0 %vm18570_vm0, %v18569_v1  ;;  %v934_v3 = vpack.c.bf16 %v909_v2, %v908_v0  ;;  %v1591_v2 = vld [vmem:[#allocation2 + $0xf2] sm:$0xff] }
  0x86   : > { %14173 = vmatmul.mubr.msk.bf16.gmra.mrb[44].mxu0 %vm763_vm1, %v996_v7  ;;  %v912_v7 = vld [vmem:[#allocation2 + $0x110] sm:$0xff] }
  0x87   : > { %14216 = vmatprep.mubr.msk.bf16.mxu0 %vm18570_vm0, %v18569_v1  ;;  %v936_v9 = vpack.c.bf16 %v913_v8, %v912_v7  ;;  %v1595_v8 = vld [vmem:[#allocation2 + $0x112] sm:$0xff] }
  0x8e   : > { %14217 = vmatmul.mubr.msk.bf16.vlgmr.msra.gmra.mrb[0].mxu0 %vm763_vm1, %v919_v12  ;;  %v937_v12 = vpack.c.bf16 %v915_v11, %v914_v10  ;;  %v1597_v11 = vld [vmem:[#allocation2 + $0x122] sm:$0xff] }
  0x8f   : > { %14301 = vmatpush3.bf16.msra.mxu0 %v18403_v13  ;;  %14220 = vmatprep.mubr.msk.bf16.mxu0 %vm18570_vm0, %v18569_v1  ;;  %v916_v13 = vld [vmem:[#allocation2 + $0x130] sm:$0xff] }
  0x90   : > { %14302 = vmatprep.subr.bf16.mxu0 %v18569_v1  ;;  %v938_v15 = vpack.c.bf16 %v917_v14, %v916_v13  ;;  %v1599_v14 = vld [vmem:[#allocation2 + $0x132] sm:$0xff] }
  0x93   : > { %14303 = vmatpush3.bf16.msra.mxu0 %v18404_v18  ;;  %v1561_v18 = vld [vmem:[#allocation2 + $0x2] sm:$0xff] }
  0x94   : > { %14388 = vmatprep.subr.bf16.mxu0 %v18569_v1 }
  0x96   : > { %14221 = vmatmul.mubr.msk.bf16.gmra.mrb[4].mxu0 %vm763_vm1, %v920_v19  ;;  %v1562_v19 = vld [vmem:[#allocation2 + $0xa] sm:$0xff] }
  0x97   : > { %14224 = vmatprep.mubr.msk.bf16.mxu0 %vm18570_vm0, %v18569_v1  ;;  %v1602_v20 = vpack.c.bf16 %v1562_v19, %v1561_v18  ;;  %v18407_v19 = vld [vmem:[%s22094_s0 + $0x40] sm:$0xff]  }
  0x9e   : > { %14225 = vmatmul.mubr.msk.bf16.gmra.mrb[8].mxu0 %vm763_vm1, %v921_v24  ;;  %v18406_v24 = vld [vmem:[%s22094_s0 + $0x38] sm:$0xff]  }
  0x9f   : > { %14228 = vmatprep.mubr.msk.bf16.mxu0 %vm18570_vm0, %v18569_v1 }
  0xa6   : > { %14229 = vmatmul.mubr.msk.bf16.gmra.mrb[12].mxu0 %vm763_vm1, %v922_v29  ;;  %v1567_v29 = vld [vmem:[#allocation2 + $0x32] sm:$0xff] }
  0xa7   : > { %14232 = vmatprep.mubr.msk.bf16.mxu0 %vm18570_vm0, %v18569_v1  ;;  %v19041_v31 = vpack.c.bf16 %v1568_v30, %v1567_v29  ;;  %v2328_v29 = vld [vmem:[#allocation2 + $0x1b] sm:$0xff] }
  0xae   : > { %14233 = vmatmul.mubr.msk.bf16.gmra.mrb[16].mxu0 %vm763_vm1, %v923_v33  ;;  %v1570_v33 = vld [vmem:[#allocation2 + $0x4a] sm:$0xff] }
  0xaf   : > { %14236 = vmatprep.mubr.msk.bf16.mxu0 %vm18570_vm0, %v18569_v1  ;;  %v19047_v34 = vpack.c.bf16 %v1570_v33, %v1569_v32  ;;  %v2329_v32 = vld [vmem:[#allocation2 + $0x23] sm:$0xff]  ;;  %v2330_v33 = vld [vmem:[#allocation2 + $0x2b] sm:$0xff] }
  0xb6   : > { %14237 = vmatmul.mubr.msk.bf16.gmra.mrb[20].mxu0 %vm763_vm1, %v924_v36  ;;  %v1572_v36 = vld [vmem:[#allocation2 + $0x5a] sm:$0xff] }
  0xb7   : > { %14240 = vmatprep.mubr.msk.bf16.mxu0 %vm18570_vm0, %v18569_v1  ;;  %v19053_v37 = vpack.c.bf16 %v1572_v36, %v1571_v35  ;;  %v2369_v35 = vpack.c.bf16 %v2330_v33, %v2329_v32  ;;  %v2331_v36 = vld [vmem:[#allocation2 + $0x33] sm:$0xff]  ;;  %v18411_v32 = vld [vmem:[%s22094_s0 + $0x60] sm:$0xff]  }
  0xb8   : > { %v2712_v33 = vld [vmem:[#allocation2 + $0x24] sm:$0xff] }
  0xbe   : > { %14241 = vmatmul.mubr.msk.bf16.gmra.mrb[24].mxu0 %vm763_vm1, %v925_v39  ;;  %v1574_v39 = vld [vmem:[#allocation2 + $0x6a] sm:$0xff] }
  0xbf   : > { %14244 = vmatprep.mubr.msk.bf16.mxu0 %vm18570_vm0, %v18569_v1  ;;  %v19059_v40 = vpack.c.bf16 %v1574_v39, %v1573_v38  ;;  %v2333_v39 = vld [vmem:[#allocation2 + $0x43] sm:$0xff] }
  0xc6   : > { %14245 = vmatmul.mubr.msk.bf16.gmra.mrb[28].mxu0 %vm763_vm1, %v926_v42  ;;  %v1576_v42 = vld [vmem:[#allocation2 + $0x7a] sm:$0xff] }
  0xc7   : > { %14248 = vmatprep.mubr.msk.bf16.mxu0 %vm18570_vm0, %v18569_v1  ;;  %v19065_v43 = vpack.c.bf16 %v1576_v42, %v1575_v41  ;;  %v2335_v42 = vld [vmem:[#allocation2 + $0x53] sm:$0xff] }
  0xce   : > { %14249 = vmatmul.mubr.msk.bf16.gmra.mrb[32].mxu0 %vm763_vm1, %v927_v45  ;;  %v1578_v45 = vld [vmem:[#allocation2 + $0x8a] sm:$0xff] }
  0xcf   : > { %14252 = vmatprep.mubr.msk.bf16.mxu0 %vm18570_vm0, %v18569_v1  ;;  %v19071_v46 = vpack.c.bf16 %v1578_v45, %v1577_v44  ;;  %v2337_v45 = vld [vmem:[#allocation2 + $0x63] sm:$0xff] }
  0xd6   : > { %14253 = vmatmul.mubr.msk.bf16.gmra.mrb[36].mxu0 %vm763_vm1, %v928_v48  ;;  %v1580_v48 = vld [vmem:[#allocation2 + $0x9a] sm:$0xff] }
  0xd7   : > { %14256 = vmatprep.mubr.msk.bf16.mxu0 %vm18570_vm0, %v18569_v1  ;;  %v19077_v49 = vpack.c.bf16 %v1580_v48, %v1579_v47  ;;  %v2339_v48 = vld [vmem:[#allocation2 + $0x73] sm:$0xff] }
  0xde   : > { %14257 = vmatmul.mubr.msk.bf16.gmra.mrb[40].mxu0 %vm763_vm1, %v929_v51  ;;  %v1582_v51 = vld [vmem:[#allocation2 + $0xaa] sm:$0xff] }
  0xdf   : > { %14260 = vmatprep.mubr.msk.bf16.mxu0 %vm18570_vm0, %v18569_v1  ;;  %v19083_v52 = vpack.c.bf16 %v1582_v51, %v1581_v50  ;;  %v2341_v51 = vld [vmem:[#allocation2 + $0x83] sm:$0xff] }
  0xe6   : > { %14261 = vmatmul.mubr.msk.bf16.gmra.mrb[44].mxu0 %vm763_vm1, %v930_v54  ;;  %v1584_v54 = vld [vmem:[#allocation2 + $0xba] sm:$0xff] }
  0xe7   : > { %14264 = vmatprep.mubr.msk.bf16.mxu0 %vm18570_vm0, %v18569_v1  ;;  %v19089_v55 = vpack.c.bf16 %v1584_v54, %v1583_v53  ;;  %v2343_v54 = vld [vmem:[#allocation2 + $0x93] sm:$0xff] }
  0xee   : > { %14265 = vmatmul.mubr.msk.bf16.gmra.mrb[48].mxu0 %vm763_vm1, %v931_v57  ;;  %v1586_v57 = vld [vmem:[#allocation2 + $0xca] sm:$0xff] }
  0xef   : > { %14268 = vmatprep.mubr.msk.bf16.mxu0 %vm18570_vm0, %v18569_v1  ;;  %v19095_v58 = vpack.c.bf16 %v1586_v57, %v1585_v56  ;;  %v2345_v57 = vld [vmem:[#allocation2 + $0xa3] sm:$0xff] }
  0xf6   : > { %14269 = vmatmul.mubr.msk.bf16.gmra.mrb[52].mxu0 %vm763_vm1, %v932_v60  ;;  %v1588_v60 = vld [vmem:[#allocation2 + $0xda] sm:$0xff] }
  0xf7   : > { %14272 = vmatprep.mubr.msk.bf16.mxu0 %vm18570_vm0, %v18569_v1  ;;  %v19101_v61 = vpack.c.bf16 %v1588_v60, %v1587_v59  ;;  %v2347_v60 = vld [vmem:[#allocation2 + $0xb3] sm:$0xff] }
  0xfe   : > { %14273 = vmatmul.mubr.msk.bf16.gmra.mrb[56].mxu0 %vm763_vm1, %v933_v63  ;;  %v1590_v63 = vld [vmem:[#allocation2 + $0xea] sm:$0xff] }
  0xff   : > { %14276 = vmatprep.mubr.msk.bf16.mxu0 %vm18570_vm0, %v18569_v1  ;;  %v19107_v0 = vpack.c.bf16 %v1590_v63, %v1589_v62  ;;  %v2349_v63 = vld [vmem:[#allocation2 + $0xc3] sm:$0xff] }
 0x106   : > { %14277 = vmatmul.mubr.msk.bf16.gmra.mrb[60].mxu0 %vm763_vm1, %v934_v3  ;;  %v1592_v3 = vld [vmem:[#allocation2 + $0xfa] sm:$0xff] }
 0x107   : > { %14280 = vmatprep.mubr.msk.bf16.mxu0 %vm18570_vm0, %v18569_v1  ;;  %v19113_v4 = vpack.c.bf16 %v1592_v3, %v1591_v2  ;;  %v2351_v3 = vld [vmem:[#allocation2 + $0xd3] sm:$0xff] }
 0x10e   : > { %14281 = vmatmul.mubr.msk.bf16.gmra.mrb[64].mxu0 %vm763_vm1, %v935_v6  ;;  %v1594_v6 = vld [vmem:[#allocation2 + $0x10a] sm:$0xff] }
 0x10f   : > { %14284 = vmatprep.mubr.msk.bf16.mxu0 %vm18570_vm0, %v18569_v1  ;;  %v19119_v7 = vpack.c.bf16 %v1594_v6, %v1593_v5  ;;  %v2353_v6 = vld [vmem:[#allocation2 + $0xe3] sm:$0xff] }
 0x116   : > { %14285 = vmatmul.mubr.msk.bf16.gmra.mrb[68].mxu0 %vm763_vm1, %v936_v9  ;;  %v1596_v9 = vld [vmem:[#allocation2 + $0x11a] sm:$0xff] }
 0x117   : > { %14288 = vmatprep.mubr.msk.bf16.mxu0 %vm18570_vm0, %v18569_v1  ;;  %v1619_v10 = vpack.c.bf16 %v1596_v9, %v1595_v8  ;;  %v2355_v9 = vld [vmem:[#allocation2 + $0xf3] sm:$0xff] }
 0x11e   : > { %14289 = vmatmul.mubr.msk.bf16.gmra.mrb[72].mxu0 %vm763_vm1, %v937_v12  ;;  %v1598_v12 = vld [vmem:[#allocation2 + $0x12a] sm:$0xff] }
 0x11f   : > { %14292 = vmatprep.mubr.msk.bf16.mxu0 %vm18570_vm0, %v18569_v1  ;;  %v1620_v13 = vpack.c.bf16 %v1598_v12, %v1597_v11  ;;  %v2357_v12 = vld [vmem:[#allocation2 + $0x103] sm:$0xff] }
 0x126   : > { %14293 = vmatmul.mubr.msk.bf16.gmra.mrb[76].mxu0 %vm763_vm1, %v938_v15  ;;  %v1600_v15 = vld [vmem:[#allocation2 + $0x13a] sm:$0xff] }
 0x127   : > { %14296 = vmatprep.mubr.msk.bf16.mxu0 %vm18570_vm0, %v18569_v1  ;;  %v1621_v16 = vpack.c.bf16 %v1600_v15, %v1599_v14  ;;  %v2359_v15 = vld [vmem:[#allocation2 + $0x113] sm:$0xff] }
 0x12e   : > { %14297 = vmatmul.mubr.msk.bf16.gmra.mrb[80].mxu0 %vm763_vm1, %v939_v17  ;;  %v1601_v17 = vld [vmem:[#allocation2 + $0x142] sm:$0xf] }
 0x12f   : > { %14304 = vmatprep.mubr.msk.bf16.mxu0 %vm18570_vm0, %v18569_v1  ;;  %v1622_v18 = vpack.c.bf16 %v1601_v17, %v1601_v17 }
 0x136   : > { %14305 = vmatmul.mubr.msk.bf16.vlgmr.msra.gmra.mrb[0].mxu0 %vm763_vm1, %v1602_v20  ;;  %v18408_v20 = vld [vmem:[%s22094_s0 + $0x48] sm:$0xff]  }
 0x137   : > { %14389 = vmatpush3.bf16.msra.mxu0 %v18405_v21  ;;  %14308 = vmatprep.mubr.msk.bf16.mxu0 %vm18570_vm0, %v18569_v1  ;;  %v834_v21 = vld [vmem:[%s18826_s26 + $0x138] sm:$0xff]  ;;  %s13478_s26 = sshll.u32 %s18723_s7, 4 }
 0x138   : > { %14390 = vmatprep.subr.bf16.mxu0 %v18569_v1  ;;  %875 = vst.msk [vmem:[#allocation2 + $0x14b] sm:$0xff] %vm763_vm1, %v834_v21  ;;  %v2363_v21 = vld [vmem:[#allocation2 + $0x133] sm:$0xff] }
 0x13b   : > { %14391 = vmatpush3.bf16.msra.mxu0 %v18406_v24 }
 0x13c   : > { %14476 = vmatprep.subr.bf16.mxu0 %v18569_v1 }
 0x13e   : > { %14309 = vmatmul.mubr.msk.bf16.gmra.mrb[4].mxu0 %vm763_vm1, %v19028_v25 }
 0x13f   : > { %14312 = vmatprep.mubr.msk.bf16.mxu0 %vm18570_vm0, %v18569_v1  ;;  %v1983_v24 = vld [vmem:[#allocation2 + $0x14a] sm:$0xff]  ;;  %v1984_v26 = vld [vmem:[#allocation2 + $0x152] sm:$0xf] }
 0x140   : > { %v2005_v27 = vpack.c.bf16 %v1984_v26, %v1984_v26 }
 0x146   : > { %14313 = vmatmul.mubr.msk.bf16.gmra.mrb[8].mxu0 %vm763_vm1, %v19035_v28 }
 0x147   : > { %14316 = vmatprep.mubr.msk.bf16.mxu0 %vm18570_vm0, %v18569_v1 }
 0x14e   : > { %14317 = vmatmul.mubr.msk.bf16.gmra.mrb[12].mxu0 %vm763_vm1, %v19041_v31 }
 0x14f   : > { %14320 = vmatprep.mubr.msk.bf16.mxu0 %vm18570_vm0, %v18569_v1 }
 0x156   : > { %14321 = vmatmul.mubr.msk.bf16.gmra.mrb[16].mxu0 %vm763_vm1, %v19047_v34 }
 0x157   : > { %14324 = vmatprep.mubr.msk.bf16.mxu0 %vm18570_vm0, %v18569_v1 }
 0x15e   : > { %14325 = vmatmul.mubr.msk.bf16.gmra.mrb[20].mxu0 %vm763_vm1, %v19053_v37 }
 0x15f   : > { %14328 = vmatprep.mubr.msk.bf16.mxu0 %vm18570_vm0, %v18569_v1 }
 0x166   : > { %14329 = vmatmul.mubr.msk.bf16.gmra.mrb[24].mxu0 %vm763_vm1, %v19059_v40 }
 0x167   : > { %14332 = vmatprep.mubr.msk.bf16.mxu0 %vm18570_vm0, %v18569_v1 }
 0x16e   : > { %14333 = vmatmul.mubr.msk.bf16.gmra.mrb[28].mxu0 %vm763_vm1, %v19065_v43 }
 0x16f   : > { %14336 = vmatprep.mubr.msk.bf16.mxu0 %vm18570_vm0, %v18569_v1 }
 0x176   : > { %14337 = vmatmul.mubr.msk.bf16.gmra.mrb[32].mxu0 %vm763_vm1, %v19071_v46 }
 0x177   : > { %14340 = vmatprep.mubr.msk.bf16.mxu0 %vm18570_vm0, %v18569_v1 }
 0x17e   : > { %14341 = vmatmul.mubr.msk.bf16.gmra.mrb[36].mxu0 %vm763_vm1, %v19077_v49 }
 0x17f   : > { %14344 = vmatprep.mubr.msk.bf16.mxu0 %vm18570_vm0, %v18569_v1 }
 0x186   : > { %14345 = vmatmul.mubr.msk.bf16.gmra.mrb[40].mxu0 %vm763_vm1, %v19083_v52 }
 0x187   : > { %14348 = vmatprep.mubr.msk.bf16.mxu0 %vm18570_vm0, %v18569_v1 }
 0x18e   : > { %14349 = vmatmul.mubr.msk.bf16.gmra.mrb[44].mxu0 %vm763_vm1, %v19089_v55 }
 0x18f   : > { %14352 = vmatprep.mubr.msk.bf16.mxu0 %vm18570_vm0, %v18569_v1 }
 0x196   : > { %14353 = vmatmul.mubr.msk.bf16.gmra.mrb[48].mxu0 %vm763_vm1, %v19095_v58 }
 0x197   : > { %14356 = vmatprep.mubr.msk.bf16.mxu0 %vm18570_vm0, %v18569_v1 }
 0x19e   : > { %14357 = vmatmul.mubr.msk.bf16.gmra.mrb[52].mxu0 %vm763_vm1, %v19101_v61 }
 0x19f   : > { %14360 = vmatprep.mubr.msk.bf16.mxu0 %vm18570_vm0, %v18569_v1 }
 0x1a6   : > { %14361 = vmatmul.mubr.msk.bf16.gmra.mrb[56].mxu0 %vm763_vm1, %v19107_v0 }
 0x1a7   : > { %14364 = vmatprep.mubr.msk.bf16.mxu0 %vm18570_vm0, %v18569_v1 }
 0x1ae   : > { %14365 = vmatmul.mubr.msk.bf16.gmra.mrb[60].mxu0 %vm763_vm1, %v19113_v4 }
 0x1af   : > { %14368 = vmatprep.mubr.msk.bf16.mxu0 %vm18570_vm0, %v18569_v1 }
 0x1b6   : > { %14369 = vmatmul.mubr.msk.bf16.gmra.mrb[64].mxu0 %vm763_vm1, %v19119_v7 }
 0x1b7   : > { %14372 = vmatprep.mubr.msk.bf16.mxu0 %vm18570_vm0, %v18569_v1 }
 0x1be   : > { %14373 = vmatmul.mubr.msk.bf16.gmra.mrb[68].mxu0 %vm763_vm1, %v1619_v10 }
 0x1bf   : > { %14376 = vmatprep.mubr.msk.bf16.mxu0 %vm18570_vm0, %v18569_v1 }
 0x1c6   : > { %14377 = vmatmul.mubr.msk.bf16.gmra.mrb[72].mxu0 %vm763_vm1, %v1620_v13 }
 0x1c7   : > { %14380 = vmatprep.mubr.msk.bf16.mxu0 %vm18570_vm0, %v18569_v1 }
 0x1ce   : > { %14381 = vmatmul.mubr.msk.bf16.gmra.mrb[76].mxu0 %vm763_vm1, %v1621_v16 }
 0x1cf   : > { %14384 = vmatprep.mubr.msk.bf16.mxu0 %vm18570_vm0, %v18569_v1 }
 0x1d6   : > { %14385 = vmatmul.mubr.msk.bf16.gmra.mrb[80].mxu0 %vm763_vm1, %v1622_v18  ;;  %v2361_v18 = vld [vmem:[#allocation2 + $0x123] sm:$0xff] }
 0x1d7   : > { %14392 = vmatprep.mubr.msk.bf16.mxu0 %vm18570_vm0, %v18569_v1 }
 0x1de   : > { %14393 = vmatmul.mubr.msk.bf16.vlgmr.msra.gmra.mrb[0].mxu0 %vm763_vm1, %v19028_v25  ;;  %v2004_v25 = vpack.c.bf16 %v1983_v24, %v1982_v23  ;;  %v2386_v23 = vpack.c.bf16 %v2364_v22, %v2363_v21  ;;  %v2365_v24 = vld [vmem:[#allocation2 + $0x143] sm:$0xff]  ;;  %v2746_v22 = vld [vmem:[#allocation2 + $0x134] sm:$0xff] }
 0x1df   : > { %14477 = vmatpush3.bf16.msra.mxu0 %v18407_v19  ;;  %14396 = vmatprep.mubr.msk.bf16.mxu0 %vm18570_vm0, %v18569_v1  ;;  %v2362_v19 = vld [vmem:[#allocation2 + $0x12b] sm:$0xff] }
 0x1e0   : > { %14478 = vmatprep.subr.bf16.mxu0 %v18569_v1 }
 0x1e3   : > { %14479 = vmatpush3.bf16.msra.mxu0 %v18408_v20  ;;  %v2385_v20 = vpack.c.bf16 %v2362_v19, %v2361_v18  ;;  %v2744_v19 = vld [vmem:[#allocation2 + $0x124] sm:$0xff] }
 0x1e4   : > { %14564 = vmatprep.subr.bf16.mxu0 %v18569_v1 }
 0x1e6   : > { %14397 = vmatmul.mubr.msk.bf16.gmra.mrb[4].mxu0 %vm763_vm1, %v19035_v28  ;;  %v2327_v28 = vld [vmem:[#allocation2 + $0x13] sm:$0xff] }
 0x1e7   : > { %14400 = vmatprep.mubr.msk.bf16.mxu0 %vm18570_vm0, %v18569_v1  ;;  %v2368_v30 = vpack.c.bf16 %v2328_v29, %v2327_v28  ;;  %v2710_v29 = vld [vmem:[#allocation2 + $0x14] sm:$0xff] }
 0x1ee   : > { %14401 = vmatmul.mubr.msk.bf16.gmra.mrb[8].mxu0 %vm763_vm1, %v19041_v31  ;;  %v18409_v31 = vld [vmem:[%s22094_s0 + $0x50] sm:$0xff]  }
 0x1ef   : > { %14404 = vmatprep.mubr.msk.bf16.mxu0 %vm18570_vm0, %v18569_v1 }
 0x1f6   : > { %14405 = vmatmul.mubr.msk.bf16.gmra.mrb[12].mxu0 %vm763_vm1, %v19047_v34  ;;  %v18410_v34 = vld [vmem:[%s22094_s0 + $0x58] sm:$0xff]  }
 0x1f7   : > { %14408 = vmatprep.mubr.msk.bf16.mxu0 %vm18570_vm0, %v18569_v1 }
 0x1fe   : > { %14409 = vmatmul.mubr.msk.bf16.gmra.mrb[16].mxu0 %vm763_vm1, %v19053_v37  ;;  %v2332_v37 = vld [vmem:[#allocation2 + $0x3b] sm:$0xff] }
 0x1ff   : > { %14412 = vmatprep.mubr.msk.bf16.mxu0 %vm18570_vm0, %v18569_v1  ;;  %v2370_v38 = vpack.c.bf16 %v2332_v37, %v2331_v36  ;;  %v2714_v37 = vld [vmem:[#allocation2 + $0x34] sm:$0xff] }
 0x206   : > { %14413 = vmatmul.mubr.msk.bf16.gmra.mrb[20].mxu0 %vm763_vm1, %v19059_v40  ;;  %v2334_v40 = vld [vmem:[#allocation2 + $0x4b] sm:$0xff] }
 0x207   : > { %14416 = vmatprep.mubr.msk.bf16.mxu0 %vm18570_vm0, %v18569_v1  ;;  %v2371_v41 = vpack.c.bf16 %v2334_v40, %v2333_v39  ;;  %v2716_v40 = vld [vmem:[#allocation2 + $0x44] sm:$0xff] }
 0x20e   : > { %14417 = vmatmul.mubr.msk.bf16.gmra.mrb[24].mxu0 %vm763_vm1, %v19065_v43  ;;  %v2336_v43 = vld [vmem:[#allocation2 + $0x5b] sm:$0xff] }
 0x20f   : > { %14420 = vmatprep.mubr.msk.bf16.mxu0 %vm18570_vm0, %v18569_v1  ;;  %v2372_v44 = vpack.c.bf16 %v2336_v43, %v2335_v42  ;;  %v2718_v43 = vld [vmem:[#allocation2 + $0x54] sm:$0xff] }
 0x216   : > { %14421 = vmatmul.mubr.msk.bf16.gmra.mrb[28].mxu0 %vm763_vm1, %v19071_v46  ;;  %v2338_v46 = vld [vmem:[#allocation2 + $0x6b] sm:$0xff] }
 0x217   : > { %14424 = vmatprep.mubr.msk.bf16.mxu0 %vm18570_vm0, %v18569_v1  ;;  %v2373_v47 = vpack.c.bf16 %v2338_v46, %v2337_v45  ;;  %v2720_v46 = vld [vmem:[#allocation2 + $0x64] sm:$0xff] }
 0x21e   : > { %14425 = vmatmul.mubr.msk.bf16.gmra.mrb[32].mxu0 %vm763_vm1, %v19077_v49  ;;  %v2340_v49 = vld [vmem:[#allocation2 + $0x7b] sm:$0xff] }
 0x21f   : > { %14428 = vmatprep.mubr.msk.bf16.mxu0 %vm18570_vm0, %v18569_v1  ;;  %v2374_v50 = vpack.c.bf16 %v2340_v49, %v2339_v48  ;;  %v2722_v49 = vld [vmem:[#allocation2 + $0x74] sm:$0xff] }
 0x226   : > { %14429 = vmatmul.mubr.msk.bf16.gmra.mrb[36].mxu0 %vm763_vm1, %v19083_v52  ;;  %v2342_v52 = vld [vmem:[#allocation2 + $0x8b] sm:$0xff] }
 0x227   : > { %14432 = vmatprep.mubr.msk.bf16.mxu0 %vm18570_vm0, %v18569_v1  ;;  %v2375_v53 = vpack.c.bf16 %v2342_v52, %v2341_v51  ;;  %v2724_v52 = vld [vmem:[#allocation2 + $0x84] sm:$0xff] }
 0x22e   : > { %14433 = vmatmul.mubr.msk.bf16.gmra.mrb[40].mxu0 %vm763_vm1, %v19089_v55  ;;  %v2344_v55 = vld [vmem:[#allocation2 + $0x9b] sm:$0xff] }
 0x22f   : > { %14436 = vmatprep.mubr.msk.bf16.mxu0 %vm18570_vm0, %v18569_v1  ;;  %v2376_v56 = vpack.c.bf16 %v2344_v55, %v2343_v54  ;;  %v2726_v55 = vld [vmem:[#allocation2 + $0x94] sm:$0xff] }
 0x236   : > { %14437 = vmatmul.mubr.msk.bf16.gmra.mrb[44].mxu0 %vm763_vm1, %v19095_v58  ;;  %v2346_v58 = vld [vmem:[#allocation2 + $0xab] sm:$0xff] }
 0x237   : > { %14440 = vmatprep.mubr.msk.bf16.mxu0 %vm18570_vm0, %v18569_v1  ;;  %v2377_v59 = vpack.c.bf16 %v2346_v58, %v2345_v57  ;;  %v2728_v58 = vld [vmem:[#allocation2 + $0xa4] sm:$0xff] }
 0x23e   : > { %14441 = vmatmul.mubr.msk.bf16.gmra.mrb[48].mxu0 %vm763_vm1, %v19101_v61  ;;  %v2348_v61 = vld [vmem:[#allocation2 + $0xbb] sm:$0xff] }
 0x23f   : > { %14444 = vmatprep.mubr.msk.bf16.mxu0 %vm18570_vm0, %v18569_v1  ;;  %v2378_v62 = vpack.c.bf16 %v2348_v61, %v2347_v60  ;;  %v2730_v61 = vld [vmem:[#allocation2 + $0xb4] sm:$0xff] }
 0x246   : > { %14445 = vmatmul.mubr.msk.bf16.gmra.mrb[52].mxu0 %vm763_vm1, %v19107_v0  ;;  %v2350_v0 = vld [vmem:[#allocation2 + $0xcb] sm:$0xff] }
 0x247   : > { %14448 = vmatprep.mubr.msk.bf16.mxu0 %vm18570_vm0, %v18569_v1  ;;  %v2379_v2 = vpack.c.bf16 %v2350_v0, %v2349_v63  ;;  %v2732_v0 = vld [vmem:[#allocation2 + $0xc4] sm:$0xff] }
 0x24e   : > { %14449 = vmatmul.mubr.msk.bf16.gmra.mrb[56].mxu0 %vm763_vm1, %v19113_v4  ;;  %v2352_v4 = vld [vmem:[#allocation2 + $0xdb] sm:$0xff] }
 0x24f   : > { %14452 = vmatprep.mubr.msk.bf16.mxu0 %vm18570_vm0, %v18569_v1  ;;  %v2380_v5 = vpack.c.bf16 %v2352_v4, %v2351_v3  ;;  %v2734_v4 = vld [vmem:[#allocation2 + $0xd4] sm:$0xff] }
 0x256   : > { %14453 = vmatmul.mubr.msk.bf16.gmra.mrb[60].mxu0 %vm763_vm1, %v19119_v7  ;;  %v2354_v7 = vld [vmem:[#allocation2 + $0xeb] sm:$0xff] }
 0x257   : > { %14456 = vmatprep.mubr.msk.bf16.mxu0 %vm18570_vm0, %v18569_v1  ;;  %v2381_v8 = vpack.c.bf16 %v2354_v7, %v2353_v6  ;;  %v2736_v7 = vld [vmem:[#allocation2 + $0xe4] sm:$0xff] }
 0x25e   : > { %14457 = vmatmul.mubr.msk.bf16.gmra.mrb[64].mxu0 %vm763_vm1, %v1619_v10  ;;  %v2356_v10 = vld [vmem:[#allocation2 + $0xfb] sm:$0xff] }
 0x25f   : > { %14460 = vmatprep.mubr.msk.bf16.mxu0 %vm18570_vm0, %v18569_v1  ;;  %v2382_v11 = vpack.c.bf16 %v2356_v10, %v2355_v9  ;;  %v2738_v10 = vld [vmem:[#allocation2 + $0xf4] sm:$0xff] }
 0x266   : > { %14461 = vmatmul.mubr.msk.bf16.gmra.mrb[68].mxu0 %vm763_vm1, %v1620_v13  ;;  %v2358_v13 = vld [vmem:[#allocation2 + $0x10b] sm:$0xff] }
 0x267   : > { %14464 = vmatprep.mubr.msk.bf16.mxu0 %vm18570_vm0, %v18569_v1  ;;  %v2383_v14 = vpack.c.bf16 %v2358_v13, %v2357_v12  ;;  %v2740_v13 = vld [vmem:[#allocation2 + $0x104] sm:$0xff] }
 0x26e   : > { %14465 = vmatmul.mubr.msk.bf16.gmra.mrb[72].mxu0 %vm763_vm1, %v1621_v16  ;;  %v2360_v16 = vld [vmem:[#allocation2 + $0x11b] sm:$0xff] }
 0x26f   : > { %14468 = vmatprep.mubr.msk.bf16.mxu0 %vm18570_vm0, %v18569_v1  ;;  %v2384_v17 = vpack.c.bf16 %v2360_v16, %v2359_v15  ;;  %v2742_v16 = vld [vmem:[#allocation2 + $0x114] sm:$0xff] }
 0x276   : > { %14469 = vmatmul.mubr.msk.bf16.gmra.mrb[76].mxu0 %vm763_vm1, %v2004_v25  ;;  %v2366_v25 = vld [vmem:[#allocation2 + $0x14b] sm:$0xff] }
 0x277   : > { %14472 = vmatprep.mubr.msk.bf16.mxu0 %vm18570_vm0, %v18569_v1  ;;  %v2387_v26 = vpack.c.bf16 %v2366_v25, %v2365_v24  ;;  %v2748_v25 = vld [vmem:[#allocation2 + $0x144] sm:$0xff] }
 0x27e   : > { %14473 = vmatmul.mubr.msk.bf16.gmra.mrb[80].mxu0 %vm763_vm1, %v2005_v27  ;;  %v2367_v27 = vld [vmem:[#allocation2 + $0x153] sm:$0xf] }
 0x27f   : > { %14480 = vmatprep.mubr.msk.bf16.mxu0 %vm18570_vm0, %v18569_v1  ;;  %v2388_v28 = vpack.c.bf16 %v2367_v27, %v2367_v27 }
 0x286   : > { %14481 = vmatmul.mubr.msk.bf16.vlgmr.msra.gmra.mrb[0].mxu0 %vm763_vm1, %v2368_v30  ;;  %v2711_v30 = vld [vmem:[#allocation2 + $0x1c] sm:$0xff] }
 0x287   : > { %14565 = vmatpush3.bf16.msra.mxu0 %v18409_v31  ;;  %14484 = vmatprep.mubr.msk.bf16.mxu0 %vm18570_vm0, %v18569_v1  ;;  %v2751_v31 = vpack.c.bf16 %v2711_v30, %v2710_v29  ;;  %v18413_v30 = vld [vmem:[%s22094_s0 + $0x70] sm:$0xff]  }
 0x288   : > { %14566 = vmatprep.subr.bf16.mxu0 %v18569_v1 }
 0x28b   : > { %14567 = vmatpush3.bf16.msra.mxu0 %v18410_v34  ;;  %v2713_v34 = vld [vmem:[#allocation2 + $0x2c] sm:$0xff] }
 0x28c   : > { %14652 = vmatprep.subr.bf16.mxu0 %v18569_v1  ;;  %v19309_v36 = vpack.c.bf16 %v2713_v34, %v2712_v33  ;;  %v3132_v33 = vld [vmem:[#allocation2 + $0x15c] sm:$0xff] }
 0x28e   : > { %14485 = vmatmul.mubr.msk.bf16.gmra.mrb[4].mxu0 %vm763_vm1, %v2369_v35  ;;  %v18412_v35 = vld [vmem:[%s22094_s0 + $0x68] sm:$0xff]  }
 0x28f   : > { %14488 = vmatprep.mubr.msk.bf16.mxu0 %vm18570_vm0, %v18569_v1 }
 0x296   : > { %14489 = vmatmul.mubr.msk.bf16.gmra.mrb[8].mxu0 %vm763_vm1, %v2370_v38  ;;  %v2715_v38 = vld [vmem:[#allocation2 + $0x3c] sm:$0xff] }
 0x297   : > { %14492 = vmatprep.mubr.msk.bf16.mxu0 %vm18570_vm0, %v18569_v1  ;;  %v19316_v39 = vpack.c.bf16 %v2715_v38, %v2714_v37  ;;  %v3476_v37 = vld [vmem:[#allocation2 + $0x25] sm:$0xff]  ;;  %v3477_v38 = vld [vmem:[#allocation2 + $0x2d] sm:$0xff] }
 0x29e   : > { %14493 = vmatmul.mubr.msk.bf16.gmra.mrb[12].mxu0 %vm763_vm1, %v2371_v41  ;;  %v2717_v41 = vld [vmem:[#allocation2 + $0x4c] sm:$0xff] }
 0x29f   : > { %14496 = vmatprep.mubr.msk.bf16.mxu0 %vm18570_vm0, %v18569_v1  ;;  %v19322_v42 = vpack.c.bf16 %v2717_v41, %v2716_v40  ;;  %v18415_v40 = vld [vmem:[%s22094_s0 + $0x80] sm:$0xff]   ;;  %v3478_v41 = vld [vmem:[#allocation2 + $0x35] sm:$0xff] }
 0x2a6   : > { %14497 = vmatmul.mubr.msk.bf16.gmra.mrb[16].mxu0 %vm763_vm1, %v2372_v44  ;;  %v2719_v44 = vld [vmem:[#allocation2 + $0x5c] sm:$0xff] }
 0x2a7   : > { %14500 = vmatprep.mubr.msk.bf16.mxu0 %vm18570_vm0, %v18569_v1  ;;  %v19328_v45 = vpack.c.bf16 %v2719_v44, %v2718_v43  ;;  %v18416_v43 = vld [vmem:[%s22094_s0 + $0x88] sm:$0xff]  }
 0x2ae   : > { %14501 = vmatmul.mubr.msk.bf16.gmra.mrb[20].mxu0 %vm763_vm1, %v2373_v47  ;;  %v2721_v47 = vld [vmem:[#allocation2 + $0x6c] sm:$0xff] }
 0x2af   : > { %14504 = vmatprep.mubr.msk.bf16.mxu0 %vm18570_vm0, %v18569_v1  ;;  %v19334_v48 = vpack.c.bf16 %v2721_v47, %v2720_v46  ;;  %v3481_v46 = vld [vmem:[#allocation2 + $0x4d] sm:$0xff] }
 0x2b6   : > { %14505 = vmatmul.mubr.msk.bf16.gmra.mrb[24].mxu0 %vm763_vm1, %v2374_v50  ;;  %v2723_v50 = vld [vmem:[#allocation2 + $0x7c] sm:$0xff] }
 0x2b7   : > { %14508 = vmatprep.mubr.msk.bf16.mxu0 %vm18570_vm0, %v18569_v1  ;;  %v19340_v51 = vpack.c.bf16 %v2723_v50, %v2722_v49  ;;  %v3483_v49 = vld [vmem:[#allocation2 + $0x5d] sm:$0xff] }
 0x2be   : > { %14509 = vmatmul.mubr.msk.bf16.gmra.mrb[28].mxu0 %vm763_vm1, %v2375_v53  ;;  %v2725_v53 = vld [vmem:[#allocation2 + $0x8c] sm:$0xff] }
 0x2bf   : > { %14512 = vmatprep.mubr.msk.bf16.mxu0 %vm18570_vm0, %v18569_v1  ;;  %v19346_v54 = vpack.c.bf16 %v2725_v53, %v2724_v52  ;;  %v3485_v52 = vld [vmem:[#allocation2 + $0x6d] sm:$0xff] }
 0x2c6   : > { %14513 = vmatmul.mubr.msk.bf16.gmra.mrb[32].mxu0 %vm763_vm1, %v2376_v56  ;;  %v2727_v56 = vld [vmem:[#allocation2 + $0x9c] sm:$0xff] }
 0x2c7   : > { %14516 = vmatprep.mubr.msk.bf16.mxu0 %vm18570_vm0, %v18569_v1  ;;  %v19352_v57 = vpack.c.bf16 %v2727_v56, %v2726_v55  ;;  %v3487_v55 = vld [vmem:[#allocation2 + $0x7d] sm:$0xff] }
 0x2ce   : > { %14517 = vmatmul.mubr.msk.bf16.gmra.mrb[36].mxu0 %vm763_vm1, %v2377_v59  ;;  %v2729_v59 = vld [vmem:[#allocation2 + $0xac] sm:$0xff] }
 0x2cf   : > { %14520 = vmatprep.mubr.msk.bf16.mxu0 %vm18570_vm0, %v18569_v1  ;;  %v19358_v60 = vpack.c.bf16 %v2729_v59, %v2728_v58  ;;  %v3489_v58 = vld [vmem:[#allocation2 + $0x8d] sm:$0xff] }
 0x2d6   : > { %14521 = vmatmul.mubr.msk.bf16.gmra.mrb[40].mxu0 %vm763_vm1, %v2378_v62  ;;  %v2731_v62 = vld [vmem:[#allocation2 + $0xbc] sm:$0xff] }
 0x2d7   : > { %14524 = vmatprep.mubr.msk.bf16.mxu0 %vm18570_vm0, %v18569_v1  ;;  %v19364_v63 = vpack.c.bf16 %v2731_v62, %v2730_v61  ;;  %v3491_v61 = vld [vmem:[#allocation2 + $0x9d] sm:$0xff] }
 0x2de   : > { %14525 = vmatmul.mubr.msk.bf16.gmra.mrb[44].mxu0 %vm763_vm1, %v2379_v2  ;;  %v2733_v2 = vld [vmem:[#allocation2 + $0xcc] sm:$0xff] }
 0x2df   : > { %14528 = vmatprep.mubr.msk.bf16.mxu0 %vm18570_vm0, %v18569_v1  ;;  %v19370_v3 = vpack.c.bf16 %v2733_v2, %v2732_v0  ;;  %v3493_v0 = vld [vmem:[#allocation2 + $0xad] sm:$0xff] }
 0x2e6   : > { %14529 = vmatmul.mubr.msk.bf16.gmra.mrb[48].mxu0 %vm763_vm1, %v2380_v5  ;;  %v2735_v5 = vld [vmem:[#allocation2 + $0xdc] sm:$0xff] }
 0x2e7   : > { %14532 = vmatprep.mubr.msk.bf16.mxu0 %vm18570_vm0, %v18569_v1  ;;  %v19376_v6 = vpack.c.bf16 %v2735_v5, %v2734_v4  ;;  %v3495_v4 = vld [vmem:[#allocation2 + $0xbd] sm:$0xff] }
 0x2ee   : > { %14533 = vmatmul.mubr.msk.bf16.gmra.mrb[52].mxu0 %vm763_vm1, %v2381_v8  ;;  %v2737_v8 = vld [vmem:[#allocation2 + $0xec] sm:$0xff] }
 0x2ef   : > { %14536 = vmatprep.mubr.msk.bf16.mxu0 %vm18570_vm0, %v18569_v1  ;;  %v19382_v9 = vpack.c.bf16 %v2737_v8, %v2736_v7  ;;  %v3497_v7 = vld [vmem:[#allocation2 + $0xcd] sm:$0xff] }
 0x2f6   : > { %14537 = vmatmul.mubr.msk.bf16.gmra.mrb[56].mxu0 %vm763_vm1, %v2382_v11  ;;  %v2739_v11 = vld [vmem:[#allocation2 + $0xfc] sm:$0xff] }
 0x2f7   : > { %14540 = vmatprep.mubr.msk.bf16.mxu0 %vm18570_vm0, %v18569_v1  ;;  %v19388_v12 = vpack.c.bf16 %v2739_v11, %v2738_v10  ;;  %v3499_v10 = vld [vmem:[#allocation2 + $0xdd] sm:$0xff] }
 0x2fe   : > { %14541 = vmatmul.mubr.msk.bf16.gmra.mrb[60].mxu0 %vm763_vm1, %v2383_v14  ;;  %v2741_v14 = vld [vmem:[#allocation2 + $0x10c] sm:$0xff] }
 0x2ff   : > { %14544 = vmatprep.mubr.msk.bf16.mxu0 %vm18570_vm0, %v18569_v1  ;;  %v2766_v15 = vpack.c.bf16 %v2741_v14, %v2740_v13  ;;  %v3501_v13 = vld [vmem:[#allocation2 + $0xed] sm:$0xff] }
 0x306   : > { %14545 = vmatmul.mubr.msk.bf16.gmra.mrb[64].mxu0 %vm763_vm1, %v2384_v17  ;;  %v2743_v17 = vld [vmem:[#allocation2 + $0x11c] sm:$0xff] }
 0x307   : > { %14548 = vmatprep.mubr.msk.bf16.mxu0 %vm18570_vm0, %v18569_v1  ;;  %v2767_v18 = vpack.c.bf16 %v2743_v17, %v2742_v16  ;;  %v3503_v16 = vld [vmem:[#allocation2 + $0xfd] sm:$0xff] }
 0x30e   : > { %14549 = vmatmul.mubr.msk.bf16.gmra.mrb[68].mxu0 %vm763_vm1, %v2385_v20  ;;  %v2745_v20 = vld [vmem:[#allocation2 + $0x12c] sm:$0xff] }
 0x30f   : > { %14552 = vmatprep.mubr.msk.bf16.mxu0 %vm18570_vm0, %v18569_v1  ;;  %v2768_v21 = vpack.c.bf16 %v2745_v20, %v2744_v19  ;;  %v3505_v19 = vld [vmem:[#allocation2 + $0x10d] sm:$0xff] }
 0x316   : > { %14553 = vmatmul.mubr.msk.bf16.gmra.mrb[72].mxu0 %vm763_vm1, %v2386_v23  ;;  %v2747_v23 = vld [vmem:[#allocation2 + $0x13c] sm:$0xff] }
 0x317   : > { %14556 = vmatprep.mubr.msk.bf16.mxu0 %vm18570_vm0, %v18569_v1  ;;  %v2769_v24 = vpack.c.bf16 %v2747_v23, %v2746_v22  ;;  %v3507_v22 = vld [vmem:[#allocation2 + $0x11d] sm:$0xff] }
 0x31e   : > { %14557 = vmatmul.mubr.msk.bf16.gmra.mrb[76].mxu0 %vm763_vm1, %v2387_v26  ;;  %v2749_v26 = vld [vmem:[#allocation2 + $0x14c] sm:$0xff] }
 0x31f   : > { %14560 = vmatprep.mubr.msk.bf16.mxu0 %vm18570_vm0, %v18569_v1  ;;  %v2770_v27 = vpack.c.bf16 %v2749_v26, %v2748_v25  ;;  %v3509_v25 = vld [vmem:[#allocation2 + $0x12d] sm:$0xff] }
 0x326   : > { %14561 = vmatmul.mubr.msk.bf16.gmra.mrb[80].mxu0 %vm763_vm1, %v2388_v28  ;;  %v2750_v28 = vld [vmem:[#allocation2 + $0x154] sm:$0xf] }
 0x327   : > { %14568 = vmatprep.mubr.msk.bf16.mxu0 %vm18570_vm0, %v18569_v1  ;;  %v2771_v29 = vpack.c.bf16 %v2750_v28, %v2750_v28  ;;  %v969_v28 = vld [vmem:[#allocation2 + $0xc9] sm:$0xff] }
 0x32e   : > { %14569 = vmatmul.mubr.msk.bf16.vlgmr.msra.gmra.mrb[0].mxu0 %vm763_vm1, %v2751_v31  ;;  %v18414_v31 = vld [vmem:[%s22094_s0 + $0x78] sm:$0xff]   ;;  %s22103_s0 = sld [smem:[#allocation13_spill]] }
 0x32f   : > { %14653 = vmatpush3.bf16.msra.mxu0 %v18411_v32  ;;  %14572 = vmatprep.mubr.msk.bf16.mxu0 %vm18570_vm0, %v18569_v1  ;;  %v3131_v32 = vld [vmem:[#allocation2 + $0x154] sm:$0xff] }
 0x330   : > { %14654 = vmatprep.subr.bf16.mxu0 %v18569_v1  ;;  %v3153_v34 = vpack.c.bf16 %v3132_v33, %v3131_v32  ;;  %v970_v33 = vld [vmem:[#allocation2 + $0xd1] sm:$0xff] }
 0x333   : > { %14655 = vmatpush3.bf16.msra.mxu0 %v18412_v35  ;;  %v3133_v35 = vld [vmem:[#allocation2 + $0x164] sm:$0xf] }
 0x334   : > { %14740 = vmatprep.subr.bf16.mxu0 %v18569_v1 }
 0x336   : > { %14573 = vmatmul.mubr.msk.bf16.gmra.mrb[4].mxu0 %vm763_vm1, %v19309_v36 }
 0x337   : > { %14576 = vmatprep.mubr.msk.bf16.mxu0 %vm18570_vm0, %v18569_v1 }
 0x33e   : > { %14577 = vmatmul.mubr.msk.bf16.gmra.mrb[8].mxu0 %vm763_vm1, %v19316_v39 }
 0x33f   : > { %14580 = vmatprep.mubr.msk.bf16.mxu0 %vm18570_vm0, %v18569_v1 }
 0x346   : > { %14581 = vmatmul.mubr.msk.bf16.gmra.mrb[12].mxu0 %vm763_vm1, %v19322_v42 }
 0x347   : > { %14584 = vmatprep.mubr.msk.bf16.mxu0 %vm18570_vm0, %v18569_v1 }
 0x34e   : > { %14585 = vmatmul.mubr.msk.bf16.gmra.mrb[16].mxu0 %vm763_vm1, %v19328_v45 }
 0x34f   : > { %14588 = vmatprep.mubr.msk.bf16.mxu0 %vm18570_vm0, %v18569_v1 }
 0x356   : > { %14589 = vmatmul.mubr.msk.bf16.gmra.mrb[20].mxu0 %vm763_vm1, %v19334_v48 }
 0x357   : > { %14592 = vmatprep.mubr.msk.bf16.mxu0 %vm18570_vm0, %v18569_v1 }
 0x35e   : > { %14593 = vmatmul.mubr.msk.bf16.gmra.mrb[24].mxu0 %vm763_vm1, %v19340_v51 }
 0x35f   : > { %14596 = vmatprep.mubr.msk.bf16.mxu0 %vm18570_vm0, %v18569_v1 }
 0x366   : > { %14597 = vmatmul.mubr.msk.bf16.gmra.mrb[28].mxu0 %vm763_vm1, %v19346_v54 }
 0x367   : > { %14600 = vmatprep.mubr.msk.bf16.mxu0 %vm18570_vm0, %v18569_v1 }
 0x36e   : > { %14601 = vmatmul.mubr.msk.bf16.gmra.mrb[32].mxu0 %vm763_vm1, %v19352_v57 }
 0x36f   : > { %14604 = vmatprep.mubr.msk.bf16.mxu0 %vm18570_vm0, %v18569_v1 }
 0x376   : > { %14605 = vmatmul.mubr.msk.bf16.gmra.mrb[36].mxu0 %vm763_vm1, %v19358_v60 }
 0x377   : > { %14608 = vmatprep.mubr.msk.bf16.mxu0 %vm18570_vm0, %v18569_v1 }
 0x37e   : > { %14609 = vmatmul.mubr.msk.bf16.gmra.mrb[40].mxu0 %vm763_vm1, %v19364_v63 }
 0x37f   : > { %14612 = vmatprep.mubr.msk.bf16.mxu0 %vm18570_vm0, %v18569_v1 }
 0x386   : > { %14613 = vmatmul.mubr.msk.bf16.gmra.mrb[44].mxu0 %vm763_vm1, %v19370_v3 }
 0x387   : > { %14616 = vmatprep.mubr.msk.bf16.mxu0 %vm18570_vm0, %v18569_v1 }
 0x38e   : > { %14617 = vmatmul.mubr.msk.bf16.gmra.mrb[48].mxu0 %vm763_vm1, %v19376_v6 }
 0x38f   : > { %14620 = vmatprep.mubr.msk.bf16.mxu0 %vm18570_vm0, %v18569_v1 }
 0x396   : > { %14621 = vmatmul.mubr.msk.bf16.gmra.mrb[52].mxu0 %vm763_vm1, %v19382_v9 }
 0x397   : > { %14624 = vmatprep.mubr.msk.bf16.mxu0 %vm18570_vm0, %v18569_v1 }
 0x39e   : > { %14625 = vmatmul.mubr.msk.bf16.gmra.mrb[56].mxu0 %vm763_vm1, %v19388_v12 }
 0x39f   : > { %14628 = vmatprep.mubr.msk.bf16.mxu0 %vm18570_vm0, %v18569_v1 }
 0x3a6   : > { %14629 = vmatmul.mubr.msk.bf16.gmra.mrb[60].mxu0 %vm763_vm1, %v2766_v15 }
 0x3a7   : > { %14632 = vmatprep.mubr.msk.bf16.mxu0 %vm18570_vm0, %v18569_v1 }
 0x3ae   : > { %14633 = vmatmul.mubr.msk.bf16.gmra.mrb[64].mxu0 %vm763_vm1, %v2767_v18 }
 0x3af   : > { %14636 = vmatprep.mubr.msk.bf16.mxu0 %vm18570_vm0, %v18569_v1 }
 0x3b6   : > { %14637 = vmatmul.mubr.msk.bf16.gmra.mrb[68].mxu0 %vm763_vm1, %v2768_v21 }
 0x3b7   : > { %14640 = vmatprep.mubr.msk.bf16.mxu0 %vm18570_vm0, %v18569_v1 }
 0x3be   : > { %14641 = vmatmul.mubr.msk.bf16.gmra.mrb[72].mxu0 %vm763_vm1, %v2769_v24 }
 0x3bf   : > { %14644 = vmatprep.mubr.msk.bf16.mxu0 %vm18570_vm0, %v18569_v1 }
 0x3c6   : > { %14645 = vmatmul.mubr.msk.bf16.gmra.mrb[76].mxu0 %vm763_vm1, %v2770_v27 }
 0x3c7   : > { %14648 = vmatprep.mubr.msk.bf16.mxu0 %vm18570_vm0, %v18569_v1 }
 0x3ce   : > { %14649 = vmatmul.mubr.msk.bf16.gmra.mrb[80].mxu0 %vm763_vm1, %v2771_v29  ;;  %v3510_v29 = vld [vmem:[#allocation2 + $0x135] sm:$0xff] }
 0x3cf   : > { %14656 = vmatprep.mubr.msk.bf16.mxu0 %vm18570_vm0, %v18569_v1 }
 0x3d6   : > { %14657 = vmatmul.mubr.msk.bf16.vlgmr.msra.gmra.mrb[0].mxu0 %vm763_vm1, %v19309_v36  ;;  %v3154_v36 = vpack.c.bf16 %v3133_v35, %v3133_v35  ;;  %v3512_v35 = vld [vmem:[#allocation2 + $0x145] sm:$0xff] }
 0x3d7   : > { %14741 = vmatpush3.bf16.msra.mxu0 %v18413_v30  ;;  %14660 = vmatprep.mubr.msk.bf16.mxu0 %vm18570_vm0, %v18569_v1  ;;  %v3511_v30 = vld [vmem:[#allocation2 + $0x13d] sm:$0xff] }
 0x3d8   : > { %14742 = vmatprep.subr.bf16.mxu0 %v18569_v1  ;;  %v3534_v32 = vpack.c.bf16 %v3511_v30, %v3510_v29  ;;  %v3877_v30 = vld [vmem:[#allocation2 + $0xb6] sm:$0xff] }
 0x3db   : > { %14743 = vmatpush3.bf16.msra.mxu0 %v18414_v31 }
 0x3dc   : > { %14828 = vmatprep.subr.bf16.mxu0 %v18569_v1 }
 0x3de   : > { %14661 = vmatmul.mubr.msk.bf16.gmra.mrb[4].mxu0 %vm763_vm1, %v19316_v39  ;;  %v3517_v39 = vpack.c.bf16 %v3477_v38, %v3476_v37 }
 0x3df   : > { %14664 = vmatprep.mubr.msk.bf16.mxu0 %vm18570_vm0, %v18569_v1 }
 0x3e6   : > { %14665 = vmatmul.mubr.msk.bf16.gmra.mrb[8].mxu0 %vm763_vm1, %v19322_v42  ;;  %v3479_v42 = vld [vmem:[#allocation2 + $0x3d] sm:$0xff] }
 0x3e7   : > { %14668 = vmatprep.mubr.msk.bf16.mxu0 %vm18570_vm0, %v18569_v1  ;;  %v3518_v44 = vpack.c.bf16 %v3479_v42, %v3478_v41  ;;  %v3514_v41 = vld [vmem:[#allocation2 + $0x155] sm:$0xff]  ;;  %v3515_v42 = vld [vmem:[#allocation2 + $0x15d] sm:$0xff] }
 0x3ee   : > { %14669 = vmatmul.mubr.msk.bf16.gmra.mrb[12].mxu0 %vm763_vm1, %v19328_v45  ;;  %v3480_v45 = vld [vmem:[#allocation2 + $0x45] sm:$0xff] }
 0x3ef   : > { %14672 = vmatprep.mubr.msk.bf16.mxu0 %vm18570_vm0, %v18569_v1  ;;  %v3519_v47 = vpack.c.bf16 %v3481_v46, %v3480_v45  ;;  %v974_v45 = vld [vmem:[#allocation2 + $0xf1] sm:$0xff]  ;;  %v975_v46 = vld [vmem:[#allocation2 + $0xf9] sm:$0xff] }
 0x3f6   : > { %14673 = vmatmul.mubr.msk.bf16.gmra.mrb[16].mxu0 %vm763_vm1, %v19334_v48  ;;  %v3482_v48 = vld [vmem:[#allocation2 + $0x55] sm:$0xff] }
 0x3f7   : > { %14676 = vmatprep.mubr.msk.bf16.mxu0 %vm18570_vm0, %v18569_v1  ;;  %v3520_v50 = vpack.c.bf16 %v3483_v49, %v3482_v48  ;;  %v1000_v48 = vpack.c.bf16 %v975_v46, %v974_v45  ;;  %v3885_v45 = vld [vmem:[#allocation2 + $0xf6] sm:$0xff]  ;;  %v3886_v46 = vld [vmem:[#allocation2 + $0xfe] sm:$0xff] }
 0x3fe   : > { %14677 = vmatmul.mubr.msk.bf16.gmra.mrb[20].mxu0 %vm763_vm1, %v19340_v51  ;;  %v3484_v51 = vld [vmem:[#allocation2 + $0x65] sm:$0xff] }
 0x3ff   : > { %14680 = vmatprep.mubr.msk.bf16.mxu0 %vm18570_vm0, %v18569_v1  ;;  %v3521_v53 = vpack.c.bf16 %v3485_v52, %v3484_v51  ;;  %v977_v51 = vld [vmem:[#allocation2 + $0x109] sm:$0xff] }
 0x400   : > { %v3859_v52 = vld [vmem:[#allocation2 + $0x26] sm:$0xff] }
 0x406   : > { %14681 = vmatmul.mubr.msk.bf16.gmra.mrb[24].mxu0 %vm763_vm1, %v19346_v54  ;;  %v3486_v54 = vld [vmem:[#allocation2 + $0x75] sm:$0xff] }
 0x407   : > { %14684 = vmatprep.mubr.msk.bf16.mxu0 %vm18570_vm0, %v18569_v1  ;;  %v3522_v56 = vpack.c.bf16 %v3487_v55, %v3486_v54 }
 0x40e   : > { %14685 = vmatmul.mubr.msk.bf16.gmra.mrb[28].mxu0 %vm763_vm1, %v19352_v57  ;;  %v3488_v57 = vld [vmem:[#allocation2 + $0x85] sm:$0xff] }
 0x40f   : > { %14688 = vmatprep.mubr.msk.bf16.mxu0 %vm18570_vm0, %v18569_v1  ;;  %v3523_v59 = vpack.c.bf16 %v3489_v58, %v3488_v57  ;;  %v979_v57 = vld [vmem:[#allocation2 + $0x119] sm:$0xff] }
 0x410   : > { %v3861_v58 = vld [vmem:[#allocation2 + $0x36] sm:$0xff] }
 0x416   : > { %14689 = vmatmul.mubr.msk.bf16.gmra.mrb[32].mxu0 %vm763_vm1, %v19358_v60  ;;  %v3490_v60 = vld [vmem:[#allocation2 + $0x95] sm:$0xff] }
 0x417   : > { %14692 = vmatprep.mubr.msk.bf16.mxu0 %vm18570_vm0, %v18569_v1  ;;  %v3524_v62 = vpack.c.bf16 %v3491_v61, %v3490_v60 }
 0x41e   : > { %14693 = vmatmul.mubr.msk.bf16.gmra.mrb[36].mxu0 %vm763_vm1, %v19364_v63  ;;  %v3492_v63 = vld [vmem:[#allocation2 + $0xa5] sm:$0xff] }
 0x41f   : > { %14696 = vmatprep.mubr.msk.bf16.mxu0 %vm18570_vm0, %v18569_v1  ;;  %v3525_v2 = vpack.c.bf16 %v3493_v0, %v3492_v63  ;;  %v981_v63 = vld [vmem:[#allocation2 + $0x129] sm:$0xff] }
 0x420   : > { %v3863_v0 = vld [vmem:[#allocation2 + $0x46] sm:$0xff] }
 0x426   : > { %14697 = vmatmul.mubr.msk.bf16.gmra.mrb[40].mxu0 %vm763_vm1, %v19370_v3  ;;  %v3494_v3 = vld [vmem:[#allocation2 + $0xb5] sm:$0xff] }
 0x427   : > { %14700 = vmatprep.mubr.msk.bf16.mxu0 %vm18570_vm0, %v18569_v1  ;;  %v3526_v5 = vpack.c.bf16 %v3495_v4, %v3494_v3 }
 0x42e   : > { %14701 = vmatmul.mubr.msk.bf16.gmra.mrb[44].mxu0 %vm763_vm1, %v19376_v6  ;;  %v3496_v6 = vld [vmem:[#allocation2 + $0xc5] sm:$0xff] }
 0x42f   : > { %14704 = vmatprep.mubr.msk.bf16.mxu0 %vm18570_vm0, %v18569_v1  ;;  %v3527_v8 = vpack.c.bf16 %v3497_v7, %v3496_v6  ;;  %v983_v6 = vld [vmem:[#allocation2 + $0x139] sm:$0xff] }
 0x430   : > { %v3865_v7 = vld [vmem:[#allocation2 + $0x56] sm:$0xff] }
 0x436   : > { %14705 = vmatmul.mubr.msk.bf16.gmra.mrb[48].mxu0 %vm763_vm1, %v19382_v9  ;;  %v3498_v9 = vld [vmem:[#allocation2 + $0xd5] sm:$0xff] }
 0x437   : > { %14708 = vmatprep.mubr.msk.bf16.mxu0 %vm18570_vm0, %v18569_v1  ;;  %v3528_v11 = vpack.c.bf16 %v3499_v10, %v3498_v9 }
 0x43e   : > { %14709 = vmatmul.mubr.msk.bf16.gmra.mrb[52].mxu0 %vm763_vm1, %v19388_v12  ;;  %v3500_v12 = vld [vmem:[#allocation2 + $0xe5] sm:$0xff] }
 0x43f   : > { %14712 = vmatprep.mubr.msk.bf16.mxu0 %vm18570_vm0, %v18569_v1  ;;  %v3529_v14 = vpack.c.bf16 %v3501_v13, %v3500_v12  ;;  %v3867_v12 = vld [vmem:[#allocation2 + $0x66] sm:$0xff]  ;;  %v3868_v13 = vld [vmem:[#allocation2 + $0x6e] sm:$0xff] }
 0x446   : > { %14713 = vmatmul.mubr.msk.bf16.gmra.mrb[56].mxu0 %vm763_vm1, %v2766_v15  ;;  %v3502_v15 = vld [vmem:[#allocation2 + $0xf5] sm:$0xff] }
 0x447   : > { %14716 = vmatprep.mubr.msk.bf16.mxu0 %vm18570_vm0, %v18569_v1  ;;  %v3530_v17 = vpack.c.bf16 %v3503_v16, %v3502_v15  ;;  %v3904_v16 = vpack.c.bf16 %v3868_v13, %v3867_v12 }
 0x44e   : > { %14717 = vmatmul.mubr.msk.bf16.gmra.mrb[60].mxu0 %vm763_vm1, %v2767_v18  ;;  %v3504_v18 = vld [vmem:[#allocation2 + $0x105] sm:$0xff] }
 0x44f   : > { %14720 = vmatprep.mubr.msk.bf16.mxu0 %vm18570_vm0, %v18569_v1  ;;  %v3531_v20 = vpack.c.bf16 %v3505_v19, %v3504_v18  ;;  %v3869_v18 = vld [vmem:[#allocation2 + $0x76] sm:$0xff]  ;;  %v3870_v19 = vld [vmem:[#allocation2 + $0x7e] sm:$0xff] }
 0x456   : > { %14721 = vmatmul.mubr.msk.bf16.gmra.mrb[64].mxu0 %vm763_vm1, %v2768_v21  ;;  %v3506_v21 = vld [vmem:[#allocation2 + $0x115] sm:$0xff] }
 0x457   : > { %14724 = vmatprep.mubr.msk.bf16.mxu0 %vm18570_vm0, %v18569_v1  ;;  %v3532_v23 = vpack.c.bf16 %v3507_v22, %v3506_v21  ;;  %v3871_v21 = vld [vmem:[#allocation2 + $0x86] sm:$0xff]  ;;  %v3872_v22 = vld [vmem:[#allocation2 + $0x8e] sm:$0xff] }
 0x45e   : > { %14725 = vmatmul.mubr.msk.bf16.gmra.mrb[68].mxu0 %vm763_vm1, %v2769_v24  ;;  %v3508_v24 = vld [vmem:[#allocation2 + $0x125] sm:$0xff] }
 0x45f   : > { %14728 = vmatprep.mubr.msk.bf16.mxu0 %vm18570_vm0, %v18569_v1  ;;  %v3533_v26 = vpack.c.bf16 %v3509_v25, %v3508_v24  ;;  %v3873_v24 = vld [vmem:[#allocation2 + $0x96] sm:$0xff]  ;;  %v3874_v25 = vld [vmem:[#allocation2 + $0x9e] sm:$0xff] }
 0x466   : > { %14729 = vmatmul.mubr.msk.bf16.gmra.mrb[72].mxu0 %vm763_vm1, %v2770_v27  ;;  %v968_v27 = vld [vmem:[#allocation2 + $0xc1] sm:$0xff] }
 0x467   : > { %14732 = vmatprep.mubr.msk.bf16.mxu0 %vm18570_vm0, %v18569_v1  ;;  %v997_v31 = vpack.c.bf16 %v969_v28, %v968_v27  ;;  %v3875_v27 = vld [vmem:[#allocation2 + $0xa6] sm:$0xff]  ;;  %v3876_v28 = vld [vmem:[#allocation2 + $0xae] sm:$0xff] }
 0x468   : > { %v3908_v29 = vpack.c.bf16 %v3876_v28, %v3875_v27  ;;  %v19705_v28 = vld [vmem:[%s22098_s1] ss:$0 sm:$0xff]  ;;  %s22102_s1 = sld [smem:[#allocation20_spill]] }
 0x469   : > { %14177 = vmatmul.mubr.msk.bf16.vlgmr.msra.gmra.mrb[0].mxu1 %vm763_vm1, %v997_v31  ;;  %v3878_v31 = vld [vmem:[#allocation2 + $0xbe] sm:$0xff] }
 0x46a   : > { %14180 = vmatprep.mubr.msk.bf16.mxu1 %vm18570_vm0, %v18569_v1 }
 0x46e   : > { %14733 = vmatmul.mubr.msk.bf16.gmra.mrb[76].mxu0 %vm763_vm1, %v3153_v34  ;;  %v971_v34 = vld [vmem:[#allocation2 + $0xd9] sm:$0xff] }
 0x46f   : > { %14736 = vmatprep.mubr.msk.bf16.mxu0 %vm18570_vm0, %v18569_v1  ;;  %v998_v37 = vpack.c.bf16 %v971_v34, %v970_v33  ;;  %v3879_v33 = vld [vmem:[#allocation2 + $0xc6] sm:$0xff]  ;;  %v3880_v34 = vld [vmem:[#allocation2 + $0xce] sm:$0xff] }
 0x471   : > { %14181 = vmatmul.mubr.msk.bf16.gmra.mrb[4].mxu1 %vm763_vm1, %v998_v37  ;;  %v3882_v37 = vld [vmem:[#allocation2 + $0xde] sm:$0xff] }
 0x472   : > { %14184 = vmatprep.mubr.msk.bf16.mxu1 %vm18570_vm0, %v18569_v1 }
 0x476   : > { %14737 = vmatmul.mubr.msk.bf16.gmra.mrb[80].mxu0 %vm763_vm1, %v3154_v36  ;;  %v3513_v36 = vld [vmem:[#allocation2 + $0x14d] sm:$0xff] }
 0x477   : > { %14744 = vmatprep.mubr.msk.bf16.mxu0 %vm18570_vm0, %v18569_v1  ;;  %v3535_v38 = vpack.c.bf16 %v3513_v36, %v3512_v35  ;;  %v3910_v35 = vpack.c.bf16 %v3880_v34, %v3879_v33  ;;  %v3881_v36 = vld [vmem:[#allocation2 + $0xd6] sm:$0xff] }
 0x47e   : > { %14745 = vmatmul.mubr.msk.bf16.vlgmr.msra.gmra.mrb[0].mxu0 %vm763_vm1, %v3517_v39  ;;  %v972_v39 = vld [vmem:[#allocation2 + $0xe1] sm:$0xff] }
 0x47f   : > { %14829 = vmatpush3.bf16.msra.mxu0 %v18415_v40  ;;  %14748 = vmatprep.mubr.msk.bf16.mxu0 %vm18570_vm0, %v18569_v1  ;;  %v973_v40 = vld [vmem:[#allocation2 + $0xe9] sm:$0xff] }
 0x480   : > { %14830 = vmatprep.subr.bf16.mxu0 %v18569_v1 }
 0x483   : > { %14831 = vmatpush3.bf16.msra.mxu0 %v18416_v43  ;;  %v999_v43 = vpack.c.bf16 %v973_v40, %v972_v39  ;;  %v3883_v39 = vld [vmem:[#allocation2 + $0xe6] sm:$0xff]  ;;  %v3884_v40 = vld [vmem:[#allocation2 + $0xee] sm:$0xff] }
 0x484   : > { %15708 = vmatprep.subr.bf16.mxu0 %v18569_v1 }
 0x485   : > { %14185 = vmatmul.mubr.msk.bf16.gmra.mrb[8].mxu1 %vm763_vm1, %v999_v43  ;;  %v4569_v43 = vld [vmem:[#allocation2 + $0x9] sm:$0xff] }
 0x486   : > { %14749 = vmatmul.mubr.msk.bf16.gmra.mrb[4].mxu0 %vm763_vm1, %v3518_v44  ;;  %v3536_v44 = vpack.c.bf16 %v3515_v42, %v3514_v41  ;;  %14188 = vmatprep.mubr.msk.bf16.mxu1 %vm18570_vm0, %v18569_v1  ;;  %v3912_v41 = vpack.c.bf16 %v3884_v40, %v3883_v39  ;;  %v4568_v42 = vld [vmem:[#allocation2 + $0x1] sm:$0xff] }
 0x487   : > { %14752 = vmatprep.mubr.msk.bf16.mxu0 %vm18570_vm0, %v18569_v1  ;;  %v4380_v40 = vld [vmem:[%s22099_s8 + $0x8] sm:$0xff] }
 0x48d   : > { %14189 = vmatmul.mubr.msk.bf16.gmra.mrb[12].mxu1 %vm763_vm1, %v1000_v48  ;;  %v18419_v48 = vld [vmem:[%s22096_s27] sm:$0xff]  }
 0x48e   : > { %14753 = vmatmul.mubr.msk.bf16.gmra.mrb[8].mxu0 %vm763_vm1, %v3519_v47  ;;  %v3516_v47 = vld [vmem:[#allocation2 + $0x165] sm:$0xf]  ;;  %14192 = vmatprep.mubr.msk.bf16.mxu1 %vm18570_vm0, %v18569_v1 }
 0x48f   : > { %14756 = vmatprep.mubr.msk.bf16.mxu0 %vm18570_vm0, %v18569_v1  ;;  %v3537_v49 = vpack.c.bf16 %v3516_v47, %v3516_v47  ;;  %v3913_v47 = vpack.c.bf16 %v3886_v46, %v3885_v45 }
 0x496   : > { %14757 = vmatmul.mubr.msk.bf16.gmra.mrb[12].mxu0 %vm763_vm1, %v3520_v50  ;;  %v976_v50 = vld [vmem:[#allocation2 + $0x101] sm:$0xff] }
 0x497   : > { %14760 = vmatprep.mubr.msk.bf16.mxu0 %vm18570_vm0, %v18569_v1  ;;  %v1001_v54 = vpack.c.bf16 %v977_v51, %v976_v50  ;;  %v3888_v50 = vld [vmem:[#allocation2 + $0x10e] sm:$0xff] }
 0x499   : > { %14193 = vmatmul.mubr.msk.bf16.gmra.mrb[16].mxu1 %vm763_vm1, %v1001_v54 }
 0x49a   : > { %14196 = vmatprep.mubr.msk.bf16.mxu1 %vm18570_vm0, %v18569_v1 }
 0x49e   : > { %14761 = vmatmul.mubr.msk.bf16.gmra.mrb[16].mxu0 %vm763_vm1, %v3521_v53  ;;  %v3860_v53 = vld [vmem:[#allocation2 + $0x2e] sm:$0xff] }
 0x49f   : > { %14764 = vmatprep.mubr.msk.bf16.mxu0 %vm18570_vm0, %v18569_v1  ;;  %v3900_v55 = vpack.c.bf16 %v3860_v53, %v3859_v52  ;;  %v3889_v52 = vld [vmem:[#allocation2 + $0x116] sm:$0xff]  ;;  %v3890_v53 = vld [vmem:[#allocation2 + $0x11e] sm:$0xff] }
 0x4a0   : > { %v3915_v54 = vpack.c.bf16 %v3890_v53, %v3889_v52 }
 0x4a6   : > { %14765 = vmatmul.mubr.msk.bf16.gmra.mrb[20].mxu0 %vm763_vm1, %v3522_v56  ;;  %v978_v56 = vld [vmem:[#allocation2 + $0x111] sm:$0xff] }
 0x4a7   : > { %14768 = vmatprep.mubr.msk.bf16.mxu0 %vm18570_vm0, %v18569_v1  ;;  %v1002_v60 = vpack.c.bf16 %v979_v57, %v978_v56  ;;  %v3892_v56 = vld [vmem:[#allocation2 + $0x12e] sm:$0xff] }
 0x4a9   : > { %14197 = vmatmul.mubr.msk.bf16.gmra.mrb[20].mxu1 %vm763_vm1, %v1002_v60 }
 0x4aa   : > { %14200 = vmatprep.mubr.msk.bf16.mxu1 %vm18570_vm0, %v18569_v1 }
 0x4ae   : > { %14769 = vmatmul.mubr.msk.bf16.gmra.mrb[24].mxu0 %vm763_vm1, %v3523_v59  ;;  %v3862_v59 = vld [vmem:[#allocation2 + $0x3e] sm:$0xff] }
 0x4af   : > { %14772 = vmatprep.mubr.msk.bf16.mxu0 %vm18570_vm0, %v18569_v1  ;;  %v3901_v61 = vpack.c.bf16 %v3862_v59, %v3861_v58  ;;  %v3893_v58 = vld [vmem:[#allocation2 + $0x136] sm:$0xff]  ;;  %v3894_v59 = vld [vmem:[#allocation2 + $0x13e] sm:$0xff] }
 0x4b0   : > { %v3917_v60 = vpack.c.bf16 %v3894_v59, %v3893_v58  ;;  %v4382_v58 = vld [vmem:[%s22099_s8 + $0x18] sm:$0xff] }
 0x4b6   : > { %14773 = vmatmul.mubr.msk.bf16.gmra.mrb[28].mxu0 %vm763_vm1, %v3524_v62  ;;  %v980_v62 = vld [vmem:[#allocation2 + $0x121] sm:$0xff] }
 0x4b7   : > { %14776 = vmatprep.mubr.msk.bf16.mxu0 %vm18570_vm0, %v18569_v1  ;;  %v1003_v3 = vpack.c.bf16 %v981_v63, %v980_v62  ;;  %v3896_v62 = vld [vmem:[#allocation2 + $0x14e] sm:$0xff] }
 0x4b9   : > { %14201 = vmatmul.mubr.msk.bf16.gmra.mrb[24].mxu1 %vm763_vm1, %v1003_v3 }
 0x4ba   : > { %14204 = vmatprep.mubr.msk.bf16.mxu1 %vm18570_vm0, %v18569_v1 }
 0x4be   : > { %14777 = vmatmul.mubr.msk.bf16.gmra.mrb[32].mxu0 %vm763_vm1, %v3525_v2  ;;  %v3864_v2 = vld [vmem:[#allocation2 + $0x4e] sm:$0xff] }
 0x4bf   : > { %14780 = vmatprep.mubr.msk.bf16.mxu0 %vm18570_vm0, %v18569_v1  ;;  %v3902_v4 = vpack.c.bf16 %v3864_v2, %v3863_v0  ;;  %v3897_v0 = vld [vmem:[#allocation2 + $0x156] sm:$0xff]  ;;  %v3898_v2 = vld [vmem:[#allocation2 + $0x15e] sm:$0xff] }
 0x4c0   : > { %v3919_v3 = vpack.c.bf16 %v3898_v2, %v3897_v0 }
 0x4c6   : > { %14781 = vmatmul.mubr.msk.bf16.gmra.mrb[36].mxu0 %vm763_vm1, %v3526_v5  ;;  %v982_v5 = vld [vmem:[#allocation2 + $0x131] sm:$0xff] }
 0x4c7   : > { %14784 = vmatprep.mubr.msk.bf16.mxu0 %vm18570_vm0, %v18569_v1  ;;  %v1004_v9 = vpack.c.bf16 %v983_v6, %v982_v5 }
 0x4c9   : > { %14205 = vmatmul.mubr.msk.bf16.gmra.mrb[28].mxu1 %vm763_vm1, %v1004_v9 }
 0x4ca   : > { %14208 = vmatprep.mubr.msk.bf16.mxu1 %vm18570_vm0, %v18569_v1 }
 0x4ce   : > { %14785 = vmatmul.mubr.msk.bf16.gmra.mrb[40].mxu0 %vm763_vm1, %v3527_v8  ;;  %v3866_v8 = vld [vmem:[#allocation2 + $0x5e] sm:$0xff] }
 0x4cf   : > { %14788 = vmatprep.mubr.msk.bf16.mxu0 %vm18570_vm0, %v18569_v1  ;;  %v3903_v10 = vpack.c.bf16 %v3866_v8, %v3865_v7 }
 0x4d6   : > { %14789 = vmatmul.mubr.msk.bf16.gmra.mrb[44].mxu0 %vm763_vm1, %v3528_v11  ;;  %v18417_v11 = vld [vmem:[%s22096_s27 + $0x10] sm:$0xff]  }
 0x4d7   : > { %14792 = vmatprep.mubr.msk.bf16.mxu0 %vm18570_vm0, %v18569_v1  ;;  %14917 = vmatpush3.bf16.msra.mxu1 %v18417_v11 }
 0x4d8   : > { %14918 = vmatprep.subr.bf16.mxu1 %v18569_v1 }
 0x4de   : > { %14793 = vmatmul.mubr.msk.bf16.gmra.mrb[48].mxu0 %vm763_vm1, %v3529_v14  ;;  %v984_v14 = vld [vmem:[#allocation2 + $0x141] sm:$0xf] }
 0x4df   : > { %14796 = vmatprep.mubr.msk.bf16.mxu0 %vm18570_vm0, %v18569_v1  ;;  %v1005_v15 = vpack.c.bf16 %v984_v14, %v984_v14  ;;  %v18420_v14 = vld [vmem:[%s22096_s27 + $0x8] sm:$0xff]  }
 0x4e1   : > { %14209 = vmatmul.mubr.msk.bf16.gmra.mrb[32].mxu1 %vm763_vm1, %v1005_v15 }
 0x4e2   : > { %14920 = vmatprep.mubr.msk.bf16.mxu1 %vm18570_vm0, %v18569_v1 }
 0x4e6   : > { %14797 = vmatmul.mubr.msk.bf16.gmra.mrb[52].mxu0 %vm763_vm1, %v3530_v17  ;;  %v18418_v17 = vld [vmem:[%s22096_s27 + $0x18] sm:$0xff]  }
 0x4e7   : > { %14800 = vmatprep.mubr.msk.bf16.mxu0 %vm18570_vm0, %v18569_v1  ;;  %14919 = vmatpush3.bf16.msra.mxu1 %v18418_v17 }
 0x4e8   : > { %15004 = vmatprep.subr.bf16.mxu1 %v18569_v1 }
 0x4ee   : > { %14801 = vmatmul.mubr.msk.bf16.gmra.mrb[56].mxu0 %vm763_vm1, %v3531_v20  ;;  %v3905_v20 = vpack.c.bf16 %v3870_v19, %v3869_v18 }
 0x4ef   : > { %14804 = vmatprep.mubr.msk.bf16.mxu0 %vm18570_vm0, %v18569_v1 }
 0x4f6   : > { %14805 = vmatmul.mubr.msk.bf16.gmra.mrb[60].mxu0 %vm763_vm1, %v3532_v23  ;;  %v3906_v23 = vpack.c.bf16 %v3872_v22, %v3871_v21 }
 0x4f7   : > { %14808 = vmatprep.mubr.msk.bf16.mxu0 %vm18570_vm0, %v18569_v1 }
 0x4fe   : > { %14809 = vmatmul.mubr.msk.bf16.gmra.mrb[64].mxu0 %vm763_vm1, %v3533_v26  ;;  %v3907_v26 = vpack.c.bf16 %v3874_v25, %v3873_v24  ;;  %v19698_v24 = vld [vmem:[%s22097_s9] ss:$0 sm:$0xff]  ;;  %s22101_s9 = sld [smem:[#allocation19_spill]] }
 0x4ff   : > { %14812 = vmatprep.mubr.msk.bf16.mxu0 %vm18570_vm0, %v18569_v1 }
 0x506   : > { %14813 = vmatmul.mubr.msk.bf16.gmra.mrb[68].mxu0 %vm763_vm1, %v3534_v32  ;;  %v3909_v32 = vpack.c.bf16 %v3878_v31, %v3877_v30 }
 0x507   : > { %14816 = vmatprep.mubr.msk.bf16.mxu0 %vm18570_vm0, %v18569_v1 }
 0x50e   : > { %14817 = vmatmul.mubr.msk.bf16.gmra.mrb[72].mxu0 %vm763_vm1, %v3535_v38  ;;  %v3911_v38 = vpack.c.bf16 %v3882_v37, %v3881_v36  ;;  %v4379_v36 = vld [vmem:[%s22099_s8] sm:$0xff] }
 0x50f   : > { %14820 = vmatprep.mubr.msk.bf16.mxu0 %vm18570_vm0, %v18569_v1 }
 0x516   : > { %14821 = vmatmul.mubr.msk.bf16.gmra.mrb[76].mxu0 %vm763_vm1, %v3536_v44  ;;  %v4609_v44 = vpack.c.bf16 %v4569_v43, %v4568_v42 }
 0x517   : > { %14824 = vmatprep.mubr.msk.bf16.mxu0 %vm18570_vm0, %v18569_v1 }
 0x518   : > { %14921 = vmatmul.mubr.msk.bf16.vlgmr.msra.gmra.mrb[36].mxu1 %vm763_vm1, %v4609_v44 }
 0x519   : > { %14924 = vmatprep.mubr.msk.bf16.mxu1 %vm18570_vm0, %v18569_v1  ;;  %15005 = vmatpush3.bf16.msra.mxu1 %v18419_v48 }
 0x51a   : > { %15006 = vmatprep.subr.bf16.mxu1 %v18569_v1 }
 0x51d   : > { %15007 = vmatpush3.bf16.msra.mxu1 %v18420_v14 }
 0x51e   : > { %14825 = vmatmul.mubr.msk.bf16.gmra.mrb[80].mxu0 %vm763_vm1, %v3537_v49  ;;  %v3887_v49 = vld [vmem:[#allocation2 + $0x106] sm:$0xff]  ;;  %15092 = vmatprep.subr.bf16.mxu1 %v18569_v1 }
 0x51f   : > { %14832 = vmatprep.mubr.msk.bf16.mxu0 %vm18570_vm0, %v18569_v1  ;;  %v3914_v51 = vpack.c.bf16 %v3888_v50, %v3887_v49 }
 0x526   : > { %14833 = vmatmul.mubr.msk.bf16.vlgmr.msra.gmra.mrb[0].mxu0 %vm763_vm1, %v3900_v55  ;;  %v3891_v55 = vld [vmem:[#allocation2 + $0x126] sm:$0xff] }
 0x527   : > { %14836 = vmatprep.mubr.msk.bf16.mxu0 %vm18570_vm0, %v18569_v1  ;;  %v3916_v57 = vpack.c.bf16 %v3892_v56, %v3891_v55 }
 0x52e   : > { %14837 = vmatmul.mubr.msk.bf16.gmra.mrb[4].mxu0 %vm763_vm1, %v3901_v61  ;;  %v3895_v61 = vld [vmem:[#allocation2 + $0x146] sm:$0xff] }
 0x52f   : > { %14840 = vmatprep.mubr.msk.bf16.mxu0 %vm18570_vm0, %v18569_v1  ;;  %v3918_v63 = vpack.c.bf16 %v3896_v62, %v3895_v61 }
 0x536   : > { %14841 = vmatmul.mubr.msk.bf16.gmra.mrb[8].mxu0 %vm763_vm1, %v3902_v4  ;;  %v3899_v4 = vld [vmem:[#allocation2 + $0x166] sm:$0xf] }
 0x537   : > { %14844 = vmatprep.mubr.msk.bf16.mxu0 %vm18570_vm0, %v18569_v1  ;;  %v3920_v5 = vpack.c.bf16 %v3899_v4, %v3899_v4 }
 0x53c   : > { %v19673_v6 = vpop.f32.mrb[0].mxu1 }
 0x53d   : > { %v14178_v7 = vpop.f32.mrb[1].mxu1 }
 0x53e   : > { %14845 = vmatmul.mubr.msk.bf16.gmra.mrb[12].mxu0 %vm763_vm1, %v3903_v10  ;;  %v19675_v8 = vpop.f32.mrb[2].mxu1 }
 0x53f   : > { %14848 = vmatprep.mubr.msk.bf16.mxu0 %vm18570_vm0, %v18569_v1  ;;  %v14179_v9 = vpop.f32.mrb[3].mxu1 }
 0x544   : > { %v19677_v10 = vpop.f32.mrb[4].mxu1 }
 0x545   : > { %v14182_v11 = vpop.f32.mrb[5].mxu1 }
 0x546   : > { %14849 = vmatmul.mubr.msk.bf16.gmra.mrb[16].mxu0 %vm763_vm1, %v3904_v16  ;;  %v19679_v12 = vpop.f32.mrb[6].mxu1 }
 0x547   : > { %14852 = vmatprep.mubr.msk.bf16.mxu0 %vm18570_vm0, %v18569_v1  ;;  %v14183_v13 = vpop.f32.mrb[7].mxu1 }
 0x54e   : > { %14853 = vmatmul.mubr.msk.bf16.gmra.mrb[20].mxu0 %vm763_vm1, %v3905_v20 }
 0x54f   : > { %14856 = vmatprep.mubr.msk.bf16.mxu0 %vm18570_vm0, %v18569_v1 }
 0x556   : > { %14857 = vmatmul.mubr.msk.bf16.gmra.mrb[24].mxu0 %vm763_vm1, %v3906_v23 }
 0x557   : > { %14860 = vmatprep.mubr.msk.bf16.mxu0 %vm18570_vm0, %v18569_v1 }
 0x558   : > { %v19684_v15 = vpop.f32.mrb[8].mxu1 }
 0x559   : > { %v14186_v16 = vpop.f32.mrb[9].mxu1 }
 0x55a   : > { %v19686_v17 = vpop.f32.mrb[10].mxu1 }
 0x55b   : > { %v14187_v18 = vpop.f32.mrb[11].mxu1 }
 0x55c   : > { %v4383_v18 = vld [vmem:[%s22099_s8 + $0x20] sm:$0xff] }
 0x55e   : > { %14861 = vmatmul.mubr.msk.bf16.gmra.mrb[28].mxu0 %vm763_vm1, %v3907_v26 }
 0x55f   : > { %14864 = vmatprep.mubr.msk.bf16.mxu0 %vm18570_vm0, %v18569_v1 }
 0x560   : > { %v19689_v19 = vpop.f32.mrb[12].mxu1 }
 0x561   : > { %v14190_v20 = vpop.f32.mrb[13].mxu1 }
 0x562   : > { %v19691_v21 = vpop.f32.mrb[14].mxu1 }
 0x563   : > { %v14191_v22 = vpop.f32.mrb[15].mxu1 }
 0x566   : > { %14865 = vmatmul.mubr.msk.bf16.gmra.mrb[32].mxu0 %vm763_vm1, %v3908_v29 }
 0x567   : > { %14868 = vmatprep.mubr.msk.bf16.mxu0 %vm18570_vm0, %v18569_v1 }
 0x56c   : > { %v19693_v23 = vpop.f32.mrb[16].mxu1 }
 0x56d   : > { %v14194_v25 = vpop.f32.mrb[17].mxu1 }
 0x56e   : > { %14869 = vmatmul.mubr.msk.bf16.gmra.mrb[36].mxu0 %vm763_vm1, %v3909_v32  ;;  %v19700_v26 = vpop.f32.mrb[18].mxu1  ;;  %v4384_v25 = vld [vmem:[%s22099_s8 + $0x28] sm:$0xff] }
 0x56f   : > { %14872 = vmatprep.mubr.msk.bf16.mxu0 %vm18570_vm0, %v18569_v1  ;;  %v14195_v29 = vpop.f32.mrb[19].mxu1 }
 0x576   : > { %14873 = vmatmul.mubr.msk.bf16.gmra.mrb[40].mxu0 %vm763_vm1, %v3910_v35 }
 0x577   : > { %14876 = vmatprep.mubr.msk.bf16.mxu0 %vm18570_vm0, %v18569_v1 }
 0x57c   : > { %v19714_v39 = vpop.f32.mrb[20].mxu1 }
 0x57e   : > { %14877 = vmatmul.mubr.msk.bf16.gmra.mrb[44].mxu0 %vm763_vm1, %v3911_v38 }
 0x57f   : > { %14880 = vmatprep.mubr.msk.bf16.mxu0 %vm18570_vm0, %v18569_v1 }
 0x586   : > { %14881 = vmatmul.mubr.msk.bf16.gmra.mrb[48].mxu0 %vm763_vm1, %v3912_v41  ;;  %v14198_v41 = vpop.f32.mrb[21].mxu1 }
 0x587   : > { %14884 = vmatprep.mubr.msk.bf16.mxu0 %vm18570_vm0, %v18569_v1  ;;  %v19719_v44 = vpop.f32.mrb[22].mxu1 }
 0x588   : > { %v14199_v46 = vpop.f32.mrb[23].mxu1 }
 0x58e   : > { %14885 = vmatmul.mubr.msk.bf16.gmra.mrb[52].mxu0 %vm763_vm1, %v3913_v47 }
 0x58f   : > { %14888 = vmatprep.mubr.msk.bf16.mxu0 %vm18570_vm0, %v18569_v1 }
 0x596   : > { %14889 = vmatmul.mubr.msk.bf16.gmra.mrb[56].mxu0 %vm763_vm1, %v3914_v51 }
 0x597   : > { %14892 = vmatprep.mubr.msk.bf16.mxu0 %vm18570_vm0, %v18569_v1 }
 0x59e   : > { %14893 = vmatmul.mubr.msk.bf16.gmra.mrb[60].mxu0 %vm763_vm1, %v3915_v54  ;;  %v4381_v54 = vld [vmem:[%s22099_s8 + $0x10] sm:$0xff] }
 0x59f   : > { %14896 = vmatprep.mubr.msk.bf16.mxu0 %vm18570_vm0, %v18569_v1 }
 0x5a6   : > { %14897 = vmatmul.mubr.msk.bf16.gmra.mrb[64].mxu0 %vm763_vm1, %v3916_v57  ;;  %v19730_v57 = vpop.f32.mrb[24].mxu1 }
 0x5a7   : > { %14900 = vmatprep.mubr.msk.bf16.mxu0 %vm18570_vm0, %v18569_v1  ;;  %v14202_v59 = vpop.f32.mrb[25].mxu1 }
 0x5a8   : > { %v19735_v62 = vpop.f32.mrb[26].mxu1 }
 0x5a9   : > { %v14203_v0 = vpop.f32.mrb[27].mxu1 }
 0x5ae   : > { %14901 = vmatmul.mubr.msk.bf16.gmra.mrb[68].mxu0 %vm763_vm1, %v3917_v60 }
 0x5af   : > { %14904 = vmatprep.mubr.msk.bf16.mxu0 %vm18570_vm0, %v18569_v1 }
 0x5b6   : > { %14905 = vmatmul.mubr.msk.bf16.gmra.mrb[72].mxu0 %vm763_vm1, %v3918_v63 }
 0x5b7   : > { %14908 = vmatprep.mubr.msk.bf16.mxu0 %vm18570_vm0, %v18569_v1 }
 0x5be   : > { %14909 = vmatmul.mubr.msk.bf16.gmra.mrb[76].mxu0 %vm763_vm1, %v3919_v3 }
 0x5bf   : > { %14912 = vmatprep.mubr.msk.bf16.mxu0 %vm18570_vm0, %v18569_v1 }
 0x5c6   : > { %14913 = vmatmul.mubr.msk.bf16.gmra.mrb[80].mxu0 %vm763_vm1, %v3920_v5 }
 0x5c7   : > { %15712 = vmatprep.mubr.msk.bf16.mxu0 %vm18570_vm0, %v18569_v1 }
 0x5f9   : > { %v4035_v27 = vpop.f32.mrb[0].mxu0 }
 0x5fa   : > { %v4249_v30 = vmul.f32 %v19698_v24, %v4035_v27  ;;  %v14834_v31 = vpop.f32.mrb[1].mxu0 }
 0x5fb   : > { %v4038_v32 = vpop.f32.mrb[2].mxu0 }
 0x5fc   : > { %v4297_v33 = vadd.f32 %v19705_v28, %v4249_v30  ;;  %v4250_v34 = vmul.f32 %v19698_v24, %v4038_v32  ;;  %v14835_v35 = vpop.f32.mrb[3].mxu0  ;;  %v19752_v30 = vpop.f32.mrb[28].mxu1 }
 0x5fd   : > { %v14206_v32 = vpop.f32.mrb[29].mxu1 }
 0x5fe   : > { %v4338_v37 = vmax.f32 %v4297_v33, 0.0  ;;  %v4298_v38 = vadd.f32 %v19705_v28, %v4250_v34 }
 0x600   : > { %v4420_v42 = vmul.f32 %v4379_v36, %v4338_v37  ;;  %v4339_v43 = vmax.f32 %v4298_v38, 0.0  ;;  %v19756_v36 = vpop.f32.mrb[30].mxu1 }
 0x601   : > { %v4043_v45 = vpop.f32.mrb[4].mxu0  ;;  %v14207_v41 = vpop.f32.mrb[31].mxu1 }
 0x602   : > { %4461 = vst.msk [vmem:[#allocation2 + $0x13] sm:$0xff] %vm763_vm1, %v4420_v42  ;;  %v4421_v47 = vmul.f32 %v4380_v40, %v4339_v43  ;;  %v4251_v48 = vmul.f32 %v19698_v24, %v4043_v45  ;;  %v14838_v49 = vpop.f32.mrb[5].mxu0 }
 0x603   : > { %v4046_v50 = vpop.f32.mrb[6].mxu0 }
 0x604   : > { %4462 = vst.msk [vmem:[#allocation2 + $0x1b] sm:$0xff] %vm763_vm1, %v4421_v47  ;;  %v4299_v51 = vadd.f32 %v19705_v28, %v4251_v48  ;;  %v4252_v52 = vmul.f32 %v19698_v24, %v4046_v50  ;;  %v14839_v53 = vpop.f32.mrb[7].mxu0  ;;  %v4385_v47 = vld [vmem:[%s22099_s8 + $0x30] sm:$0xff]  ;;  %v4386_v50 = vld [vmem:[%s22099_s8 + $0x38] sm:$0xff] }
 0x606   : > { %v4340_v55 = vmax.f32 %v4299_v51, 0.0  ;;  %v4300_v56 = vadd.f32 %v19705_v28, %v4252_v52 }
 0x608   : > { %v4422_v60 = vmul.f32 %v4381_v54, %v4340_v55  ;;  %v4341_v61 = vmax.f32 %v4300_v56, 0.0  ;;  %v19771_v54 = vpop.f32.mrb[32].mxu1 }
 0x609   : > { %v4051_v63 = vpop.f32.mrb[8].mxu0  ;;  %v4570_v7 = vld [vmem:[#allocation2 + $0x11] sm:$0xff]  ;;  %v14210_v59 = vpop.f32.mrb[33].mxu1 }
 0x60a   : > { %4463 = vst.msk [vmem:[#allocation2 + $0x23] sm:$0xff] %vm763_vm1, %v4422_v60  ;;  %v4423_v2 = vmul.f32 %v4382_v58, %v4341_v61  ;;  %v4253_v3 = vmul.f32 %v19698_v24, %v4051_v63  ;;  %v14842_v4 = vpop.f32.mrb[9].mxu0  ;;  %v1283_v0 = vpop.f32.mrb[34].mxu1  ;;  %v4391_v59 = vld [vmem:[%s22099_s8 + $0x60] sm:$0xff] }
 0x60b   : > { %v4054_v5 = vpop.f32.mrb[10].mxu0  ;;  %v4571_v9 = vld [vmem:[#allocation2 + $0x19] sm:$0xff] }
 0x60c   : > { %4464 = vst.msk [vmem:[#allocation2 + $0x2b] sm:$0xff] %vm763_vm1, %v4423_v2  ;;  %v4301_v11 = vadd.f32 %v19705_v28, %v4253_v3  ;;  %v4254_v13 = vmul.f32 %v19698_v24, %v4054_v5  ;;  %v14843_v14 = vpop.f32.mrb[11].mxu0  ;;  %v4610_v16 = vpack.c.bf16 %v4571_v9, %v4570_v7  ;;  %v14211_v7 = vpop.f32.mrb[35].mxu1  ;;  %v4387_v9 = vld [vmem:[%s22099_s8 + $0x40] sm:$0xff] }
 0x60d   : > { %v4388_v14 = vld [vmem:[%s22099_s8 + $0x48] sm:$0xff] }
 0x60e   : > { %v4342_v20 = vmax.f32 %v4301_v11, 0.0  ;;  %v4302_v22 = vadd.f32 %v19705_v28, %v4254_v13  ;;  %14925 = vmatmul.mubr.msk.bf16.gmra.mrb[40].mxu1 %vm763_vm1, %v4610_v16 }
 0x60f   : > { %14928 = vmatprep.mubr.msk.bf16.mxu1 %vm18570_vm0, %v18569_v1 }
 0x610   : > { %v4424_v27 = vmul.f32 %v4383_v18, %v4342_v20  ;;  %v4343_v29 = vmax.f32 %v4302_v22, 0.0 }
 0x611   : > { %v4059_v31 = vpop.f32.mrb[12].mxu0  ;;  %v4572_v38 = vld [vmem:[#allocation2 + $0x21] sm:$0xff] }
 0x612   : > { %4465 = vst.msk [vmem:[#allocation2 + $0x33] sm:$0xff] %vm763_vm1, %v4424_v27  ;;  %v4425_v33 = vmul.f32 %v4384_v25, %v4343_v29  ;;  %v4255_v34 = vmul.f32 %v19698_v24, %v4059_v31  ;;  %v14846_v35 = vpop.f32.mrb[13].mxu0 }
 0x613   : > { %v4062_v37 = vpop.f32.mrb[14].mxu0  ;;  %v4573_v40 = vld [vmem:[#allocation2 + $0x29] sm:$0xff] }
 0x614   : > { %4466 = vst.msk [vmem:[#allocation2 + $0x3b] sm:$0xff] %vm763_vm1, %v4425_v33  ;;  %v4303_v42 = vadd.f32 %v19705_v28, %v4255_v34  ;;  %v4256_v43 = vmul.f32 %v19698_v24, %v4062_v37  ;;  %v14847_v45 = vpop.f32.mrb[15].mxu0  ;;  %v4611_v46 = vpack.c.bf16 %v4573_v40, %v4572_v38  ;;  %v4389_v38 = vld [vmem:[%s22099_s8 + $0x50] sm:$0xff] }
 0x616   : > { %v4344_v48 = vmax.f32 %v4303_v42, 0.0  ;;  %v4304_v49 = vadd.f32 %v19705_v28, %v4256_v43  ;;  %14929 = vmatmul.mubr.msk.bf16.gmra.mrb[44].mxu1 %vm763_vm1, %v4611_v46  ;;  %v4390_v42 = vld [vmem:[%s22099_s8 + $0x58] sm:$0xff] }
 0x617   : > { %14932 = vmatprep.mubr.msk.bf16.mxu1 %vm18570_vm0, %v18569_v1 }
 0x618   : > { %v4426_v51 = vmul.f32 %v4385_v47, %v4344_v48  ;;  %v4345_v52 = vmax.f32 %v4304_v49, 0.0 }
 0x619   : > { %v4067_v53 = vpop.f32.mrb[16].mxu0  ;;  %v4574_v61 = vld [vmem:[#allocation2 + $0x31] sm:$0xff] }
 0x61a   : > { %4467 = vst.msk [vmem:[#allocation2 + $0x43] sm:$0xff] %vm763_vm1, %v4426_v51  ;;  %v4427_v55 = vmul.f32 %v4386_v50, %v4345_v52  ;;  %v4257_v56 = vmul.f32 %v19698_v24, %v4067_v53  ;;  %v14850_v58 = vpop.f32.mrb[17].mxu0 }
 0x61b   : > { %v4070_v60 = vpop.f32.mrb[18].mxu0  ;;  %v4575_v63 = vld [vmem:[#allocation2 + $0x39] sm:$0xff] }
 0x61c   : > { %4468 = vst.msk [vmem:[#allocation2 + $0x4b] sm:$0xff] %vm763_vm1, %v4427_v55  ;;  %v4305_v2 = vadd.f32 %v19705_v28, %v4257_v56  ;;  %v4258_v3 = vmul.f32 %v19698_v24, %v4070_v60  ;;  %v14851_v4 = vpop.f32.mrb[19].mxu0  ;;  %v4612_v5 = vpack.c.bf16 %v4575_v63, %v4574_v61  ;;  %v4392_v63 = vld [vmem:[%s22099_s8 + $0x68] sm:$0xff] }
 0x61e   : > { %v4346_v11 = vmax.f32 %v4305_v2, 0.0  ;;  %v4306_v13 = vadd.f32 %v19705_v28, %v4258_v3  ;;  %14933 = vmatmul.mubr.msk.bf16.gmra.mrb[48].mxu1 %vm763_vm1, %v4612_v5 }
 0x61f   : > { %14936 = vmatprep.mubr.msk.bf16.mxu1 %vm18570_vm0, %v18569_v1 }
 0x620   : > { %v4428_v16 = vmul.f32 %v4387_v9, %v4346_v11  ;;  %v4347_v18 = vmax.f32 %v4306_v13, 0.0 }
 0x621   : > { %v4075_v20 = vpop.f32.mrb[20].mxu0  ;;  %v4576_v31 = vld [vmem:[#allocation2 + $0x41] sm:$0xff] }
 0x622   : > { %4469 = vst.msk [vmem:[#allocation2 + $0x53] sm:$0xff] %vm763_vm1, %v4428_v16  ;;  %v4429_v22 = vmul.f32 %v4388_v14, %v4347_v18  ;;  %v4259_v25 = vmul.f32 %v19698_v24, %v4075_v20  ;;  %v14854_v27 = vpop.f32.mrb[21].mxu0 }
 0x623   : > { %v4078_v29 = vpop.f32.mrb[22].mxu0  ;;  %v4577_v32 = vld [vmem:[#allocation2 + $0x49] sm:$0xff] }
 0x624   : > { %4470 = vst.msk [vmem:[#allocation2 + $0x5b] sm:$0xff] %vm763_vm1, %v4429_v22  ;;  %v4307_v33 = vadd.f32 %v19705_v28, %v4259_v25  ;;  %v4260_v34 = vmul.f32 %v19698_v24, %v4078_v29  ;;  %v14855_v35 = vpop.f32.mrb[23].mxu0  ;;  %v4613_v37 = vpack.c.bf16 %v4577_v32, %v4576_v31  ;;  %v4393_v22 = vld [vmem:[%s22099_s8 + $0x70] sm:$0xff]  ;;  %v4394_v29 = vld [vmem:[%s22099_s8 + $0x78] sm:$0xff] }
 0x626   : > { %v4348_v40 = vmax.f32 %v4307_v33, 0.0  ;;  %v4308_v41 = vadd.f32 %v19705_v28, %v4260_v34  ;;  %14937 = vmatmul.mubr.msk.bf16.gmra.mrb[52].mxu1 %vm763_vm1, %v4613_v37 }
 0x627   : > { %14940 = vmatprep.mubr.msk.bf16.mxu1 %vm18570_vm0, %v18569_v1 }
 0x628   : > { %v4430_v43 = vmul.f32 %v4389_v38, %v4348_v40  ;;  %v4349_v45 = vmax.f32 %v4308_v41, 0.0 }
 0x629   : > { %v4083_v46 = vpop.f32.mrb[24].mxu0  ;;  %v4578_v51 = vld [vmem:[#allocation2 + $0x51] sm:$0xff] }
 0x62a   : > { %4471 = vst.msk [vmem:[#allocation2 + $0x63] sm:$0xff] %vm763_vm1, %v4430_v43  ;;  %v4431_v47 = vmul.f32 %v4390_v42, %v4349_v45  ;;  %v4261_v48 = vmul.f32 %v19698_v24, %v4083_v46  ;;  %v14858_v49 = vpop.f32.mrb[25].mxu0 }
 0x62b   : > { %v4086_v50 = vpop.f32.mrb[26].mxu0  ;;  %v4579_v52 = vld [vmem:[#allocation2 + $0x59] sm:$0xff] }
 0x62c   : > { %4472 = vst.msk [vmem:[#allocation2 + $0x6b] sm:$0xff] %vm763_vm1, %v4431_v47  ;;  %v4309_v53 = vadd.f32 %v19705_v28, %v4261_v48  ;;  %v4262_v55 = vmul.f32 %v19698_v24, %v4086_v50  ;;  %v14859_v56 = vpop.f32.mrb[27].mxu0  ;;  %v4614_v58 = vpack.c.bf16 %v4579_v52, %v4578_v51  ;;  %v4395_v47 = vld [vmem:[%s22099_s8 + $0x80] sm:$0xff]  ;;  %v4396_v50 = vld [vmem:[%s22099_s8 + $0x88] sm:$0xff] }
 0x62e   : > { %v4350_v60 = vmax.f32 %v4309_v53, 0.0  ;;  %v4310_v61 = vadd.f32 %v19705_v28, %v4262_v55  ;;  %14941 = vmatmul.mubr.msk.bf16.gmra.mrb[56].mxu1 %vm763_vm1, %v4614_v58 }
 0x62f   : > { %14944 = vmatprep.mubr.msk.bf16.mxu1 %vm18570_vm0, %v18569_v1 }
 0x630   : > { %v4432_v0 = vmul.f32 %v4391_v59, %v4350_v60  ;;  %v4351_v2 = vmax.f32 %v4310_v61, 0.0 }
 0x631   : > { %v4091_v3 = vpop.f32.mrb[28].mxu0  ;;  %v4580_v11 = vld [vmem:[#allocation2 + $0x61] sm:$0xff] }
 0x632   : > { %4473 = vst.msk [vmem:[#allocation2 + $0x73] sm:$0xff] %vm763_vm1, %v4432_v0  ;;  %v4433_v4 = vmul.f32 %v4392_v63, %v4351_v2  ;;  %v4263_v5 = vmul.f32 %v19698_v24, %v4091_v3  ;;  %v14862_v7 = vpop.f32.mrb[29].mxu0 }
 0x633   : > { %v4094_v9 = vpop.f32.mrb[30].mxu0  ;;  %v4581_v13 = vld [vmem:[#allocation2 + $0x69] sm:$0xff] }
 0x634   : > { %4474 = vst.msk [vmem:[#allocation2 + $0x7b] sm:$0xff] %vm763_vm1, %v4433_v4  ;;  %v4311_v14 = vadd.f32 %v19705_v28, %v4263_v5  ;;  %v4264_v16 = vmul.f32 %v19698_v24, %v4094_v9  ;;  %v14863_v18 = vpop.f32.mrb[31].mxu0  ;;  %v4615_v20 = vpack.c.bf16 %v4581_v13, %v4580_v11  ;;  %v4397_v4 = vld [vmem:[%s22099_s8 + $0x90] sm:$0xff]  ;;  %v4398_v9 = vld [vmem:[%s22099_s8 + $0x98] sm:$0xff] }
 0x636   : > { %v4352_v25 = vmax.f32 %v4311_v14, 0.0  ;;  %v4312_v27 = vadd.f32 %v19705_v28, %v4264_v16  ;;  %14945 = vmatmul.mubr.msk.bf16.gmra.mrb[60].mxu1 %vm763_vm1, %v4615_v20 }
 0x637   : > { %14948 = vmatprep.mubr.msk.bf16.mxu1 %vm18570_vm0, %v18569_v1 }
 0x638   : > { %v4434_v31 = vmul.f32 %v4393_v22, %v4352_v25  ;;  %v4353_v32 = vmax.f32 %v4312_v27, 0.0 }
 0x639   : > { %v4099_v33 = vpop.f32.mrb[32].mxu0  ;;  %v4582_v40 = vld [vmem:[#allocation2 + $0x71] sm:$0xff] }
 0x63a   : > { %4475 = vst.msk [vmem:[#allocation2 + $0x83] sm:$0xff] %vm763_vm1, %v4434_v31  ;;  %v4435_v34 = vmul.f32 %v4394_v29, %v4353_v32  ;;  %v4265_v35 = vmul.f32 %v19698_v24, %v4099_v33  ;;  %v14866_v37 = vpop.f32.mrb[33].mxu0 }
 0x63b   : > { %v4102_v38 = vpop.f32.mrb[34].mxu0  ;;  %v4583_v41 = vld [vmem:[#allocation2 + $0x79] sm:$0xff] }
 0x63c   : > { %4476 = vst.msk [vmem:[#allocation2 + $0x8b] sm:$0xff] %vm763_vm1, %v4435_v34  ;;  %v4313_v42 = vadd.f32 %v19705_v28, %v4265_v35  ;;  %v4266_v43 = vmul.f32 %v19698_v24, %v4102_v38  ;;  %v14867_v45 = vpop.f32.mrb[35].mxu0  ;;  %v4616_v46 = vpack.c.bf16 %v4583_v41, %v4582_v40  ;;  %v4399_v34 = vld [vmem:[%s22099_s8 + $0xa0] sm:$0xff]  ;;  %v4400_v38 = vld [vmem:[%s22099_s8 + $0xa8] sm:$0xff] }
 0x63e   : > { %v4354_v48 = vmax.f32 %v4313_v42, 0.0  ;;  %v4314_v49 = vadd.f32 %v19705_v28, %v4266_v43  ;;  %14949 = vmatmul.mubr.msk.bf16.gmra.mrb[64].mxu1 %vm763_vm1, %v4616_v46 }
 0x63f   : > { %14952 = vmatprep.mubr.msk.bf16.mxu1 %vm18570_vm0, %v18569_v1 }
 0x640   : > { %v4436_v51 = vmul.f32 %v4395_v47, %v4354_v48  ;;  %v4355_v52 = vmax.f32 %v4314_v49, 0.0 }
 0x641   : > { %v4107_v53 = vpop.f32.mrb[36].mxu0  ;;  %v4584_v60 = vld [vmem:[#allocation2 + $0x81] sm:$0xff] }
 0x642   : > { %4477 = vst.msk [vmem:[#allocation2 + $0x93] sm:$0xff] %vm763_vm1, %v4436_v51  ;;  %v4437_v55 = vmul.f32 %v4396_v50, %v4355_v52  ;;  %v4267_v56 = vmul.f32 %v19698_v24, %v4107_v53  ;;  %v14870_v58 = vpop.f32.mrb[37].mxu0 }
 0x643   : > { %v4110_v59 = vpop.f32.mrb[38].mxu0  ;;  %v4585_v61 = vld [vmem:[#allocation2 + $0x89] sm:$0xff] }
 0x644   : > { %4478 = vst.msk [vmem:[#allocation2 + $0x9b] sm:$0xff] %vm763_vm1, %v4437_v55  ;;  %v4315_v63 = vadd.f32 %v19705_v28, %v4267_v56  ;;  %v4268_v0 = vmul.f32 %v19698_v24, %v4110_v59  ;;  %v14871_v2 = vpop.f32.mrb[39].mxu0  ;;  %v4617_v3 = vpack.c.bf16 %v4585_v61, %v4584_v60  ;;  %v4401_v55 = vld [vmem:[%s22099_s8 + $0xb0] sm:$0xff]  ;;  %v4402_v59 = vld [vmem:[%s22099_s8 + $0xb8] sm:$0xff] }
 0x646   : > { %v4356_v5 = vmax.f32 %v4315_v63, 0.0  ;;  %v4316_v7 = vadd.f32 %v19705_v28, %v4268_v0  ;;  %14953 = vmatmul.mubr.msk.bf16.gmra.mrb[68].mxu1 %vm763_vm1, %v4617_v3 }
 0x647   : > { %14956 = vmatprep.mubr.msk.bf16.mxu1 %vm18570_vm0, %v18569_v1 }
 0x648   : > { %v4438_v11 = vmul.f32 %v4397_v4, %v4356_v5  ;;  %v4357_v13 = vmax.f32 %v4316_v7, 0.0 }
 0x649   : > { %v4115_v14 = vpop.f32.mrb[40].mxu0  ;;  %v4586_v25 = vld [vmem:[#allocation2 + $0x91] sm:$0xff] }
 0x64a   : > { %4479 = vst.msk [vmem:[#allocation2 + $0xa3] sm:$0xff] %vm763_vm1, %v4438_v11  ;;  %v4439_v16 = vmul.f32 %v4398_v9, %v4357_v13  ;;  %v4269_v18 = vmul.f32 %v19698_v24, %v4115_v14  ;;  %v14874_v20 = vpop.f32.mrb[41].mxu0 }
 0x64b   : > { %v4118_v22 = vpop.f32.mrb[42].mxu0  ;;  %v4587_v27 = vld [vmem:[#allocation2 + $0x99] sm:$0xff] }
 0x64c   : > { %4480 = vst.msk [vmem:[#allocation2 + $0xab] sm:$0xff] %vm763_vm1, %v4439_v16  ;;  %v4317_v29 = vadd.f32 %v19705_v28, %v4269_v18  ;;  %v4270_v31 = vmul.f32 %v19698_v24, %v4118_v22  ;;  %v14875_v32 = vpop.f32.mrb[43].mxu0  ;;  %v4618_v33 = vpack.c.bf16 %v4587_v27, %v4586_v25 }
 0x64e   : > { %v4358_v35 = vmax.f32 %v4317_v29, 0.0  ;;  %v4318_v37 = vadd.f32 %v19705_v28, %v4270_v31  ;;  %14957 = vmatmul.mubr.msk.bf16.gmra.mrb[72].mxu1 %vm763_vm1, %v4618_v33 }
 0x64f   : > { %14960 = vmatprep.mubr.msk.bf16.mxu1 %vm18570_vm0, %v18569_v1 }
 0x650   : > { %v4440_v40 = vmul.f32 %v4399_v34, %v4358_v35  ;;  %v4359_v41 = vmax.f32 %v4318_v37, 0.0 }
 0x651   : > { %v4123_v42 = vpop.f32.mrb[44].mxu0  ;;  %v4588_v48 = vld [vmem:[#allocation2 + $0xa1] sm:$0xff] }
 0x652   : > { %4481 = vst.msk [vmem:[#allocation2 + $0xb3] sm:$0xff] %vm763_vm1, %v4440_v40  ;;  %v4441_v43 = vmul.f32 %v4400_v38, %v4359_v41  ;;  %v4271_v45 = vmul.f32 %v19698_v24, %v4123_v42  ;;  %v14878_v46 = vpop.f32.mrb[45].mxu0 }
 0x653   : > { %v4126_v47 = vpop.f32.mrb[46].mxu0  ;;  %v4589_v49 = vld [vmem:[#allocation2 + $0xa9] sm:$0xff] }
 0x654   : > { %4482 = vst.msk [vmem:[#allocation2 + $0xbb] sm:$0xff] %vm763_vm1, %v4441_v43  ;;  %v4319_v50 = vadd.f32 %v19705_v28, %v4271_v45  ;;  %v4272_v51 = vmul.f32 %v19698_v24, %v4126_v47  ;;  %v14879_v52 = vpop.f32.mrb[47].mxu0  ;;  %v4619_v53 = vpack.c.bf16 %v4589_v49, %v4588_v48  ;;  %v4406_v47 = vld [vmem:[%s22099_s8 + $0xd8] sm:$0xff] }
 0x656   : > { %v4360_v56 = vmax.f32 %v4319_v50, 0.0  ;;  %v4320_v58 = vadd.f32 %v19705_v28, %v4272_v51  ;;  %14961 = vmatmul.mubr.msk.bf16.gmra.mrb[76].mxu1 %vm763_vm1, %v4619_v53 }
 0x657   : > { %14964 = vmatprep.mubr.msk.bf16.mxu1 %vm18570_vm0, %v18569_v1 }
 0x658   : > { %v4442_v60 = vmul.f32 %v4401_v55, %v4360_v56  ;;  %v4361_v61 = vmax.f32 %v4320_v58, 0.0 }
 0x659   : > { %v4131_v63 = vpop.f32.mrb[48].mxu0  ;;  %v4590_v5 = vld [vmem:[#allocation2 + $0xb1] sm:$0xff] }
 0x65a   : > { %4483 = vst.msk [vmem:[#allocation2 + $0xc3] sm:$0xff] %vm763_vm1, %v4442_v60  ;;  %v4443_v0 = vmul.f32 %v4402_v59, %v4361_v61  ;;  %v16488_v2 = vadd.f32 %v4131_v63, %v19673_v6  ;;  %v14882_v3 = vpop.f32.mrb[49].mxu0  ;;  %v4403_v6 = vld [vmem:[%s22099_s8 + $0xc0] sm:$0xff] }
 0x65b   : > { %v4134_v4 = vpop.f32.mrb[50].mxu0  ;;  %v4591_v7 = vld [vmem:[#allocation2 + $0xb9] sm:$0xff] }
 0x65c   : > { %4484 = vst.msk [vmem:[#allocation2 + $0xcb] sm:$0xff] %vm763_vm1, %v4443_v0  ;;  %v4273_v9 = vmul.f32 %v16488_v2, %v19698_v24  ;;  %v16489_v11 = vadd.f32 %v4134_v4, %v19675_v8  ;;  %v14883_v13 = vpop.f32.mrb[51].mxu0  ;;  %v4620_v14 = vpack.c.bf16 %v4591_v7, %v4590_v5  ;;  %v4404_v8 = vld [vmem:[%s22099_s8 + $0xc8] sm:$0xff] }
 0x65e   : > { %v4321_v16 = vadd.f32 %v19705_v28, %v4273_v9  ;;  %v4274_v18 = vmul.f32 %v16489_v11, %v19698_v24  ;;  %14965 = vmatmul.mubr.msk.bf16.gmra.mrb[80].mxu1 %vm763_vm1, %v4620_v14 }
 0x65f   : > { %14968 = vmatprep.mubr.msk.bf16.mxu1 %vm18570_vm0, %v18569_v1 }
 0x660   : > { %v4362_v20 = vmax.f32 %v4321_v16, 0.0  ;;  %v4322_v22 = vadd.f32 %v19705_v28, %v4274_v18 }
 0x661   : > { %v4139_v25 = vpop.f32.mrb[52].mxu0  ;;  %v4592_v34 = vld [vmem:[#allocation2 + $0xc1] sm:$0xff] }
 0x662   : > { %v4444_v27 = vmul.f32 %v4403_v6, %v4362_v20  ;;  %v4363_v29 = vmax.f32 %v4322_v22, 0.0  ;;  %v16490_v31 = vadd.f32 %v4139_v25, %v19677_v10  ;;  %v14886_v32 = vpop.f32.mrb[53].mxu0  ;;  %v4405_v10 = vld [vmem:[%s22099_s8 + $0xd0] sm:$0xff] }
 0x663   : > { %v4142_v33 = vpop.f32.mrb[54].mxu0  ;;  %v4593_v35 = vld [vmem:[#allocation2 + $0xc9] sm:$0xff] }
 0x664   : > { %4485 = vst.msk [vmem:[#allocation2 + $0xd3] sm:$0xff] %vm763_vm1, %v4444_v27  ;;  %v4445_v37 = vmul.f32 %v4404_v8, %v4363_v29  ;;  %v4275_v38 = vmul.f32 %v16490_v31, %v19698_v24  ;;  %v16491_v40 = vadd.f32 %v4142_v33, %v19679_v12  ;;  %v14887_v41 = vpop.f32.mrb[55].mxu0  ;;  %v4621_v42 = vpack.c.bf16 %v4593_v35, %v4592_v34 }
 0x666   : > { %4486 = vst.msk [vmem:[#allocation2 + $0xdb] sm:$0xff] %vm763_vm1, %v4445_v37  ;;  %v4323_v43 = vadd.f32 %v19705_v28, %v4275_v38  ;;  %v4276_v45 = vmul.f32 %v16491_v40, %v19698_v24  ;;  %14969 = vmatmul.mubr.msk.bf16.gmra.mrb[84].mxu1 %vm763_vm1, %v4621_v42 }
 0x667   : > { %14972 = vmatprep.mubr.msk.bf16.mxu1 %vm18570_vm0, %v18569_v1 }
 0x668   : > { %v4364_v46 = vmax.f32 %v4323_v43, 0.0  ;;  %v4324_v12 = vadd.f32 %v19705_v28, %v4276_v45 }
 0x669   : > { %v4147_v48 = vpop.f32.mrb[56].mxu0 }
 0x66a   : > { %v4446_v49 = vmul.f32 %v4405_v10, %v4364_v46  ;;  %v4365_v50 = vmax.f32 %v4324_v12, 0.0  ;;  %v16492_v51 = vadd.f32 %v4147_v48, %v19684_v15  ;;  %v14890_v52 = vpop.f32.mrb[57].mxu0  ;;  %v4407_v15 = vld [vmem:[%s22099_s8 + $0xe0] sm:$0xff] }
 0x66b   : > { %v4150_v53 = vpop.f32.mrb[58].mxu0  ;;  %v4594_v60 = vld [vmem:[#allocation2 + $0xd1] sm:$0xff] }
 0x66c   : > { %4487 = vst.msk [vmem:[#allocation2 + $0xe3] sm:$0xff] %vm763_vm1, %v4446_v49  ;;  %v4447_v55 = vmul.f32 %v4406_v47, %v4365_v50  ;;  %v4277_v56 = vmul.f32 %v16492_v51, %v19698_v24  ;;  %v16493_v58 = vadd.f32 %v4150_v53, %v19686_v17  ;;  %v14891_v59 = vpop.f32.mrb[59].mxu0  ;;  %v4408_v17 = vld [vmem:[%s22099_s8 + $0xe8] sm:$0xff] }
 0x66d   : > { %v4595_v61 = vld [vmem:[#allocation2 + $0xd9] sm:$0xff] }
 0x66e   : > { %4488 = vst.msk [vmem:[#allocation2 + $0xeb] sm:$0xff] %vm763_vm1, %v4447_v55  ;;  %v4325_v63 = vadd.f32 %v19705_v28, %v4277_v56  ;;  %v4278_v0 = vmul.f32 %v16493_v58, %v19698_v24  ;;  %v4622_v2 = vpack.c.bf16 %v4595_v61, %v4594_v60 }
 0x670   : > { %v4366_v3 = vmax.f32 %v4325_v63, 0.0  ;;  %v4326_v4 = vadd.f32 %v19705_v28, %v4278_v0  ;;  %14973 = vmatmul.mubr.msk.bf16.gmra.mrb[88].mxu1 %vm763_vm1, %v4622_v2 }
 0x671   : > { %v4155_v5 = vpop.f32.mrb[60].mxu0  ;;  %14976 = vmatprep.mubr.msk.bf16.mxu1 %vm18570_vm0, %v18569_v1 }
 0x672   : > { %v4448_v7 = vmul.f32 %v4407_v15, %v4366_v3  ;;  %v4367_v9 = vmax.f32 %v4326_v4, 0.0  ;;  %v16494_v11 = vadd.f32 %v4155_v5, %v19689_v19  ;;  %v14894_v13 = vpop.f32.mrb[61].mxu0  ;;  %v4409_v19 = vld [vmem:[%s22099_s8 + $0xf0] sm:$0xff] }
 0x673   : > { %v4158_v14 = vpop.f32.mrb[62].mxu0  ;;  %v4596_v22 = vld [vmem:[#allocation2 + $0xe1] sm:$0xff] }
 0x674   : > { %4489 = vst.msk [vmem:[#allocation2 + $0xf3] sm:$0xff] %vm763_vm1, %v4448_v7  ;;  %v4449_v16 = vmul.f32 %v4408_v17, %v4367_v9  ;;  %v4279_v18 = vmul.f32 %v16494_v11, %v19698_v24  ;;  %v16495_v6 = vadd.f32 %v4158_v14, %v19691_v21  ;;  %v14895_v20 = vpop.f32.mrb[63].mxu0  ;;  %v4410_v21 = vld [vmem:[%s22099_s8 + $0xf8] sm:$0xff] }
 0x675   : > { %v4597_v8 = vld [vmem:[#allocation2 + $0xe9] sm:$0xff] }
 0x676   : > { %4490 = vst.msk [vmem:[#allocation2 + $0xfb] sm:$0xff] %vm763_vm1, %v4449_v16  ;;  %v4327_v25 = vadd.f32 %v19705_v28, %v4279_v18  ;;  %v4280_v27 = vmul.f32 %v16495_v6, %v19698_v24  ;;  %v4623_v29 = vpack.c.bf16 %v4597_v8, %v4596_v22 }
 0x678   : > { %v4368_v31 = vmax.f32 %v4327_v25, 0.0  ;;  %v4328_v32 = vadd.f32 %v19705_v28, %v4280_v27  ;;  %14977 = vmatmul.mubr.msk.bf16.gmra.mrb[92].mxu1 %vm763_vm1, %v4623_v29 }
 0x679   : > { %v4163_v33 = vpop.f32.mrb[64].mxu0  ;;  %14980 = vmatprep.mubr.msk.bf16.mxu1 %vm18570_vm0, %v18569_v1 }
 0x67a   : > { %v4450_v34 = vmul.f32 %v4409_v19, %v4368_v31  ;;  %v4369_v35 = vmax.f32 %v4328_v32, 0.0  ;;  %v16496_v37 = vadd.f32 %v4163_v33, %v19693_v23  ;;  %v14898_v38 = vpop.f32.mrb[65].mxu0  ;;  %v4411_v23 = vld [vmem:[%s22099_s8 + $0x100] sm:$0xff] }
 0x67b   : > { %v4166_v40 = vpop.f32.mrb[66].mxu0  ;;  %v4598_v10 = vld [vmem:[#allocation2 + $0xf1] sm:$0xff] }
 0x67c   : > { %4491 = vst.msk [vmem:[#allocation2 + $0x103] sm:$0xff] %vm763_vm1, %v4450_v34  ;;  %v4451_v41 = vmul.f32 %v4410_v21, %v4369_v35  ;;  %v4281_v42 = vmul.f32 %v16496_v37, %v19698_v24  ;;  %v16497_v43 = vadd.f32 %v4166_v40, %v19700_v26  ;;  %v14899_v45 = vpop.f32.mrb[67].mxu0  ;;  %v4412_v26 = vld [vmem:[%s22099_s8 + $0x108] sm:$0xff] }
 0x67d   : > { %v4599_v46 = vld [vmem:[#allocation2 + $0xf9] sm:$0xff] }
 0x67e   : > { %4492 = vst.msk [vmem:[#allocation2 + $0x10b] sm:$0xff] %vm763_vm1, %v4451_v41  ;;  %v4329_v12 = vadd.f32 %v19705_v28, %v4281_v42  ;;  %v4282_v47 = vmul.f32 %v16497_v43, %v19698_v24  ;;  %v4624_v48 = vpack.c.bf16 %v4599_v46, %v4598_v10 }
 0x680   : > { %v4370_v49 = vmax.f32 %v4329_v12, 0.0  ;;  %v4330_v50 = vadd.f32 %v19705_v28, %v4282_v47  ;;  %14981 = vmatmul.mubr.msk.bf16.gmra.mrb[96].mxu1 %vm763_vm1, %v4624_v48 }
 0x681   : > { %v4171_v51 = vpop.f32.mrb[68].mxu0  ;;  %14984 = vmatprep.mubr.msk.bf16.mxu1 %vm18570_vm0, %v18569_v1 }
 0x682   : > { %v4452_v52 = vmul.f32 %v4411_v23, %v4370_v49  ;;  %v4371_v53 = vmax.f32 %v4330_v50, 0.0  ;;  %v16498_v55 = vadd.f32 %v4171_v51, %v19714_v39  ;;  %v14902_v56 = vpop.f32.mrb[69].mxu0  ;;  %v4413_v39 = vld [vmem:[%s22099_s8 + $0x110] sm:$0xff] }
 0x683   : > { %v4174_v58 = vpop.f32.mrb[70].mxu0  ;;  %v4600_v0 = vld [vmem:[#allocation2 + $0x101] sm:$0xff] }
 0x684   : > { %4493 = vst.msk [vmem:[#allocation2 + $0x113] sm:$0xff] %vm763_vm1, %v4452_v52  ;;  %v4453_v59 = vmul.f32 %v4412_v26, %v4371_v53  ;;  %v4283_v60 = vmul.f32 %v16498_v55, %v19698_v24  ;;  %v16499_v61 = vadd.f32 %v4174_v58, %v19719_v44  ;;  %v14903_v63 = vpop.f32.mrb[71].mxu0  ;;  %v4414_v44 = vld [vmem:[%s22099_s8 + $0x118] sm:$0xff] }
 0x685   : > { %v4601_v2 = vld [vmem:[#allocation2 + $0x109] sm:$0xff] }
 0x686   : > { %4494 = vst.msk [vmem:[#allocation2 + $0x11b] sm:$0xff] %vm763_vm1, %v4453_v59  ;;  %v4331_v15 = vadd.f32 %v19705_v28, %v4283_v60  ;;  %v4284_v3 = vmul.f32 %v16499_v61, %v19698_v24  ;;  %v4625_v4 = vpack.c.bf16 %v4601_v2, %v4600_v0  ;;  %v4419_v0 = vld [vmem:[%s22099_s8 + $0x140] sm:$0xf] }
 0x688   : > { %v4372_v17 = vmax.f32 %v4331_v15, 0.0  ;;  %v4332_v5 = vadd.f32 %v19705_v28, %v4284_v3  ;;  %14985 = vmatmul.mubr.msk.bf16.gmra.mrb[100].mxu1 %vm763_vm1, %v4625_v4  ;;  %v4503_v3 = vld [vmem:[#allocation2 + $0x8] sm:$0xff] }
 0x689   : > { %v4179_v7 = vpop.f32.mrb[72].mxu0  ;;  %14988 = vmatprep.mubr.msk.bf16.mxu1 %vm18570_vm0, %v18569_v1 }
 0x68a   : > { %v4454_v9 = vmul.f32 %v4413_v39, %v4372_v17  ;;  %v4373_v11 = vmax.f32 %v4332_v5, 0.0  ;;  %v16500_v13 = vadd.f32 %v4179_v7, %v19730_v57  ;;  %v14906_v14 = vpop.f32.mrb[73].mxu0  ;;  %v4415_v57 = vld [vmem:[%s22099_s8 + $0x120] sm:$0xff]  ;;  %v18422_v17 = vld [vmem:[%s22096_s27 + $0x28] sm:$0xff]   ;;  %v4505_v5 = vld [vmem:[#allocation2 + $0x18] sm:$0xff] }
 0x68b   : > { %v4182_v16 = vpop.f32.mrb[74].mxu0  ;;  %v4602_v8 = vld [vmem:[#allocation2 + $0x111] sm:$0xff]  ;;  %v18421_v39 = vld [vmem:[%s22096_s27 + $0x20] sm:$0xff]  }
 0x68c   : > { %4495 = vst.msk [vmem:[#allocation2 + $0x123] sm:$0xff] %vm763_vm1, %v4454_v9  ;;  %v4455_v18 = vmul.f32 %v4414_v44, %v4373_v11  ;;  %v4285_v6 = vmul.f32 %v16500_v13, %v19698_v24  ;;  %v16501_v20 = vadd.f32 %v4182_v16, %v19735_v62  ;;  %v14907_v22 = vpop.f32.mrb[75].mxu0  ;;  %v4416_v62 = vld [vmem:[%s22099_s8 + $0x128] sm:$0xff]  ;;  %v4504_v44 = vld [vmem:[#allocation2 + $0x10] sm:$0xff]  ;;  %v4506_v11 = vld [vmem:[#allocation2 + $0x20] sm:$0xff] }
 0x68d   : > { %v4603_v25 = vld [vmem:[#allocation2 + $0x119] sm:$0xff]  ;;  %v4544_v7 = vpack.c.bf16 %v4505_v5, %v4504_v44  ;;  %v4507_v9 = vld [vmem:[#allocation2 + $0x28] sm:$0xff]  ;;  %v4508_v16 = vld [vmem:[#allocation2 + $0x30] sm:$0xff] }
 0x68e   : > { %4496 = vst.msk [vmem:[#allocation2 + $0x12b] sm:$0xff] %vm763_vm1, %v4455_v18  ;;  %v4333_v27 = vadd.f32 %v19705_v28, %v4285_v6  ;;  %v4286_v29 = vmul.f32 %v16501_v20, %v19698_v24  ;;  %v4626_v19 = vpack.c.bf16 %v4603_v25, %v4602_v8  ;;  %v4545_v13 = vpack.c.bf16 %v4507_v9, %v4506_v11  ;;  %v4509_v14 = vld [vmem:[#allocation2 + $0x38] sm:$0xff]  ;;  %v4511_v6 = vld [vmem:[#allocation2 + $0x48] sm:$0xff]  ;;  %v4510_v20 = vld [vmem:[#allocation2 + $0x40] sm:$0xff] }
 0x68f   : > { %v4546_v18 = vpack.c.bf16 %v4509_v14, %v4508_v16  ;;  %v4547_v22 = vpack.c.bf16 %v4511_v6, %v4510_v20  ;;  %v4513_v8 = vld [vmem:[#allocation2 + $0x58] sm:$0xff]  ;;  %v4512_v25 = vld [vmem:[#allocation2 + $0x50] sm:$0xff] }
 0x690   : > { %v4374_v31 = vmax.f32 %v4333_v27, 0.0  ;;  %v4334_v32 = vadd.f32 %v19705_v28, %v4286_v29  ;;  %14989 = vmatmul.mubr.msk.bf16.gmra.mrb[104].mxu1 %vm763_vm1, %v4626_v19  ;;  %v4548_v27 = vpack.c.bf16 %v4513_v8, %v4512_v25  ;;  %v4515_v29 = vld [vmem:[#allocation2 + $0x68] sm:$0xff]  ;;  %v4514_v19 = vld [vmem:[#allocation2 + $0x60] sm:$0xff]  ;;  %v18424_v5 = vld [vmem:[%s22096_s27 + $0x38] sm:$0xff]  }
 0x691   : > { %v4187_v21 = vpop.f32.mrb[76].mxu0  ;;  %14992 = vmatprep.mubr.msk.bf16.mxu1 %vm18570_vm0, %v18569_v1  ;;  %v5188_v44 = vld [vmem:[#allocation2 + $0x1a] sm:$0xff]  ;;  %v5190_v11 = vld [vmem:[#allocation2 + $0x2a] sm:$0xff] }
 0x692   : > { %v4456_v33 = vmul.f32 %v4415_v57, %v4374_v31  ;;  %v4375_v34 = vmax.f32 %v4334_v32, 0.0  ;;  %v16502_v35 = vadd.f32 %v4187_v21, %v19752_v30  ;;  %v14910_v37 = vpop.f32.mrb[77].mxu0  ;;  %v4417_v30 = vld [vmem:[%s22099_s8 + $0x130] sm:$0xff]  ;;  %v4549_v57 = vpack.c.bf16 %v4515_v29, %v4514_v19  ;;  %v4517_v31 = vld [vmem:[#allocation2 + $0x78] sm:$0xff]  ;;  %v4519_v21 = vld [vmem:[#allocation2 + $0x88] sm:$0xff] }
 0x693   : > { %v4190_v38 = vpop.f32.mrb[78].mxu0  ;;  %v4604_v45 = vld [vmem:[#allocation2 + $0x121] sm:$0xff]  ;;  %v4516_v32 = vld [vmem:[#allocation2 + $0x70] sm:$0xff] }
 0x694   : > { %4497 = vst.msk [vmem:[#allocation2 + $0x133] sm:$0xff] %vm763_vm1, %v4456_v33  ;;  %v4457_v40 = vmul.f32 %v4416_v62, %v4375_v34  ;;  %v4287_v41 = vmul.f32 %v16502_v35, %v19698_v24  ;;  %v16503_v42 = vadd.f32 %v4190_v38, %v19756_v36  ;;  %v14911_v43 = vpop.f32.mrb[79].mxu0  ;;  %v4418_v36 = vld [vmem:[%s22099_s8 + $0x138] sm:$0xff]  ;;  %v4550_v62 = vpack.c.bf16 %v4517_v31, %v4516_v32  ;;  %v4518_v33 = vld [vmem:[#allocation2 + $0x80] sm:$0xff]  ;;  %v4520_v37 = vld [vmem:[#allocation2 + $0x90] sm:$0xff] }
 0x695   : > { %v4605_v10 = vld [vmem:[#allocation2 + $0x129] sm:$0xff]  ;;  %v4551_v34 = vpack.c.bf16 %v4519_v21, %v4518_v33  ;;  %v4521_v35 = vld [vmem:[#allocation2 + $0x98] sm:$0xff] }
 0x696   : > { %4498 = vst.msk [vmem:[#allocation2 + $0x13b] sm:$0xff] %vm763_vm1, %v4457_v40  ;;  %v4335_v46 = vadd.f32 %v19705_v28, %v4287_v41  ;;  %v4288_v12 = vmul.f32 %v16503_v42, %v19698_v24  ;;  %v4627_v47 = vpack.c.bf16 %v4605_v10, %v4604_v45  ;;  %v4552_v38 = vpack.c.bf16 %v4521_v35, %v4520_v37  ;;  %v4523_v40 = vld [vmem:[#allocation2 + $0xa8] sm:$0xff]  ;;  %v4522_v41 = vld [vmem:[#allocation2 + $0xa0] sm:$0xff]  ;;  %v4525_v43 = vld [vmem:[#allocation2 + $0xb8] sm:$0xff] }
 0x697   : > { %v4553_v42 = vpack.c.bf16 %v4523_v40, %v4522_v41  ;;  %v4524_v45 = vld [vmem:[#allocation2 + $0xb0] sm:$0xff]  ;;  %v5192_v16 = vld [vmem:[#allocation2 + $0x3a] sm:$0xff] }
 0x698   : > { %v4376_v48 = vmax.f32 %v4335_v46, 0.0  ;;  %v4336_v23 = vadd.f32 %v19705_v28, %v4288_v12  ;;  %14993 = vmatmul.mubr.msk.bf16.gmra.mrb[108].mxu1 %vm763_vm1, %v4627_v47  ;;  %v4554_v10 = vpack.c.bf16 %v4525_v43, %v4524_v45  ;;  %v4527_v46 = vld [vmem:[#allocation2 + $0xc8] sm:$0xff]  ;;  %v4526_v12 = vld [vmem:[#allocation2 + $0xc0] sm:$0xff] }
 0x699   : > { %v4195_v49 = vpop.f32.mrb[80].mxu0  ;;  %14996 = vmatprep.mubr.msk.bf16.mxu1 %vm18570_vm0, %v18569_v1  ;;  %v4555_v47 = vpack.c.bf16 %v4527_v46, %v4526_v12  ;;  %v5194_v20 = vld [vmem:[#allocation2 + $0x4a] sm:$0xff]  ;;  %v5196_v25 = vld [vmem:[#allocation2 + $0x5a] sm:$0xff] }
 0x69a   : > { %v4458_v50 = vmul.f32 %v4417_v30, %v4376_v48  ;;  %v4377_v26 = vmax.f32 %v4336_v23, 0.0  ;;  %v16504_v51 = vadd.f32 %v4195_v49, %v19771_v54  ;;  %v14914_v52 = vpop.f32.mrb[81].mxu0  ;;  %v4529_v30 = vld [vmem:[#allocation2 + $0xd8] sm:$0xff]  ;;  %v4528_v48 = vld [vmem:[#allocation2 + $0xd0] sm:$0xff]  ;;  %v4530_v49 = vld [vmem:[#allocation2 + $0xe0] sm:$0xff] }
 0x69b   : > { %v4198_v53 = vpop.f32.mrb[82].mxu0  ;;  %v4606_v59 = vld [vmem:[#allocation2 + $0x131] sm:$0xff]  ;;  %v4556_v23 = vpack.c.bf16 %v4529_v30, %v4528_v48  ;;  %v5200_v32 = vld [vmem:[#allocation2 + $0x7a] sm:$0xff] }
 0x69c   : > { %4499 = vst.msk [vmem:[#allocation2 + $0x143] sm:$0xff] %vm763_vm1, %v4458_v50  ;;  %v4459_v55 = vmul.f32 %v4418_v36, %v4377_v26  ;;  %v4289_v56 = vmul.f32 %v16504_v51, %v19698_v24  ;;  %v14915_v58 = vpop.f32.mrb[83].mxu0  ;;  %v4531_v36 = vld [vmem:[#allocation2 + $0xe8] sm:$0xff]  ;;  %v4533_v26 = vld [vmem:[#allocation2 + $0xf8] sm:$0xff]  ;;  %v4532_v51 = vld [vmem:[#allocation2 + $0xf0] sm:$0xff] }
 0x69d   : > { %v4607_v60 = vld [vmem:[#allocation2 + $0x139] sm:$0xff]  ;;  %v4557_v50 = vpack.c.bf16 %v4531_v36, %v4530_v49  ;;  %v4558_v52 = vpack.c.bf16 %v4533_v26, %v4532_v51  ;;  %v4535_v53 = vld [vmem:[#allocation2 + $0x108] sm:$0xff] }
 0x69e   : > { %4500 = vst.msk [vmem:[#allocation2 + $0x14b] sm:$0xff] %vm763_vm1, %v4459_v55  ;;  %v4337_v61 = vadd.f32 %v19705_v28, %v4289_v56  ;;  %v4628_v63 = vpack.c.bf16 %v4607_v60, %v4606_v59  ;;  %v4502_v28 = vld [vmem:[#allocation2] sm:$0xff]  ;;  %v4537_v58 = vld [vmem:[#allocation2 + $0x118] sm:$0xff]  ;;  %v4536_v59 = vld [vmem:[#allocation2 + $0x110] sm:$0xff] }
 0x69f   : > { %v4543_v4 = vpack.c.bf16 %v4503_v3, %v4502_v28  ;;  %v4534_v55 = vld [vmem:[#allocation2 + $0x100] sm:$0xff]  ;;  %v4560_v60 = vpack.c.bf16 %v4537_v58, %v4536_v59  ;;  %v5198_v19 = vld [vmem:[#allocation2 + $0x6a] sm:$0xff] }
 0x6a0   : > { %v4378_v54 = vmax.f32 %v4337_v61, 0.0  ;;  %14997 = vmatmul.mubr.msk.bf16.gmra.mrb[112].mxu1 %vm763_vm1, %v4628_v63  ;;  %v4559_v56 = vpack.c.bf16 %v4535_v53, %v4534_v55  ;;  %v4539_v61 = vld [vmem:[#allocation2 + $0x128] sm:$0xff]  ;;  %v4538_v63 = vld [vmem:[#allocation2 + $0x120] sm:$0xff] }
 0x6a1   : > { %15000 = vmatprep.mubr.msk.bf16.mxu1 %vm18570_vm0, %v18569_v1  ;;  %v5185_v3 = vld [vmem:[#allocation2 + $0x2] sm:$0xff]  ;;  %v5202_v33 = vld [vmem:[#allocation2 + $0x8a] sm:$0xff]  ;;  %v5204_v37 = vld [vmem:[#allocation2 + $0x9a] sm:$0xff] }
 0x6a2   : > { %v4460_v2 = vmul.f32 %v4419_v0, %v4378_v54  ;;  %v4561_v0 = vpack.c.bf16 %v4539_v61, %v4538_v63  ;;  %v4541_v54 = vld [vmem:[#allocation2 + $0x138] sm:$0xff]  ;;  %v5206_v41 = vld [vmem:[#allocation2 + $0xaa] sm:$0xff] }
 0x6a3   : > { %v4608_v24 = vld [vmem:[#allocation2 + $0x141] sm:$0xf]  ;;  %v5210_v12 = vld [vmem:[#allocation2 + $0xca] sm:$0xff] }
 0x6a4   : > { %4501 = vst.msk [vmem:[#allocation2 + $0x153] sm:$0xf] %vm876_vm3, %v4460_v2  ;;  %v4629_v15 = vpack.c.bf16 %v4608_v24, %v4608_v24  ;;  %v4540_v2 = vld [vmem:[#allocation2 + $0x130] sm:$0xff]  ;;  %v5208_v45 = vld [vmem:[#allocation2 + $0xba] sm:$0xff] }
 0x6a5   : > { %v4562_v24 = vpack.c.bf16 %v4541_v54, %v4540_v2  ;;  %v5212_v48 = vld [vmem:[#allocation2 + $0xda] sm:$0xff]  ;;  %v5214_v49 = vld [vmem:[#allocation2 + $0xea] sm:$0xff] }
 0x6a6   : > { %v5216_v51 = vld [vmem:[#allocation2 + $0xfa] sm:$0xff]  ;;  %v5218_v55 = vld [vmem:[#allocation2 + $0x10a] sm:$0xff] }
 0x6a7   : > { %v5220_v59 = vld [vmem:[#allocation2 + $0x11a] sm:$0xff]  ;;  %v5222_v63 = vld [vmem:[#allocation2 + $0x12a] sm:$0xff] }
 0x6a8   : > { %15001 = vmatmul.mubr.msk.bf16.gmra.mrb[116].mxu1 %vm763_vm1, %v4629_v15  ;;  %v4542_v15 = vld [vmem:[#allocation2 + $0x140] sm:$0xf] }
 0x6a9   : > { %15008 = vmatprep.mubr.msk.bf16.mxu1 %vm18570_vm0, %v18569_v1  ;;  %v4563_v28 = vpack.c.bf16 %v4542_v15, %v4542_v15  ;;  %v5224_v2 = vld [vmem:[#allocation2 + $0x13a] sm:$0xff] }
 0x6b0   : > { %15009 = vmatmul.mubr.msk.bf16.vlgmr.msra.gmra.mrb[36].mxu1 %vm763_vm1, %v4543_v4  ;;  %v5186_v4 = vld [vmem:[#allocation2 + $0xa] sm:$0xff] }
 0x6b1   : > { %15093 = vmatpush3.bf16.msra.mxu1 %v18421_v39  ;;  %15012 = vmatprep.mubr.msk.bf16.mxu1 %vm18570_vm0, %v18569_v1  ;;  %v5226_v39 = vpack.c.bf16 %v5186_v4, %v5185_v3  ;;  %v18425_v4 = vld [vmem:[%s22096_s27 + $0x40] sm:$0xff]  }
 0x6b2   : > { %15094 = vmatprep.subr.bf16.mxu1 %v18569_v1 }
 0x6b5   : > { %15095 = vmatpush3.bf16.msra.mxu1 %v18422_v17  ;;  %v18423_v17 = vld [vmem:[%s22096_s27 + $0x30] sm:$0xff]  }
 0x6b6   : > { %15180 = vmatprep.subr.bf16.mxu1 %v18569_v1 }
 0x6b8   : > { %15013 = vmatmul.mubr.msk.bf16.gmra.mrb[40].mxu1 %vm763_vm1, %v4544_v7  ;;  %v5187_v7 = vld [vmem:[#allocation2 + $0x12] sm:$0xff] }
 0x6b9   : > { %15016 = vmatprep.mubr.msk.bf16.mxu1 %vm18570_vm0, %v18569_v1  ;;  %v20125_v9 = vpack.c.bf16 %v5188_v44, %v5187_v7  ;;  %v5608_v7 = vld [vmem:[#allocation2 + $0x152] sm:$0xf] }
 0x6c0   : > { %15017 = vmatmul.mubr.msk.bf16.gmra.mrb[44].mxu1 %vm763_vm1, %v4545_v13  ;;  %v5189_v13 = vld [vmem:[#allocation2 + $0x22] sm:$0xff] }
 0x6c1   : > { %15020 = vmatprep.mubr.msk.bf16.mxu1 %vm18570_vm0, %v18569_v1  ;;  %v20132_v14 = vpack.c.bf16 %v5190_v11, %v5189_v13  ;;  %v5952_v11 = vld [vmem:[#allocation2 + $0x1b] sm:$0xff]  ;;  %v5951_v13 = vld [vmem:[#allocation2 + $0x13] sm:$0xff] }
 0x6c8   : > { %15021 = vmatmul.mubr.msk.bf16.gmra.mrb[48].mxu1 %vm763_vm1, %v4546_v18  ;;  %v5191_v18 = vld [vmem:[#allocation2 + $0x32] sm:$0xff] }
 0x6c9   : > { %15024 = vmatprep.mubr.msk.bf16.mxu1 %vm18570_vm0, %v18569_v1  ;;  %v20138_v6 = vpack.c.bf16 %v5192_v16, %v5191_v18  ;;  %v5992_v16 = vpack.c.bf16 %v5952_v11, %v5951_v13  ;;  %v18428_v18 = vld [vmem:[%s22096_s27 + $0x58] sm:$0xff]  }
 0x6ca   : > { %v6335_v13 = vld [vmem:[#allocation2 + $0x1c] sm:$0xff] }
 0x6d0   : > { %15025 = vmatmul.mubr.msk.bf16.gmra.mrb[52].mxu1 %vm763_vm1, %v4547_v22  ;;  %v5193_v22 = vld [vmem:[#allocation2 + $0x42] sm:$0xff] }
 0x6d1   : > { %15028 = vmatprep.mubr.msk.bf16.mxu1 %vm18570_vm0, %v18569_v1  ;;  %v20144_v8 = vpack.c.bf16 %v5194_v20, %v5193_v22  ;;  %v5953_v20 = vld [vmem:[#allocation2 + $0x23] sm:$0xff] }
 0x6d8   : > { %15029 = vmatmul.mubr.msk.bf16.gmra.mrb[56].mxu1 %vm763_vm1, %v4548_v27  ;;  %v5195_v27 = vld [vmem:[#allocation2 + $0x52] sm:$0xff] }
 0x6d9   : > { %15032 = vmatprep.mubr.msk.bf16.mxu1 %vm18570_vm0, %v18569_v1  ;;  %v20150_v29 = vpack.c.bf16 %v5196_v25, %v5195_v27  ;;  %v5955_v25 = vld [vmem:[#allocation2 + $0x33] sm:$0xff] }
 0x6e0   : > { %15033 = vmatmul.mubr.msk.bf16.gmra.mrb[60].mxu1 %vm763_vm1, %v4549_v57  ;;  %v5197_v57 = vld [vmem:[#allocation2 + $0x62] sm:$0xff] }
 0x6e1   : > { %15036 = vmatprep.mubr.msk.bf16.mxu1 %vm18570_vm0, %v18569_v1  ;;  %v20156_v31 = vpack.c.bf16 %v5198_v19, %v5197_v57  ;;  %v5957_v19 = vld [vmem:[#allocation2 + $0x43] sm:$0xff] }
 0x6e8   : > { %15037 = vmatmul.mubr.msk.bf16.gmra.mrb[64].mxu1 %vm763_vm1, %v4550_v62  ;;  %v5199_v62 = vld [vmem:[#allocation2 + $0x72] sm:$0xff] }
 0x6e9   : > { %15040 = vmatprep.mubr.msk.bf16.mxu1 %vm18570_vm0, %v18569_v1  ;;  %v20162_v21 = vpack.c.bf16 %v5200_v32, %v5199_v62  ;;  %v5959_v32 = vld [vmem:[#allocation2 + $0x53] sm:$0xff] }
 0x6f0   : > { %15041 = vmatmul.mubr.msk.bf16.gmra.mrb[68].mxu1 %vm763_vm1, %v4551_v34  ;;  %v5201_v34 = vld [vmem:[#allocation2 + $0x82] sm:$0xff] }
 0x6f1   : > { %15044 = vmatprep.mubr.msk.bf16.mxu1 %vm18570_vm0, %v18569_v1  ;;  %v20168_v35 = vpack.c.bf16 %v5202_v33, %v5201_v34  ;;  %v5961_v33 = vld [vmem:[#allocation2 + $0x63] sm:$0xff] }
 0x6f8   : > { %15045 = vmatmul.mubr.msk.bf16.gmra.mrb[72].mxu1 %vm763_vm1, %v4552_v38  ;;  %v5203_v38 = vld [vmem:[#allocation2 + $0x92] sm:$0xff] }
 0x6f9   : > { %15048 = vmatprep.mubr.msk.bf16.mxu1 %vm18570_vm0, %v18569_v1  ;;  %v20174_v40 = vpack.c.bf16 %v5204_v37, %v5203_v38  ;;  %v5963_v37 = vld [vmem:[#allocation2 + $0x73] sm:$0xff] }
 0x700   : > { %15049 = vmatmul.mubr.msk.bf16.gmra.mrb[76].mxu1 %vm763_vm1, %v4553_v42  ;;  %v5205_v42 = vld [vmem:[#allocation2 + $0xa2] sm:$0xff] }
 0x701   : > { %15052 = vmatprep.mubr.msk.bf16.mxu1 %vm18570_vm0, %v18569_v1  ;;  %v20180_v43 = vpack.c.bf16 %v5206_v41, %v5205_v42  ;;  %v5965_v41 = vld [vmem:[#allocation2 + $0x83] sm:$0xff] }
 0x708   : > { %15053 = vmatmul.mubr.msk.bf16.gmra.mrb[80].mxu1 %vm763_vm1, %v4554_v10  ;;  %v5207_v10 = vld [vmem:[#allocation2 + $0xb2] sm:$0xff] }
 0x709   : > { %15056 = vmatprep.mubr.msk.bf16.mxu1 %vm18570_vm0, %v18569_v1  ;;  %v20186_v46 = vpack.c.bf16 %v5208_v45, %v5207_v10  ;;  %v5967_v45 = vld [vmem:[#allocation2 + $0x93] sm:$0xff] }
 0x710   : > { %15057 = vmatmul.mubr.msk.bf16.gmra.mrb[84].mxu1 %vm763_vm1, %v4555_v47  ;;  %v5209_v47 = vld [vmem:[#allocation2 + $0xc2] sm:$0xff] }
 0x711   : > { %15060 = vmatprep.mubr.msk.bf16.mxu1 %vm18570_vm0, %v18569_v1  ;;  %v20192_v30 = vpack.c.bf16 %v5210_v12, %v5209_v47  ;;  %v5969_v12 = vld [vmem:[#allocation2 + $0xa3] sm:$0xff] }
 0x718   : > { %15061 = vmatmul.mubr.msk.bf16.gmra.mrb[88].mxu1 %vm763_vm1, %v4556_v23  ;;  %v5211_v23 = vld [vmem:[#allocation2 + $0xd2] sm:$0xff] }
 0x719   : > { %15064 = vmatprep.mubr.msk.bf16.mxu1 %vm18570_vm0, %v18569_v1  ;;  %v20198_v36 = vpack.c.bf16 %v5212_v48, %v5211_v23  ;;  %v5971_v48 = vld [vmem:[#allocation2 + $0xb3] sm:$0xff] }
 0x720   : > { %15065 = vmatmul.mubr.msk.bf16.gmra.mrb[92].mxu1 %vm763_vm1, %v4557_v50  ;;  %v5213_v50 = vld [vmem:[#allocation2 + $0xe2] sm:$0xff] }
 0x721   : > { %15068 = vmatprep.mubr.msk.bf16.mxu1 %vm18570_vm0, %v18569_v1  ;;  %v20204_v26 = vpack.c.bf16 %v5214_v49, %v5213_v50  ;;  %v5973_v49 = vld [vmem:[#allocation2 + $0xc3] sm:$0xff] }
 0x728   : > { %15069 = vmatmul.mubr.msk.bf16.gmra.mrb[96].mxu1 %vm763_vm1, %v4558_v52  ;;  %v5215_v52 = vld [vmem:[#allocation2 + $0xf2] sm:$0xff] }
 0x729   : > { %15072 = vmatprep.mubr.msk.bf16.mxu1 %vm18570_vm0, %v18569_v1  ;;  %v5241_v53 = vpack.c.bf16 %v5216_v51, %v5215_v52  ;;  %v5975_v51 = vld [vmem:[#allocation2 + $0xd3] sm:$0xff] }
 0x730   : > { %15073 = vmatmul.mubr.msk.bf16.gmra.mrb[100].mxu1 %vm763_vm1, %v4559_v56  ;;  %v5217_v56 = vld [vmem:[#allocation2 + $0x102] sm:$0xff] }
 0x731   : > { %15076 = vmatprep.mubr.msk.bf16.mxu1 %vm18570_vm0, %v18569_v1  ;;  %v5242_v58 = vpack.c.bf16 %v5218_v55, %v5217_v56  ;;  %v5977_v55 = vld [vmem:[#allocation2 + $0xe3] sm:$0xff] }
 0x738   : > { %15077 = vmatmul.mubr.msk.bf16.gmra.mrb[104].mxu1 %vm763_vm1, %v4560_v60  ;;  %v5219_v60 = vld [vmem:[#allocation2 + $0x112] sm:$0xff] }
 0x739   : > { %15080 = vmatprep.mubr.msk.bf16.mxu1 %vm18570_vm0, %v18569_v1  ;;  %v5243_v61 = vpack.c.bf16 %v5220_v59, %v5219_v60  ;;  %v5979_v59 = vld [vmem:[#allocation2 + $0xf3] sm:$0xff] }
 0x740   : > { %15081 = vmatmul.mubr.msk.bf16.gmra.mrb[108].mxu1 %vm763_vm1, %v4561_v0  ;;  %v5221_v0 = vld [vmem:[#allocation2 + $0x122] sm:$0xff] }
 0x741   : > { %15084 = vmatprep.mubr.msk.bf16.mxu1 %vm18570_vm0, %v18569_v1  ;;  %v5244_v54 = vpack.c.bf16 %v5222_v63, %v5221_v0  ;;  %v5981_v63 = vld [vmem:[#allocation2 + $0x103] sm:$0xff] }
 0x748   : > { %15085 = vmatmul.mubr.msk.bf16.gmra.mrb[112].mxu1 %vm763_vm1, %v4562_v24  ;;  %v5223_v24 = vld [vmem:[#allocation2 + $0x132] sm:$0xff] }
 0x749   : > { %15088 = vmatprep.mubr.msk.bf16.mxu1 %vm18570_vm0, %v18569_v1  ;;  %v5245_v15 = vpack.c.bf16 %v5224_v2, %v5223_v24  ;;  %v5983_v2 = vld [vmem:[#allocation2 + $0x113] sm:$0xff] }
 0x750   : > { %15089 = vmatmul.mubr.msk.bf16.gmra.mrb[116].mxu1 %vm763_vm1, %v4563_v28  ;;  %v5225_v28 = vld [vmem:[#allocation2 + $0x142] sm:$0xf] }
 0x751   : > { %15096 = vmatprep.mubr.msk.bf16.mxu1 %vm18570_vm0, %v18569_v1  ;;  %v5246_v3 = vpack.c.bf16 %v5225_v28, %v5225_v28  ;;  %v5985_v28 = vld [vmem:[#allocation2 + $0x123] sm:$0xff] }
 0x758   : > { %15097 = vmatmul.mubr.msk.bf16.vlgmr.msra.gmra.mrb[36].mxu1 %vm763_vm1, %v5226_v39  ;;  %v18426_v39 = vld [vmem:[%s22096_s27 + $0x48] sm:$0xff]  }
 0x759   : > { %15181 = vmatpush3.bf16.msra.mxu1 %v18423_v17  ;;  %15100 = vmatprep.mubr.msk.bf16.mxu1 %vm18570_vm0, %v18569_v1  ;;  %v5607_v17 = vld [vmem:[#allocation2 + $0x14a] sm:$0xff] }
 0x75a   : > { %15182 = vmatprep.subr.bf16.mxu1 %v18569_v1 }
 0x75d   : > { %15183 = vmatpush3.bf16.msra.mxu1 %v18424_v5  ;;  %v5606_v5 = vld [vmem:[#allocation2 + $0x142] sm:$0xff] }
 0x75e   : > { %15268 = vmatprep.subr.bf16.mxu1 %v18569_v1  ;;  %v5628_v44 = vpack.c.bf16 %v5607_v17, %v5606_v5  ;;  %v5990_v5 = vld [vmem:[#allocation2 + $0x14b] sm:$0xff] }
 0x760   : > { %15101 = vmatmul.mubr.msk.bf16.gmra.mrb[40].mxu1 %vm763_vm1, %v20125_v9 }
 0x761   : > { %15104 = vmatprep.mubr.msk.bf16.mxu1 %vm18570_vm0, %v18569_v1 }
 0x768   : > { %15105 = vmatmul.mubr.msk.bf16.gmra.mrb[44].mxu1 %vm763_vm1, %v20132_v14 }
 0x769   : > { %15108 = vmatprep.mubr.msk.bf16.mxu1 %vm18570_vm0, %v18569_v1 }
 0x770   : > { %15109 = vmatmul.mubr.msk.bf16.gmra.mrb[48].mxu1 %vm763_vm1, %v20138_v6 }
 0x771   : > { %15112 = vmatprep.mubr.msk.bf16.mxu1 %vm18570_vm0, %v18569_v1 }
 0x778   : > { %15113 = vmatmul.mubr.msk.bf16.gmra.mrb[52].mxu1 %vm763_vm1, %v20144_v8 }
 0x779   : > { %15116 = vmatprep.mubr.msk.bf16.mxu1 %vm18570_vm0, %v18569_v1 }
 0x780   : > { %15117 = vmatmul.mubr.msk.bf16.gmra.mrb[56].mxu1 %vm763_vm1, %v20150_v29 }
 0x781   : > { %15120 = vmatprep.mubr.msk.bf16.mxu1 %vm18570_vm0, %v18569_v1 }
 0x788   : > { %15121 = vmatmul.mubr.msk.bf16.gmra.mrb[60].mxu1 %vm763_vm1, %v20156_v31 }
 0x789   : > { %15124 = vmatprep.mubr.msk.bf16.mxu1 %vm18570_vm0, %v18569_v1 }
 0x790   : > { %15125 = vmatmul.mubr.msk.bf16.gmra.mrb[64].mxu1 %vm763_vm1, %v20162_v21 }
 0x791   : > { %15128 = vmatprep.mubr.msk.bf16.mxu1 %vm18570_vm0, %v18569_v1 }
 0x798   : > { %15129 = vmatmul.mubr.msk.bf16.gmra.mrb[68].mxu1 %vm763_vm1, %v20168_v35 }
 0x799   : > { %15132 = vmatprep.mubr.msk.bf16.mxu1 %vm18570_vm0, %v18569_v1 }
 0x7a0   : > { %15133 = vmatmul.mubr.msk.bf16.gmra.mrb[72].mxu1 %vm763_vm1, %v20174_v40 }
 0x7a1   : > { %15136 = vmatprep.mubr.msk.bf16.mxu1 %vm18570_vm0, %v18569_v1 }
 0x7a8   : > { %15137 = vmatmul.mubr.msk.bf16.gmra.mrb[76].mxu1 %vm763_vm1, %v20180_v43 }
 0x7a9   : > { %15140 = vmatprep.mubr.msk.bf16.mxu1 %vm18570_vm0, %v18569_v1 }
 0x7b0   : > { %15141 = vmatmul.mubr.msk.bf16.gmra.mrb[80].mxu1 %vm763_vm1, %v20186_v46 }
 0x7b1   : > { %15144 = vmatprep.mubr.msk.bf16.mxu1 %vm18570_vm0, %v18569_v1 }
 0x7b8   : > { %15145 = vmatmul.mubr.msk.bf16.gmra.mrb[84].mxu1 %vm763_vm1, %v20192_v30 }
 0x7b9   : > { %15148 = vmatprep.mubr.msk.bf16.mxu1 %vm18570_vm0, %v18569_v1 }
 0x7c0   : > { %15149 = vmatmul.mubr.msk.bf16.gmra.mrb[88].mxu1 %vm763_vm1, %v20198_v36 }
 0x7c1   : > { %15152 = vmatprep.mubr.msk.bf16.mxu1 %vm18570_vm0, %v18569_v1 }
 0x7c8   : > { %15153 = vmatmul.mubr.msk.bf16.gmra.mrb[92].mxu1 %vm763_vm1, %v20204_v26 }
 0x7c9   : > { %15156 = vmatprep.mubr.msk.bf16.mxu1 %vm18570_vm0, %v18569_v1 }
 0x7d0   : > { %15157 = vmatmul.mubr.msk.bf16.gmra.mrb[96].mxu1 %vm763_vm1, %v5241_v53 }
 0x7d1   : > { %15160 = vmatprep.mubr.msk.bf16.mxu1 %vm18570_vm0, %v18569_v1 }
 0x7d8   : > { %15161 = vmatmul.mubr.msk.bf16.gmra.mrb[100].mxu1 %vm763_vm1, %v5242_v58 }
 0x7d9   : > { %15164 = vmatprep.mubr.msk.bf16.mxu1 %vm18570_vm0, %v18569_v1 }
 0x7e0   : > { %15165 = vmatmul.mubr.msk.bf16.gmra.mrb[104].mxu1 %vm763_vm1, %v5243_v61 }
 0x7e1   : > { %15168 = vmatprep.mubr.msk.bf16.mxu1 %vm18570_vm0, %v18569_v1 }
 0x7e8   : > { %15169 = vmatmul.mubr.msk.bf16.gmra.mrb[108].mxu1 %vm763_vm1, %v5244_v54 }
 0x7e9   : > { %15172 = vmatprep.mubr.msk.bf16.mxu1 %vm18570_vm0, %v18569_v1 }
 0x7f0   : > { %15173 = vmatmul.mubr.msk.bf16.gmra.mrb[112].mxu1 %vm763_vm1, %v5245_v15 }
 0x7f1   : > { %15176 = vmatprep.mubr.msk.bf16.mxu1 %vm18570_vm0, %v18569_v1 }
 0x7f8   : > { %15177 = vmatmul.mubr.msk.bf16.gmra.mrb[116].mxu1 %vm763_vm1, %v5246_v3 }
 0x7f9   : > { %15184 = vmatprep.mubr.msk.bf16.mxu1 %vm18570_vm0, %v18569_v1 }
 0x800   : > { %15185 = vmatmul.mubr.msk.bf16.vlgmr.msra.gmra.mrb[36].mxu1 %vm763_vm1, %v20125_v9  ;;  %v5629_v9 = vpack.c.bf16 %v5608_v7, %v5608_v7 }
 0x801   : > { %15269 = vmatpush3.bf16.msra.mxu1 %v18425_v4  ;;  %15188 = vmatprep.mubr.msk.bf16.mxu1 %vm18570_vm0, %v18569_v1  ;;  %v5988_v4 = vld [vmem:[#allocation2 + $0x13b] sm:$0xff] }
 0x802   : > { %15270 = vmatprep.subr.bf16.mxu1 %v18569_v1 }
 0x805   : > { %15271 = vmatpush3.bf16.msra.mxu1 %v18426_v39  ;;  %v5987_v39 = vld [vmem:[#allocation2 + $0x133] sm:$0xff] }
 0x806   : > { %15356 = vmatprep.subr.bf16.mxu1 %v18569_v1  ;;  %v6010_v17 = vpack.c.bf16 %v5988_v4, %v5987_v39  ;;  %v6371_v39 = vld [vmem:[#allocation2 + $0x13c] sm:$0xff] }
 0x808   : > { %15189 = vmatmul.mubr.msk.bf16.gmra.mrb[40].mxu1 %vm763_vm1, %v20132_v14  ;;  %v18427_v14 = vld [vmem:[%s22096_s27 + $0x50] sm:$0xff]  }
 0x809   : > { %15192 = vmatprep.mubr.msk.bf16.mxu1 %vm18570_vm0, %v18569_v1 }
 0x810   : > { %15193 = vmatmul.mubr.msk.bf16.gmra.mrb[44].mxu1 %vm763_vm1, %v20138_v6  ;;  %v5954_v6 = vld [vmem:[#allocation2 + $0x2b] sm:$0xff] }
 0x811   : > { %15196 = vmatprep.mubr.msk.bf16.mxu1 %vm18570_vm0, %v18569_v1  ;;  %v5993_v22 = vpack.c.bf16 %v5954_v6, %v5953_v20  ;;  %v18430_v6 = vld [vmem:[%s22096_s27 + $0x68] sm:$0xff]  }
 0x812   : > { %v6337_v20 = vld [vmem:[#allocation2 + $0x2c] sm:$0xff] }
 0x818   : > { %15197 = vmatmul.mubr.msk.bf16.gmra.mrb[48].mxu1 %vm763_vm1, %v20144_v8  ;;  %v5956_v8 = vld [vmem:[#allocation2 + $0x3b] sm:$0xff] }
 0x819   : > { %15200 = vmatprep.mubr.msk.bf16.mxu1 %vm18570_vm0, %v18569_v1  ;;  %v5994_v27 = vpack.c.bf16 %v5956_v8, %v5955_v25  ;;  %v6339_v25 = vld [vmem:[#allocation2 + $0x3c] sm:$0xff] }
 0x820   : > { %15201 = vmatmul.mubr.msk.bf16.gmra.mrb[52].mxu1 %vm763_vm1, %v20150_v29  ;;  %v5958_v29 = vld [vmem:[#allocation2 + $0x4b] sm:$0xff] }
 0x821   : > { %15204 = vmatprep.mubr.msk.bf16.mxu1 %vm18570_vm0, %v18569_v1  ;;  %v5995_v57 = vpack.c.bf16 %v5958_v29, %v5957_v19  ;;  %v6341_v19 = vld [vmem:[#allocation2 + $0x4c] sm:$0xff] }
 0x828   : > { %15205 = vmatmul.mubr.msk.bf16.gmra.mrb[56].mxu1 %vm763_vm1, %v20156_v31  ;;  %v5960_v31 = vld [vmem:[#allocation2 + $0x5b] sm:$0xff] }
 0x829   : > { %15208 = vmatprep.mubr.msk.bf16.mxu1 %vm18570_vm0, %v18569_v1  ;;  %v5996_v62 = vpack.c.bf16 %v5960_v31, %v5959_v32  ;;  %v6343_v32 = vld [vmem:[#allocation2 + $0x5c] sm:$0xff] }
 0x830   : > { %15209 = vmatmul.mubr.msk.bf16.gmra.mrb[60].mxu1 %vm763_vm1, %v20162_v21  ;;  %v5962_v21 = vld [vmem:[#allocation2 + $0x6b] sm:$0xff] }
 0x831   : > { %15212 = vmatprep.mubr.msk.bf16.mxu1 %vm18570_vm0, %v18569_v1  ;;  %v5997_v34 = vpack.c.bf16 %v5962_v21, %v5961_v33  ;;  %v6345_v33 = vld [vmem:[#allocation2 + $0x6c] sm:$0xff] }
 0x838   : > { %15213 = vmatmul.mubr.msk.bf16.gmra.mrb[64].mxu1 %vm763_vm1, %v20168_v35  ;;  %v5964_v35 = vld [vmem:[#allocation2 + $0x7b] sm:$0xff] }
 0x839   : > { %15216 = vmatprep.mubr.msk.bf16.mxu1 %vm18570_vm0, %v18569_v1  ;;  %v5998_v38 = vpack.c.bf16 %v5964_v35, %v5963_v37  ;;  %v6347_v37 = vld [vmem:[#allocation2 + $0x7c] sm:$0xff] }
 0x840   : > { %15217 = vmatmul.mubr.msk.bf16.gmra.mrb[68].mxu1 %vm763_vm1, %v20174_v40  ;;  %v5966_v40 = vld [vmem:[#allocation2 + $0x8b] sm:$0xff] }
 0x841   : > { %15220 = vmatprep.mubr.msk.bf16.mxu1 %vm18570_vm0, %v18569_v1  ;;  %v5999_v42 = vpack.c.bf16 %v5966_v40, %v5965_v41  ;;  %v6349_v41 = vld [vmem:[#allocation2 + $0x8c] sm:$0xff] }
 0x848   : > { %15221 = vmatmul.mubr.msk.bf16.gmra.mrb[72].mxu1 %vm763_vm1, %v20180_v43  ;;  %v5968_v43 = vld [vmem:[#allocation2 + $0x9b] sm:$0xff] }
 0x849   : > { %15224 = vmatprep.mubr.msk.bf16.mxu1 %vm18570_vm0, %v18569_v1  ;;  %v6000_v10 = vpack.c.bf16 %v5968_v43, %v5967_v45  ;;  %v6351_v45 = vld [vmem:[#allocation2 + $0x9c] sm:$0xff] }
 0x850   : > { %15225 = vmatmul.mubr.msk.bf16.gmra.mrb[76].mxu1 %vm763_vm1, %v20186_v46  ;;  %v5970_v46 = vld [vmem:[#allocation2 + $0xab] sm:$0xff] }
 0x851   : > { %15228 = vmatprep.mubr.msk.bf16.mxu1 %vm18570_vm0, %v18569_v1  ;;  %v6001_v47 = vpack.c.bf16 %v5970_v46, %v5969_v12  ;;  %v6353_v12 = vld [vmem:[#allocation2 + $0xac] sm:$0xff] }
 0x858   : > { %15229 = vmatmul.mubr.msk.bf16.gmra.mrb[80].mxu1 %vm763_vm1, %v20192_v30  ;;  %v5972_v30 = vld [vmem:[#allocation2 + $0xbb] sm:$0xff] }
 0x859   : > { %15232 = vmatprep.mubr.msk.bf16.mxu1 %vm18570_vm0, %v18569_v1  ;;  %v6002_v23 = vpack.c.bf16 %v5972_v30, %v5971_v48  ;;  %v6355_v48 = vld [vmem:[#allocation2 + $0xbc] sm:$0xff] }
 0x860   : > { %15233 = vmatmul.mubr.msk.bf16.gmra.mrb[84].mxu1 %vm763_vm1, %v20198_v36  ;;  %v5974_v36 = vld [vmem:[#allocation2 + $0xcb] sm:$0xff] }
 0x861   : > { %15236 = vmatprep.mubr.msk.bf16.mxu1 %vm18570_vm0, %v18569_v1  ;;  %v6003_v50 = vpack.c.bf16 %v5974_v36, %v5973_v49  ;;  %v6357_v49 = vld [vmem:[#allocation2 + $0xcc] sm:$0xff] }
 0x868   : > { %15237 = vmatmul.mubr.msk.bf16.gmra.mrb[88].mxu1 %vm763_vm1, %v20204_v26  ;;  %v5976_v26 = vld [vmem:[#allocation2 + $0xdb] sm:$0xff] }
 0x869   : > { %15240 = vmatprep.mubr.msk.bf16.mxu1 %vm18570_vm0, %v18569_v1  ;;  %v6004_v52 = vpack.c.bf16 %v5976_v26, %v5975_v51  ;;  %v6359_v51 = vld [vmem:[#allocation2 + $0xdc] sm:$0xff] }
 0x870   : > { %15241 = vmatmul.mubr.msk.bf16.gmra.mrb[92].mxu1 %vm763_vm1, %v5241_v53  ;;  %v5978_v53 = vld [vmem:[#allocation2 + $0xeb] sm:$0xff] }
 0x871   : > { %15244 = vmatprep.mubr.msk.bf16.mxu1 %vm18570_vm0, %v18569_v1  ;;  %v6005_v56 = vpack.c.bf16 %v5978_v53, %v5977_v55  ;;  %v6361_v55 = vld [vmem:[#allocation2 + $0xec] sm:$0xff] }
 0x878   : > { %15245 = vmatmul.mubr.msk.bf16.gmra.mrb[96].mxu1 %vm763_vm1, %v5242_v58  ;;  %v5980_v58 = vld [vmem:[#allocation2 + $0xfb] sm:$0xff] }
 0x879   : > { %15248 = vmatprep.mubr.msk.bf16.mxu1 %vm18570_vm0, %v18569_v1  ;;  %v6006_v60 = vpack.c.bf16 %v5980_v58, %v5979_v59  ;;  %v6363_v59 = vld [vmem:[#allocation2 + $0xfc] sm:$0xff] }
 0x880   : > { %15249 = vmatmul.mubr.msk.bf16.gmra.mrb[100].mxu1 %vm763_vm1, %v5243_v61  ;;  %v5982_v61 = vld [vmem:[#allocation2 + $0x10b] sm:$0xff] }
 0x881   : > { %15252 = vmatprep.mubr.msk.bf16.mxu1 %vm18570_vm0, %v18569_v1  ;;  %v6007_v0 = vpack.c.bf16 %v5982_v61, %v5981_v63  ;;  %v6365_v63 = vld [vmem:[#allocation2 + $0x10c] sm:$0xff] }
 0x888   : > { %15253 = vmatmul.mubr.msk.bf16.gmra.mrb[104].mxu1 %vm763_vm1, %v5244_v54  ;;  %v5984_v54 = vld [vmem:[#allocation2 + $0x11b] sm:$0xff] }
 0x889   : > { %15256 = vmatprep.mubr.msk.bf16.mxu1 %vm18570_vm0, %v18569_v1  ;;  %v6008_v24 = vpack.c.bf16 %v5984_v54, %v5983_v2  ;;  %v6367_v2 = vld [vmem:[#allocation2 + $0x11c] sm:$0xff] }
 0x890   : > { %15257 = vmatmul.mubr.msk.bf16.gmra.mrb[108].mxu1 %vm763_vm1, %v5245_v15  ;;  %v5986_v15 = vld [vmem:[#allocation2 + $0x12b] sm:$0xff] }
 0x891   : > { %15260 = vmatprep.mubr.msk.bf16.mxu1 %vm18570_vm0, %v18569_v1  ;;  %v6009_v3 = vpack.c.bf16 %v5986_v15, %v5985_v28  ;;  %v6369_v28 = vld [vmem:[#allocation2 + $0x12c] sm:$0xff] }
 0x898   : > { %15261 = vmatmul.mubr.msk.bf16.gmra.mrb[112].mxu1 %vm763_vm1, %v5628_v44  ;;  %v5989_v44 = vld [vmem:[#allocation2 + $0x143] sm:$0xff] }
 0x899   : > { %15264 = vmatprep.mubr.msk.bf16.mxu1 %vm18570_vm0, %v18569_v1  ;;  %v6011_v7 = vpack.c.bf16 %v5990_v5, %v5989_v44  ;;  %v6373_v44 = vld [vmem:[#allocation2 + $0x14c] sm:$0xff] }
 0x8a0   : > { %15265 = vmatmul.mubr.msk.bf16.gmra.mrb[116].mxu1 %vm763_vm1, %v5629_v9  ;;  %v5991_v9 = vld [vmem:[#allocation2 + $0x153] sm:$0xf] }
 0x8a1   : > { %15272 = vmatprep.mubr.msk.bf16.mxu1 %vm18570_vm0, %v18569_v1  ;;  %v6012_v11 = vpack.c.bf16 %v5991_v9, %v5991_v9 }
 0x8a8   : > { %15273 = vmatmul.mubr.msk.bf16.vlgmr.msra.gmra.mrb[36].mxu1 %vm763_vm1, %v5992_v16  ;;  %v18429_v16 = vld [vmem:[%s22096_s27 + $0x60] sm:$0xff]  }
 0x8a9   : > { %15357 = vmatpush3.bf16.msra.mxu1 %v18427_v14  ;;  %15276 = vmatprep.mubr.msk.bf16.mxu1 %vm18570_vm0, %v18569_v1  ;;  %v6334_v14 = vld [vmem:[#allocation2 + $0x14] sm:$0xff] }
 0x8aa   : > { %15358 = vmatprep.subr.bf16.mxu1 %v18569_v1 }
 0x8ad   : > { %15359 = vmatpush3.bf16.msra.mxu1 %v18428_v18  ;;  %v6375_v18 = vpack.c.bf16 %v6335_v13, %v6334_v14  ;;  %v18431_v14 = vld [vmem:[%s22096_s27 + $0x70] sm:$0xff]  }
 0x8ae   : > { %15444 = vmatprep.subr.bf16.mxu1 %v18569_v1 }
 0x8b0   : > { %15277 = vmatmul.mubr.msk.bf16.gmra.mrb[40].mxu1 %vm763_vm1, %v5993_v22  ;;  %v6336_v22 = vld [vmem:[#allocation2 + $0x24] sm:$0xff] }
 0x8b1   : > { %15280 = vmatprep.mubr.msk.bf16.mxu1 %vm18570_vm0, %v18569_v1  ;;  %v20394_v8 = vpack.c.bf16 %v6337_v20, %v6336_v22  ;;  %v6757_v22 = vld [vmem:[#allocation2 + $0x164] sm:$0xf] }
 0x8b8   : > { %15281 = vmatmul.mubr.msk.bf16.gmra.mrb[44].mxu1 %vm763_vm1, %v5994_v27  ;;  %v6338_v27 = vld [vmem:[#allocation2 + $0x34] sm:$0xff] }
 0x8b9   : > { %15284 = vmatprep.mubr.msk.bf16.mxu1 %vm18570_vm0, %v18569_v1  ;;  %v20401_v29 = vpack.c.bf16 %v6339_v25, %v6338_v27  ;;  %v7101_v25 = vld [vmem:[#allocation2 + $0x2d] sm:$0xff]  ;;  %v7100_v27 = vld [vmem:[#allocation2 + $0x25] sm:$0xff] }
 0x8c0   : > { %15285 = vmatmul.mubr.msk.bf16.gmra.mrb[48].mxu1 %vm763_vm1, %v5995_v57  ;;  %v6340_v57 = vld [vmem:[#allocation2 + $0x44] sm:$0xff] }
 0x8c1   : > { %15288 = vmatprep.mubr.msk.bf16.mxu1 %vm18570_vm0, %v18569_v1  ;;  %v20407_v31 = vpack.c.bf16 %v6341_v19, %v6340_v57  ;;  %v7141_v19 = vpack.c.bf16 %v7101_v25, %v7100_v27  ;;  %v18434_v57 = vld [vmem:[%s22096_s27 + $0x88] sm:$0xff]  }
 0x8c2   : > { %v7484_v27 = vld [vmem:[#allocation2 + $0x2e] sm:$0xff] }
 0x8c8   : > { %15289 = vmatmul.mubr.msk.bf16.gmra.mrb[52].mxu1 %vm763_vm1, %v5996_v62  ;;  %v6342_v62 = vld [vmem:[#allocation2 + $0x54] sm:$0xff] }
 0x8c9   : > { %15292 = vmatprep.mubr.msk.bf16.mxu1 %vm18570_vm0, %v18569_v1  ;;  %v20413_v21 = vpack.c.bf16 %v6343_v32, %v6342_v62  ;;  %v7102_v32 = vld [vmem:[#allocation2 + $0x35] sm:$0xff] }
 0x8d0   : > { %15293 = vmatmul.mubr.msk.bf16.gmra.mrb[56].mxu1 %vm763_vm1, %v5997_v34  ;;  %v6344_v34 = vld [vmem:[#allocation2 + $0x64] sm:$0xff] }
 0x8d1   : > { %15296 = vmatprep.mubr.msk.bf16.mxu1 %vm18570_vm0, %v18569_v1  ;;  %v20419_v35 = vpack.c.bf16 %v6345_v33, %v6344_v34  ;;  %v7104_v33 = vld [vmem:[#allocation2 + $0x45] sm:$0xff] }
 0x8d8   : > { %15297 = vmatmul.mubr.msk.bf16.gmra.mrb[60].mxu1 %vm763_vm1, %v5998_v38  ;;  %v6346_v38 = vld [vmem:[#allocation2 + $0x74] sm:$0xff] }
 0x8d9   : > { %15300 = vmatprep.mubr.msk.bf16.mxu1 %vm18570_vm0, %v18569_v1  ;;  %v20425_v40 = vpack.c.bf16 %v6347_v37, %v6346_v38  ;;  %v7106_v37 = vld [vmem:[#allocation2 + $0x55] sm:$0xff] }
 0x8e0   : > { %15301 = vmatmul.mubr.msk.bf16.gmra.mrb[64].mxu1 %vm763_vm1, %v5999_v42  ;;  %v6348_v42 = vld [vmem:[#allocation2 + $0x84] sm:$0xff] }
 0x8e1   : > { %15304 = vmatprep.mubr.msk.bf16.mxu1 %vm18570_vm0, %v18569_v1  ;;  %v20431_v43 = vpack.c.bf16 %v6349_v41, %v6348_v42  ;;  %v7108_v41 = vld [vmem:[#allocation2 + $0x65] sm:$0xff] }
 0x8e8   : > { %15305 = vmatmul.mubr.msk.bf16.gmra.mrb[68].mxu1 %vm763_vm1, %v6000_v10  ;;  %v6350_v10 = vld [vmem:[#allocation2 + $0x94] sm:$0xff] }
 0x8e9   : > { %15308 = vmatprep.mubr.msk.bf16.mxu1 %vm18570_vm0, %v18569_v1  ;;  %v20437_v46 = vpack.c.bf16 %v6351_v45, %v6350_v10  ;;  %v7110_v45 = vld [vmem:[#allocation2 + $0x75] sm:$0xff] }
 0x8f0   : > { %15309 = vmatmul.mubr.msk.bf16.gmra.mrb[72].mxu1 %vm763_vm1, %v6001_v47  ;;  %v6352_v47 = vld [vmem:[#allocation2 + $0xa4] sm:$0xff] }
 0x8f1   : > { %15312 = vmatprep.mubr.msk.bf16.mxu1 %vm18570_vm0, %v18569_v1  ;;  %v20443_v30 = vpack.c.bf16 %v6353_v12, %v6352_v47  ;;  %v7112_v12 = vld [vmem:[#allocation2 + $0x85] sm:$0xff] }
 0x8f8   : > { %15313 = vmatmul.mubr.msk.bf16.gmra.mrb[76].mxu1 %vm763_vm1, %v6002_v23  ;;  %v6354_v23 = vld [vmem:[#allocation2 + $0xb4] sm:$0xff] }
 0x8f9   : > { %15316 = vmatprep.mubr.msk.bf16.mxu1 %vm18570_vm0, %v18569_v1  ;;  %v20449_v36 = vpack.c.bf16 %v6355_v48, %v6354_v23  ;;  %v7114_v48 = vld [vmem:[#allocation2 + $0x95] sm:$0xff] }
 0x900   : > { %15317 = vmatmul.mubr.msk.bf16.gmra.mrb[80].mxu1 %vm763_vm1, %v6003_v50  ;;  %v6356_v50 = vld [vmem:[#allocation2 + $0xc4] sm:$0xff] }
 0x901   : > { %15320 = vmatprep.mubr.msk.bf16.mxu1 %vm18570_vm0, %v18569_v1  ;;  %v20455_v26 = vpack.c.bf16 %v6357_v49, %v6356_v50  ;;  %v7116_v49 = vld [vmem:[#allocation2 + $0xa5] sm:$0xff] }
 0x908   : > { %15321 = vmatmul.mubr.msk.bf16.gmra.mrb[84].mxu1 %vm763_vm1, %v6004_v52  ;;  %v6358_v52 = vld [vmem:[#allocation2 + $0xd4] sm:$0xff] }
 0x909   : > { %15324 = vmatprep.mubr.msk.bf16.mxu1 %vm18570_vm0, %v18569_v1  ;;  %v20461_v53 = vpack.c.bf16 %v6359_v51, %v6358_v52  ;;  %v7118_v51 = vld [vmem:[#allocation2 + $0xb5] sm:$0xff] }
 0x910   : > { %15325 = vmatmul.mubr.msk.bf16.gmra.mrb[88].mxu1 %vm763_vm1, %v6005_v56  ;;  %v6360_v56 = vld [vmem:[#allocation2 + $0xe4] sm:$0xff] }
 0x911   : > { %15328 = vmatprep.mubr.msk.bf16.mxu1 %vm18570_vm0, %v18569_v1  ;;  %v20467_v58 = vpack.c.bf16 %v6361_v55, %v6360_v56  ;;  %v7120_v55 = vld [vmem:[#allocation2 + $0xc5] sm:$0xff] }
 0x918   : > { %15329 = vmatmul.mubr.msk.bf16.gmra.mrb[92].mxu1 %vm763_vm1, %v6006_v60  ;;  %v6362_v60 = vld [vmem:[#allocation2 + $0xf4] sm:$0xff] }
 0x919   : > { %15332 = vmatprep.mubr.msk.bf16.mxu1 %vm18570_vm0, %v18569_v1  ;;  %v20473_v61 = vpack.c.bf16 %v6363_v59, %v6362_v60  ;;  %v7122_v59 = vld [vmem:[#allocation2 + $0xd5] sm:$0xff] }
 0x920   : > { %15333 = vmatmul.mubr.msk.bf16.gmra.mrb[96].mxu1 %vm763_vm1, %v6007_v0  ;;  %v6364_v0 = vld [vmem:[#allocation2 + $0x104] sm:$0xff] }
 0x921   : > { %15336 = vmatprep.mubr.msk.bf16.mxu1 %vm18570_vm0, %v18569_v1  ;;  %v6390_v54 = vpack.c.bf16 %v6365_v63, %v6364_v0  ;;  %v7124_v63 = vld [vmem:[#allocation2 + $0xe5] sm:$0xff] }
 0x928   : > { %15337 = vmatmul.mubr.msk.bf16.gmra.mrb[100].mxu1 %vm763_vm1, %v6008_v24  ;;  %v6366_v24 = vld [vmem:[#allocation2 + $0x114] sm:$0xff] }
 0x929   : > { %15340 = vmatprep.mubr.msk.bf16.mxu1 %vm18570_vm0, %v18569_v1  ;;  %v6391_v15 = vpack.c.bf16 %v6367_v2, %v6366_v24  ;;  %v7126_v2 = vld [vmem:[#allocation2 + $0xf5] sm:$0xff] }
 0x930   : > { %15341 = vmatmul.mubr.msk.bf16.gmra.mrb[104].mxu1 %vm763_vm1, %v6009_v3  ;;  %v6368_v3 = vld [vmem:[#allocation2 + $0x124] sm:$0xff] }
 0x931   : > { %15344 = vmatprep.mubr.msk.bf16.mxu1 %vm18570_vm0, %v18569_v1  ;;  %v6392_v4 = vpack.c.bf16 %v6369_v28, %v6368_v3  ;;  %v7128_v28 = vld [vmem:[#allocation2 + $0x105] sm:$0xff] }
 0x938   : > { %15345 = vmatmul.mubr.msk.bf16.gmra.mrb[108].mxu1 %vm763_vm1, %v6010_v17  ;;  %v6370_v17 = vld [vmem:[#allocation2 + $0x134] sm:$0xff] }
 0x939   : > { %15348 = vmatprep.mubr.msk.bf16.mxu1 %vm18570_vm0, %v18569_v1  ;;  %v6393_v5 = vpack.c.bf16 %v6371_v39, %v6370_v17  ;;  %v7130_v39 = vld [vmem:[#allocation2 + $0x115] sm:$0xff] }
 0x940   : > { %15349 = vmatmul.mubr.msk.bf16.gmra.mrb[112].mxu1 %vm763_vm1, %v6011_v7  ;;  %v6372_v7 = vld [vmem:[#allocation2 + $0x144] sm:$0xff] }
 0x941   : > { %15352 = vmatprep.mubr.msk.bf16.mxu1 %vm18570_vm0, %v18569_v1  ;;  %v6394_v9 = vpack.c.bf16 %v6373_v44, %v6372_v7  ;;  %v7132_v44 = vld [vmem:[#allocation2 + $0x125] sm:$0xff] }
 0x948   : > { %15353 = vmatmul.mubr.msk.bf16.gmra.mrb[116].mxu1 %vm763_vm1, %v6012_v11  ;;  %v6374_v11 = vld [vmem:[#allocation2 + $0x154] sm:$0xf] }
 0x949   : > { %15360 = vmatprep.mubr.msk.bf16.mxu1 %vm18570_vm0, %v18569_v1  ;;  %v6395_v13 = vpack.c.bf16 %v6374_v11, %v6374_v11  ;;  %v7134_v11 = vld [vmem:[#allocation2 + $0x135] sm:$0xff] }
 0x950   : > { %15361 = vmatmul.mubr.msk.bf16.vlgmr.msra.gmra.mrb[36].mxu1 %vm763_vm1, %v6375_v18  ;;  %v6755_v18 = vld [vmem:[#allocation2 + $0x154] sm:$0xff] }
 0x951   : > { %15445 = vmatpush3.bf16.msra.mxu1 %v18429_v16  ;;  %15364 = vmatprep.mubr.msk.bf16.mxu1 %vm18570_vm0, %v18569_v1  ;;  %v18432_v16 = vld [vmem:[%s22096_s27 + $0x78] sm:$0xff]  }
 0x952   : > { %15446 = vmatprep.subr.bf16.mxu1 %v18569_v1 }
 0x955   : > { %15447 = vmatpush3.bf16.msra.mxu1 %v18430_v6  ;;  %v6756_v6 = vld [vmem:[#allocation2 + $0x15c] sm:$0xff] }
 0x956   : > { %15532 = vmatprep.subr.bf16.mxu1 %v18569_v1  ;;  %v6777_v20 = vpack.c.bf16 %v6756_v6, %v6755_v18  ;;  %v7138_v6 = vld [vmem:[#allocation2 + $0x155] sm:$0xff] }
 0x958   : > { %15365 = vmatmul.mubr.msk.bf16.gmra.mrb[40].mxu1 %vm763_vm1, %v20394_v8 }
 0x959   : > { %15368 = vmatprep.mubr.msk.bf16.mxu1 %vm18570_vm0, %v18569_v1 }
 0x960   : > { %15369 = vmatmul.mubr.msk.bf16.gmra.mrb[44].mxu1 %vm763_vm1, %v20401_v29 }
 0x961   : > { %15372 = vmatprep.mubr.msk.bf16.mxu1 %vm18570_vm0, %v18569_v1 }
 0x968   : > { %15373 = vmatmul.mubr.msk.bf16.gmra.mrb[48].mxu1 %vm763_vm1, %v20407_v31 }
 0x969   : > { %15376 = vmatprep.mubr.msk.bf16.mxu1 %vm18570_vm0, %v18569_v1 }
 0x970   : > { %15377 = vmatmul.mubr.msk.bf16.gmra.mrb[52].mxu1 %vm763_vm1, %v20413_v21 }
 0x971   : > { %15380 = vmatprep.mubr.msk.bf16.mxu1 %vm18570_vm0, %v18569_v1 }
 0x978   : > { %15381 = vmatmul.mubr.msk.bf16.gmra.mrb[56].mxu1 %vm763_vm1, %v20419_v35 }
 0x979   : > { %15384 = vmatprep.mubr.msk.bf16.mxu1 %vm18570_vm0, %v18569_v1 }
 0x980   : > { %15385 = vmatmul.mubr.msk.bf16.gmra.mrb[60].mxu1 %vm763_vm1, %v20425_v40 }
 0x981   : > { %15388 = vmatprep.mubr.msk.bf16.mxu1 %vm18570_vm0, %v18569_v1 }
 0x988   : > { %15389 = vmatmul.mubr.msk.bf16.gmra.mrb[64].mxu1 %vm763_vm1, %v20431_v43 }
 0x989   : > { %15392 = vmatprep.mubr.msk.bf16.mxu1 %vm18570_vm0, %v18569_v1 }
 0x990   : > { %15393 = vmatmul.mubr.msk.bf16.gmra.mrb[68].mxu1 %vm763_vm1, %v20437_v46 }
 0x991   : > { %15396 = vmatprep.mubr.msk.bf16.mxu1 %vm18570_vm0, %v18569_v1 }
 0x998   : > { %15397 = vmatmul.mubr.msk.bf16.gmra.mrb[72].mxu1 %vm763_vm1, %v20443_v30 }
 0x999   : > { %15400 = vmatprep.mubr.msk.bf16.mxu1 %vm18570_vm0, %v18569_v1 }
 0x9a0   : > { %15401 = vmatmul.mubr.msk.bf16.gmra.mrb[76].mxu1 %vm763_vm1, %v20449_v36 }
 0x9a1   : > { %15404 = vmatprep.mubr.msk.bf16.mxu1 %vm18570_vm0, %v18569_v1 }
 0x9a8   : > { %15405 = vmatmul.mubr.msk.bf16.gmra.mrb[80].mxu1 %vm763_vm1, %v20455_v26 }
 0x9a9   : > { %15408 = vmatprep.mubr.msk.bf16.mxu1 %vm18570_vm0, %v18569_v1 }
 0x9b0   : > { %15409 = vmatmul.mubr.msk.bf16.gmra.mrb[84].mxu1 %vm763_vm1, %v20461_v53 }
 0x9b1   : > { %15412 = vmatprep.mubr.msk.bf16.mxu1 %vm18570_vm0, %v18569_v1 }
 0x9b8   : > { %15413 = vmatmul.mubr.msk.bf16.gmra.mrb[88].mxu1 %vm763_vm1, %v20467_v58 }
 0x9b9   : > { %15416 = vmatprep.mubr.msk.bf16.mxu1 %vm18570_vm0, %v18569_v1 }
 0x9c0   : > { %15417 = vmatmul.mubr.msk.bf16.gmra.mrb[92].mxu1 %vm763_vm1, %v20473_v61 }
 0x9c1   : > { %15420 = vmatprep.mubr.msk.bf16.mxu1 %vm18570_vm0, %v18569_v1 }
 0x9c8   : > { %15421 = vmatmul.mubr.msk.bf16.gmra.mrb[96].mxu1 %vm763_vm1, %v6390_v54 }
 0x9c9   : > { %15424 = vmatprep.mubr.msk.bf16.mxu1 %vm18570_vm0, %v18569_v1 }
 0x9d0   : > { %15425 = vmatmul.mubr.msk.bf16.gmra.mrb[100].mxu1 %vm763_vm1, %v6391_v15 }
 0x9d1   : > { %15428 = vmatprep.mubr.msk.bf16.mxu1 %vm18570_vm0, %v18569_v1 }
 0x9d8   : > { %15429 = vmatmul.mubr.msk.bf16.gmra.mrb[104].mxu1 %vm763_vm1, %v6392_v4 }
 0x9d9   : > { %15432 = vmatprep.mubr.msk.bf16.mxu1 %vm18570_vm0, %v18569_v1 }
 0x9e0   : > { %15433 = vmatmul.mubr.msk.bf16.gmra.mrb[108].mxu1 %vm763_vm1, %v6393_v5 }
 0x9e1   : > { %15436 = vmatprep.mubr.msk.bf16.mxu1 %vm18570_vm0, %v18569_v1 }
 0x9e8   : > { %15437 = vmatmul.mubr.msk.bf16.gmra.mrb[112].mxu1 %vm763_vm1, %v6394_v9 }
 0x9e9   : > { %15440 = vmatprep.mubr.msk.bf16.mxu1 %vm18570_vm0, %v18569_v1 }
 0x9f0   : > { %15441 = vmatmul.mubr.msk.bf16.gmra.mrb[116].mxu1 %vm763_vm1, %v6395_v13 }
 0x9f1   : > { %15448 = vmatprep.mubr.msk.bf16.mxu1 %vm18570_vm0, %v18569_v1 }
 0x9f8   : > { %15449 = vmatmul.mubr.msk.bf16.vlgmr.msra.gmra.mrb[36].mxu1 %vm763_vm1, %v20394_v8  ;;  %v6778_v8 = vpack.c.bf16 %v6757_v22, %v6757_v22 }
 0x9f9   : > { %15533 = vmatpush3.bf16.msra.mxu1 %v18431_v14  ;;  %15452 = vmatprep.mubr.msk.bf16.mxu1 %vm18570_vm0, %v18569_v1  ;;  %v7137_v14 = vld [vmem:[#allocation2 + $0x14d] sm:$0xff] }
 0x9fa   : > { %15534 = vmatprep.subr.bf16.mxu1 %v18569_v1 }
 0x9fd   : > { %15535 = vmatpush3.bf16.msra.mxu1 %v18432_v16  ;;  %v7136_v16 = vld [vmem:[#allocation2 + $0x145] sm:$0xff] }
 0x9fe   : > { %15620 = vmatprep.subr.bf16.mxu1 %v18569_v1  ;;  %v7159_v18 = vpack.c.bf16 %v7137_v14, %v7136_v16  ;;  %v7520_v14 = vld [vmem:[#allocation2 + $0x14e] sm:$0xff]  ;;  %v7519_v16 = vld [vmem:[#allocation2 + $0x146] sm:$0xff] }
 0xa00   : > { %15453 = vmatmul.mubr.msk.bf16.gmra.mrb[40].mxu1 %vm763_vm1, %v20401_v29  ;;  %v18433_v29 = vld [vmem:[%s22096_s27 + $0x80] sm:$0xff]  }
 0xa01   : > { %15456 = vmatprep.mubr.msk.bf16.mxu1 %vm18570_vm0, %v18569_v1 }
 0xa08   : > { %15457 = vmatmul.mubr.msk.bf16.gmra.mrb[44].mxu1 %vm763_vm1, %v20407_v31  ;;  %v7103_v31 = vld [vmem:[#allocation2 + $0x3d] sm:$0xff] }
 0xa09   : > { %15460 = vmatprep.mubr.msk.bf16.mxu1 %vm18570_vm0, %v18569_v1  ;;  %v7142_v62 = vpack.c.bf16 %v7103_v31, %v7102_v32  ;;  %v7485_v31 = vld [vmem:[#allocation2 + $0x36] sm:$0xff] }
 0xa10   : > { %15461 = vmatmul.mubr.msk.bf16.gmra.mrb[48].mxu1 %vm763_vm1, %v20413_v21  ;;  %v7105_v21 = vld [vmem:[#allocation2 + $0x4d] sm:$0xff] }
 0xa11   : > { %15464 = vmatprep.mubr.msk.bf16.mxu1 %vm18570_vm0, %v18569_v1  ;;  %v7143_v34 = vpack.c.bf16 %v7105_v21, %v7104_v33  ;;  %v7487_v21 = vld [vmem:[#allocation2 + $0x46] sm:$0xff] }
 0xa18   : > { %15465 = vmatmul.mubr.msk.bf16.gmra.mrb[52].mxu1 %vm763_vm1, %v20419_v35  ;;  %v7107_v35 = vld [vmem:[#allocation2 + $0x5d] sm:$0xff] }
 0xa19   : > { %15468 = vmatprep.mubr.msk.bf16.mxu1 %vm18570_vm0, %v18569_v1  ;;  %v7144_v38 = vpack.c.bf16 %v7107_v35, %v7106_v37  ;;  %v7489_v35 = vld [vmem:[#allocation2 + $0x56] sm:$0xff] }
 0xa20   : > { %15469 = vmatmul.mubr.msk.bf16.gmra.mrb[56].mxu1 %vm763_vm1, %v20425_v40  ;;  %v7109_v40 = vld [vmem:[#allocation2 + $0x6d] sm:$0xff] }
 0xa21   : > { %15472 = vmatprep.mubr.msk.bf16.mxu1 %vm18570_vm0, %v18569_v1  ;;  %v7145_v42 = vpack.c.bf16 %v7109_v40, %v7108_v41  ;;  %v7491_v40 = vld [vmem:[#allocation2 + $0x66] sm:$0xff] }
 0xa28   : > { %15473 = vmatmul.mubr.msk.bf16.gmra.mrb[60].mxu1 %vm763_vm1, %v20431_v43  ;;  %v7111_v43 = vld [vmem:[#allocation2 + $0x7d] sm:$0xff] }
 0xa29   : > { %15476 = vmatprep.mubr.msk.bf16.mxu1 %vm18570_vm0, %v18569_v1  ;;  %v7146_v10 = vpack.c.bf16 %v7111_v43, %v7110_v45  ;;  %v7494_v43 = vld [vmem:[#allocation2 + $0x7e] sm:$0xff]  ;;  %v7493_v45 = vld [vmem:[#allocation2 + $0x76] sm:$0xff] }
 0xa30   : > { %15477 = vmatmul.mubr.msk.bf16.gmra.mrb[64].mxu1 %vm763_vm1, %v20437_v46  ;;  %v7113_v46 = vld [vmem:[#allocation2 + $0x8d] sm:$0xff] }
 0xa31   : > { %15480 = vmatprep.mubr.msk.bf16.mxu1 %vm18570_vm0, %v18569_v1  ;;  %v7147_v47 = vpack.c.bf16 %v7113_v46, %v7112_v12  ;;  %v7496_v46 = vld [vmem:[#allocation2 + $0x8e] sm:$0xff]  ;;  %v7495_v12 = vld [vmem:[#allocation2 + $0x86] sm:$0xff] }
 0xa38   : > { %15481 = vmatmul.mubr.msk.bf16.gmra.mrb[68].mxu1 %vm763_vm1, %v20443_v30  ;;  %v7115_v30 = vld [vmem:[#allocation2 + $0x9d] sm:$0xff] }
 0xa39   : > { %15484 = vmatprep.mubr.msk.bf16.mxu1 %vm18570_vm0, %v18569_v1  ;;  %v7148_v23 = vpack.c.bf16 %v7115_v30, %v7114_v48  ;;  %v7498_v30 = vld [vmem:[#allocation2 + $0x9e] sm:$0xff]  ;;  %v7497_v48 = vld [vmem:[#allocation2 + $0x96] sm:$0xff] }
 0xa40   : > { %15485 = vmatmul.mubr.msk.bf16.gmra.mrb[72].mxu1 %vm763_vm1, %v20449_v36  ;;  %v7117_v36 = vld [vmem:[#allocation2 + $0xad] sm:$0xff] }
 0xa41   : > { %15488 = vmatprep.mubr.msk.bf16.mxu1 %vm18570_vm0, %v18569_v1  ;;  %v7149_v50 = vpack.c.bf16 %v7117_v36, %v7116_v49  ;;  %v7500_v36 = vld [vmem:[#allocation2 + $0xae] sm:$0xff]  ;;  %v7499_v49 = vld [vmem:[#allocation2 + $0xa6] sm:$0xff] }
 0xa48   : > { %15489 = vmatmul.mubr.msk.bf16.gmra.mrb[76].mxu1 %vm763_vm1, %v20455_v26  ;;  %v7119_v26 = vld [vmem:[#allocation2 + $0xbd] sm:$0xff] }
 0xa49   : > { %15492 = vmatprep.mubr.msk.bf16.mxu1 %vm18570_vm0, %v18569_v1  ;;  %v7150_v52 = vpack.c.bf16 %v7119_v26, %v7118_v51  ;;  %v7502_v26 = vld [vmem:[#allocation2 + $0xbe] sm:$0xff]  ;;  %v7501_v51 = vld [vmem:[#allocation2 + $0xb6] sm:$0xff] }
 0xa50   : > { %15493 = vmatmul.mubr.msk.bf16.gmra.mrb[80].mxu1 %vm763_vm1, %v20461_v53  ;;  %v7121_v53 = vld [vmem:[#allocation2 + $0xcd] sm:$0xff] }
 0xa51   : > { %15496 = vmatprep.mubr.msk.bf16.mxu1 %vm18570_vm0, %v18569_v1  ;;  %v7151_v56 = vpack.c.bf16 %v7121_v53, %v7120_v55  ;;  %v7504_v53 = vld [vmem:[#allocation2 + $0xce] sm:$0xff]  ;;  %v7503_v55 = vld [vmem:[#allocation2 + $0xc6] sm:$0xff] }
 0xa58   : > { %15497 = vmatmul.mubr.msk.bf16.gmra.mrb[84].mxu1 %vm763_vm1, %v20467_v58  ;;  %v7123_v58 = vld [vmem:[#allocation2 + $0xdd] sm:$0xff] }
 0xa59   : > { %15500 = vmatprep.mubr.msk.bf16.mxu1 %vm18570_vm0, %v18569_v1  ;;  %v7152_v60 = vpack.c.bf16 %v7123_v58, %v7122_v59  ;;  %v7506_v58 = vld [vmem:[#allocation2 + $0xde] sm:$0xff]  ;;  %v7505_v59 = vld [vmem:[#allocation2 + $0xd6] sm:$0xff] }
 0xa60   : > { %15501 = vmatmul.mubr.msk.bf16.gmra.mrb[88].mxu1 %vm763_vm1, %v20473_v61  ;;  %v7125_v61 = vld [vmem:[#allocation2 + $0xed] sm:$0xff] }
 0xa61   : > { %15504 = vmatprep.mubr.msk.bf16.mxu1 %vm18570_vm0, %v18569_v1  ;;  %v7153_v0 = vpack.c.bf16 %v7125_v61, %v7124_v63  ;;  %v7508_v61 = vld [vmem:[#allocation2 + $0xee] sm:$0xff]  ;;  %v7507_v63 = vld [vmem:[#allocation2 + $0xe6] sm:$0xff] }
 0xa68   : > { %15505 = vmatmul.mubr.msk.bf16.gmra.mrb[92].mxu1 %vm763_vm1, %v6390_v54  ;;  %v7127_v54 = vld [vmem:[#allocation2 + $0xfd] sm:$0xff] }
 0xa69   : > { %15508 = vmatprep.mubr.msk.bf16.mxu1 %vm18570_vm0, %v18569_v1  ;;  %v7154_v24 = vpack.c.bf16 %v7127_v54, %v7126_v2  ;;  %v7510_v54 = vld [vmem:[#allocation2 + $0xfe] sm:$0xff]  ;;  %v7509_v2 = vld [vmem:[#allocation2 + $0xf6] sm:$0xff] }
 0xa70   : > { %15509 = vmatmul.mubr.msk.bf16.gmra.mrb[96].mxu1 %vm763_vm1, %v6391_v15  ;;  %v7129_v15 = vld [vmem:[#allocation2 + $0x10d] sm:$0xff] }
 0xa71   : > { %15512 = vmatprep.mubr.msk.bf16.mxu1 %vm18570_vm0, %v18569_v1  ;;  %v7155_v3 = vpack.c.bf16 %v7129_v15, %v7128_v28  ;;  %v7512_v15 = vld [vmem:[#allocation2 + $0x10e] sm:$0xff]  ;;  %v7511_v28 = vld [vmem:[#allocation2 + $0x106] sm:$0xff] }
 0xa78   : > { %15513 = vmatmul.mubr.msk.bf16.gmra.mrb[100].mxu1 %vm763_vm1, %v6392_v4  ;;  %v7131_v4 = vld [vmem:[#allocation2 + $0x11d] sm:$0xff] }
 0xa79   : > { %15516 = vmatprep.mubr.msk.bf16.mxu1 %vm18570_vm0, %v18569_v1  ;;  %v7156_v17 = vpack.c.bf16 %v7131_v4, %v7130_v39  ;;  %v7514_v4 = vld [vmem:[#allocation2 + $0x11e] sm:$0xff]  ;;  %v7513_v39 = vld [vmem:[#allocation2 + $0x116] sm:$0xff] }
 0xa80   : > { %15517 = vmatmul.mubr.msk.bf16.gmra.mrb[104].mxu1 %vm763_vm1, %v6393_v5  ;;  %v7133_v5 = vld [vmem:[#allocation2 + $0x12d] sm:$0xff] }
 0xa81   : > { %15520 = vmatprep.mubr.msk.bf16.mxu1 %vm18570_vm0, %v18569_v1  ;;  %v7157_v7 = vpack.c.bf16 %v7133_v5, %v7132_v44  ;;  %v7516_v5 = vld [vmem:[#allocation2 + $0x12e] sm:$0xff]  ;;  %v7515_v44 = vld [vmem:[#allocation2 + $0x126] sm:$0xff] }
 0xa88   : > { %15521 = vmatmul.mubr.msk.bf16.gmra.mrb[108].mxu1 %vm763_vm1, %v6394_v9  ;;  %v7135_v9 = vld [vmem:[#allocation2 + $0x13d] sm:$0xff] }
 0xa89   : > { %15524 = vmatprep.mubr.msk.bf16.mxu1 %vm18570_vm0, %v18569_v1  ;;  %v7158_v13 = vpack.c.bf16 %v7135_v9, %v7134_v11  ;;  %v7518_v9 = vld [vmem:[#allocation2 + $0x13e] sm:$0xff]  ;;  %v7517_v11 = vld [vmem:[#allocation2 + $0x136] sm:$0xff] }
 0xa90   : > { %15525 = vmatmul.mubr.msk.bf16.gmra.mrb[112].mxu1 %vm763_vm1, %v6777_v20  ;;  %v7139_v20 = vld [vmem:[#allocation2 + $0x15d] sm:$0xff] }
 0xa91   : > { %15528 = vmatprep.mubr.msk.bf16.mxu1 %vm18570_vm0, %v18569_v1  ;;  %v7160_v22 = vpack.c.bf16 %v7139_v20, %v7138_v6  ;;  %v7521_v6 = vld [vmem:[#allocation2 + $0x156] sm:$0xff]  ;;  %v7522_v20 = vld [vmem:[#allocation2 + $0x15e] sm:$0xff] }
 0xa98   : > { %15529 = vmatmul.mubr.msk.bf16.gmra.mrb[116].mxu1 %vm763_vm1, %v6778_v8  ;;  %v7140_v8 = vld [vmem:[#allocation2 + $0x165] sm:$0xf] }
 0xa99   : > { %15536 = vmatprep.mubr.msk.bf16.mxu1 %vm18570_vm0, %v18569_v1  ;;  %v7161_v25 = vpack.c.bf16 %v7140_v8, %v7140_v8  ;;  %v8246_v8 = vld [vmem:[#allocation3 + $0x1] sm:$0xff] }
 0xaa0   : > { %15537 = vmatmul.mubr.msk.bf16.vlgmr.msra.gmra.mrb[36].mxu1 %vm763_vm1, %v7141_v19 }
 0xaa1   : > { %15621 = vmatpush3.bf16.msra.mxu1 %v18433_v29  ;;  %15540 = vmatprep.mubr.msk.bf16.mxu1 %vm18570_vm0, %v18569_v1  ;;  %v7483_v29 = vld [vmem:[#allocation2 + $0x26] sm:$0xff] }
 0xaa2   : > { %15622 = vmatprep.subr.bf16.mxu1 %v18569_v1  ;;  %v7524_v19 = vpack.c.bf16 %v7484_v27, %v7483_v29  ;;  %v7543_v27 = vpack.c.bf16 %v7522_v20, %v7521_v6  ;;  %v8010_v20 = vld [vmem:[%s22099_s8 + $0x38] sm:$0xff] }
 0xaa5   : > { %15623 = vmatpush3.bf16.msra.mxu1 %v18434_v57  ;;  %v7486_v57 = vld [vmem:[#allocation2 + $0x3e] sm:$0xff] }
 0xaa6   : > { %15996 = vmatprep.subr.bf16.mxu1 %v18569_v1  ;;  %v7525_v32 = vpack.c.bf16 %v7486_v57, %v7485_v31  ;;  %v20730_v31 = vld [vmem:[%s22101_s9] ss:$0 sm:$0xff]  ;;  %s755_s9 = sand.u32 1, %s18559_s2  }
 0xaa7   : > { %s756_s6 = scalar_lea.vmem [#allocation5], %s755_s9  ;;  %s12581_s7 = scalar_lea.sflag [#allocation6], %s755_s9 }
 0xaa8   : > { %15541 = vmatmul.mubr.msk.bf16.gmra.mrb[40].mxu1 %vm763_vm1, %v7142_v62  ;;  %v7488_v62 = vld [vmem:[#allocation2 + $0x4e] sm:$0xff] }
 0xaa9   : > { %15544 = vmatprep.mubr.msk.bf16.mxu1 %vm18570_vm0, %v18569_v1  ;;  %v7526_v33 = vpack.c.bf16 %v7488_v62, %v7487_v21  ;;  %v20735_v62 = vld [vmem:[%s22102_s1] ss:$0 sm:$0xff]  ;;  %s18571_s1 = smov [#allocation5]  }
 0xab0   : > { %15545 = vmatmul.mubr.msk.bf16.gmra.mrb[44].mxu1 %vm763_vm1, %v7143_v34  ;;  %v7490_v34 = vld [vmem:[#allocation2 + $0x5e] sm:$0xff] }
 0xab1   : > { %15548 = vmatprep.mubr.msk.bf16.mxu1 %vm18570_vm0, %v18569_v1  ;;  %v7527_v37 = vpack.c.bf16 %v7490_v34, %v7489_v35 }
 0xab8   : > { %15549 = vmatmul.mubr.msk.bf16.gmra.mrb[48].mxu1 %vm763_vm1, %v7144_v38  ;;  %v7492_v38 = vld [vmem:[#allocation2 + $0x6e] sm:$0xff] }
 0xab9   : > { %15552 = vmatprep.mubr.msk.bf16.mxu1 %vm18570_vm0, %v18569_v1  ;;  %v7528_v41 = vpack.c.bf16 %v7492_v38, %v7491_v40  ;;  %v8003_v40 = vld [vmem:[%s22099_s8] sm:$0xff] }
 0xac0   : > { %15553 = vmatmul.mubr.msk.bf16.gmra.mrb[52].mxu1 %vm763_vm1, %v7145_v42  ;;  %v18435_v42 = vld [vmem:[%s22100_s10 + $0x10] sm:$0xff]  }
 0xac1   : > { %15556 = vmatprep.mubr.msk.bf16.mxu1 %vm18570_vm0, %v18569_v1  ;;  %15709 = vmatpush3.bf16.msra.mxu0 %v18435_v42 }
 0xac2   : > { %15710 = vmatprep.subr.bf16.mxu0 %v18569_v1 }
 0xac8   : > { %15557 = vmatmul.mubr.msk.bf16.gmra.mrb[56].mxu1 %vm763_vm1, %v7146_v10  ;;  %v7529_v10 = vpack.c.bf16 %v7494_v43, %v7493_v45  ;;  %v8004_v43 = vld [vmem:[%s22099_s8 + $0x8] sm:$0xff] }
 0xac9   : > { %15560 = vmatprep.mubr.msk.bf16.mxu1 %vm18570_vm0, %v18569_v1 }
 0xad0   : > { %15561 = vmatmul.mubr.msk.bf16.gmra.mrb[60].mxu1 %vm763_vm1, %v7147_v47  ;;  %v7530_v47 = vpack.c.bf16 %v7496_v46, %v7495_v12 }
 0xad1   : > { %15564 = vmatprep.mubr.msk.bf16.mxu1 %vm18570_vm0, %v18569_v1 }
 0xad8   : > { %15565 = vmatmul.mubr.msk.bf16.gmra.mrb[64].mxu1 %vm763_vm1, %v7148_v23  ;;  %v7531_v23 = vpack.c.bf16 %v7498_v30, %v7497_v48 }
 0xad9   : > { %15568 = vmatprep.mubr.msk.bf16.mxu1 %vm18570_vm0, %v18569_v1 }
 0xae0   : > { %15569 = vmatmul.mubr.msk.bf16.gmra.mrb[68].mxu1 %vm763_vm1, %v7149_v50  ;;  %v7532_v50 = vpack.c.bf16 %v7500_v36, %v7499_v49 }
 0xae1   : > { %15572 = vmatprep.mubr.msk.bf16.mxu1 %vm18570_vm0, %v18569_v1 }
 0xae8   : > { %15573 = vmatmul.mubr.msk.bf16.gmra.mrb[72].mxu1 %vm763_vm1, %v7150_v52  ;;  %v7533_v52 = vpack.c.bf16 %v7502_v26, %v7501_v51 }
 0xae9   : > { %15576 = vmatprep.mubr.msk.bf16.mxu1 %vm18570_vm0, %v18569_v1 }
 0xaf0   : > { %15577 = vmatmul.mubr.msk.bf16.gmra.mrb[76].mxu1 %vm763_vm1, %v7151_v56  ;;  %v7534_v56 = vpack.c.bf16 %v7504_v53, %v7503_v55 }
 0xaf1   : > { %15580 = vmatprep.mubr.msk.bf16.mxu1 %vm18570_vm0, %v18569_v1 }
 0xaf8   : > { %15581 = vmatmul.mubr.msk.bf16.gmra.mrb[80].mxu1 %vm763_vm1, %v7152_v60  ;;  %v7535_v60 = vpack.c.bf16 %v7506_v58, %v7505_v59 }
 0xaf9   : > { %15584 = vmatprep.mubr.msk.bf16.mxu1 %vm18570_vm0, %v18569_v1 }
 0xb00   : > { %15585 = vmatmul.mubr.msk.bf16.gmra.mrb[84].mxu1 %vm763_vm1, %v7153_v0  ;;  %v7536_v0 = vpack.c.bf16 %v7508_v61, %v7507_v63 }
 0xb01   : > { %15588 = vmatprep.mubr.msk.bf16.mxu1 %vm18570_vm0, %v18569_v1 }
 0xb08   : > { %15589 = vmatmul.mubr.msk.bf16.gmra.mrb[88].mxu1 %vm763_vm1, %v7154_v24  ;;  %v7537_v24 = vpack.c.bf16 %v7510_v54, %v7509_v2  ;;  %v18437_v2 = vld [vmem:[%s22100_s10] sm:$0xff]  }
 0xb09   : > { %15592 = vmatprep.mubr.msk.bf16.mxu1 %vm18570_vm0, %v18569_v1 }
 0xb10   : > { %15593 = vmatmul.mubr.msk.bf16.gmra.mrb[92].mxu1 %vm763_vm1, %v7155_v3  ;;  %v7538_v3 = vpack.c.bf16 %v7512_v15, %v7511_v28 }
 0xb11   : > { %15596 = vmatprep.mubr.msk.bf16.mxu1 %vm18570_vm0, %v18569_v1 }
 0xb18   : > { %15597 = vmatmul.mubr.msk.bf16.gmra.mrb[96].mxu1 %vm763_vm1, %v7156_v17  ;;  %v7539_v17 = vpack.c.bf16 %v7514_v4, %v7513_v39 }
 0xb19   : > { %15600 = vmatprep.mubr.msk.bf16.mxu1 %vm18570_vm0, %v18569_v1 }
 0xb20   : > { %15601 = vmatmul.mubr.msk.bf16.gmra.mrb[100].mxu1 %vm763_vm1, %v7157_v7  ;;  %v7540_v7 = vpack.c.bf16 %v7516_v5, %v7515_v44 }
 0xb21   : > { %15604 = vmatprep.mubr.msk.bf16.mxu1 %vm18570_vm0, %v18569_v1 }
 0xb28   : > { %15605 = vmatmul.mubr.msk.bf16.gmra.mrb[104].mxu1 %vm763_vm1, %v7158_v13  ;;  %v7541_v13 = vpack.c.bf16 %v7518_v9, %v7517_v11 }
 0xb29   : > { %15608 = vmatprep.mubr.msk.bf16.mxu1 %vm18570_vm0, %v18569_v1 }
 0xb30   : > { %15609 = vmatmul.mubr.msk.bf16.gmra.mrb[108].mxu1 %vm763_vm1, %v7159_v18  ;;  %v7542_v18 = vpack.c.bf16 %v7520_v14, %v7519_v16  ;;  %v8009_v16 = vld [vmem:[%s22099_s8 + $0x30] sm:$0xff] }
 0xb31   : > { %15612 = vmatprep.mubr.msk.bf16.mxu1 %vm18570_vm0, %v18569_v1 }
 0xb38   : > { %15613 = vmatmul.mubr.msk.bf16.gmra.mrb[112].mxu1 %vm763_vm1, %v7160_v22  ;;  %v18436_v22 = vld [vmem:[%s22100_s10 + $0x18] sm:$0xff]  }
 0xb39   : > { %15616 = vmatprep.mubr.msk.bf16.mxu1 %vm18570_vm0, %v18569_v1  ;;  %15711 = vmatpush3.bf16.msra.mxu0 %v18436_v22 }
 0xb3a   : > { %15740 = vmatprep.subr.bf16.mxu0 %v18569_v1 }
 0xb40   : > { %15617 = vmatmul.mubr.msk.bf16.gmra.mrb[116].mxu1 %vm763_vm1, %v7161_v25  ;;  %v8247_v25 = vld [vmem:[#allocation3 + $0x9] sm:$0xff] }
 0xb41   : > { %15624 = vmatprep.mubr.msk.bf16.mxu1 %vm18570_vm0, %v18569_v1  ;;  %v8259_v29 = vpack.c.bf16 %v8247_v25, %v8246_v8 }
 0xb43   : > { %15713 = vmatmul.mubr.msk.bf16.vlgmr.msra.gmra.mrb[84].mxu0 %vm763_vm1, %v8259_v29 }
 0xb44   : > { %15716 = vmatprep.mubr.msk.bf16.mxu0 %vm18570_vm0, %v18569_v1  ;;  %15741 = vmatpush3.bf16.msra.mxu0 %v18437_v2 }
 0xb45   : > { %15742 = vmatprep.subr.bf16.mxu0 %v18569_v1 }
 0xb48   : > { %15625 = vmatmul.mubr.msk.bf16.vlgmr.msra.gmra.mrb[36].mxu1 %vm763_vm1, %v7524_v19  ;;  %v7523_v19 = vld [vmem:[#allocation2 + $0x166] sm:$0xf] }
 0xb49   : > { %15628 = vmatprep.mubr.msk.bf16.mxu1 %vm18570_vm0, %v18569_v1  ;;  %v7544_v57 = vpack.c.bf16 %v7523_v19, %v7523_v19 }
 0xb50   : > { %15629 = vmatmul.mubr.msk.bf16.gmra.mrb[40].mxu1 %vm763_vm1, %v7525_v32 }
 0xb51   : > { %15632 = vmatprep.mubr.msk.bf16.mxu1 %vm18570_vm0, %v18569_v1 }
 0xb58   : > { %15633 = vmatmul.mubr.msk.bf16.gmra.mrb[44].mxu1 %vm763_vm1, %v7526_v33 }
 0xb59   : > { %15636 = vmatprep.mubr.msk.bf16.mxu1 %vm18570_vm0, %v18569_v1 }
 0xb60   : > { %15637 = vmatmul.mubr.msk.bf16.gmra.mrb[48].mxu1 %vm763_vm1, %v7527_v37 }
 0xb61   : > { %15640 = vmatprep.mubr.msk.bf16.mxu1 %vm18570_vm0, %v18569_v1 }
 0xb68   : > { %15641 = vmatmul.mubr.msk.bf16.gmra.mrb[52].mxu1 %vm763_vm1, %v7528_v41 }
 0xb69   : > { %15644 = vmatprep.mubr.msk.bf16.mxu1 %vm18570_vm0, %v18569_v1 }
 0xb70   : > { %15645 = vmatmul.mubr.msk.bf16.gmra.mrb[56].mxu1 %vm763_vm1, %v7529_v10 }
 0xb71   : > { %15648 = vmatprep.mubr.msk.bf16.mxu1 %vm18570_vm0, %v18569_v1 }
 0xb78   : > { %15649 = vmatmul.mubr.msk.bf16.gmra.mrb[60].mxu1 %vm763_vm1, %v7530_v47 }
 0xb79   : > { %15652 = vmatprep.mubr.msk.bf16.mxu1 %vm18570_vm0, %v18569_v1 }
 0xb80   : > { %15653 = vmatmul.mubr.msk.bf16.gmra.mrb[64].mxu1 %vm763_vm1, %v7531_v23 }
 0xb81   : > { %15656 = vmatprep.mubr.msk.bf16.mxu1 %vm18570_vm0, %v18569_v1 }
 0xb88   : > { %15657 = vmatmul.mubr.msk.bf16.gmra.mrb[68].mxu1 %vm763_vm1, %v7532_v50  ;;  %v8005_v50 = vld [vmem:[%s22099_s8 + $0x10] sm:$0xff] }
 0xb89   : > { %15660 = vmatprep.mubr.msk.bf16.mxu1 %vm18570_vm0, %v18569_v1 }
 0xb90   : > { %15661 = vmatmul.mubr.msk.bf16.gmra.mrb[72].mxu1 %vm763_vm1, %v7533_v52  ;;  %v8006_v52 = vld [vmem:[%s22099_s8 + $0x18] sm:$0xff] }
 0xb91   : > { %15664 = vmatprep.mubr.msk.bf16.mxu1 %vm18570_vm0, %v18569_v1 }
 0xb98   : > { %15665 = vmatmul.mubr.msk.bf16.gmra.mrb[76].mxu1 %vm763_vm1, %v7534_v56 }
 0xb99   : > { %15668 = vmatprep.mubr.msk.bf16.mxu1 %vm18570_vm0, %v18569_v1 }
 0xba0   : > { %15669 = vmatmul.mubr.msk.bf16.gmra.mrb[80].mxu1 %vm763_vm1, %v7535_v60 }
 0xba1   : > { %15672 = vmatprep.mubr.msk.bf16.mxu1 %vm18570_vm0, %v18569_v1 }
 0xba8   : > { %15673 = vmatmul.mubr.msk.bf16.gmra.mrb[84].mxu1 %vm763_vm1, %v7536_v0 }
 0xba9   : > { %15676 = vmatprep.mubr.msk.bf16.mxu1 %vm18570_vm0, %v18569_v1 }
 0xbb0   : > { %15677 = vmatmul.mubr.msk.bf16.gmra.mrb[88].mxu1 %vm763_vm1, %v7537_v24  ;;  %v8007_v24 = vld [vmem:[%s22099_s8 + $0x20] sm:$0xff] }
 0xbb1   : > { %15680 = vmatprep.mubr.msk.bf16.mxu1 %vm18570_vm0, %v18569_v1 }
 0xbb8   : > { %15681 = vmatmul.mubr.msk.bf16.gmra.mrb[92].mxu1 %vm763_vm1, %v7538_v3  ;;  %v8008_v3 = vld [vmem:[%s22099_s8 + $0x28] sm:$0xff] }
 0xbb9   : > { %15684 = vmatprep.mubr.msk.bf16.mxu1 %vm18570_vm0, %v18569_v1 }
 0xbc0   : > { %15685 = vmatmul.mubr.msk.bf16.gmra.mrb[96].mxu1 %vm763_vm1, %v7539_v17 }
 0xbc1   : > { %15688 = vmatprep.mubr.msk.bf16.mxu1 %vm18570_vm0, %v18569_v1 }
 0xbc8   : > { %15689 = vmatmul.mubr.msk.bf16.gmra.mrb[100].mxu1 %vm763_vm1, %v7540_v7 }
 0xbc9   : > { %15692 = vmatprep.mubr.msk.bf16.mxu1 %vm18570_vm0, %v18569_v1 }
 0xbd0   : > { %15693 = vmatmul.mubr.msk.bf16.gmra.mrb[104].mxu1 %vm763_vm1, %v7541_v13 }
 0xbd1   : > { %15696 = vmatprep.mubr.msk.bf16.mxu1 %vm18570_vm0, %v18569_v1 }
 0xbd8   : > { %15697 = vmatmul.mubr.msk.bf16.gmra.mrb[108].mxu1 %vm763_vm1, %v7542_v18 }
 0xbd9   : > { %15700 = vmatprep.mubr.msk.bf16.mxu1 %vm18570_vm0, %v18569_v1 }
 0xbe0   : > { %15701 = vmatmul.mubr.msk.bf16.gmra.mrb[112].mxu1 %vm763_vm1, %v7543_v27 }
 0xbe1   : > { %15704 = vmatprep.mubr.msk.bf16.mxu1 %vm18570_vm0, %v18569_v1 }
 0xbe8   : > { %15705 = vmatmul.mubr.msk.bf16.gmra.mrb[116].mxu1 %vm763_vm1, %v7544_v57 }
 0xbe9   : > { %16000 = vmatprep.mubr.msk.bf16.mxu1 %vm18570_vm0, %v18569_v1 }
 0xc1b   : > { %v7659_v32 = vpop.f32.mrb[36].mxu1 }
 0xc1c   : > { %v7873_v21 = vmul.f32 %v20730_v31, %v7659_v32  ;;  %v15626_v33 = vpop.f32.mrb[37].mxu1 }
 0xc1d   : > { %v7662_v34 = vpop.f32.mrb[38].mxu1 }
 0xc1e   : > { %v7921_v35 = vadd.f32 %v20735_v62, %v7873_v21  ;;  %v7874_v37 = vmul.f32 %v20730_v31, %v7662_v34  ;;  %v15627_v38 = vpop.f32.mrb[39].mxu1  ;;  %v8011_v34 = vld [vmem:[%s22099_s8 + $0x40] sm:$0xff] }
 0xc1f   : > { %v8012_v38 = vld [vmem:[%s22099_s8 + $0x48] sm:$0xff] }
 0xc20   : > { %v7962_v41 = vmax.f32 %v7921_v35, 0.0  ;;  %v7922_v42 = vadd.f32 %v20735_v62, %v7874_v37 }
 0xc22   : > { %v8044_v45 = vmul.f32 %v8003_v40, %v7962_v41  ;;  %v7963_v10 = vmax.f32 %v7922_v42, 0.0 }
 0xc23   : > { %v7667_v46 = vpop.f32.mrb[40].mxu1 }
 0xc24   : > { %8085 = vst.msk [vmem:[#allocation2 + $0x13] sm:$0xff] %vm763_vm1, %v8044_v45  ;;  %v8045_v12 = vmul.f32 %v8004_v43, %v7963_v10  ;;  %v7875_v47 = vmul.f32 %v20730_v31, %v7667_v46  ;;  %v15630_v30 = vpop.f32.mrb[41].mxu1 }
 0xc25   : > { %v7670_v48 = vpop.f32.mrb[42].mxu1 }
 0xc26   : > { %8086 = vst.msk [vmem:[#allocation2 + $0x1b] sm:$0xff] %vm763_vm1, %v8045_v12  ;;  %v7923_v23 = vadd.f32 %v20735_v62, %v7875_v47  ;;  %v7876_v36 = vmul.f32 %v20730_v31, %v7670_v48  ;;  %v15631_v49 = vpop.f32.mrb[43].mxu1 }
 0xc28   : > { %v7964_v26 = vmax.f32 %v7923_v23, 0.0  ;;  %v7924_v51 = vadd.f32 %v20735_v62, %v7876_v36  ;;  %v18438_v36 = vld [vmem:[%s22100_s10 + $0x8] sm:$0xff]  }
 0xc29   : > { %15743 = vmatpush3.bf16.msra.mxu0 %v18438_v36 }
 0xc2a   : > { %v8046_v53 = vmul.f32 %v8005_v50, %v7964_v26  ;;  %v7965_v55 = vmax.f32 %v7924_v51, 0.0  ;;  %15772 = vmatprep.subr.bf16.mxu0 %v18569_v1 }
 0xc2b   : > { %v7675_v56 = vpop.f32.mrb[44].mxu1 }
 0xc2c   : > { %8087 = vst.msk [vmem:[#allocation2 + $0x23] sm:$0xff] %vm763_vm1, %v8046_v53  ;;  %v8047_v58 = vmul.f32 %v8006_v52, %v7965_v55  ;;  %v7877_v59 = vmul.f32 %v20730_v31, %v7675_v56  ;;  %v15634_v60 = vpop.f32.mrb[45].mxu1  ;;  %v8013_v53 = vld [vmem:[%s22099_s8 + $0x50] sm:$0xff] }
 0xc2d   : > { %v7678_v61 = vpop.f32.mrb[46].mxu1 }
 0xc2e   : > { %8088 = vst.msk [vmem:[#allocation2 + $0x2b] sm:$0xff] %vm763_vm1, %v8047_v58  ;;  %v7925_v63 = vadd.f32 %v20735_v62, %v7877_v59  ;;  %v7878_v0 = vmul.f32 %v20730_v31, %v7678_v61  ;;  %v15635_v54 = vpop.f32.mrb[47].mxu1  ;;  %v8014_v58 = vld [vmem:[%s22099_s8 + $0x58] sm:$0xff] }
 0xc30   : > { %v7966_v15 = vmax.f32 %v7925_v63, 0.0  ;;  %v7926_v28 = vadd.f32 %v20735_v62, %v7878_v0 }
 0xc32   : > { %v8048_v4 = vmul.f32 %v8007_v24, %v7966_v15  ;;  %v7967_v39 = vmax.f32 %v7926_v28, 0.0 }
 0xc33   : > { %v7683_v17 = vpop.f32.mrb[48].mxu1 }
 0xc34   : > { %8089 = vst.msk [vmem:[#allocation2 + $0x33] sm:$0xff] %vm763_vm1, %v8048_v4  ;;  %v8049_v5 = vmul.f32 %v8008_v3, %v7967_v39  ;;  %v7879_v44 = vmul.f32 %v20730_v31, %v7683_v17  ;;  %v15638_v7 = vpop.f32.mrb[49].mxu1  ;;  %v8015_v3 = vld [vmem:[%s22099_s8 + $0x60] sm:$0xff]  ;;  %v8016_v17 = vld [vmem:[%s22099_s8 + $0x68] sm:$0xff] }
 0xc35   : > { %v7686_v9 = vpop.f32.mrb[50].mxu1 }
 0xc36   : > { %8090 = vst.msk [vmem:[#allocation2 + $0x3b] sm:$0xff] %vm763_vm1, %v8049_v5  ;;  %v7927_v11 = vadd.f32 %v20735_v62, %v7879_v44  ;;  %v7880_v13 = vmul.f32 %v20730_v31, %v7686_v9  ;;  %v15639_v14 = vpop.f32.mrb[51].mxu1 }
 0xc38   : > { %v7968_v18 = vmax.f32 %v7927_v11, 0.0  ;;  %v7928_v6 = vadd.f32 %v20735_v62, %v7880_v13 }
 0xc3a   : > { %v8050_v22 = vmul.f32 %v8009_v16, %v7968_v18  ;;  %v7969_v8 = vmax.f32 %v7928_v6, 0.0 }
 0xc3b   : > { %v7691_v25 = vpop.f32.mrb[52].mxu1  ;;  %v8127_v40 = vld [vmem:[#allocation2 + $0x26] ss:$2 sm:$0xff]  ;;  %v8129_v41 = vld [vmem:[#allocation2 + $0x27] ss:$2 sm:$0xff] }
 0xc3c   : > { %8091 = vst.msk [vmem:[#allocation2 + $0x43] sm:$0xff] %vm763_vm1, %v8050_v22  ;;  %v8051_v27 = vmul.f32 %v8010_v20, %v7969_v8  ;;  %v7881_v29 = vmul.f32 %v20730_v31, %v7691_v25  ;;  %v15642_v19 = vpop.f32.mrb[53].mxu1  ;;  %v8134_v48 = vmax.f32 %v8127_v40, %v8129_v41 }
 0xc3d   : > { %v7694_v57 = vpop.f32.mrb[54].mxu1  ;;  %v8017_v19 = vld [vmem:[%s22099_s8 + $0x70] sm:$0xff] }
 0xc3e   : > { %8092 = vst.msk [vmem:[#allocation2 + $0x4b] sm:$0xff] %vm763_vm1, %v8051_v27  ;;  %v7929_v32 = vadd.f32 %v20735_v62, %v7881_v29  ;;  %v7882_v21 = vmul.f32 %v20730_v31, %v7694_v57  ;;  %v15643_v33 = vpop.f32.mrb[55].mxu1 }
 0xc3f   : > { %v8018_v33 = vld [vmem:[%s22099_s8 + $0x78] sm:$0xff] }
 0xc40   : > { %v7970_v35 = vmax.f32 %v7929_v32, 0.0  ;;  %v7930_v37 = vadd.f32 %v20735_v62, %v7882_v21 }
 0xc42   : > { %v8052_v42 = vmul.f32 %v8011_v34, %v7970_v35  ;;  %v7971_v43 = vmax.f32 %v7930_v37, 0.0 }
 0xc43   : > { %v7699_v45 = vpop.f32.mrb[56].mxu1  ;;  %v8131_v10 = vld [vmem:[#allocation2 + $0x38] ss:$2 sm:$0xff]  ;;  %v8133_v46 = vld [vmem:[#allocation2 + $0x39] ss:$2 sm:$0xff] }
 0xc44   : > { %8093 = vst.msk [vmem:[#allocation2 + $0x53] sm:$0xff] %vm763_vm1, %v8052_v42  ;;  %v8053_v12 = vmul.f32 %v8012_v38, %v7971_v43  ;;  %v7883_v47 = vmul.f32 %v20730_v31, %v7699_v45  ;;  %v15646_v30 = vpop.f32.mrb[57].mxu1  ;;  %v8135_v23 = vmax.f32 %v8131_v10, %v8133_v46  ;;  %v8019_v46 = vld [vmem:[%s22099_s8 + $0x80] sm:$0xff] }
 0xc45   : > { %v7702_v49 = vpop.f32.mrb[58].mxu1  ;;  %v8020_v30 = vld [vmem:[%s22099_s8 + $0x88] sm:$0xff] }
 0xc46   : > { %8094 = vst.msk [vmem:[#allocation2 + $0x5b] sm:$0xff] %vm763_vm1, %v8053_v12  ;;  %v7931_v50 = vadd.f32 %v20735_v62, %v7883_v47  ;;  %v7884_v26 = vmul.f32 %v20730_v31, %v7702_v49  ;;  %v15647_v51 = vpop.f32.mrb[59].mxu1  ;;  %v8136_v52 = vmax.f32 %v8134_v48, %v8135_v23 }
 0xc48   : > { %v7972_v55 = vmax.f32 %v7931_v50, 0.0  ;;  %v7932_v56 = vadd.f32 %v20735_v62, %v7884_v26  ;;  %8137 = vst.msk [vmem:[#allocation3 + $0x16] sm:$0xff] %vm763_vm1, %v8136_v52 }
 0xc4a   : > { %v8054_v59 = vmul.f32 %v8013_v53, %v7972_v55  ;;  %v7973_v60 = vmax.f32 %v7932_v56, 0.0 }
 0xc4b   : > { %v7707_v61 = vpop.f32.mrb[60].mxu1  ;;  %v8139_v9 = vld [vmem:[#allocation2 + $0x4a] ss:$2 sm:$0xff]  ;;  %v8141_v11 = vld [vmem:[#allocation2 + $0x4b] ss:$2 sm:$0xff] }
 0xc4c   : > { %8095 = vst.msk [vmem:[#allocation2 + $0x63] sm:$0xff] %vm763_vm1, %v8054_v59  ;;  %v8055_v63 = vmul.f32 %v8014_v58, %v7973_v60  ;;  %v7885_v0 = vmul.f32 %v20730_v31, %v7707_v61  ;;  %v15650_v54 = vpop.f32.mrb[61].mxu1  ;;  %v8146_v27 = vmax.f32 %v8139_v9, %v8141_v11 }
 0xc4d   : > { %v7710_v2 = vpop.f32.mrb[62].mxu1 }
 0xc4e   : > { %8096 = vst.msk [vmem:[#allocation2 + $0x6b] sm:$0xff] %vm763_vm1, %v8055_v63  ;;  %v7933_v24 = vadd.f32 %v20735_v62, %v7885_v0  ;;  %v7886_v15 = vmul.f32 %v20730_v31, %v7710_v2  ;;  %v15651_v28 = vpop.f32.mrb[63].mxu1 }
 0xc4f   : > { %v8248_v48 = vld [vmem:[#allocation3 + $0x11] sm:$0xff] }
 0xc50   : > { %v7974_v4 = vmax.f32 %v7933_v24, 0.0  ;;  %v7934_v39 = vadd.f32 %v20735_v62, %v7886_v15  ;;  %v8021_v24 = vld [vmem:[%s22099_s8 + $0x90] sm:$0xff] }
 0xc52   : > { %v8056_v5 = vmul.f32 %v8015_v3, %v7974_v4  ;;  %v7975_v44 = vmax.f32 %v7934_v39, 0.0  ;;  %v8022_v4 = vld [vmem:[%s22099_s8 + $0x98] sm:$0xff] }
 0xc53   : > { %v7715_v7 = vpop.f32.mrb[64].mxu1  ;;  %v8143_v6 = vld [vmem:[#allocation2 + $0x5c] ss:$2 sm:$0xff] }
 0xc54   : > { %8097 = vst.msk [vmem:[#allocation2 + $0x73] sm:$0xff] %vm763_vm1, %v8056_v5  ;;  %v8057_v13 = vmul.f32 %v8016_v17, %v7975_v44  ;;  %v7887_v14 = vmul.f32 %v20730_v31, %v7715_v7  ;;  %v15654_v16 = vpop.f32.mrb[65].mxu1 }
 0xc55   : > { %v7718_v18 = vpop.f32.mrb[66].mxu1  ;;  %v8145_v20 = vld [vmem:[#allocation2 + $0x5d] ss:$2 sm:$0xff] }
 0xc56   : > { %8098 = vst.msk [vmem:[#allocation2 + $0x7b] sm:$0xff] %vm763_vm1, %v8057_v13  ;;  %v7935_v22 = vadd.f32 %v20735_v62, %v7887_v14  ;;  %v7888_v8 = vmul.f32 %v20730_v31, %v7718_v18  ;;  %v15655_v25 = vpop.f32.mrb[67].mxu1  ;;  %v8147_v29 = vmax.f32 %v8143_v6, %v8145_v20  ;;  %v8023_v18 = vld [vmem:[%s22099_s8 + $0xa0] sm:$0xff] }
 0xc58   : > { %v7976_v57 = vmax.f32 %v7935_v22, 0.0  ;;  %v7936_v32 = vadd.f32 %v20735_v62, %v7888_v8  ;;  %v8148_v21 = vmax.f32 %v8146_v27, %v8147_v29  ;;  %v8024_v22 = vld [vmem:[%s22099_s8 + $0xa8] sm:$0xff] }
 0xc5a   : > { %v8058_v34 = vmul.f32 %v8017_v19, %v7976_v57  ;;  %v7977_v35 = vmax.f32 %v7936_v32, 0.0  ;;  %8149 = vst.msk [vmem:[#allocation3 + $0x20] sm:$0xff] %vm763_vm1, %v8148_v21 }
 0xc5b   : > { %v7723_v37 = vpop.f32.mrb[68].mxu1 }
 0xc5c   : > { %8099 = vst.msk [vmem:[#allocation2 + $0x83] sm:$0xff] %vm763_vm1, %v8058_v34  ;;  %v8059_v38 = vmul.f32 %v8018_v33, %v7977_v35  ;;  %v7889_v40 = vmul.f32 %v20730_v31, %v7723_v37  ;;  %v15658_v41 = vpop.f32.mrb[69].mxu1 }
 0xc5d   : > { %v7726_v42 = vpop.f32.mrb[70].mxu1  ;;  %v8151_v51 = vld [vmem:[#allocation2 + $0x6e] ss:$2 sm:$0xff]  ;;  %v8153_v52 = vld [vmem:[#allocation2 + $0x6f] ss:$2 sm:$0xff] }
 0xc5e   : > { %8100 = vst.msk [vmem:[#allocation2 + $0x8b] sm:$0xff] %vm763_vm1, %v8059_v38  ;;  %v7937_v43 = vadd.f32 %v20735_v62, %v7889_v40  ;;  %v7890_v45 = vmul.f32 %v20730_v31, %v7726_v42  ;;  %v15659_v10 = vpop.f32.mrb[71].mxu1  ;;  %v8158_v54 = vmax.f32 %v8151_v51, %v8153_v52  ;;  %v8025_v40 = vld [vmem:[%s22099_s8 + $0xb0] sm:$0xff] }
 0xc60   : > { %v7978_v12 = vmax.f32 %v7937_v43, 0.0  ;;  %v7938_v47 = vadd.f32 %v20735_v62, %v7890_v45  ;;  %v8026_v43 = vld [vmem:[%s22099_s8 + $0xb8] sm:$0xff] }
 0xc61   : > { %v8249_v23 = vld [vmem:[#allocation3 + $0x19] sm:$0xff]  ;;  %v8250_v8 = vld [vmem:[#allocation3 + $0x21] sm:$0xff] }
 0xc62   : > { %v8060_v36 = vmul.f32 %v8019_v46, %v7978_v12  ;;  %v7979_v49 = vmax.f32 %v7938_v47, 0.0  ;;  %v8260_v50 = vpack.c.bf16 %v8249_v23, %v8248_v48 }
 0xc63   : > { %v7731_v26 = vpop.f32.mrb[72].mxu1 }
 0xc64   : > { %8101 = vst.msk [vmem:[#allocation2 + $0x93] sm:$0xff] %vm763_vm1, %v8060_v36  ;;  %v8061_v53 = vmul.f32 %v8020_v30, %v7979_v49  ;;  %v7891_v55 = vmul.f32 %v20730_v31, %v7731_v26  ;;  %v15662_v56 = vpop.f32.mrb[73].mxu1  ;;  %15717 = vmatmul.mubr.msk.bf16.gmra.mrb[88].mxu0 %vm763_vm1, %v8260_v50 }
 0xc65   : > { %v7734_v58 = vpop.f32.mrb[74].mxu1  ;;  %15720 = vmatprep.mubr.msk.bf16.mxu0 %vm18570_vm0, %v18569_v1  ;;  %v8155_v59 = vld [vmem:[#allocation2 + $0x80] ss:$2 sm:$0xff]  ;;  %v8157_v60 = vld [vmem:[#allocation2 + $0x81] ss:$2 sm:$0xff] }
 0xc66   : > { %8102 = vst.msk [vmem:[#allocation2 + $0x9b] sm:$0xff] %vm763_vm1, %v8061_v53  ;;  %v7939_v61 = vadd.f32 %v20735_v62, %v7891_v55  ;;  %v7892_v63 = vmul.f32 %v20730_v31, %v7734_v58  ;;  %v15663_v0 = vpop.f32.mrb[75].mxu1  ;;  %v8159_v2 = vmax.f32 %v8155_v59, %v8157_v60  ;;  %v8027_v58 = vld [vmem:[%s22099_s8 + $0xc0] sm:$0xff] }
 0xc68   : > { %v7980_v15 = vmax.f32 %v7939_v61, 0.0  ;;  %v7940_v28 = vadd.f32 %v20735_v62, %v7892_v63  ;;  %v8160_v3 = vmax.f32 %v8158_v54, %v8159_v2  ;;  %v8028_v61 = vld [vmem:[%s22099_s8 + $0xc8] sm:$0xff] }
 0xc6a   : > { %v8062_v39 = vmul.f32 %v8021_v24, %v7980_v15  ;;  %v7981_v17 = vmax.f32 %v7940_v28, 0.0  ;;  %8161 = vst.msk [vmem:[#allocation3 + $0x2a] sm:$0xff] %vm763_vm1, %v8160_v3 }
 0xc6b   : > { %v7739_v5 = vpop.f32.mrb[76].mxu1 }
 0xc6c   : > { %8103 = vst.msk [vmem:[#allocation2 + $0xa3] sm:$0xff] %vm763_vm1, %v8062_v39  ;;  %v8063_v44 = vmul.f32 %v8022_v4, %v7981_v17  ;;  %v7893_v7 = vmul.f32 %v20730_v31, %v7739_v5  ;;  %v15666_v9 = vpop.f32.mrb[77].mxu1  ;;  %v8029_v17 = vld [vmem:[%s22099_s8 + $0xd0] sm:$0xff] }
 0xc6d   : > { %v7742_v11 = vpop.f32.mrb[78].mxu1  ;;  %v8163_v45 = vld [vmem:[#allocation2 + $0x92] ss:$2 sm:$0xff]  ;;  %v8165_v10 = vld [vmem:[#allocation2 + $0x93] ss:$2 sm:$0xff] }
 0xc6e   : > { %8104 = vst.msk [vmem:[#allocation2 + $0xab] sm:$0xff] %vm763_vm1, %v8063_v44  ;;  %v7941_v13 = vadd.f32 %v20735_v62, %v7893_v7  ;;  %v7894_v14 = vmul.f32 %v20730_v31, %v7742_v11  ;;  %v15667_v16 = vpop.f32.mrb[79].mxu1  ;;  %v8170_v50 = vmax.f32 %v8163_v45, %v8165_v10  ;;  %v8030_v7 = vld [vmem:[%s22099_s8 + $0xd8] sm:$0xff] }
 0xc70   : > { %v7982_v6 = vmax.f32 %v7941_v13, 0.0  ;;  %v7942_v20 = vadd.f32 %v20735_v62, %v7894_v14 }
 0xc71   : > { %v8251_v25 = vld [vmem:[#allocation3 + $0x29] sm:$0xff] }
 0xc72   : > { %v8064_v27 = vmul.f32 %v8023_v18, %v7982_v6  ;;  %v7983_v29 = vmax.f32 %v7942_v20, 0.0  ;;  %v8261_v19 = vpack.c.bf16 %v8251_v25, %v8250_v8 }
 0xc73   : > { %v7747_v57 = vpop.f32.mrb[80].mxu1 }
 0xc74   : > { %8105 = vst.msk [vmem:[#allocation2 + $0xb3] sm:$0xff] %vm763_vm1, %v8064_v27  ;;  %v8065_v32 = vmul.f32 %v8024_v22, %v7983_v29  ;;  %v7895_v21 = vmul.f32 %v20730_v31, %v7747_v57  ;;  %v15670_v33 = vpop.f32.mrb[81].mxu1  ;;  %15721 = vmatmul.mubr.msk.bf16.gmra.mrb[92].mxu0 %vm763_vm1, %v8261_v19 }
 0xc75   : > { %v7750_v34 = vpop.f32.mrb[82].mxu1  ;;  %15724 = vmatprep.mubr.msk.bf16.mxu0 %vm18570_vm0, %v18569_v1  ;;  %v8167_v30 = vld [vmem:[#allocation2 + $0xa4] ss:$2 sm:$0xff] }
 0xc76   : > { %8106 = vst.msk [vmem:[#allocation2 + $0xbb] sm:$0xff] %vm763_vm1, %v8065_v32  ;;  %v7943_v35 = vadd.f32 %v20735_v62, %v7895_v21  ;;  %v7896_v37 = vmul.f32 %v20730_v31, %v7750_v34  ;;  %v15671_v38 = vpop.f32.mrb[83].mxu1  ;;  %v8031_v33 = vld [vmem:[%s22099_s8 + $0xe0] sm:$0xff] }
 0xc78   : > { %v7984_v41 = vmax.f32 %v7943_v35, 0.0  ;;  %v7944_v42 = vadd.f32 %v20735_v62, %v7896_v37  ;;  %v8032_v37 = vld [vmem:[%s22099_s8 + $0xe8] sm:$0xff] }
 0xc7a   : > { %v8066_v46 = vmul.f32 %v8025_v40, %v7984_v41  ;;  %v7985_v12 = vmax.f32 %v7944_v42, 0.0 }
 0xc7b   : > { %v7755_v47 = vpop.f32.mrb[84].mxu1  ;;  %v8169_v48 = vld [vmem:[#allocation2 + $0xa5] ss:$2 sm:$0xff] }
 0xc7c   : > { %8107 = vst.msk [vmem:[#allocation2 + $0xc3] sm:$0xff] %vm763_vm1, %v8066_v46  ;;  %v8067_v23 = vmul.f32 %v8026_v43, %v7985_v12  ;;  %v7897_v36 = vmul.f32 %v20730_v31, %v7755_v47  ;;  %v15674_v49 = vpop.f32.mrb[85].mxu1  ;;  %v8171_v26 = vmax.f32 %v8167_v30, %v8169_v48  ;;  %v8033_v30 = vld [vmem:[%s22099_s8 + $0xf0] sm:$0xff] }
 0xc7d   : > { %v7758_v51 = vpop.f32.mrb[86].mxu1 }
 0xc7e   : > { %8108 = vst.msk [vmem:[#allocation2 + $0xcb] sm:$0xff] %vm763_vm1, %v8067_v23  ;;  %v7945_v52 = vadd.f32 %v20735_v62, %v7897_v36  ;;  %v7898_v53 = vmul.f32 %v20730_v31, %v7758_v51  ;;  %v15675_v55 = vpop.f32.mrb[87].mxu1  ;;  %v8172_v56 = vmax.f32 %v8170_v50, %v8171_v26  ;;  %v8034_v26 = vld [vmem:[%s22099_s8 + $0xf8] sm:$0xff] }
 0xc80   : > { %v7986_v59 = vmax.f32 %v7945_v52, 0.0  ;;  %v7946_v60 = vadd.f32 %v20735_v62, %v7898_v53  ;;  %8173 = vst.msk [vmem:[#allocation3 + $0x34] sm:$0xff] %vm763_vm1, %v8172_v56 }
 0xc82   : > { %v8068_v63 = vmul.f32 %v8027_v58, %v7986_v59  ;;  %v7987_v0 = vmax.f32 %v7946_v60, 0.0 }
 0xc83   : > { %v7763_v54 = vpop.f32.mrb[88].mxu1  ;;  %v8175_v9 = vld [vmem:[#allocation2 + $0xb6] ss:$2 sm:$0xff]  ;;  %v8177_v11 = vld [vmem:[#allocation2 + $0xb7] ss:$2 sm:$0xff] }
 0xc84   : > { %8109 = vst.msk [vmem:[#allocation2 + $0xd3] sm:$0xff] %vm763_vm1, %v8068_v63  ;;  %v8069_v2 = vmul.f32 %v8028_v61, %v7987_v0  ;;  %v7899_v24 = vmul.f32 %v20730_v31, %v7763_v54  ;;  %v15678_v15 = vpop.f32.mrb[89].mxu1  ;;  %v8182_v25 = vmax.f32 %v8175_v9, %v8177_v11 }
 0xc85   : > { %v7766_v28 = vpop.f32.mrb[90].mxu1 }
 0xc86   : > { %8110 = vst.msk [vmem:[#allocation2 + $0xdb] sm:$0xff] %vm763_vm1, %v8069_v2  ;;  %v7947_v3 = vadd.f32 %v20735_v62, %v7899_v24  ;;  %v7900_v4 = vmul.f32 %v20730_v31, %v7766_v28  ;;  %v15679_v39 = vpop.f32.mrb[91].mxu1 }
 0xc87   : > { %v8252_v48 = vld [vmem:[#allocation3 + $0x31] sm:$0xff] }
 0xc88   : > { %v7988_v5 = vmax.f32 %v7947_v3, 0.0  ;;  %v7948_v44 = vadd.f32 %v20735_v62, %v7900_v4  ;;  %v8035_v3 = vld [vmem:[%s22099_s8 + $0x100] sm:$0xff] }
 0xc8a   : > { %v8070_v13 = vmul.f32 %v8029_v17, %v7988_v5  ;;  %v7989_v14 = vmax.f32 %v7948_v44, 0.0  ;;  %v8036_v5 = vld [vmem:[%s22099_s8 + $0x108] sm:$0xff] }
 0xc8b   : > { %v7771_v16 = vpop.f32.mrb[92].mxu1  ;;  %v8179_v18 = vld [vmem:[#allocation2 + $0xc8] ss:$2 sm:$0xff]  ;;  %v8181_v6 = vld [vmem:[#allocation2 + $0xc9] ss:$2 sm:$0xff] }
 0xc8c   : > { %8111 = vst.msk [vmem:[#allocation2 + $0xe3] sm:$0xff] %vm763_vm1, %v8070_v13  ;;  %v8071_v20 = vmul.f32 %v8030_v7, %v7989_v14  ;;  %v7901_v22 = vmul.f32 %v20730_v31, %v7771_v16  ;;  %v15682_v8 = vpop.f32.mrb[93].mxu1  ;;  %v8183_v27 = vmax.f32 %v8179_v18, %v8181_v6 }
 0xc8d   : > { %v7774_v29 = vpop.f32.mrb[94].mxu1 }
 0xc8e   : > { %8112 = vst.msk [vmem:[#allocation2 + $0xeb] sm:$0xff] %vm763_vm1, %v8071_v20  ;;  %v7949_v19 = vadd.f32 %v20735_v62, %v7901_v22  ;;  %v7902_v57 = vmul.f32 %v20730_v31, %v7774_v29  ;;  %v15683_v32 = vpop.f32.mrb[95].mxu1  ;;  %v8184_v21 = vmax.f32 %v8182_v25, %v8183_v27  ;;  %v8037_v22 = vld [vmem:[%s22099_s8 + $0x110] sm:$0xff]  ;;  %v8038_v27 = vld [vmem:[%s22099_s8 + $0x118] sm:$0xff] }
 0xc90   : > { %v7990_v34 = vmax.f32 %v7949_v19, 0.0  ;;  %v7950_v35 = vadd.f32 %v20735_v62, %v7902_v57  ;;  %8185 = vst.msk [vmem:[#allocation3 + $0x3e] sm:$0xff] %vm763_vm1, %v8184_v21 }
 0xc92   : > { %v8072_v38 = vmul.f32 %v8031_v33, %v7990_v34  ;;  %v7991_v40 = vmax.f32 %v7950_v35, 0.0 }
 0xc93   : > { %v7779_v41 = vpop.f32.mrb[96].mxu1  ;;  %v8187_v55 = vld [vmem:[#allocation2 + $0xda] ss:$2 sm:$0xff]  ;;  %v8189_v56 = vld [vmem:[#allocation2 + $0xdb] ss:$2 sm:$0xff] }
 0xc94   : > { %8113 = vst.msk [vmem:[#allocation2 + $0xf3] sm:$0xff] %vm763_vm1, %v8072_v38  ;;  %v8073_v42 = vmul.f32 %v8032_v37, %v7991_v40  ;;  %v7903_v43 = vmul.f32 %v20730_v31, %v7779_v41  ;;  %v15686_v45 = vpop.f32.mrb[97].mxu1  ;;  %v8194_v15 = vmax.f32 %v8187_v55, %v8189_v56 }
 0xc95   : > { %v7782_v10 = vpop.f32.mrb[98].mxu1 }
 0xc96   : > { %8114 = vst.msk [vmem:[#allocation2 + $0xfb] sm:$0xff] %vm763_vm1, %v8073_v42  ;;  %v7951_v46 = vadd.f32 %v20735_v62, %v7903_v43  ;;  %v7904_v12 = vmul.f32 %v20730_v31, %v7782_v10  ;;  %v15687_v47 = vpop.f32.mrb[99].mxu1 }
 0xc97   : > { %v8253_v23 = vld [vmem:[#allocation3 + $0x39] sm:$0xff] }
 0xc98   : > { %v7992_v36 = vmax.f32 %v7951_v46, 0.0  ;;  %v7952_v49 = vadd.f32 %v20735_v62, %v7904_v12  ;;  %v8262_v50 = vpack.c.bf16 %v8253_v23, %v8252_v48 }
 0xc9a   : > { %v8074_v51 = vmul.f32 %v8033_v30, %v7992_v36  ;;  %v7993_v52 = vmax.f32 %v7952_v49, 0.0  ;;  %15725 = vmatmul.mubr.msk.bf16.gmra.mrb[96].mxu0 %vm763_vm1, %v8262_v50  ;;  %v8039_v30 = vld [vmem:[%s22099_s8 + $0x120] sm:$0xff]  ;;  %v8040_v49 = vld [vmem:[%s22099_s8 + $0x128] sm:$0xff] }
 0xc9b   : > { %v7787_v53 = vpop.f32.mrb[100].mxu1  ;;  %15728 = vmatprep.mubr.msk.bf16.mxu0 %vm18570_vm0, %v18569_v1  ;;  %v8191_v63 = vld [vmem:[#allocation2 + $0xec] ss:$2 sm:$0xff] }
 0xc9c   : > { %8115 = vst.msk [vmem:[#allocation2 + $0x103] sm:$0xff] %vm763_vm1, %v8074_v51  ;;  %v8075_v58 = vmul.f32 %v8034_v26, %v7993_v52  ;;  %v7905_v59 = vmul.f32 %v20730_v31, %v7787_v53  ;;  %v15690_v60 = vpop.f32.mrb[101].mxu1 }
 0xc9d   : > { %v7790_v61 = vpop.f32.mrb[102].mxu1  ;;  %v8193_v0 = vld [vmem:[#allocation2 + $0xed] ss:$2 sm:$0xff] }
 0xc9e   : > { %8116 = vst.msk [vmem:[#allocation2 + $0x10b] sm:$0xff] %vm763_vm1, %v8075_v58  ;;  %v7953_v54 = vadd.f32 %v20735_v62, %v7905_v59  ;;  %v7906_v2 = vmul.f32 %v20730_v31, %v7790_v61  ;;  %v15691_v24 = vpop.f32.mrb[103].mxu1  ;;  %v8195_v28 = vmax.f32 %v8191_v63, %v8193_v0  ;;  %v8041_v61 = vld [vmem:[%s22099_s8 + $0x130] sm:$0xff] }
 0xca0   : > { %v7994_v4 = vmax.f32 %v7953_v54, 0.0  ;;  %v7954_v39 = vadd.f32 %v20735_v62, %v7906_v2  ;;  %v8196_v17 = vmax.f32 %v8194_v15, %v8195_v28  ;;  %v8042_v54 = vld [vmem:[%s22099_s8 + $0x138] sm:$0xff] }
 0xca2   : > { %v8076_v44 = vmul.f32 %v8035_v3, %v7994_v4  ;;  %v7995_v7 = vmax.f32 %v7954_v39, 0.0  ;;  %8197 = vst.msk [vmem:[#allocation3 + $0x48] sm:$0xff] %vm763_vm1, %v8196_v17 }
 0xca3   : > { %v7795_v9 = vpop.f32.mrb[104].mxu1 }
 0xca4   : > { %8117 = vst.msk [vmem:[#allocation2 + $0x113] sm:$0xff] %vm763_vm1, %v8076_v44  ;;  %v8077_v11 = vmul.f32 %v8036_v5, %v7995_v7  ;;  %v7907_v13 = vmul.f32 %v20730_v31, %v7795_v9  ;;  %v15694_v14 = vpop.f32.mrb[105].mxu1  ;;  %v8043_v44 = vld [vmem:[%s22099_s8 + $0x140] sm:$0xf] }
 0xca5   : > { %v7798_v16 = vpop.f32.mrb[106].mxu1  ;;  %v8199_v34 = vld [vmem:[#allocation2 + $0xfe] ss:$2 sm:$0xff]  ;;  %v8201_v35 = vld [vmem:[#allocation2 + $0xff] ss:$2 sm:$0xff] }
 0xca6   : > { %8118 = vst.msk [vmem:[#allocation2 + $0x11b] sm:$0xff] %vm763_vm1, %v8077_v11  ;;  %v7955_v18 = vadd.f32 %v20735_v62, %v7907_v13  ;;  %v7908_v6 = vmul.f32 %v20730_v31, %v7798_v16  ;;  %v15695_v20 = vpop.f32.mrb[107].mxu1  ;;  %v8206_v12 = vmax.f32 %v8199_v34, %v8201_v35  ;;  %v8227_v35 = vld [vmem:[#allocation3 + $0x28] sm:$0xff] }
 0xca8   : > { %v7996_v8 = vmax.f32 %v7955_v18, 0.0  ;;  %v7956_v25 = vadd.f32 %v20735_v62, %v7908_v6 }
 0xca9   : > { %v8254_v29 = vld [vmem:[#allocation3 + $0x41] sm:$0xff]  ;;  %v8255_v19 = vld [vmem:[#allocation3 + $0x49] sm:$0xff] }
 0xcaa   : > { %v8078_v57 = vmul.f32 %v8037_v22, %v7996_v8  ;;  %v7997_v32 = vmax.f32 %v7956_v25, 0.0  ;;  %v8263_v21 = vpack.c.bf16 %v8255_v19, %v8254_v29  ;;  %v8223_v29 = vld [vmem:[#allocation3 + $0x8] sm:$0xff] }
 0xcab   : > { %v7803_v33 = vpop.f32.mrb[108].mxu1 }
 0xcac   : > { %8119 = vst.msk [vmem:[#allocation2 + $0x123] sm:$0xff] %vm763_vm1, %v8078_v57  ;;  %v8079_v37 = vmul.f32 %v8038_v27, %v7997_v32  ;;  %v7909_v38 = vmul.f32 %v20730_v31, %v7803_v33  ;;  %v15698_v40 = vpop.f32.mrb[109].mxu1  ;;  %15729 = vmatmul.mubr.msk.bf16.gmra.mrb[100].mxu0 %vm763_vm1, %v8263_v21  ;;  %v21017_v27 = vld [vmem:[#allocation3] sm:$0xff]  ;;  %v18439_v57 = vld [vmem:[%s22100_s10 + $0x20] sm:$0xff]   ;;  %v18440_v32 = vld [vmem:[%s22100_s10 + $0x28] sm:$0xff]  }
 0xcad   : > { %v7806_v41 = vpop.f32.mrb[110].mxu1  ;;  %15732 = vmatprep.mubr.msk.bf16.mxu0 %vm18570_vm0, %v18569_v1  ;;  %v8203_v42 = vld [vmem:[#allocation2 + $0x110] ss:$2 sm:$0xff]  ;;  %v8205_v43 = vld [vmem:[#allocation2 + $0x111] ss:$2 sm:$0xff]  ;;  %v8235_v19 = vpack.c.bf16 %v8223_v29, %v21017_v27  ;;  %v8224_v21 = vld [vmem:[#allocation3 + $0x10] sm:$0xff] }
 0xcae   : > { %8120 = vst.msk [vmem:[#allocation2 + $0x12b] sm:$0xff] %vm763_vm1, %v8079_v37  ;;  %v7957_v45 = vadd.f32 %v20735_v62, %v7909_v38  ;;  %v7910_v10 = vmul.f32 %v20730_v31, %v7806_v41  ;;  %v15699_v46 = vpop.f32.mrb[111].mxu1  ;;  %v8207_v47 = vmax.f32 %v8203_v42, %v8205_v43  ;;  %v8225_v33 = vld [vmem:[#allocation3 + $0x18] sm:$0xff]  ;;  %v8226_v37 = vld [vmem:[#allocation3 + $0x20] sm:$0xff]  ;;  %v8228_v41 = vld [vmem:[#allocation3 + $0x30] sm:$0xff] }
 0xcaf   : > { %v8236_v34 = vpack.c.bf16 %v8225_v33, %v8224_v21  ;;  %v8237_v38 = vpack.c.bf16 %v8227_v35, %v8226_v37  ;;  %v8229_v40 = vld [vmem:[#allocation3 + $0x38] sm:$0xff]  ;;  %v8231_v43 = vld [vmem:[#allocation3 + $0x48] sm:$0xff] }
 0xcb0   : > { %v7998_v48 = vmax.f32 %v7957_v45, 0.0  ;;  %v7958_v23 = vadd.f32 %v20735_v62, %v7910_v10  ;;  %v8208_v36 = vmax.f32 %v8206_v12, %v8207_v47  ;;  %v8238_v42 = vpack.c.bf16 %v8229_v40, %v8228_v41  ;;  %v8230_v45 = vld [vmem:[#allocation3 + $0x40] sm:$0xff]  ;;  %v8836_v29 = vld [vmem:[#allocation3 + $0x33] sm:$0xff] }
 0xcb1   : > { %v8239_v10 = vpack.c.bf16 %v8231_v43, %v8230_v45  ;;  %v8837_v21 = vld [vmem:[#allocation3 + $0x3b] sm:$0xff]  ;;  %v8990_v45 = vld [vmem:[#allocation3 + $0xc] sm:$0xff] }
 0xcb2   : > { %v8080_v50 = vmul.f32 %v8039_v30, %v7998_v48  ;;  %v7999_v26 = vmax.f32 %v7958_v23, 0.0  ;;  %8209 = vst.msk [vmem:[#allocation3 + $0x52] sm:$0xff] %vm763_vm1, %v8208_v36  ;;  %v21049_v23 = vld [vmem:[#allocation3 + $0x2] sm:$0xff]  ;;  %v8514_v36 = vld [vmem:[#allocation3 + $0xa] sm:$0xff] }
 0xcb3   : > { %v7811_v51 = vpop.f32.mrb[112].mxu1 }
 0xcb4   : > { %8121 = vst.msk [vmem:[#allocation2 + $0x133] sm:$0xff] %vm763_vm1, %v8080_v50  ;;  %v8081_v52 = vmul.f32 %v8040_v49, %v7999_v26  ;;  %v7911_v53 = vmul.f32 %v20730_v31, %v7811_v51  ;;  %v15702_v55 = vpop.f32.mrb[113].mxu1  ;;  %v8526_v49 = vpack.c.bf16 %v8514_v36, %v21049_v23  ;;  %v18441_v50 = vld [vmem:[%s22100_s10 + $0x30] sm:$0xff]   ;;  %v18442_v26 = vld [vmem:[%s22100_s10 + $0x38] sm:$0xff]  }
 0xcb5   : > { %v7814_v56 = vpop.f32.mrb[114].mxu1  ;;  %v8211_v9 = vld [vmem:[#allocation2 + $0x122] ss:$2 sm:$0xff]  ;;  %v8213_v11 = vld [vmem:[#allocation2 + $0x123] ss:$2 sm:$0xff]  ;;  %v8518_v55 = vld [vmem:[#allocation3 + $0x2a] sm:$0xff] }
 0xcb6   : > { %8122 = vst.msk [vmem:[#allocation2 + $0x13b] sm:$0xff] %vm763_vm1, %v8081_v52  ;;  %v7959_v58 = vadd.f32 %v20735_v62, %v7911_v53  ;;  %v7912_v59 = vmul.f32 %v20730_v31, %v7814_v56  ;;  %v15703_v60 = vpop.f32.mrb[115].mxu1  ;;  %v8516_v51 = vld [vmem:[#allocation3 + $0x1a] sm:$0xff]  ;;  %v8515_v52 = vld [vmem:[#allocation3 + $0x12] sm:$0xff]  ;;  %v8517_v56 = vld [vmem:[#allocation3 + $0x22] sm:$0xff] }
 0xcb7   : > { %v8527_v53 = vpack.c.bf16 %v8516_v51, %v8515_v52  ;;  %v8519_v60 = vld [vmem:[#allocation3 + $0x32] sm:$0xff] }
 0xcb8   : > { %v8000_v63 = vmax.f32 %v7959_v58, 0.0  ;;  %v7960_v0 = vadd.f32 %v20735_v62, %v7912_v59  ;;  %v8528_v58 = vpack.c.bf16 %v8518_v55, %v8517_v56  ;;  %v8520_v59 = vld [vmem:[#allocation3 + $0x3a] sm:$0xff] }
 0xcb9   : > { %v8256_v20 = vld [vmem:[#allocation3 + $0x51] sm:$0xff] }
 0xcba   : > { %v8082_v2 = vmul.f32 %v8041_v61, %v8000_v63  ;;  %v8001_v24 = vmax.f32 %v7960_v0, 0.0  ;;  %v8232_v12 = vld [vmem:[#allocation3 + $0x50] sm:$0xff]  ;;  %v8529_v61 = vpack.c.bf16 %v8520_v59, %v8519_v60  ;;  %v8521_v63 = vld [vmem:[#allocation3 + $0x42] sm:$0xff] }
 0xcbb   : > { %v7819_v15 = vpop.f32.mrb[116].mxu1  ;;  %v8522_v0 = vld [vmem:[#allocation3 + $0x4a] sm:$0xff]  ;;  %v8840_v35 = vld [vmem:[#allocation3 + $0x53] sm:$0xff] }
 0xcbc   : > { %8123 = vst.msk [vmem:[#allocation2 + $0x143] sm:$0xff] %vm763_vm1, %v8082_v2  ;;  %v8083_v28 = vmul.f32 %v8042_v54, %v8001_v24  ;;  %v7913_v3 = vmul.f32 %v20730_v31, %v7819_v15  ;;  %v15706_v4 = vpop.f32.mrb[117].mxu1  ;;  %v8218_v31 = vmax.f32 %v8211_v9, %v8213_v11  ;;  %v8530_v54 = vpack.c.bf16 %v8522_v0, %v8521_v63  ;;  %v8523_v24 = vld [vmem:[#allocation3 + $0x52] sm:$0xff] }
 0xcbd   : > { %v7822_v39 = vpop.f32.mrb[118].mxu1  ;;  %v8215_v14 = vld [vmem:[#allocation2 + $0x134] ss:$2 sm:$0xff]  ;;  %v8689_v9 = vpack.c.bf16 %v8523_v24, %v8522_v0 }
 0xcbe   : > { %8124 = vst.msk [vmem:[#allocation2 + $0x14b] sm:$0xff] %vm763_vm1, %v8083_v28  ;;  %v7961_v17 = vadd.f32 %v20735_v62, %v7913_v3  ;;  %v15707_v5 = vpop.f32.mrb[119].mxu1  ;;  %v18443_v4 = vld [vmem:[%s22100_s10 + $0x40] sm:$0xff]   ;;  %v8685_v39 = vpack.c.bf16 %v8515_v52, %v8514_v36  ;;  %v8996_v52 = vld [vmem:[#allocation3 + $0x3c] sm:$0xff] }
 0xcbf   : > { %v8686_v5 = vpack.c.bf16 %v8517_v56, %v8516_v51  ;;  %v8997_v51 = vld [vmem:[#allocation3 + $0x44] sm:$0xff]  ;;  %v8999_v56 = vld [vmem:[#allocation3 + $0x54] sm:$0xff] }
 0xcc0   : > { %v8002_v7 = vmax.f32 %v7961_v17, 0.0  ;;  %v18444_v17 = vld [vmem:[%s22100_s10 + $0x48] sm:$0xff]  }
 0xcc2   : > { %v8084_v13 = vmul.f32 %v8043_v44, %v8002_v7  ;;  %v8687_v44 = vpack.c.bf16 %v8519_v60, %v8518_v55  ;;  %v8688_v7 = vpack.c.bf16 %v8521_v63, %v8520_v59  ;;  %v8998_v55 = vld [vmem:[#allocation3 + $0x4c] sm:$0xff]  ;;  %v9001_v60 = vld [vmem:[#allocation3 + $0x64] sm:$0xff] }
 0xcc3   : > { %v8217_v16 = vld [vmem:[#allocation2 + $0x135] ss:$2 sm:$0xff] }
 0xcc4   : > { %8125 = vst.msk [vmem:[#allocation2 + $0x153] sm:$0xf] %vm876_vm3, %v8084_v13  ;;  %v8219_v18 = vmax.f32 %v8215_v14, %v8217_v16  ;;  %v8684_v14 = vld [vmem:[#allocation3 + $0x6a] sm:$0xf] }
 0xcc5   : > { %v8691_v16 = vpack.c.bf16 %v8684_v14, %v8684_v14  ;;  %v9002_v63 = vld [vmem:[#allocation3 + $0x6c] sm:$0xf]  ;;  %v18451_v14 = vld [vmem:[%s22100_s10 + $0x80] sm:$0xff]  }
 0xcc6   : > { %v8220_v6 = vmax.f32 %v8218_v31, %v8219_v18  ;;  %v8831_v31 = vld [vmem:[#allocation3 + $0xb] sm:$0xff]  ;;  %v8832_v18 = vld [vmem:[#allocation3 + $0x13] sm:$0xff]  ;;  %v9009_v0 = vpack.c.bf16 %v9002_v63, %v9002_v63 }
 0xcc8   : > { %8221 = vst.msk [vmem:[#allocation3 + $0x5c] sm:$0xff] %vm763_vm1, %v8220_v6  ;;  %v18445_v6 = vld [vmem:[%s22100_s10 + $0x50] sm:$0xff]  }
 0xccf   : > { %v8257_v62 = vld [vmem:[#allocation3 + $0x59] sm:$0xff]  ;;  %v8258_v8 = vld [vmem:[#allocation3 + $0x61] sm:$0xf] }
 0xcd0   : > { %v8264_v22 = vpack.c.bf16 %v8257_v62, %v8256_v20  ;;  %v8265_v25 = vpack.c.bf16 %v8258_v8, %v8258_v8  ;;  %v8233_v46 = vld [vmem:[#allocation3 + $0x58] sm:$0xff]  ;;  %v8234_v30 = vld [vmem:[#allocation3 + $0x60] sm:$0xf]  ;;  %v8844_v20 = vpack.c.bf16 %v8832_v18, %v8831_v31  ;;  %v18446_v62 = vld [vmem:[%s22100_s10 + $0x58] sm:$0xff]  }
 0xcd1   : > { %v8240_v47 = vpack.c.bf16 %v8233_v46, %v8232_v12  ;;  %v8241_v48 = vpack.c.bf16 %v8234_v30, %v8234_v30  ;;  %v8524_v2 = vld [vmem:[#allocation3 + $0x5a] sm:$0xff]  ;;  %v8525_v28 = vld [vmem:[#allocation3 + $0x62] sm:$0xf]  ;;  %v18447_v46 = vld [vmem:[%s22100_s10 + $0x60] sm:$0xff]  }
 0xcd2   : > { %15733 = vmatmul.mubr.msk.bf16.gmra.mrb[104].mxu0 %vm763_vm1, %v8264_v22  ;;  %v8531_v15 = vpack.c.bf16 %v8524_v2, %v8523_v24  ;;  %v8532_v3 = vpack.c.bf16 %v8525_v28, %v8525_v28  ;;  %v8683_v11 = vld [vmem:[#allocation3 + $0x62] sm:$0xff]  ;;  %v18452_v31 = vld [vmem:[%s22100_s10 + $0x88] sm:$0xff]   ;;  %v9311_v18 = vld [vmem:[#allocation3 + $0x2d] sm:$0xff] }
 0xcd3   : > { %15736 = vmatprep.mubr.msk.bf16.mxu0 %vm18570_vm0, %v18569_v1  ;;  %v8690_v13 = vpack.c.bf16 %v8683_v11, %v8524_v2  ;;  %v8834_v22 = vld [vmem:[#allocation3 + $0x23] sm:$0xff]  ;;  %v8833_v8 = vld [vmem:[#allocation3 + $0x1b] sm:$0xff] }
 0xcd4   : > { %v8842_v40 = vld [vmem:[#allocation3 + $0x63] sm:$0xff] }
 0xcd5   : > { %v8993_v30 = vld [vmem:[#allocation3 + $0x24] sm:$0xff]  ;;  %v9000_v59 = vld [vmem:[#allocation3 + $0x5c] sm:$0xff] }
 0xcd6   : > { %v18450_v24 = vld [vmem:[%s22100_s10 + $0x78] sm:$0xff]   ;;  %v9309_v11 = vld [vmem:[#allocation3 + $0x1d] sm:$0xff] }
 0xcda   : > { %15737 = vmatmul.mubr.msk.bf16.gmra.mrb[108].mxu0 %vm763_vm1, %v8265_v25  ;;  %v8845_v25 = vpack.c.bf16 %v8834_v22, %v8833_v8  ;;  %v9312_v22 = vld [vmem:[#allocation3 + $0x35] sm:$0xff] }
 0xcdb   : > { %15744 = vmatprep.mubr.msk.bf16.mxu0 %vm18570_vm0, %v18569_v1 }
 0xce2   : > { %15745 = vmatmul.mubr.msk.bf16.vlgmr.msra.gmra.mrb[84].mxu0 %vm763_vm1, %v8235_v19  ;;  %v8835_v19 = vld [vmem:[#allocation3 + $0x2b] sm:$0xff] }
 0xce3   : > { %15773 = vmatpush3.bf16.msra.mxu0 %v18439_v57  ;;  %15748 = vmatprep.mubr.msk.bf16.mxu0 %vm18570_vm0, %v18569_v1  ;;  %v8846_v57 = vpack.c.bf16 %v8836_v29, %v8835_v19  ;;  %v9314_v29 = vld [vmem:[#allocation3 + $0x45] sm:$0xff] }
 0xce4   : > { %15774 = vmatprep.subr.bf16.mxu0 %v18569_v1 }
 0xce7   : > { %15775 = vmatpush3.bf16.msra.mxu0 %v18440_v32  ;;  %v8838_v32 = vld [vmem:[#allocation3 + $0x43] sm:$0xff] }
 0xce8   : > { %15804 = vmatprep.subr.bf16.mxu0 %v18569_v1  ;;  %v8847_v33 = vpack.c.bf16 %v8838_v32, %v8837_v21  ;;  %v9317_v32 = vld [vmem:[#allocation3 + $0x5d] sm:$0xff] }
 0xcea   : > { %15749 = vmatmul.mubr.msk.bf16.gmra.mrb[88].mxu0 %vm763_vm1, %v8236_v34  ;;  %v8839_v34 = vld [vmem:[#allocation3 + $0x4b] sm:$0xff] }
 0xceb   : > { %15752 = vmatprep.mubr.msk.bf16.mxu0 %vm18570_vm0, %v18569_v1  ;;  %v8848_v37 = vpack.c.bf16 %v8840_v35, %v8839_v34  ;;  %v9319_v34 = vld [vmem:[#allocation3 + $0x6d] sm:$0xff] }
 0xcf2   : > { %15753 = vmatmul.mubr.msk.bf16.gmra.mrb[92].mxu0 %vm763_vm1, %v8237_v38  ;;  %v8841_v38 = vld [vmem:[#allocation3 + $0x5b] sm:$0xff] }
 0xcf3   : > { %15756 = vmatprep.mubr.msk.bf16.mxu0 %vm18570_vm0, %v18569_v1  ;;  %v8849_v41 = vpack.c.bf16 %v8842_v40, %v8841_v38  ;;  %v9468_v40 = vld [vmem:[#allocation3 + $0x1e] sm:$0xff] }
 0xcfa   : > { %15757 = vmatmul.mubr.msk.bf16.gmra.mrb[96].mxu0 %vm763_vm1, %v8238_v42  ;;  %v8843_v42 = vld [vmem:[#allocation3 + $0x6b] sm:$0xf] }
 0xcfb   : > { %15760 = vmatprep.mubr.msk.bf16.mxu0 %vm18570_vm0, %v18569_v1  ;;  %v8850_v43 = vpack.c.bf16 %v8843_v42, %v8843_v42 }
 0xd02   : > { %15761 = vmatmul.mubr.msk.bf16.gmra.mrb[100].mxu0 %vm763_vm1, %v8239_v10  ;;  %v8991_v10 = vld [vmem:[#allocation3 + $0x14] sm:$0xff] }
 0xd03   : > { %15764 = vmatprep.mubr.msk.bf16.mxu0 %vm18570_vm0, %v18569_v1  ;;  %v9003_v12 = vpack.c.bf16 %v8991_v10, %v8990_v45  ;;  %v9469_v45 = vld [vmem:[#allocation3 + $0x26] sm:$0xff] }
 0xd0a   : > { %15765 = vmatmul.mubr.msk.bf16.gmra.mrb[104].mxu0 %vm763_vm1, %v8240_v47  ;;  %v18448_v47 = vld [vmem:[%s22100_s10 + $0x68] sm:$0xff]  }
 0xd0b   : > { %15768 = vmatprep.mubr.msk.bf16.mxu0 %vm18570_vm0, %v18569_v1 }
 0xd12   : > { %15769 = vmatmul.mubr.msk.bf16.gmra.mrb[108].mxu0 %vm763_vm1, %v8241_v48  ;;  %v8992_v48 = vld [vmem:[#allocation3 + $0x1c] sm:$0xff] }
 0xd13   : > { %15776 = vmatprep.mubr.msk.bf16.mxu0 %vm18570_vm0, %v18569_v1  ;;  %v9004_v36 = vpack.c.bf16 %v8993_v30, %v8992_v48  ;;  %v9162_v2 = vpack.c.bf16 %v8992_v48, %v8991_v10  ;;  %v9473_v48 = vld [vmem:[#allocation3 + $0x46] sm:$0xff] }
 0xd1a   : > { %15777 = vmatmul.mubr.msk.bf16.vlgmr.msra.gmra.mrb[84].mxu0 %vm763_vm1, %v8526_v49  ;;  %v8995_v49 = vld [vmem:[#allocation3 + $0x34] sm:$0xff] }
 0xd1b   : > { %15805 = vmatpush3.bf16.msra.mxu0 %v18441_v50  ;;  %15780 = vmatprep.mubr.msk.bf16.mxu0 %vm18570_vm0, %v18569_v1  ;;  %v8994_v50 = vld [vmem:[#allocation3 + $0x2c] sm:$0xff]  ;;  %v9164_v28 = vpack.c.bf16 %v8996_v52, %v8995_v49 }
 0xd1c   : > { %15806 = vmatprep.subr.bf16.mxu0 %v18569_v1 }
 0xd1f   : > { %15807 = vmatpush3.bf16.msra.mxu0 %v18442_v26  ;;  %v9005_v26 = vpack.c.bf16 %v8995_v49, %v8994_v50  ;;  %v9475_v49 = vld [vmem:[#allocation3 + $0x56] sm:$0xff] }
 0xd20   : > { %15836 = vmatprep.subr.bf16.mxu0 %v18569_v1 }
 0xd22   : > { %15781 = vmatmul.mubr.msk.bf16.gmra.mrb[88].mxu0 %vm763_vm1, %v8527_v53  ;;  %v9006_v53 = vpack.c.bf16 %v8997_v51, %v8996_v52  ;;  %v9478_v52 = vld [vmem:[#allocation3 + $0x6e] sm:$0xff] }
 0xd23   : > { %15784 = vmatprep.mubr.msk.bf16.mxu0 %vm18570_vm0, %v18569_v1 }
 0xd2a   : > { %15785 = vmatmul.mubr.msk.bf16.gmra.mrb[92].mxu0 %vm763_vm1, %v8528_v58  ;;  %v9007_v58 = vpack.c.bf16 %v8999_v56, %v8998_v55 }
 0xd2b   : > { %15788 = vmatprep.mubr.msk.bf16.mxu0 %vm18570_vm0, %v18569_v1 }
 0xd32   : > { %15789 = vmatmul.mubr.msk.bf16.gmra.mrb[96].mxu0 %vm763_vm1, %v8529_v61  ;;  %v9008_v61 = vpack.c.bf16 %v9001_v60, %v9000_v59 }
 0xd33   : > { %15792 = vmatprep.mubr.msk.bf16.mxu0 %vm18570_vm0, %v18569_v1 }
 0xd3a   : > { %15793 = vmatmul.mubr.msk.bf16.gmra.mrb[100].mxu0 %vm763_vm1, %v8530_v54  ;;  %v18449_v54 = vld [vmem:[%s22100_s10 + $0x70] sm:$0xff]   ;;  %s18509_s10 = sshll.u32 %s18571_s1, 4  ;;  %s18510_s10 = int_to_ptr.vmem [resolvable:$false] %s18509_s10 }
 0xd3b   : > { %15796 = vmatprep.mubr.msk.bf16.mxu0 %vm18570_vm0, %v18569_v1  ;;  %s18511_s8 = scalar_lea.vmem %s18510_s10, 32 }
 0xd42   : > { %15797 = vmatmul.mubr.msk.bf16.gmra.mrb[104].mxu0 %vm763_vm1, %v8531_v15  ;;  %v9163_v15 = vpack.c.bf16 %v8994_v50, %v8993_v30  ;;  %v9474_v30 = vld [vmem:[#allocation3 + $0x4e] sm:$0xff]  ;;  %v9476_v50 = vld [vmem:[#allocation3 + $0x5e] sm:$0xff] }
 0xd43   : > { %15800 = vmatprep.mubr.msk.bf16.mxu0 %vm18570_vm0, %v18569_v1 }
 0xd4a   : > { %15801 = vmatmul.mubr.msk.bf16.gmra.mrb[108].mxu0 %vm763_vm1, %v8532_v3  ;;  %v9165_v3 = vpack.c.bf16 %v8998_v55, %v8997_v51  ;;  %v9477_v51 = vld [vmem:[#allocation3 + $0x66] sm:$0xff]  ;;  %v9479_v55 = vld [vmem:[#allocation3 + $0x76] sm:$0xf] }
 0xd4b   : > { %15808 = vmatprep.mubr.msk.bf16.mxu0 %vm18570_vm0, %v18569_v1 }
 0xd52   : > { %15809 = vmatmul.mubr.msk.bf16.vlgmr.msra.gmra.mrb[84].mxu0 %vm763_vm1, %v8685_v39  ;;  %v18453_v39 = vld [vmem:[%s22052_s13 + $0x10] sm:$0xff]  }
 0xd53   : > { %15837 = vmatpush3.bf16.msra.mxu0 %v18443_v4  ;;  %15812 = vmatprep.mubr.msk.bf16.mxu0 %vm18570_vm0, %v18569_v1  ;;  %v9166_v4 = vpack.c.bf16 %v9000_v59, %v8999_v56  ;;  %v9486_v56 = vpack.c.bf16 %v9479_v55, %v9479_v55  ;;  %v21339_v55 = vld [vmem:[%s22103_s0 + $0x30] sm:$0xff] }
 0xd54   : > { %15838 = vmatprep.subr.bf16.mxu0 %v18569_v1  ;;  %15997 = vmatpush3.bf16.msra.mxu1 %v18453_v39 }
 0xd55   : > { %15998 = vmatprep.subr.bf16.mxu1 %v18569_v1 }
 0xd57   : > { %15839 = vmatpush3.bf16.msra.mxu0 %v18444_v17  ;;  %v9160_v17 = vld [vmem:[#allocation3 + $0x6c] sm:$0xff] }
 0xd58   : > { %15868 = vmatprep.subr.bf16.mxu0 %v18569_v1 }
 0xd5a   : > { %15813 = vmatmul.mubr.msk.bf16.gmra.mrb[88].mxu0 %vm763_vm1, %v8686_v5  ;;  %v18454_v5 = vld [vmem:[%s22052_s13 + $0x18] sm:$0xff]  }
 0xd5b   : > { %15816 = vmatprep.mubr.msk.bf16.mxu0 %vm18570_vm0, %v18569_v1  ;;  %15999 = vmatpush3.bf16.msra.mxu1 %v18454_v5 }
 0xd5c   : > { %16028 = vmatprep.subr.bf16.mxu1 %v18569_v1 }
 0xd62   : > { %15817 = vmatmul.mubr.msk.bf16.gmra.mrb[92].mxu0 %vm763_vm1, %v8687_v44  ;;  %v9167_v44 = vpack.c.bf16 %v9160_v17, %v9001_v60  ;;  %v21265_v60 = vld [vmem:[%s22051_s12] ss:$0 sm:$0xff] }
 0xd63   : > { %15820 = vmatprep.mubr.msk.bf16.mxu0 %vm18570_vm0, %v18569_v1 }
 0xd6a   : > { %15821 = vmatmul.mubr.msk.bf16.gmra.mrb[96].mxu0 %vm763_vm1, %v8688_v7  ;;  %v9161_v7 = vld [vmem:[#allocation3 + $0x74] sm:$0xf] }
 0xd6b   : > { %15824 = vmatprep.mubr.msk.bf16.mxu0 %vm18570_vm0, %v18569_v1 }
 0xd72   : > { %15825 = vmatmul.mubr.msk.bf16.gmra.mrb[100].mxu0 %vm763_vm1, %v8689_v9  ;;  %v9168_v9 = vpack.c.bf16 %v9161_v7, %v9161_v7 }
 0xd73   : > { %15828 = vmatprep.mubr.msk.bf16.mxu0 %vm18570_vm0, %v18569_v1 }
 0xd7a   : > { %15829 = vmatmul.mubr.msk.bf16.gmra.mrb[104].mxu0 %vm763_vm1, %v8690_v13  ;;  %v9308_v13 = vld [vmem:[#allocation3 + $0x15] sm:$0xff] }
 0xd7b   : > { %15832 = vmatprep.mubr.msk.bf16.mxu0 %vm18570_vm0, %v18569_v1 }
 0xd82   : > { %15833 = vmatmul.mubr.msk.bf16.gmra.mrb[108].mxu0 %vm763_vm1, %v8691_v16  ;;  %v9321_v16 = vpack.c.bf16 %v9309_v11, %v9308_v13 }
 0xd83   : > { %15840 = vmatprep.mubr.msk.bf16.mxu0 %vm18570_vm0, %v18569_v1 }
 0xd8a   : > { %15841 = vmatmul.mubr.msk.bf16.vlgmr.msra.gmra.mrb[84].mxu0 %vm763_vm1, %v8844_v20 }
 0xd8b   : > { %15869 = vmatpush3.bf16.msra.mxu0 %v18445_v6  ;;  %15844 = vmatprep.mubr.msk.bf16.mxu0 %vm18570_vm0, %v18569_v1  ;;  %v9310_v6 = vld [vmem:[#allocation3 + $0x25] sm:$0xff] }
 0xd8c   : > { %15870 = vmatprep.subr.bf16.mxu0 %v18569_v1  ;;  %v9322_v20 = vpack.c.bf16 %v9311_v18, %v9310_v6 }
 0xd8f   : > { %15871 = vmatpush3.bf16.msra.mxu0 %v18446_v62  ;;  %v9313_v62 = vld [vmem:[#allocation3 + $0x3d] sm:$0xff] }
 0xd90   : > { %15900 = vmatprep.subr.bf16.mxu0 %v18569_v1  ;;  %v9323_v8 = vpack.c.bf16 %v9313_v62, %v9312_v22  ;;  %v9742_v62 = vld [vmem:[#allocation3 + $0x1] sm:$0xff] }
 0xd92   : > { %15845 = vmatmul.mubr.msk.bf16.gmra.mrb[88].mxu0 %vm763_vm1, %v8845_v25  ;;  %v9315_v25 = vld [vmem:[#allocation3 + $0x4d] sm:$0xff] }
 0xd93   : > { %15848 = vmatprep.mubr.msk.bf16.mxu0 %vm18570_vm0, %v18569_v1  ;;  %v9324_v19 = vpack.c.bf16 %v9315_v25, %v9314_v29 }
 0xd9a   : > { %15849 = vmatmul.mubr.msk.bf16.gmra.mrb[92].mxu0 %vm763_vm1, %v8846_v57  ;;  %v9316_v57 = vld [vmem:[#allocation3 + $0x55] sm:$0xff] }
 0xd9b   : > { %15852 = vmatprep.mubr.msk.bf16.mxu0 %vm18570_vm0, %v18569_v1  ;;  %v9325_v21 = vpack.c.bf16 %v9317_v32, %v9316_v57 }
 0xda2   : > { %15853 = vmatmul.mubr.msk.bf16.gmra.mrb[96].mxu0 %vm763_vm1, %v8847_v33  ;;  %v9318_v33 = vld [vmem:[#allocation3 + $0x65] sm:$0xff] }
 0xda3   : > { %15856 = vmatprep.mubr.msk.bf16.mxu0 %vm18570_vm0, %v18569_v1  ;;  %v9326_v35 = vpack.c.bf16 %v9319_v34, %v9318_v33 }
 0xdaa   : > { %15857 = vmatmul.mubr.msk.bf16.gmra.mrb[100].mxu0 %vm763_vm1, %v8848_v37  ;;  %v9320_v37 = vld [vmem:[#allocation3 + $0x75] sm:$0xf] }
 0xdab   : > { %15860 = vmatprep.mubr.msk.bf16.mxu0 %vm18570_vm0, %v18569_v1  ;;  %v9327_v38 = vpack.c.bf16 %v9320_v37, %v9320_v37 }
 0xdb2   : > { %15861 = vmatmul.mubr.msk.bf16.gmra.mrb[104].mxu0 %vm763_vm1, %v8849_v41  ;;  %v9467_v41 = vld [vmem:[#allocation3 + $0x16] sm:$0xff] }
 0xdb3   : > { %15864 = vmatprep.mubr.msk.bf16.mxu0 %vm18570_vm0, %v18569_v1  ;;  %v9480_v42 = vpack.c.bf16 %v9468_v40, %v9467_v41  ;;  %v21313_v40 = vld [vmem:[%s22103_s0 + $0x20] sm:$0xff]  ;;  %v18456_v41 = vld [vmem:[%s22052_s13 + $0x8] sm:$0xff]  }
 0xdba   : > { %15865 = vmatmul.mubr.msk.bf16.gmra.mrb[108].mxu0 %vm763_vm1, %v8850_v43  ;;  %v9470_v43 = vld [vmem:[#allocation3 + $0x2e] sm:$0xff] }
 0xdbb   : > { %15872 = vmatprep.mubr.msk.bf16.mxu0 %vm18570_vm0, %v18569_v1  ;;  %v9481_v10 = vpack.c.bf16 %v9470_v43, %v9469_v45  ;;  %v21325_v45 = vld [vmem:[%s22103_s0 + $0x28] sm:$0xff] }
 0xdc2   : > { %15873 = vmatmul.mubr.msk.bf16.vlgmr.msra.gmra.mrb[84].mxu0 %vm763_vm1, %v9003_v12  ;;  %v9471_v12 = vld [vmem:[#allocation3 + $0x36] sm:$0xff] }
 0xdc3   : > { %15901 = vmatpush3.bf16.msra.mxu0 %v18447_v46  ;;  %15876 = vmatprep.mubr.msk.bf16.mxu0 %vm18570_vm0, %v18569_v1  ;;  %v9472_v46 = vld [vmem:[#allocation3 + $0x3e] sm:$0xff] }
 0xdc4   : > { %15902 = vmatprep.subr.bf16.mxu0 %v18569_v1 }
 0xdc7   : > { %15903 = vmatpush3.bf16.msra.mxu0 %v18448_v47  ;;  %v9482_v47 = vpack.c.bf16 %v9472_v46, %v9471_v12 }
 0xdc8   : > { %15932 = vmatprep.subr.bf16.mxu0 %v18569_v1 }
 0xdca   : > { %15877 = vmatmul.mubr.msk.bf16.gmra.mrb[88].mxu0 %vm763_vm1, %v9004_v36  ;;  %v9483_v36 = vpack.c.bf16 %v9474_v30, %v9473_v48 }
 0xdcb   : > { %15880 = vmatprep.mubr.msk.bf16.mxu0 %vm18570_vm0, %v18569_v1 }
 0xdd2   : > { %15881 = vmatmul.mubr.msk.bf16.gmra.mrb[92].mxu0 %vm763_vm1, %v9005_v26  ;;  %v9484_v26 = vpack.c.bf16 %v9476_v50, %v9475_v49 }
 0xdd3   : > { %15884 = vmatprep.mubr.msk.bf16.mxu0 %vm18570_vm0, %v18569_v1 }
 0xdda   : > { %15885 = vmatmul.mubr.msk.bf16.gmra.mrb[96].mxu0 %vm763_vm1, %v9006_v53  ;;  %v9485_v53 = vpack.c.bf16 %v9478_v52, %v9477_v51 }
 0xddb   : > { %15888 = vmatprep.mubr.msk.bf16.mxu0 %vm18570_vm0, %v18569_v1 }
 0xde2   : > { %15889 = vmatmul.mubr.msk.bf16.gmra.mrb[100].mxu0 %vm763_vm1, %v9007_v58  ;;  %v21260_v58 = vld [vmem:[%s22050_s11] ss:$0 sm:$0xff] }
 0xde3   : > { %15892 = vmatprep.mubr.msk.bf16.mxu0 %vm18570_vm0, %v18569_v1 }
 0xdea   : > { %15893 = vmatmul.mubr.msk.bf16.gmra.mrb[104].mxu0 %vm763_vm1, %v9008_v61 }
 0xdeb   : > { %15896 = vmatprep.mubr.msk.bf16.mxu0 %vm18570_vm0, %v18569_v1 }
 0xdf2   : > { %15897 = vmatmul.mubr.msk.bf16.gmra.mrb[108].mxu0 %vm763_vm1, %v9009_v0 }
 0xdf3   : > { %15904 = vmatprep.mubr.msk.bf16.mxu0 %vm18570_vm0, %v18569_v1 }
 0xdfa   : > { %15905 = vmatmul.mubr.msk.bf16.vlgmr.msra.gmra.mrb[84].mxu0 %vm763_vm1, %v9162_v2 }
 0xdfb   : > { %15933 = vmatpush3.bf16.msra.mxu0 %v18449_v54  ;;  %15908 = vmatprep.mubr.msk.bf16.mxu0 %vm18570_vm0, %v18569_v1 }
 0xdfc   : > { %15934 = vmatprep.subr.bf16.mxu0 %v18569_v1 }
 0xdff   : > { %15935 = vmatpush3.bf16.msra.mxu0 %v18450_v24 }
 0xe00   : > { %15964 = vmatprep.subr.bf16.mxu0 %v18569_v1 }
 0xe02   : > { %15909 = vmatmul.mubr.msk.bf16.gmra.mrb[88].mxu0 %vm763_vm1, %v9163_v15  ;;  %v21273_v15 = vld [vmem:[%s22103_s0] sm:$0xff] }
 0xe03   : > { %15912 = vmatprep.mubr.msk.bf16.mxu0 %vm18570_vm0, %v18569_v1 }
 0xe0a   : > { %15913 = vmatmul.mubr.msk.bf16.gmra.mrb[92].mxu0 %vm763_vm1, %v9164_v28 }
 0xe0b   : > { %15916 = vmatprep.mubr.msk.bf16.mxu0 %vm18570_vm0, %v18569_v1 }
 0xe12   : > { %15917 = vmatmul.mubr.msk.bf16.gmra.mrb[96].mxu0 %vm763_vm1, %v9165_v3 }
 0xe13   : > { %15920 = vmatprep.mubr.msk.bf16.mxu0 %vm18570_vm0, %v18569_v1 }
 0xe1a   : > { %15921 = vmatmul.mubr.msk.bf16.gmra.mrb[100].mxu0 %vm763_vm1, %v9166_v4  ;;  %v21279_v4 = vld [vmem:[%s22103_s0 + $0x8] sm:$0xff] }
 0xe1b   : > { %15924 = vmatprep.mubr.msk.bf16.mxu0 %vm18570_vm0, %v18569_v1 }
 0xe22   : > { %15925 = vmatmul.mubr.msk.bf16.gmra.mrb[104].mxu0 %vm763_vm1, %v9167_v44 }
 0xe23   : > { %15928 = vmatprep.mubr.msk.bf16.mxu0 %vm18570_vm0, %v18569_v1 }
 0xe2a   : > { %15929 = vmatmul.mubr.msk.bf16.gmra.mrb[108].mxu0 %vm763_vm1, %v9168_v9 }
 0xe2b   : > { %15936 = vmatprep.mubr.msk.bf16.mxu0 %vm18570_vm0, %v18569_v1 }
 0xe32   : > { %15937 = vmatmul.mubr.msk.bf16.vlgmr.msra.gmra.mrb[84].mxu0 %vm763_vm1, %v9321_v16 }
 0xe33   : > { %15965 = vmatpush3.bf16.msra.mxu0 %v18451_v14  ;;  %15940 = vmatprep.mubr.msk.bf16.mxu0 %vm18570_vm0, %v18569_v1 }
 0xe34   : > { %15966 = vmatprep.subr.bf16.mxu0 %v18569_v1 }
 0xe37   : > { %15967 = vmatpush3.bf16.msra.mxu0 %v18452_v31  ;;  %v21291_v31 = vld [vmem:[%s22103_s0 + $0x10] sm:$0xff] }
 0xe38   : > { %16284 = vmatprep.subr.bf16.mxu0 %v18569_v1 }
 0xe3a   : > { %15941 = vmatmul.mubr.msk.bf16.gmra.mrb[88].mxu0 %vm763_vm1, %v9322_v20  ;;  %v21297_v20 = vld [vmem:[%s22103_s0 + $0x18] sm:$0xff] }
 0xe3b   : > { %15944 = vmatprep.mubr.msk.bf16.mxu0 %vm18570_vm0, %v18569_v1 }
 0xe42   : > { %15945 = vmatmul.mubr.msk.bf16.gmra.mrb[92].mxu0 %vm763_vm1, %v9323_v8 }
 0xe43   : > { %15948 = vmatprep.mubr.msk.bf16.mxu0 %vm18570_vm0, %v18569_v1 }
 0xe4a   : > { %15949 = vmatmul.mubr.msk.bf16.gmra.mrb[96].mxu0 %vm763_vm1, %v9324_v19  ;;  %v18455_v19 = vld [vmem:[%s22052_s13] sm:$0xff]  }
 0xe4b   : > { %15952 = vmatprep.mubr.msk.bf16.mxu0 %vm18570_vm0, %v18569_v1 }
 0xe52   : > { %15953 = vmatmul.mubr.msk.bf16.gmra.mrb[100].mxu0 %vm763_vm1, %v9325_v21 }
 0xe53   : > { %15956 = vmatprep.mubr.msk.bf16.mxu0 %vm18570_vm0, %v18569_v1 }
 0xe5a   : > { %15957 = vmatmul.mubr.msk.bf16.gmra.mrb[104].mxu0 %vm763_vm1, %v9326_v35 }
 0xe5b   : > { %15960 = vmatprep.mubr.msk.bf16.mxu0 %vm18570_vm0, %v18569_v1 }
 0xe62   : > { %15961 = vmatmul.mubr.msk.bf16.gmra.mrb[108].mxu0 %vm763_vm1, %v9327_v38 }
 0xe63   : > { %15968 = vmatprep.mubr.msk.bf16.mxu0 %vm18570_vm0, %v18569_v1 }
 0xe6a   : > { %15969 = vmatmul.mubr.msk.bf16.vlgmr.msra.gmra.mrb[84].mxu0 %vm763_vm1, %v9480_v42 }
 0xe6b   : > { %15972 = vmatprep.mubr.msk.bf16.mxu0 %vm18570_vm0, %v18569_v1 }
 0xe72   : > { %15973 = vmatmul.mubr.msk.bf16.gmra.mrb[88].mxu0 %vm763_vm1, %v9481_v10 }
 0xe73   : > { %15976 = vmatprep.mubr.msk.bf16.mxu0 %vm18570_vm0, %v18569_v1 }
 0xe7a   : > { %15977 = vmatmul.mubr.msk.bf16.gmra.mrb[92].mxu0 %vm763_vm1, %v9482_v47 }
 0xe7b   : > { %15980 = vmatprep.mubr.msk.bf16.mxu0 %vm18570_vm0, %v18569_v1 }
 0xe82   : > { %15981 = vmatmul.mubr.msk.bf16.gmra.mrb[96].mxu0 %vm763_vm1, %v9483_v36 }
 0xe83   : > { %15984 = vmatprep.mubr.msk.bf16.mxu0 %vm18570_vm0, %v18569_v1 }
 0xe8a   : > { %15985 = vmatmul.mubr.msk.bf16.gmra.mrb[100].mxu0 %vm763_vm1, %v9484_v26 }
 0xe8b   : > { %15988 = vmatprep.mubr.msk.bf16.mxu0 %vm18570_vm0, %v18569_v1 }
 0xe92   : > { %15989 = vmatmul.mubr.msk.bf16.gmra.mrb[104].mxu0 %vm763_vm1, %v9485_v53 }
 0xe93   : > { %15992 = vmatprep.mubr.msk.bf16.mxu0 %vm18570_vm0, %v18569_v1 }
 0xe9a   : > { %15993 = vmatmul.mubr.msk.bf16.gmra.mrb[108].mxu0 %vm763_vm1, %v9486_v56 }
 0xe9b   : > { %16288 = vmatprep.mubr.msk.bf16.mxu0 %vm18570_vm0, %v18569_v1 }
 0xf3d   : > { %v9559_v59 = vpop.f32.mrb[84].mxu0 }
 0xf3e   : > { %v9633_v61 = vmul.f32 %v21260_v58, %v9559_v59  ;;  %v15970_v63 = vpop.f32.mrb[85].mxu0 }
 0xf3f   : > { %v9562_v0 = vpop.f32.mrb[86].mxu0 }
 0xf40   : > { %v9653_v54 = vadd.f32 %v21265_v60, %v9633_v61  ;;  %v9634_v2 = vmul.f32 %v21260_v58, %v9562_v0  ;;  %v15971_v24 = vpop.f32.mrb[87].mxu0  ;;  %v21347_v61 = vld [vmem:[%s22103_s0 + $0x38] sm:$0xff] }
 0xf42   : > { %v9666_v28 = vmax.f32 %v9653_v54, 0.0  ;;  %v9654_v3 = vadd.f32 %v21265_v60, %v9634_v2 }
 0xf44   : > { %v9692_v39 = vmul.f32 %v21273_v15, %v9666_v28  ;;  %v9667_v17 = vmax.f32 %v9654_v3, 0.0 }
 0xf45   : > { %v9567_v5 = vpop.f32.mrb[88].mxu0 }
 0xf46   : > { %9705 = vst.msk [vmem:[#allocation3 + $0xb] sm:$0xff] %vm763_vm1, %v9692_v39  ;;  %v9693_v44 = vmul.f32 %v21279_v4, %v9667_v17  ;;  %v9635_v7 = vmul.f32 %v21260_v58, %v9567_v5  ;;  %v15974_v9 = vpop.f32.mrb[89].mxu0 }
 0xf47   : > { %v9570_v11 = vpop.f32.mrb[90].mxu0 }
 0xf48   : > { %9706 = vst.msk [vmem:[#allocation3 + $0x13] sm:$0xff] %vm763_vm1, %v9693_v44  ;;  %v9655_v13 = vadd.f32 %v21265_v60, %v9635_v7  ;;  %v9636_v14 = vmul.f32 %v21260_v58, %v9570_v11  ;;  %v15975_v16 = vpop.f32.mrb[91].mxu0  ;;  %v21360_v11 = vld [vmem:[%s22103_s0 + $0x40] sm:$0xff] }
 0xf49   : > { %v21368_v16 = vld [vmem:[%s22103_s0 + $0x48] sm:$0xff] }
 0xf4a   : > { %v9668_v18 = vmax.f32 %v9655_v13, 0.0  ;;  %v9656_v6 = vadd.f32 %v21265_v60, %v9636_v14 }
 0xf4c   : > { %v9694_v22 = vmul.f32 %v21291_v31, %v9668_v18  ;;  %v9669_v8 = vmax.f32 %v9656_v6, 0.0 }
 0xf4d   : > { %v9575_v25 = vpop.f32.mrb[92].mxu0  ;;  %v9743_v29 = vld [vmem:[#allocation3 + $0x9] sm:$0xff] }
 0xf4e   : > { %9707 = vst.msk [vmem:[#allocation3 + $0x1b] sm:$0xff] %vm763_vm1, %v9694_v22  ;;  %v9695_v57 = vmul.f32 %v21297_v20, %v9669_v8  ;;  %v9637_v32 = vmul.f32 %v21260_v58, %v9575_v25  ;;  %v15978_v21 = vpop.f32.mrb[93].mxu0  ;;  %v9755_v33 = vpack.c.bf16 %v9743_v29, %v9742_v62 }
 0xf4f   : > { %v9578_v34 = vpop.f32.mrb[94].mxu0  ;;  %v9744_v47 = vld [vmem:[#allocation3 + $0x11] sm:$0xff] }
 0xf50   : > { %9708 = vst.msk [vmem:[#allocation3 + $0x23] sm:$0xff] %vm763_vm1, %v9695_v57  ;;  %v9657_v35 = vadd.f32 %v21265_v60, %v9637_v32  ;;  %v9638_v37 = vmul.f32 %v21260_v58, %v9578_v34  ;;  %v15979_v38 = vpop.f32.mrb[95].mxu0  ;;  %16001 = vmatmul.mubr.msk.bf16.vlgmr.msra.gmra.mrb[120].mxu1 %vm763_vm1, %v9755_v33 }
 0xf51   : > { %16029 = vmatpush3.bf16.msra.mxu1 %v18455_v19  ;;  %16004 = vmatprep.mubr.msk.bf16.mxu1 %vm18570_vm0, %v18569_v1 }
 0xf52   : > { %v9670_v42 = vmax.f32 %v9657_v35, 0.0  ;;  %v9658_v43 = vadd.f32 %v21265_v60, %v9638_v37  ;;  %16030 = vmatprep.subr.bf16.mxu1 %v18569_v1  ;;  %v21381_v35 = vld [vmem:[%s22103_s0 + $0x50] sm:$0xff] }
 0xf54   : > { %v9696_v10 = vmul.f32 %v21313_v40, %v9670_v42  ;;  %v9671_v46 = vmax.f32 %v9658_v43, 0.0 }
 0xf55   : > { %v9583_v12 = vpop.f32.mrb[96].mxu0  ;;  %v9745_v30 = vld [vmem:[#allocation3 + $0x19] sm:$0xff]  ;;  %16031 = vmatpush3.bf16.msra.mxu1 %v18456_v41  ;;  %v21389_v41 = vld [vmem:[%s22103_s0 + $0x58] sm:$0xff] }
 0xf56   : > { %9709 = vst.msk [vmem:[#allocation3 + $0x2b] sm:$0xff] %vm763_vm1, %v9696_v10  ;;  %v9697_v48 = vmul.f32 %v21325_v45, %v9671_v46  ;;  %v9639_v36 = vmul.f32 %v21260_v58, %v9583_v12  ;;  %v15982_v49 = vpop.f32.mrb[97].mxu0  ;;  %v9756_v50 = vpack.c.bf16 %v9745_v30, %v9744_v47  ;;  %16060 = vmatprep.subr.bf16.mxu1 %v18569_v1 }
 0xf57   : > { %v9586_v26 = vpop.f32.mrb[98].mxu0  ;;  %v9746_v2 = vld [vmem:[#allocation3 + $0x21] sm:$0xff] }
 0xf58   : > { %9710 = vst.msk [vmem:[#allocation3 + $0x33] sm:$0xff] %vm763_vm1, %v9697_v48  ;;  %v9659_v51 = vadd.f32 %v21265_v60, %v9639_v36  ;;  %v9640_v52 = vmul.f32 %v21260_v58, %v9586_v26  ;;  %v15983_v53 = vpop.f32.mrb[99].mxu0  ;;  %16005 = vmatmul.mubr.msk.bf16.gmra.mrb[124].mxu1 %vm763_vm1, %v9756_v50 }
 0xf59   : > { %16008 = vmatprep.mubr.msk.bf16.mxu1 %vm18570_vm0, %v18569_v1 }
 0xf5a   : > { %v9672_v56 = vmax.f32 %v9659_v51, 0.0  ;;  %v9660_v59 = vadd.f32 %v21265_v60, %v9640_v52  ;;  %v9691_v51 = vld [vmem:[%s22103_s0 + $0x60] sm:$0xf] }
 0xf5c   : > { %v9698_v63 = vmul.f32 %v21339_v55, %v9672_v56  ;;  %v9673_v0 = vmax.f32 %v9660_v59, 0.0 }
 0xf5d   : > { %v9591_v54 = vpop.f32.mrb[100].mxu0  ;;  %v9747_v24 = vld [vmem:[#allocation3 + $0x29] sm:$0xff] }
 0xf5e   : > { %9711 = vst.msk [vmem:[#allocation3 + $0x3b] sm:$0xff] %vm763_vm1, %v9698_v63  ;;  %v9699_v28 = vmul.f32 %v21347_v61, %v9673_v0  ;;  %v9641_v3 = vmul.f32 %v21260_v58, %v9591_v54  ;;  %v15986_v39 = vpop.f32.mrb[101].mxu0  ;;  %v9757_v17 = vpack.c.bf16 %v9747_v24, %v9746_v2  ;;  %v9719_v0 = vld [vmem:[#allocation3 + $0x8] sm:$0xff]  ;;  %v18457_v54 = vld [vmem:[%s22052_s13 + $0x20] sm:$0xff]   ;;  %v18458_v24 = vld [vmem:[%s22052_s13 + $0x28] sm:$0xff]  }
 0xf5f   : > { %v9594_v5 = vpop.f32.mrb[102].mxu0  ;;  %v9748_v22 = vld [vmem:[#allocation3 + $0x31] sm:$0xff]  ;;  %v9731_v2 = vpack.c.bf16 %v9719_v0, %v21017_v27  ;;  %v9723_v27 = vld [vmem:[#allocation3 + $0x28] sm:$0xff] }
 0xf60   : > { %9712 = vst.msk [vmem:[#allocation3 + $0x43] sm:$0xff] %vm763_vm1, %v9699_v28  ;;  %v9661_v44 = vadd.f32 %v21265_v60, %v9641_v3  ;;  %v9642_v7 = vmul.f32 %v21260_v58, %v9594_v5  ;;  %v15987_v9 = vpop.f32.mrb[103].mxu0  ;;  %16009 = vmatmul.mubr.msk.bf16.gmra.mrb[128].mxu1 %vm763_vm1, %v9757_v17  ;;  %v9721_v28 = vld [vmem:[#allocation3 + $0x18] sm:$0xff]  ;;  %v9720_v3 = vld [vmem:[#allocation3 + $0x10] sm:$0xff]  ;;  %v9722_v17 = vld [vmem:[#allocation3 + $0x20] sm:$0xff] }
 0xf61   : > { %16012 = vmatprep.mubr.msk.bf16.mxu1 %vm18570_vm0, %v18569_v1  ;;  %v9732_v39 = vpack.c.bf16 %v9721_v28, %v9720_v3  ;;  %v9733_v5 = vpack.c.bf16 %v9723_v27, %v9722_v17  ;;  %v18463_v28 = vld [vmem:[%s22052_s13 + $0x50] sm:$0xff]  }
 0xf62   : > { %v9674_v13 = vmax.f32 %v9661_v44, 0.0  ;;  %v9662_v14 = vadd.f32 %v21265_v60, %v9642_v7  ;;  %v9724_v7 = vld [vmem:[#allocation3 + $0x30] sm:$0xff]  ;;  %v10330_v27 = vld [vmem:[#allocation3 + $0x23] sm:$0xff]  ;;  %v10329_v17 = vld [vmem:[#allocation3 + $0x1b] sm:$0xff] }
 0xf64   : > { %v9700_v18 = vmul.f32 %v21360_v11, %v9674_v13  ;;  %v9675_v6 = vmax.f32 %v9662_v14, 0.0 }
 0xf65   : > { %v9599_v62 = vpop.f32.mrb[104].mxu0  ;;  %v9749_v8 = vld [vmem:[#allocation3 + $0x39] sm:$0xff] }
 0xf66   : > { %9713 = vst.msk [vmem:[#allocation3 + $0x4b] sm:$0xff] %vm763_vm1, %v9700_v18  ;;  %v9701_v25 = vmul.f32 %v21368_v16, %v9675_v6  ;;  %v9643_v29 = vmul.f32 %v21260_v58, %v9599_v62  ;;  %v15990_v19 = vpop.f32.mrb[105].mxu0  ;;  %v9758_v57 = vpack.c.bf16 %v9749_v8, %v9748_v22  ;;  %v9725_v44 = vld [vmem:[#allocation3 + $0x38] sm:$0xff] }
 0xf67   : > { %v9602_v32 = vpop.f32.mrb[106].mxu0  ;;  %v9750_v46 = vld [vmem:[#allocation3 + $0x41] sm:$0xff]  ;;  %v9734_v9 = vpack.c.bf16 %v9725_v44, %v9724_v7  ;;  %v10332_v44 = vld [vmem:[#allocation3 + $0x33] sm:$0xff]  ;;  %v10331_v7 = vld [vmem:[#allocation3 + $0x2b] sm:$0xff] }
 0xf68   : > { %9714 = vst.msk [vmem:[#allocation3 + $0x53] sm:$0xff] %vm763_vm1, %v9701_v25  ;;  %v9663_v21 = vadd.f32 %v21265_v60, %v9643_v29  ;;  %v9644_v33 = vmul.f32 %v21260_v58, %v9602_v32  ;;  %v15991_v34 = vpop.f32.mrb[107].mxu0  ;;  %16013 = vmatmul.mubr.msk.bf16.gmra.mrb[132].mxu1 %vm763_vm1, %v9758_v57  ;;  %v9726_v14 = vld [vmem:[#allocation3 + $0x40] sm:$0xff]  ;;  %v10010_v29 = vld [vmem:[#allocation3 + $0xa] sm:$0xff] }
 0xf69   : > { %16016 = vmatprep.mubr.msk.bf16.mxu1 %vm18570_vm0, %v18569_v1  ;;  %v18459_v19 = vld [vmem:[%s22052_s13 + $0x30] sm:$0xff]   ;;  %v10022_v57 = vpack.c.bf16 %v10010_v29, %v21049_v23  ;;  %v18460_v32 = vld [vmem:[%s22052_s13 + $0x38] sm:$0xff]  }
 0xf6a   : > { %v9676_v37 = vmax.f32 %v9663_v21, 0.0  ;;  %v9664_v38 = vadd.f32 %v21265_v60, %v9644_v33  ;;  %v10012_v21 = vld [vmem:[#allocation3 + $0x1a] sm:$0xff]  ;;  %v10011_v33 = vld [vmem:[#allocation3 + $0x12] sm:$0xff]  ;;  %v10014_v23 = vld [vmem:[#allocation3 + $0x2a] sm:$0xff] }
 0xf6b   : > { %v10023_v34 = vpack.c.bf16 %v10012_v21, %v10011_v33 }
 0xf6c   : > { %v9702_v42 = vmul.f32 %v21381_v35, %v9676_v37  ;;  %v9677_v43 = vmax.f32 %v9664_v38, 0.0  ;;  %v10013_v37 = vld [vmem:[#allocation3 + $0x22] sm:$0xff] }
 0xf6d   : > { %v9607_v10 = vpop.f32.mrb[108].mxu0  ;;  %v9751_v12 = vld [vmem:[#allocation3 + $0x49] sm:$0xff]  ;;  %v10024_v38 = vpack.c.bf16 %v10014_v23, %v10013_v37 }
 0xf6e   : > { %9715 = vst.msk [vmem:[#allocation3 + $0x5b] sm:$0xff] %vm763_vm1, %v9702_v42  ;;  %v9703_v47 = vmul.f32 %v21389_v41, %v9677_v43  ;;  %v9645_v30 = vmul.f32 %v21260_v58, %v9607_v10  ;;  %v15994_v48 = vpop.f32.mrb[109].mxu0  ;;  %v9759_v36 = vpack.c.bf16 %v9751_v12, %v9750_v46  ;;  %v9727_v13 = vld [vmem:[#allocation3 + $0x48] sm:$0xff]  ;;  %v10016_v42 = vld [vmem:[#allocation3 + $0x3a] sm:$0xff]  ;;  %v10015_v43 = vld [vmem:[#allocation3 + $0x32] sm:$0xff] }
 0xf6f   : > { %v9610_v49 = vpop.f32.mrb[110].mxu0  ;;  %v9752_v58 = vld [vmem:[#allocation3 + $0x51] sm:$0xff]  ;;  %v9735_v18 = vpack.c.bf16 %v9727_v13, %v9726_v14  ;;  %v10025_v10 = vpack.c.bf16 %v10016_v42, %v10015_v43  ;;  %v10017_v12 = vld [vmem:[#allocation3 + $0x42] sm:$0xff] }
 0xf70   : > { %9716 = vst.msk [vmem:[#allocation3 + $0x63] sm:$0xff] %vm763_vm1, %v9703_v47  ;;  %v9665_v50 = vadd.f32 %v21265_v60, %v9645_v30  ;;  %v15995_v26 = vpop.f32.mrb[111].mxu0  ;;  %16017 = vmatmul.mubr.msk.bf16.gmra.mrb[136].mxu1 %vm763_vm1, %v9759_v36  ;;  %v9728_v62 = vld [vmem:[#allocation3 + $0x50] sm:$0xff]  ;;  %v10334_v13 = vld [vmem:[#allocation3 + $0x43] sm:$0xff]  ;;  %v10333_v14 = vld [vmem:[#allocation3 + $0x3b] sm:$0xff] }
 0xf71   : > { %16020 = vmatprep.mubr.msk.bf16.mxu1 %vm18570_vm0, %v18569_v1  ;;  %v10018_v46 = vld [vmem:[#allocation3 + $0x4a] sm:$0xff]  ;;  %v10019_v48 = vld [vmem:[#allocation3 + $0x52] sm:$0xff] }
 0xf72   : > { %v9678_v52 = vmax.f32 %v9665_v50, 0.0  ;;  %v10026_v47 = vpack.c.bf16 %v10018_v46, %v10017_v12  ;;  %v18461_v26 = vld [vmem:[%s22052_s13 + $0x40] sm:$0xff]  }
 0xf74   : > { %v9704_v53 = vmul.f32 %v9691_v51, %v9678_v52  ;;  %v10181_v51 = vpack.c.bf16 %v10011_v33, %v10010_v29  ;;  %v18462_v52 = vld [vmem:[%s22052_s13 + $0x48] sm:$0xff]   ;;  %v18465_v33 = vld [vmem:[%s22052_s13 + $0x60] sm:$0xff]  }
 0xf75   : > { %v9753_v56 = vld [vmem:[#allocation3 + $0x59] sm:$0xff] }
 0xf76   : > { %9717 = vst.msk [vmem:[#allocation3 + $0x6b] sm:$0xf] %vm876_vm3, %v9704_v53  ;;  %v9760_v59 = vpack.c.bf16 %v9753_v56, %v9752_v58  ;;  %v9729_v6 = vld [vmem:[#allocation3 + $0x58] sm:$0xff]  ;;  %v10182_v53 = vpack.c.bf16 %v10013_v37, %v10012_v21  ;;  %v10183_v58 = vpack.c.bf16 %v10015_v43, %v10014_v23  ;;  %v10184_v56 = vpack.c.bf16 %v10017_v12, %v10016_v42  ;;  %v10486_v21 = vld [vmem:[#allocation3 + $0xc] sm:$0xff]  ;;  %v10489_v37 = vld [vmem:[#allocation3 + $0x24] sm:$0xff] }
 0xf77   : > { %v9754_v60 = vld [vmem:[#allocation3 + $0x61] sm:$0xf]  ;;  %v9736_v22 = vpack.c.bf16 %v9729_v6, %v9728_v62  ;;  %v10336_v6 = vld [vmem:[#allocation3 + $0x53] sm:$0xff]  ;;  %v10335_v62 = vld [vmem:[#allocation3 + $0x4b] sm:$0xff] }
 0xf78   : > { %16021 = vmatmul.mubr.msk.bf16.gmra.mrb[140].mxu1 %vm763_vm1, %v9760_v59  ;;  %v9761_v63 = vpack.c.bf16 %v9754_v60, %v9754_v60  ;;  %v9730_v8 = vld [vmem:[#allocation3 + $0x60] sm:$0xf]  ;;  %v10185_v59 = vpack.c.bf16 %v10019_v48, %v10018_v46  ;;  %v18466_v23 = vld [vmem:[%s22052_s13 + $0x68] sm:$0xff]   ;;  %v10493_v12 = vld [vmem:[#allocation3 + $0x44] sm:$0xff] }
 0xf79   : > { %16024 = vmatprep.mubr.msk.bf16.mxu1 %vm18570_vm0, %v18569_v1  ;;  %v9737_v25 = vpack.c.bf16 %v9730_v8, %v9730_v8  ;;  %v10020_v30 = vld [vmem:[#allocation3 + $0x5a] sm:$0xff]  ;;  %v10021_v49 = vld [vmem:[#allocation3 + $0x62] sm:$0xf] }
 0xf7a   : > { %v10027_v36 = vpack.c.bf16 %v10020_v30, %v10019_v48  ;;  %v10028_v50 = vpack.c.bf16 %v10021_v49, %v10021_v49  ;;  %v10179_v60 = vld [vmem:[#allocation3 + $0x62] sm:$0xff]  ;;  %v10491_v43 = vld [vmem:[#allocation3 + $0x34] sm:$0xff] }
 0xf7b   : > { %v10338_v8 = vld [vmem:[#allocation3 + $0x63] sm:$0xff]  ;;  %v10495_v48 = vld [vmem:[#allocation3 + $0x54] sm:$0xff] }
 0xf7d   : > { %v10180_v0 = vld [vmem:[#allocation3 + $0x6a] sm:$0xf] }
 0xf80   : > { %16025 = vmatmul.mubr.msk.bf16.gmra.mrb[144].mxu1 %vm763_vm1, %v9761_v63  ;;  %v10186_v63 = vpack.c.bf16 %v10179_v60, %v10020_v30 }
 0xf81   : > { %16032 = vmatprep.mubr.msk.bf16.mxu1 %vm18570_vm0, %v18569_v1 }
 0xf88   : > { %16033 = vmatmul.mubr.msk.bf16.vlgmr.msra.gmra.mrb[120].mxu1 %vm763_vm1, %v9731_v2  ;;  %v10328_v2 = vld [vmem:[#allocation3 + $0x13] sm:$0xff] }
 0xf89   : > { %16061 = vmatpush3.bf16.msra.mxu1 %v18457_v54  ;;  %16036 = vmatprep.mubr.msk.bf16.mxu1 %vm18570_vm0, %v18569_v1  ;;  %v10187_v54 = vpack.c.bf16 %v10180_v0, %v10180_v0 }
 0xf8a   : > { %16062 = vmatprep.subr.bf16.mxu1 %v18569_v1 }
 0xf8d   : > { %16063 = vmatpush3.bf16.msra.mxu1 %v18458_v24  ;;  %v10327_v24 = vld [vmem:[#allocation3 + $0xb] sm:$0xff] }
 0xf8e   : > { %16092 = vmatprep.subr.bf16.mxu1 %v18569_v1  ;;  %v10340_v3 = vpack.c.bf16 %v10328_v2, %v10327_v24  ;;  %v10656_v2 = vld [vmem:[#allocation3 + $0x6c] sm:$0xff] }
 0xf90   : > { %16037 = vmatmul.mubr.msk.bf16.gmra.mrb[124].mxu1 %vm763_vm1, %v9732_v39  ;;  %v18464_v39 = vld [vmem:[%s22052_s13 + $0x58] sm:$0xff]  }
 0xf91   : > { %16040 = vmatprep.mubr.msk.bf16.mxu1 %vm18570_vm0, %v18569_v1 }
 0xf98   : > { %16041 = vmatmul.mubr.msk.bf16.gmra.mrb[128].mxu1 %vm763_vm1, %v9733_v5  ;;  %v10341_v5 = vpack.c.bf16 %v10330_v27, %v10329_v17  ;;  %v10804_v27 = vld [vmem:[#allocation3 + $0x15] sm:$0xff] }
 0xf99   : > { %16044 = vmatprep.mubr.msk.bf16.mxu1 %vm18570_vm0, %v18569_v1  ;;  %v18469_v17 = vld [vmem:[%s22052_s13 + $0x80] sm:$0xff]  }
 0xfa0   : > { %16045 = vmatmul.mubr.msk.bf16.gmra.mrb[132].mxu1 %vm763_vm1, %v9734_v9  ;;  %v10342_v9 = vpack.c.bf16 %v10332_v44, %v10331_v7  ;;  %v18470_v44 = vld [vmem:[%s22052_s13 + $0x88] sm:$0xff]   ;;  %v10807_v7 = vld [vmem:[#allocation3 + $0x2d] sm:$0xff] }
 0xfa1   : > { %16048 = vmatprep.mubr.msk.bf16.mxu1 %vm18570_vm0, %v18569_v1 }
 0xfa8   : > { %16049 = vmatmul.mubr.msk.bf16.gmra.mrb[136].mxu1 %vm763_vm1, %v9735_v18  ;;  %v10343_v18 = vpack.c.bf16 %v10334_v13, %v10333_v14  ;;  %v10809_v14 = vld [vmem:[#allocation3 + $0x3d] sm:$0xff] }
 0xfa9   : > { %16052 = vmatprep.mubr.msk.bf16.mxu1 %vm18570_vm0, %v18569_v1 }
 0xfb0   : > { %16053 = vmatmul.mubr.msk.bf16.gmra.mrb[140].mxu1 %vm763_vm1, %v9736_v22  ;;  %v10344_v22 = vpack.c.bf16 %v10336_v6, %v10335_v62  ;;  %v10811_v62 = vld [vmem:[#allocation3 + $0x4d] sm:$0xff] }
 0xfb1   : > { %16056 = vmatprep.mubr.msk.bf16.mxu1 %vm18570_vm0, %v18569_v1 }
 0xfb8   : > { %16057 = vmatmul.mubr.msk.bf16.gmra.mrb[144].mxu1 %vm763_vm1, %v9737_v25  ;;  %v10337_v25 = vld [vmem:[#allocation3 + $0x5b] sm:$0xff] }
 0xfb9   : > { %16064 = vmatprep.mubr.msk.bf16.mxu1 %vm18570_vm0, %v18569_v1  ;;  %v10345_v29 = vpack.c.bf16 %v10338_v8, %v10337_v25  ;;  %v10813_v25 = vld [vmem:[#allocation3 + $0x5d] sm:$0xff] }
 0xfc0   : > { %16065 = vmatmul.mubr.msk.bf16.vlgmr.msra.gmra.mrb[120].mxu1 %vm763_vm1, %v10022_v57 }
 0xfc1   : > { %16093 = vmatpush3.bf16.msra.mxu1 %v18459_v19  ;;  %16068 = vmatprep.mubr.msk.bf16.mxu1 %vm18570_vm0, %v18569_v1  ;;  %v10339_v19 = vld [vmem:[#allocation3 + $0x6b] sm:$0xf] }
 0xfc2   : > { %16094 = vmatprep.subr.bf16.mxu1 %v18569_v1  ;;  %v10346_v57 = vpack.c.bf16 %v10339_v19, %v10339_v19 }
 0xfc5   : > { %16095 = vmatpush3.bf16.msra.mxu1 %v18460_v32  ;;  %v10487_v32 = vld [vmem:[#allocation3 + $0x14] sm:$0xff] }
 0xfc6   : > { %16124 = vmatprep.subr.bf16.mxu1 %v18569_v1 }
 0xfc8   : > { %16069 = vmatmul.mubr.msk.bf16.gmra.mrb[124].mxu1 %vm763_vm1, %v10023_v34  ;;  %v10499_v34 = vpack.c.bf16 %v10487_v32, %v10486_v21 }
 0xfc9   : > { %16072 = vmatprep.mubr.msk.bf16.mxu1 %vm18570_vm0, %v18569_v1 }
 0xfd0   : > { %16073 = vmatmul.mubr.msk.bf16.gmra.mrb[128].mxu1 %vm763_vm1, %v10024_v38  ;;  %v10488_v38 = vld [vmem:[#allocation3 + $0x1c] sm:$0xff] }
 0xfd1   : > { %16076 = vmatprep.mubr.msk.bf16.mxu1 %vm18570_vm0, %v18569_v1  ;;  %v10500_v42 = vpack.c.bf16 %v10489_v37, %v10488_v38 }
 0xfd8   : > { %16077 = vmatmul.mubr.msk.bf16.gmra.mrb[132].mxu1 %vm763_vm1, %v10025_v10  ;;  %v10490_v10 = vld [vmem:[#allocation3 + $0x2c] sm:$0xff] }
 0xfd9   : > { %16080 = vmatprep.mubr.msk.bf16.mxu1 %vm18570_vm0, %v18569_v1  ;;  %v10501_v46 = vpack.c.bf16 %v10491_v43, %v10490_v10  ;;  %v10659_v60 = vpack.c.bf16 %v10490_v10, %v10489_v37  ;;  %v10963_v37 = vld [vmem:[#allocation3 + $0x16] sm:$0xff] }
 0xfe0   : > { %16081 = vmatmul.mubr.msk.bf16.gmra.mrb[136].mxu1 %vm763_vm1, %v10026_v47  ;;  %v10492_v47 = vld [vmem:[#allocation3 + $0x3c] sm:$0xff] }
 0xfe1   : > { %16084 = vmatprep.mubr.msk.bf16.mxu1 %vm18570_vm0, %v18569_v1  ;;  %v10502_v30 = vpack.c.bf16 %v10493_v12, %v10492_v47 }
 0xfe8   : > { %16085 = vmatmul.mubr.msk.bf16.gmra.mrb[140].mxu1 %vm763_vm1, %v10027_v36  ;;  %v10494_v36 = vld [vmem:[#allocation3 + $0x4c] sm:$0xff] }
 0xfe9   : > { %16088 = vmatprep.mubr.msk.bf16.mxu1 %vm18570_vm0, %v18569_v1  ;;  %v10503_v49 = vpack.c.bf16 %v10495_v48, %v10494_v36  ;;  %v10661_v0 = vpack.c.bf16 %v10494_v36, %v10493_v12  ;;  %v10967_v12 = vld [vmem:[#allocation3 + $0x36] sm:$0xff] }
 0xff0   : > { %16089 = vmatmul.mubr.msk.bf16.gmra.mrb[144].mxu1 %vm763_vm1, %v10028_v50  ;;  %v10497_v50 = vld [vmem:[#allocation3 + $0x64] sm:$0xff] }
 0xff1   : > { %16096 = vmatprep.mubr.msk.bf16.mxu1 %vm18570_vm0, %v18569_v1  ;;  %v10663_v24 = vpack.c.bf16 %v10656_v2, %v10497_v50 }
 0xff8   : > { %16097 = vmatmul.mubr.msk.bf16.vlgmr.msra.gmra.mrb[120].mxu1 %vm763_vm1, %v10181_v51 }
 0xff9   : > { %16125 = vmatpush3.bf16.msra.mxu1 %v18461_v26  ;;  %16100 = vmatprep.mubr.msk.bf16.mxu1 %vm18570_vm0, %v18569_v1  ;;  %v10496_v26 = vld [vmem:[#allocation3 + $0x5c] sm:$0xff] }
 0xffa   : > { %16126 = vmatprep.subr.bf16.mxu1 %v18569_v1  ;;  %v10504_v51 = vpack.c.bf16 %v10497_v50, %v10496_v26  ;;  %v10971_v50 = vld [vmem:[#allocation3 + $0x56] sm:$0xff] }
 0xffd   : > { %16127 = vmatpush3.bf16.msra.mxu1 %v18462_v52  ;;  %v10498_v52 = vld [vmem:[#allocation3 + $0x6c] sm:$0xf] }
 0xffe   : > { %16156 = vmatprep.subr.bf16.mxu1 %v18569_v1 }
0x1000   : > { %16101 = vmatmul.mubr.msk.bf16.gmra.mrb[124].mxu1 %vm763_vm1, %v10182_v53  ;;  %v10505_v53 = vpack.c.bf16 %v10498_v52, %v10498_v52  ;;  %v10974_v52 = vld [vmem:[#allocation3 + $0x6e] sm:$0xff] }
0x1001   : > { %16104 = vmatprep.mubr.msk.bf16.mxu1 %vm18570_vm0, %v18569_v1 }
0x1008   : > { %16105 = vmatmul.mubr.msk.bf16.gmra.mrb[128].mxu1 %vm763_vm1, %v10183_v58  ;;  %v18467_v58 = vld [vmem:[%s22052_s13 + $0x70] sm:$0xff]  }
0x1009   : > { %16108 = vmatprep.mubr.msk.bf16.mxu1 %vm18570_vm0, %v18569_v1 }
0x1010   : > { %16109 = vmatmul.mubr.msk.bf16.gmra.mrb[132].mxu1 %vm763_vm1, %v10184_v56  ;;  %v10658_v56 = vpack.c.bf16 %v10488_v38, %v10487_v32  ;;  %v10815_v32 = vld [vmem:[#allocation3 + $0x6d] sm:$0xff] }
0x1011   : > { %16112 = vmatprep.mubr.msk.bf16.mxu1 %vm18570_vm0, %v18569_v1 }
0x1018   : > { %16113 = vmatmul.mubr.msk.bf16.gmra.mrb[136].mxu1 %vm763_vm1, %v10185_v59  ;;  %v18468_v59 = vld [vmem:[%s22052_s13 + $0x78] sm:$0xff]  }
0x1019   : > { %16116 = vmatprep.mubr.msk.bf16.mxu1 %vm18570_vm0, %v18569_v1 }
0x1020   : > { %16117 = vmatmul.mubr.msk.bf16.gmra.mrb[140].mxu1 %vm763_vm1, %v10186_v63  ;;  %v10660_v63 = vpack.c.bf16 %v10492_v47, %v10491_v43  ;;  %v10965_v43 = vld [vmem:[#allocation3 + $0x26] sm:$0xff] }
0x1021   : > { %16120 = vmatprep.mubr.msk.bf16.mxu1 %vm18570_vm0, %v18569_v1 }
0x1028   : > { %16121 = vmatmul.mubr.msk.bf16.gmra.mrb[144].mxu1 %vm763_vm1, %v10187_v54  ;;  %v10662_v54 = vpack.c.bf16 %v10496_v26, %v10495_v48  ;;  %v10969_v48 = vld [vmem:[#allocation3 + $0x46] sm:$0xff] }
0x1029   : > { %16128 = vmatprep.mubr.msk.bf16.mxu1 %vm18570_vm0, %v18569_v1 }
0x1030   : > { %16129 = vmatmul.mubr.msk.bf16.vlgmr.msra.gmra.mrb[120].mxu1 %vm763_vm1, %v10340_v3 }
0x1031   : > { %16157 = vmatpush3.bf16.msra.mxu1 %v18463_v28  ;;  %16132 = vmatprep.mubr.msk.bf16.mxu1 %vm18570_vm0, %v18569_v1  ;;  %v10657_v28 = vld [vmem:[#allocation3 + $0x74] sm:$0xf] }
0x1032   : > { %16158 = vmatprep.subr.bf16.mxu1 %v18569_v1  ;;  %v10664_v3 = vpack.c.bf16 %v10657_v28, %v10657_v28 }
0x1035   : > { %16159 = vmatpush3.bf16.msra.mxu1 %v18464_v39  ;;  %v10805_v39 = vld [vmem:[#allocation3 + $0x1d] sm:$0xff] }
0x1036   : > { %16188 = vmatprep.subr.bf16.mxu1 %v18569_v1 }
0x1038   : > { %16133 = vmatmul.mubr.msk.bf16.gmra.mrb[124].mxu1 %vm763_vm1, %v10341_v5  ;;  %v10817_v5 = vpack.c.bf16 %v10805_v39, %v10804_v27 }
0x1039   : > { %16136 = vmatprep.mubr.msk.bf16.mxu1 %vm18570_vm0, %v18569_v1 }
0x1040   : > { %16137 = vmatmul.mubr.msk.bf16.gmra.mrb[128].mxu1 %vm763_vm1, %v10342_v9  ;;  %v10806_v9 = vld [vmem:[#allocation3 + $0x25] sm:$0xff] }
0x1041   : > { %16140 = vmatprep.mubr.msk.bf16.mxu1 %vm18570_vm0, %v18569_v1  ;;  %v10818_v13 = vpack.c.bf16 %v10807_v7, %v10806_v9 }
0x1048   : > { %16141 = vmatmul.mubr.msk.bf16.gmra.mrb[132].mxu1 %vm763_vm1, %v10343_v18  ;;  %v10808_v18 = vld [vmem:[#allocation3 + $0x35] sm:$0xff] }
0x1049   : > { %16144 = vmatprep.mubr.msk.bf16.mxu1 %vm18570_vm0, %v18569_v1  ;;  %v10819_v6 = vpack.c.bf16 %v10809_v14, %v10808_v18 }
0x1050   : > { %16145 = vmatmul.mubr.msk.bf16.gmra.mrb[136].mxu1 %vm763_vm1, %v10344_v22  ;;  %v10810_v22 = vld [vmem:[#allocation3 + $0x45] sm:$0xff] }
0x1051   : > { %16148 = vmatprep.mubr.msk.bf16.mxu1 %vm18570_vm0, %v18569_v1  ;;  %v10820_v8 = vpack.c.bf16 %v10811_v62, %v10810_v22 }
0x1058   : > { %16149 = vmatmul.mubr.msk.bf16.gmra.mrb[140].mxu1 %vm763_vm1, %v10345_v29  ;;  %v10812_v29 = vld [vmem:[#allocation3 + $0x55] sm:$0xff] }
0x1059   : > { %16152 = vmatprep.mubr.msk.bf16.mxu1 %vm18570_vm0, %v18569_v1  ;;  %v10821_v19 = vpack.c.bf16 %v10813_v25, %v10812_v29 }
0x1060   : > { %16153 = vmatmul.mubr.msk.bf16.gmra.mrb[144].mxu1 %vm763_vm1, %v10346_v57  ;;  %v10814_v57 = vld [vmem:[#allocation3 + $0x65] sm:$0xff] }
0x1061   : > { %16160 = vmatprep.mubr.msk.bf16.mxu1 %vm18570_vm0, %v18569_v1  ;;  %v10822_v21 = vpack.c.bf16 %v10815_v32, %v10814_v57 }
0x1068   : > { %16161 = vmatmul.mubr.msk.bf16.vlgmr.msra.gmra.mrb[120].mxu1 %vm763_vm1, %v10499_v34 }
0x1069   : > { %16189 = vmatpush3.bf16.msra.mxu1 %v18465_v33  ;;  %16164 = vmatprep.mubr.msk.bf16.mxu1 %vm18570_vm0, %v18569_v1  ;;  %v10816_v33 = vld [vmem:[#allocation3 + $0x75] sm:$0xf] }
0x106a   : > { %16190 = vmatprep.subr.bf16.mxu1 %v18569_v1  ;;  %v10823_v34 = vpack.c.bf16 %v10816_v33, %v10816_v33 }
0x106d   : > { %16191 = vmatpush3.bf16.msra.mxu1 %v18466_v23  ;;  %v10964_v23 = vld [vmem:[#allocation3 + $0x1e] sm:$0xff] }
0x106e   : > { %16220 = vmatprep.subr.bf16.mxu1 %v18569_v1  ;;  %v10976_v38 = vpack.c.bf16 %v10964_v23, %v10963_v37 }
0x1070   : > { %16165 = vmatmul.mubr.msk.bf16.gmra.mrb[124].mxu1 %vm763_vm1, %v10500_v42  ;;  %v10966_v42 = vld [vmem:[#allocation3 + $0x2e] sm:$0xff] }
0x1071   : > { %16168 = vmatprep.mubr.msk.bf16.mxu1 %vm18570_vm0, %v18569_v1  ;;  %v10977_v10 = vpack.c.bf16 %v10966_v42, %v10965_v43 }
0x1078   : > { %16169 = vmatmul.mubr.msk.bf16.gmra.mrb[128].mxu1 %vm763_vm1, %v10501_v46  ;;  %v10968_v46 = vld [vmem:[#allocation3 + $0x3e] sm:$0xff] }
0x1079   : > { %16172 = vmatprep.mubr.msk.bf16.mxu1 %vm18570_vm0, %v18569_v1  ;;  %v10978_v47 = vpack.c.bf16 %v10968_v46, %v10967_v12 }
0x1080   : > { %16173 = vmatmul.mubr.msk.bf16.gmra.mrb[132].mxu1 %vm763_vm1, %v10502_v30  ;;  %v10970_v30 = vld [vmem:[#allocation3 + $0x4e] sm:$0xff] }
0x1081   : > { %16176 = vmatprep.mubr.msk.bf16.mxu1 %vm18570_vm0, %v18569_v1  ;;  %v10979_v36 = vpack.c.bf16 %v10970_v30, %v10969_v48 }
0x1088   : > { %16177 = vmatmul.mubr.msk.bf16.gmra.mrb[136].mxu1 %vm763_vm1, %v10503_v49  ;;  %v10972_v49 = vld [vmem:[#allocation3 + $0x5e] sm:$0xff] }
0x1089   : > { %16180 = vmatprep.mubr.msk.bf16.mxu1 %vm18570_vm0, %v18569_v1  ;;  %v10980_v26 = vpack.c.bf16 %v10972_v49, %v10971_v50 }
0x1090   : > { %16181 = vmatmul.mubr.msk.bf16.gmra.mrb[140].mxu1 %vm763_vm1, %v10504_v51  ;;  %v10973_v51 = vld [vmem:[#allocation3 + $0x66] sm:$0xff] }
0x1091   : > { %16184 = vmatprep.mubr.msk.bf16.mxu1 %vm18570_vm0, %v18569_v1 }
0x1098   : > { %16185 = vmatmul.mubr.msk.bf16.gmra.mrb[144].mxu1 %vm763_vm1, %v10505_v53  ;;  %v10981_v53 = vpack.c.bf16 %v10974_v52, %v10973_v51 }
0x1099   : > { %16192 = vmatprep.mubr.msk.bf16.mxu1 %vm18570_vm0, %v18569_v1 }
0x10a0   : > { %16193 = vmatmul.mubr.msk.bf16.vlgmr.msra.gmra.mrb[120].mxu1 %vm763_vm1, %v10658_v56 }
0x10a1   : > { %16221 = vmatpush3.bf16.msra.mxu1 %v18467_v58  ;;  %16196 = vmatprep.mubr.msk.bf16.mxu1 %vm18570_vm0, %v18569_v1  ;;  %v10975_v58 = vld [vmem:[#allocation3 + $0x76] sm:$0xf] }
0x10a2   : > { %16222 = vmatprep.subr.bf16.mxu1 %v18569_v1  ;;  %v10982_v56 = vpack.c.bf16 %v10975_v58, %v10975_v58 }
0x10a5   : > { %16223 = vmatpush3.bf16.msra.mxu1 %v18468_v59  ;;  %v18471_v59 = vld [vmem:[%s22055_s16 + $0x10] sm:$0xff]  }
0x10a6   : > { %16252 = vmatprep.subr.bf16.mxu1 %v18569_v1  ;;  %16285 = vmatpush3.bf16.msra.mxu0 %v18471_v59 }
0x10a7   : > { %16286 = vmatprep.subr.bf16.mxu0 %v18569_v1 }
0x10a8   : > { %16197 = vmatmul.mubr.msk.bf16.gmra.mrb[124].mxu1 %vm763_vm1, %v10659_v60  ;;  %v18472_v60 = vld [vmem:[%s22055_s16 + $0x18] sm:$0xff]  }
0x10a9   : > { %16200 = vmatprep.mubr.msk.bf16.mxu1 %vm18570_vm0, %v18569_v1 }
0x10aa   : > { %16287 = vmatpush3.bf16.msra.mxu0 %v18472_v60 }
0x10ab   : > { %16300 = vmatprep.subr.bf16.mxu0 %v18569_v1 }
0x10b0   : > { %16201 = vmatmul.mubr.msk.bf16.gmra.mrb[128].mxu1 %vm763_vm1, %v10660_v63  ;;  %v21647_v63 = vld [vmem:[%s22053_s14] ss:$0 sm:$0xff] }
0x10b1   : > { %16204 = vmatprep.mubr.msk.bf16.mxu1 %vm18570_vm0, %v18569_v1 }
0x10b8   : > { %16205 = vmatmul.mubr.msk.bf16.gmra.mrb[132].mxu1 %vm763_vm1, %v10661_v0 }
0x10b9   : > { %16208 = vmatprep.mubr.msk.bf16.mxu1 %vm18570_vm0, %v18569_v1 }
0x10c0   : > { %16209 = vmatmul.mubr.msk.bf16.gmra.mrb[136].mxu1 %vm763_vm1, %v10662_v54  ;;  %v21652_v54 = vld [vmem:[%s22054_s15] ss:$0 sm:$0xff] }
0x10c1   : > { %16212 = vmatprep.mubr.msk.bf16.mxu1 %vm18570_vm0, %v18569_v1 }
0x10c8   : > { %16213 = vmatmul.mubr.msk.bf16.gmra.mrb[140].mxu1 %vm763_vm1, %v10663_v24 }
0x10c9   : > { %16216 = vmatprep.mubr.msk.bf16.mxu1 %vm18570_vm0, %v18569_v1 }
0x10d0   : > { %16217 = vmatmul.mubr.msk.bf16.gmra.mrb[144].mxu1 %vm763_vm1, %v10664_v3 }
0x10d1   : > { %16224 = vmatprep.mubr.msk.bf16.mxu1 %vm18570_vm0, %v18569_v1 }
0x10d8   : > { %16225 = vmatmul.mubr.msk.bf16.vlgmr.msra.gmra.mrb[120].mxu1 %vm763_vm1, %v10817_v5 }
0x10d9   : > { %16253 = vmatpush3.bf16.msra.mxu1 %v18469_v17  ;;  %16228 = vmatprep.mubr.msk.bf16.mxu1 %vm18570_vm0, %v18569_v1 }
0x10da   : > { %16254 = vmatprep.subr.bf16.mxu1 %v18569_v1 }
0x10dd   : > { %16255 = vmatpush3.bf16.msra.mxu1 %v18470_v44 }
0x10de   : > { %16428 = vmatprep.subr.bf16.mxu1 %v18569_v1 }
0x10e0   : > { %16229 = vmatmul.mubr.msk.bf16.gmra.mrb[124].mxu1 %vm763_vm1, %v10818_v13 }
0x10e1   : > { %16232 = vmatprep.mubr.msk.bf16.mxu1 %vm18570_vm0, %v18569_v1 }
0x10e8   : > { %16233 = vmatmul.mubr.msk.bf16.gmra.mrb[128].mxu1 %vm763_vm1, %v10819_v6 }
0x10e9   : > { %16236 = vmatprep.mubr.msk.bf16.mxu1 %vm18570_vm0, %v18569_v1 }
0x10f0   : > { %16237 = vmatmul.mubr.msk.bf16.gmra.mrb[132].mxu1 %vm763_vm1, %v10820_v8 }
0x10f1   : > { %16240 = vmatprep.mubr.msk.bf16.mxu1 %vm18570_vm0, %v18569_v1 }
0x10f8   : > { %16241 = vmatmul.mubr.msk.bf16.gmra.mrb[136].mxu1 %vm763_vm1, %v10821_v19 }
0x10f9   : > { %16244 = vmatprep.mubr.msk.bf16.mxu1 %vm18570_vm0, %v18569_v1 }
0x1100   : > { %16245 = vmatmul.mubr.msk.bf16.gmra.mrb[140].mxu1 %vm763_vm1, %v10822_v21 }
0x1101   : > { %16248 = vmatprep.mubr.msk.bf16.mxu1 %vm18570_vm0, %v18569_v1 }
0x1108   : > { %16249 = vmatmul.mubr.msk.bf16.gmra.mrb[144].mxu1 %vm763_vm1, %v10823_v34 }
0x1109   : > { %16256 = vmatprep.mubr.msk.bf16.mxu1 %vm18570_vm0, %v18569_v1 }
0x1110   : > { %16257 = vmatmul.mubr.msk.bf16.vlgmr.msra.gmra.mrb[120].mxu1 %vm763_vm1, %v10976_v38 }
0x1111   : > { %16260 = vmatprep.mubr.msk.bf16.mxu1 %vm18570_vm0, %v18569_v1 }
0x1118   : > { %16261 = vmatmul.mubr.msk.bf16.gmra.mrb[124].mxu1 %vm763_vm1, %v10977_v10 }
0x1119   : > { %16264 = vmatprep.mubr.msk.bf16.mxu1 %vm18570_vm0, %v18569_v1 }
0x1120   : > { %16265 = vmatmul.mubr.msk.bf16.gmra.mrb[128].mxu1 %vm763_vm1, %v10978_v47 }
0x1121   : > { %16268 = vmatprep.mubr.msk.bf16.mxu1 %vm18570_vm0, %v18569_v1 }
0x1128   : > { %16269 = vmatmul.mubr.msk.bf16.gmra.mrb[132].mxu1 %vm763_vm1, %v10979_v36 }
0x1129   : > { %16272 = vmatprep.mubr.msk.bf16.mxu1 %vm18570_vm0, %v18569_v1 }
0x1130   : > { %16273 = vmatmul.mubr.msk.bf16.gmra.mrb[136].mxu1 %vm763_vm1, %v10980_v26 }
0x1131   : > { %16276 = vmatprep.mubr.msk.bf16.mxu1 %vm18570_vm0, %v18569_v1 }
0x1138   : > { %16277 = vmatmul.mubr.msk.bf16.gmra.mrb[140].mxu1 %vm763_vm1, %v10981_v53 }
0x1139   : > { %16280 = vmatprep.mubr.msk.bf16.mxu1 %vm18570_vm0, %v18569_v1 }
0x1140   : > { %16281 = vmatmul.mubr.msk.bf16.gmra.mrb[144].mxu1 %vm763_vm1, %v10982_v56 }
0x1141   : > { %16432 = vmatprep.mubr.msk.bf16.mxu1 %vm18570_vm0, %v18569_v1 }
0x11e3   : > { %v11055_v0 = vpop.f32.mrb[120].mxu1 }
0x11e4   : > { %v11129_v2 = vmul.f32 %v21647_v63, %v11055_v0  ;;  %v16258_v24 = vpop.f32.mrb[121].mxu1 }
0x11e5   : > { %v11058_v28 = vpop.f32.mrb[122].mxu1 }
0x11e6   : > { %v11149_v3 = vadd.f32 %v21652_v54, %v11129_v2  ;;  %v11130_v39 = vmul.f32 %v21647_v63, %v11058_v28  ;;  %v16259_v27 = vpop.f32.mrb[123].mxu1 }
0x11e8   : > { %v11162_v17 = vmax.f32 %v11149_v3, 0.0  ;;  %v11150_v5 = vadd.f32 %v21652_v54, %v11130_v39 }
0x11ea   : > { %v11188_v44 = vmul.f32 %v11162_v17, %v21273_v15  ;;  %v11163_v7 = vmax.f32 %v11150_v5, 0.0  ;;  %v11274_v5 = vld [vmem:[#allocation4 + $0x1] sm:$0xff] }
0x11eb   : > { %v11063_v9 = vpop.f32.mrb[124].mxu1 }
0x11ec   : > { %11201 = vst.msk [vmem:[#allocation3 + $0xb] sm:$0xff] %vm763_vm1, %v11188_v44  ;;  %v11189_v13 = vmul.f32 %v11163_v7, %v21279_v4  ;;  %v11131_v14 = vmul.f32 %v21647_v63, %v11063_v9  ;;  %v16262_v18 = vpop.f32.mrb[125].mxu1 }
0x11ed   : > { %v11066_v6 = vpop.f32.mrb[126].mxu1 }
0x11ee   : > { %11202 = vst.msk [vmem:[#allocation3 + $0x13] sm:$0xff] %vm763_vm1, %v11189_v13  ;;  %v11151_v62 = vadd.f32 %v21652_v54, %v11131_v14  ;;  %v11132_v22 = vmul.f32 %v21647_v63, %v11066_v6  ;;  %v16263_v8 = vpop.f32.mrb[127].mxu1  ;;  %v18473_v14 = vld [vmem:[%s22055_s16] sm:$0xff]  }
0x11f0   : > { %v11164_v25 = vmax.f32 %v11151_v62, 0.0  ;;  %v11152_v15 = vadd.f32 %v21652_v54, %v11132_v22 }
0x11f2   : > { %v11190_v29 = vmul.f32 %v11164_v25, %v21291_v31  ;;  %v11165_v19 = vmax.f32 %v11152_v15, 0.0 }
0x11f3   : > { %v11071_v57 = vpop.f32.mrb[128].mxu1 }
0x11f4   : > { %11203 = vst.msk [vmem:[#allocation3 + $0x1b] sm:$0xff] %vm763_vm1, %v11190_v29  ;;  %v11191_v4 = vmul.f32 %v11165_v19, %v21297_v20  ;;  %v11133_v32 = vmul.f32 %v21647_v63, %v11071_v57  ;;  %v16266_v21 = vpop.f32.mrb[129].mxu1 }
0x11f5   : > { %v11074_v33 = vpop.f32.mrb[130].mxu1  ;;  %v18474_v21 = vld [vmem:[%s22055_s16 + $0x8] sm:$0xff]  }
0x11f6   : > { %11204 = vst.msk [vmem:[#allocation3 + $0x23] sm:$0xff] %vm763_vm1, %v11191_v4  ;;  %v11153_v34 = vadd.f32 %v21652_v54, %v11133_v32  ;;  %v11134_v23 = vmul.f32 %v21647_v63, %v11074_v33  ;;  %v16267_v37 = vpop.f32.mrb[131].mxu1 }
0x11f8   : > { %v11166_v38 = vmax.f32 %v11153_v34, 0.0  ;;  %v11154_v31 = vadd.f32 %v21652_v54, %v11134_v23 }
0x11fa   : > { %v11192_v42 = vmul.f32 %v11166_v38, %v21313_v40  ;;  %v11167_v43 = vmax.f32 %v11154_v31, 0.0 }
0x11fb   : > { %v11079_v10 = vpop.f32.mrb[132].mxu1  ;;  %v11215_v46 = vld [vmem:[#allocation3 + $0x16] ss:$2 sm:$0xf] }
0x11fc   : > { %11205 = vst.msk [vmem:[#allocation3 + $0x2b] sm:$0xff] %vm763_vm1, %v11192_v42  ;;  %v11193_v20 = vmul.f32 %v11167_v43, %v21325_v45  ;;  %v11135_v12 = vmul.f32 %v21647_v63, %v11079_v10  ;;  %v16270_v47 = vpop.f32.mrb[133].mxu1  ;;  %v11217_v30 = vld [vmem:[#allocation3 + $0x17] ss:$2 sm:$0xf] }
0x11fd   : > { %v11082_v48 = vpop.f32.mrb[134].mxu1  ;;  %v11219_v36 = vld [vmem:[#allocation3 + $0x20] ss:$2 sm:$0xf]  ;;  %v11222_v51 = vmax.f32 %v11215_v46, %v11217_v30 }
0x11fe   : > { %11206 = vst.msk [vmem:[#allocation3 + $0x33] sm:$0xff] %vm763_vm1, %v11193_v20  ;;  %v11155_v49 = vadd.f32 %v21652_v54, %v11135_v12  ;;  %v11136_v50 = vmul.f32 %v21647_v63, %v11082_v48  ;;  %v16271_v40 = vpop.f32.mrb[135].mxu1  ;;  %v11221_v26 = vld [vmem:[#allocation3 + $0x21] ss:$2 sm:$0xf] }
0x11ff   : > { %v11223_v52 = vmax.f32 %v11219_v36, %v11221_v26 }
0x1200   : > { %v11168_v53 = vmax.f32 %v11155_v49, 0.0  ;;  %v11156_v58 = vadd.f32 %v21652_v54, %v11136_v50  ;;  %v11187_v49 = vld [vmem:[%s22103_s0 + $0x60] sm:$0xf]  ;;  %s12593_s0 = sshll.u32 %s756_s6, 4  ;;  %s21999_s0 = int_to_ptr.vmem [resolvable:$true] %s12593_s0 }
0x1201   : > { %v11224_v45 = vmax.f32 %v11222_v51, %v11223_v52  ;;  %s18505_s5 = scalar_lea.vmem %s21999_s0, 16  ;;  %p18512_p0 = scmp.lt.s32.totalorder %s21999_s0, %s18510_s10 }
0x1202   : > { %v11194_v56 = vmul.f32 %v11168_v53, %v21339_v55  ;;  %v11169_v59 = vmax.f32 %v11156_v58, 0.0  ;;  %p18506_p11 = scmp.ne.s32.totalorder %s21999_s0, %s18505_s5  ;;  %p18513_p1 = scmp.lt.s32.totalorder %s18511_s8, %s18505_s5 }
0x1203   : > { %v11087_v60 = vpop.f32.mrb[136].mxu1  ;;  %11225 = vst.msk [vmem:[#allocation4 + $0xe] sm:$0xf] %vm876_vm3, %v11224_v45  ;;  %v11227_v44 = vld [vmem:[#allocation3 + $0x2a] ss:$2 sm:$0xf] }
0x1204   : > { %11207 = vst.msk [vmem:[#allocation3 + $0x3b] sm:$0xff] %vm763_vm1, %v11194_v56  ;;  %v11195_v0 = vmul.f32 %v11169_v59, %v21347_v61  ;;  %v11137_v2 = vmul.f32 %v21647_v63, %v11087_v60  ;;  %v16274_v24 = vpop.f32.mrb[137].mxu1  ;;  %v11229_v7 = vld [vmem:[#allocation3 + $0x2b] ss:$2 sm:$0xf]  ;;  %p18507_p12 = pnand %p18506_p11, %p18740_p5  ;;  %p18514_p2 = por %p18513_p1, %p18512_p0 }
0x1205   : > { %v11090_v28 = vpop.f32.mrb[138].mxu1  ;;  %v11231_v18 = vld [vmem:[#allocation3 + $0x34] ss:$2 sm:$0xf]  ;;  %v11234_v29 = vmax.f32 %v11227_v44, %v11229_v7  ;;  %v11441_v7 = vld [vmem:[#allocation4 + $0x2] sm:$0xff] }
0x1206   : > { %11208 = vst.msk [vmem:[#allocation3 + $0x43] sm:$0xff] %vm763_vm1, %v11195_v0  ;;  %v11157_v3 = vadd.f32 %v21652_v54, %v11137_v2  ;;  %v11138_v39 = vmul.f32 %v21647_v63, %v11090_v28  ;;  %v16275_v27 = vpop.f32.mrb[139].mxu1  ;;  %v11262_v2 = vld [vmem:[#allocation4] sm:$0xff]  ;;  %v18475_v28 = vld [vmem:[%s22055_s16 + $0x20] sm:$0xff]   ;;  %p18508_p13 = pneg %p18507_p12 }
0x1208   : > { %v11170_v55 = vmax.f32 %v11157_v3, 0.0  ;;  %v11158_v17 = vadd.f32 %v21652_v54, %v11138_v39  ;;  %v18476_v39 = vld [vmem:[%s22055_s16 + $0x28] sm:$0xff]   ;;  %p18515_p3 = pnand %p18514_p2, %p18508_p13 }
0x120a   : > { %v11196_v9 = vmul.f32 %v11170_v55, %v21360_v11  ;;  %v11171_v61 = vmax.f32 %v11158_v17, 0.0  ;;  %v11275_v13 = vld [vmem:[#allocation4 + $0x9] sm:$0xff] }
0x120b   : > { %v11095_v6 = vpop.f32.mrb[140].mxu1  ;;  %v11279_v62 = vpack.c.bf16 %v11275_v13, %v11274_v5  ;;  %v11233_v22 = vld [vmem:[#allocation3 + $0x35] ss:$2 sm:$0xf]  ;;  %v21729_v24 = vld [vmem:[#allocation4 + $0x8] sm:$0xff] }
0x120c   : > { %11209 = vst.msk [vmem:[#allocation3 + $0x4b] sm:$0xff] %vm763_vm1, %v11196_v9  ;;  %v11197_v8 = vmul.f32 %v11171_v61, %v21368_v16  ;;  %v11139_v25 = vmul.f32 %v21647_v63, %v11095_v6  ;;  %v16278_v15 = vpop.f32.mrb[141].mxu1  ;;  %v11235_v19 = vmax.f32 %v11231_v18, %v11233_v22  ;;  %v11267_v3 = vpack.c.bf16 %v21729_v24, %v11262_v2  ;;  %v11442_v9 = vld [vmem:[#allocation4 + $0xa] sm:$0xff]  ;;  %v18477_v61 = vld [vmem:[%s22055_s16 + $0x30] sm:$0xff]  }
0x120d   : > { %16289 = vmatmul.mubr.msk.bf16.vlgmr.msra.gmra.mrb[112].mxu0 %vm763_vm1, %v11279_v62  ;;  %v11098_v11 = vpop.f32.mrb[142].mxu1  ;;  %v11239_v23 = vld [vmem:[#allocation3 + $0x3e] ss:$2 sm:$0xf]  ;;  %v11446_v13 = vpack.c.bf16 %v11442_v9, %v11441_v7  ;;  %v18490_v7 = vld [vmem:[%s22058_s19 + $0x18] sm:$0xff]  }
0x120e   : > { %11210 = vst.msk [vmem:[#allocation3 + $0x53] sm:$0xff] %vm763_vm1, %v11197_v8  ;;  %v11159_v57 = vadd.f32 %v21652_v54, %v11139_v25  ;;  %v11140_v4 = vmul.f32 %v21647_v63, %v11098_v11  ;;  %v16279_v32 = vpop.f32.mrb[143].mxu1  ;;  %16301 = vmatpush3.bf16.msra.mxu0 %v18473_v14  ;;  %16292 = vmatprep.mubr.msk.bf16.mxu0 %vm18570_vm0, %v18569_v1  ;;  %v11241_v31 = vld [vmem:[#allocation3 + $0x3f] ss:$2 sm:$0xf]  ;;  %v18478_v14 = vld [vmem:[%s22055_s16 + $0x38] sm:$0xff]  }
0x120f   : > { %v11236_v16 = vmax.f32 %v11234_v29, %v11235_v19  ;;  %16302 = vmatprep.subr.bf16.mxu0 %v18569_v1  ;;  %v11246_v30 = vmax.f32 %v11239_v23, %v11241_v31  ;;  %v11536_v25 = vld [vmem:[#allocation4 + $0x6] sm:$0xff]  ;;  %v18479_v29 = vld [vmem:[%s22055_s16 + $0x40] sm:$0xff]   ;;  %v18480_v11 = vld [vmem:[%s22055_s16 + $0x48] sm:$0xff]  }
0x1210   : > { %v11172_v33 = vmax.f32 %v11159_v57, 0.0  ;;  %v11160_v34 = vadd.f32 %v21652_v54, %v11140_v4  ;;  %v11631_v23 = vld [vmem:[#allocation4 + $0x7] sm:$0xff]  ;;  %v13442_v9 = vld [vmem:[%s22056_s17] ss:$0 sm:$0xff] }
0x1211   : > { %11237 = vst.msk [vmem:[#allocation4 + $0x14] sm:$0xf] %vm876_vm3, %v11236_v16  ;;  %v18489_v16 = vld [vmem:[%s22058_s19 + $0x10] sm:$0xff]   ;;  %v18482_v31 = vld [vmem:[%s22055_s16 + $0x58] sm:$0xff]  }
0x1212   : > { %v11198_v37 = vmul.f32 %v11172_v33, %v21381_v35  ;;  %v11173_v38 = vmax.f32 %v11160_v34, 0.0  ;;  %16303 = vmatpush3.bf16.msra.mxu0 %v18474_v21  ;;  %v11540_v21 = vld [vmem:[#allocation4 + $0x26] sm:$0xf]  ;;  %16429 = vmatpush3.bf16.msra.mxu1 %v18489_v16 }
0x1213   : > { %v11103_v42 = vpop.f32.mrb[144].mxu1  ;;  %v11243_v43 = vld [vmem:[#allocation3 + $0x48] ss:$2 sm:$0xf]  ;;  %16316 = vmatprep.subr.bf16.mxu0 %v18569_v1  ;;  %16430 = vmatprep.subr.bf16.mxu1 %v18569_v1  ;;  %v11543_v33 = vpack.c.bf16 %v11540_v21, %v11540_v21 }
0x1214   : > { %11211 = vst.msk [vmem:[#allocation3 + $0x5b] sm:$0xff] %vm763_vm1, %v11198_v37  ;;  %v11199_v10 = vmul.f32 %v11173_v38, %v21389_v41  ;;  %v11141_v46 = vmul.f32 %v21647_v63, %v11103_v42  ;;  %v16282_v20 = vpop.f32.mrb[145].mxu1  ;;  %v11245_v12 = vld [vmem:[#allocation3 + $0x49] ss:$2 sm:$0xf]  ;;  %v18481_v37 = vld [vmem:[%s22055_s16 + $0x50] sm:$0xff]  }
0x1215   : > { %v11106_v47 = vpop.f32.mrb[146].mxu1  ;;  %v11247_v48 = vmax.f32 %v11243_v43, %v11245_v12  ;;  %v11251_v63 = vld [vmem:[#allocation3 + $0x52] ss:$2 sm:$0xf] }
0x1216   : > { %11212 = vst.msk [vmem:[#allocation3 + $0x63] sm:$0xff] %vm763_vm1, %v11199_v10  ;;  %v11161_v35 = vadd.f32 %v21652_v54, %v11141_v46  ;;  %v16283_v36 = vpop.f32.mrb[147].mxu1  ;;  %v11253_v26 = vld [vmem:[#allocation3 + $0x53] ss:$2 sm:$0xf]  ;;  %16431 = vmatpush3.bf16.msra.mxu1 %v18490_v7 }
0x1217   : > { %v11248_v50 = vmax.f32 %v11246_v30, %v11247_v48  ;;  %v11258_v53 = vmax.f32 %v11251_v63, %v11253_v26  ;;  %v11635_v46 = vld [vmem:[#allocation4 + $0x27] sm:$0xf]  ;;  %v18483_v12 = vld [vmem:[%s22055_s16 + $0x60] sm:$0xff]   ;;  %v18484_v30 = vld [vmem:[%s22055_s16 + $0x68] sm:$0xff]   ;;  %16436 = vmatprep.subr.bf16.mxu1 %v18569_v1 }
0x1218   : > { %v11174_v40 = vmax.f32 %v11161_v35, 0.0  ;;  %v11276_v54 = vld [vmem:[#allocation4 + $0x11] sm:$0xff]  ;;  %v11638_v20 = vpack.c.bf16 %v11635_v46, %v11635_v46  ;;  %v11730_v36 = vld [vmem:[#allocation4 + $0x28] sm:$0xf] }
0x1219   : > { %11249 = vst.msk [vmem:[#allocation4 + $0x1a] sm:$0xf] %vm876_vm3, %v11248_v50  ;;  %v21744_v55 = vld [vmem:[#allocation4 + $0x10] sm:$0xff]  ;;  %v18486_v26 = vld [vmem:[%s22055_s16 + $0x78] sm:$0xff]  }
0x121a   : > { %v11200_v41 = vmul.f32 %v11187_v49, %v11174_v40  ;;  %v11443_v6 = vld [vmem:[#allocation4 + $0x12] sm:$0xff]  ;;  %v11731_v47 = vpack.c.bf16 %v21744_v55, %v21729_v24  ;;  %v11733_v49 = vpack.c.bf16 %v11730_v36, %v11730_v36  ;;  %v11919_v24 = vld [vmem:[#allocation4 + $0x25] sm:$0xff] }
0x121b   : > { %v11255_v51 = vld [vmem:[#allocation3 + $0x5c] ss:$2 sm:$0xf]  ;;  %v21772_v15 = vld [vmem:[#allocation4 + $0xe] sm:$0xff] }
0x121c   : > { %11213 = vst.msk [vmem:[#allocation3 + $0x6b] sm:$0xf] %vm876_vm3, %v11200_v41  ;;  %v11541_v19 = vpack.c.bf16 %v21772_v15, %v11536_v25  ;;  %v11632_v34 = vld [vmem:[#allocation4 + $0xf] sm:$0xff]  ;;  %v18485_v41 = vld [vmem:[%s22055_s16 + $0x70] sm:$0xff]  }
0x121d   : > { %v11257_v52 = vld [vmem:[#allocation3 + $0x5d] ss:$2 sm:$0xf]  ;;  %v11636_v38 = vpack.c.bf16 %v11632_v34, %v11631_v23  ;;  %v11821_v40 = vld [vmem:[#allocation4 + $0xc] sm:$0xff] }
0x121e   : > { %v11259_v58 = vmax.f32 %v11255_v51, %v11257_v52  ;;  %v11824_v52 = vld [vmem:[#allocation4 + $0x24] sm:$0xff]  ;;  %v12135_v25 = vld [vmem:[%s22104_s3] sm:$0xff] }
0x1220   : > { %v11260_v45 = vmax.f32 %v11258_v53, %v11259_v58  ;;  %v21742_v27 = vld [vmem:[#allocation4 + $0x18] sm:$0xff]  ;;  %v11825_v58 = vld [vmem:[#allocation4 + $0x2c] sm:$0xf] }
0x1221   : > { %v11268_v17 = vpack.c.bf16 %v21742_v27, %v21744_v55  ;;  %v21787_v4 = vld [vmem:[#allocation4 + $0x16] sm:$0xff]  ;;  %v12014_v55 = vld [vmem:[#allocation4 + $0x26] sm:$0xff] }
0x1222   : > { %11261 = vst.msk [vmem:[#allocation4 + $0x20] sm:$0xf] %vm876_vm3, %v11260_v45  ;;  %v11633_v43 = vld [vmem:[#allocation4 + $0x17] sm:$0xff]  ;;  %v11828_v45 = vpack.c.bf16 %v11825_v58, %v11825_v58 }
0x1223   : > { %v11822_v50 = vld [vmem:[#allocation4 + $0x14] sm:$0xff] }
0x1224   : > { %v11826_v63 = vpack.c.bf16 %v11822_v50, %v11821_v40 }
0x1229   : > { %v11277_v56 = vld [vmem:[#allocation4 + $0x19] sm:$0xff]  ;;  %v11278_v60 = vld [vmem:[#allocation4 + $0x21] sm:$0xf] }
0x122a   : > { %v11280_v59 = vpack.c.bf16 %v11277_v56, %v11276_v54  ;;  %v11281_v0 = vpack.c.bf16 %v11278_v60, %v11278_v60  ;;  %v11266_v5 = vld [vmem:[#allocation4 + $0x20] sm:$0xf]  ;;  %v11917_v54 = vld [vmem:[#allocation4 + $0x15] sm:$0xff]  ;;  %v11916_v56 = vld [vmem:[#allocation4 + $0xd] sm:$0xff] }
0x122b   : > { %v11269_v44 = vpack.c.bf16 %v11266_v5, %v11266_v5  ;;  %v11444_v18 = vld [vmem:[#allocation4 + $0x1a] sm:$0xff]  ;;  %v11445_v22 = vld [vmem:[#allocation4 + $0x22] sm:$0xf]  ;;  %v11921_v60 = vpack.c.bf16 %v11917_v54, %v11916_v56  ;;  %v12015_v5 = vld [vmem:[#allocation4 + $0x2e] sm:$0xf] }
0x122c   : > { %16293 = vmatmul.mubr.msk.bf16.gmra.mrb[116].mxu0 %vm763_vm1, %v11280_v59  ;;  %v11447_v62 = vpack.c.bf16 %v11444_v18, %v11443_v6  ;;  %v11448_v8 = vpack.c.bf16 %v11445_v22, %v11445_v22  ;;  %v21785_v57 = vld [vmem:[#allocation4 + $0x1e] sm:$0xff]  ;;  %v18487_v59 = vld [vmem:[%s22055_s16 + $0x80] sm:$0xff]  }
0x122d   : > { %16296 = vmatprep.mubr.msk.bf16.mxu0 %vm18570_vm0, %v18569_v1  ;;  %v11542_v32 = vpack.c.bf16 %v21785_v57, %v21787_v4  ;;  %v11634_v42 = vld [vmem:[#allocation4 + $0x1f] sm:$0xff]  ;;  %v18491_v54 = vld [vmem:[%s22058_s19] sm:$0xff]  }
0x122e   : > { %v11637_v10 = vpack.c.bf16 %v11634_v42, %v11633_v43  ;;  %v11729_v48 = vld [vmem:[#allocation4 + $0x20] sm:$0xff]  ;;  %v12138_v43 = vld [vmem:[%s22104_s3 + $0x18] sm:$0xff] }
0x122f   : > { %v11732_v35 = vpack.c.bf16 %v11729_v48, %v21742_v27  ;;  %v11823_v51 = vld [vmem:[#allocation4 + $0x1c] sm:$0xff]  ;;  %v12016_v27 = vpack.c.bf16 %v21787_v4, %v21772_v15 }
0x1230   : > { %v11827_v53 = vpack.c.bf16 %v11824_v52, %v11823_v51  ;;  %v11918_v2 = vld [vmem:[#allocation4 + $0x1d] sm:$0xff] }
0x1234   : > { %16297 = vmatmul.mubr.msk.bf16.gmra.mrb[120].mxu0 %vm763_vm1, %v11281_v0  ;;  %v18488_v0 = vld [vmem:[%s22055_s16 + $0x88] sm:$0xff]  }
0x1235   : > { %16304 = vmatprep.mubr.msk.bf16.mxu0 %vm18570_vm0, %v18569_v1 }
0x123c   : > { %16305 = vmatmul.mubr.msk.bf16.vlgmr.msra.gmra.mrb[112].mxu0 %vm763_vm1, %v11267_v3  ;;  %v11920_v3 = vld [vmem:[#allocation4 + $0x2d] sm:$0xf] }
0x123d   : > { %16317 = vmatpush3.bf16.msra.mxu0 %v18475_v28  ;;  %16308 = vmatprep.mubr.msk.bf16.mxu0 %vm18570_vm0, %v18569_v1  ;;  %v11922_v28 = vpack.c.bf16 %v11919_v24, %v11918_v2  ;;  %v18493_v2 = vld [vmem:[%s22058_s19 + $0x20] sm:$0xff]  }
0x123e   : > { %16318 = vmatprep.subr.bf16.mxu0 %v18569_v1 }
0x1241   : > { %16319 = vmatpush3.bf16.msra.mxu0 %v18476_v39  ;;  %v11923_v39 = vpack.c.bf16 %v11920_v3, %v11920_v3 }
0x1242   : > { %16332 = vmatprep.subr.bf16.mxu0 %v18569_v1 }
0x1244   : > { %16309 = vmatmul.mubr.msk.bf16.gmra.mrb[116].mxu0 %vm763_vm1, %v11268_v17  ;;  %v12017_v17 = vpack.c.bf16 %v12014_v55, %v21785_v57 }
0x1245   : > { %16312 = vmatprep.mubr.msk.bf16.mxu0 %vm18570_vm0, %v18569_v1 }
0x124c   : > { %16313 = vmatmul.mubr.msk.bf16.gmra.mrb[120].mxu0 %vm763_vm1, %v11269_v44  ;;  %v12018_v44 = vpack.c.bf16 %v12015_v5, %v12015_v5 }
0x124d   : > { %16320 = vmatprep.mubr.msk.bf16.mxu0 %vm18570_vm0, %v18569_v1 }
0x1254   : > { %16321 = vmatmul.mubr.msk.bf16.vlgmr.msra.gmra.mrb[112].mxu0 %vm763_vm1, %v11446_v13  ;;  %v13443_v13 = vld [vmem:[%s22057_s18] ss:$0 sm:$0xff] }
0x1255   : > { %16333 = vmatpush3.bf16.msra.mxu0 %v18477_v61  ;;  %16324 = vmatprep.mubr.msk.bf16.mxu0 %vm18570_vm0, %v18569_v1 }
0x1256   : > { %16334 = vmatprep.subr.bf16.mxu0 %v18569_v1 }
0x1259   : > { %16335 = vmatpush3.bf16.msra.mxu0 %v18478_v14 }
0x125a   : > { %16348 = vmatprep.subr.bf16.mxu0 %v18569_v1 }
0x125c   : > { %16325 = vmatmul.mubr.msk.bf16.gmra.mrb[116].mxu0 %vm763_vm1, %v11447_v62 }
0x125d   : > { %16328 = vmatprep.mubr.msk.bf16.mxu0 %vm18570_vm0, %v18569_v1 }
0x1264   : > { %16329 = vmatmul.mubr.msk.bf16.gmra.mrb[120].mxu0 %vm763_vm1, %v11448_v8 }
0x1265   : > { %16336 = vmatprep.mubr.msk.bf16.mxu0 %vm18570_vm0, %v18569_v1 }
0x126c   : > { %16337 = vmatmul.mubr.msk.bf16.vlgmr.msra.gmra.mrb[112].mxu0 %vm763_vm1, %v11541_v19  ;;  %v12136_v19 = vld [vmem:[%s22104_s3 + $0x8] sm:$0xff] }
0x126d   : > { %16349 = vmatpush3.bf16.msra.mxu0 %v18479_v29  ;;  %16340 = vmatprep.mubr.msk.bf16.mxu0 %vm18570_vm0, %v18569_v1 }
0x126e   : > { %16350 = vmatprep.subr.bf16.mxu0 %v18569_v1 }
0x1271   : > { %16351 = vmatpush3.bf16.msra.mxu0 %v18480_v11 }
0x1272   : > { %16364 = vmatprep.subr.bf16.mxu0 %v18569_v1 }
0x1274   : > { %16341 = vmatmul.mubr.msk.bf16.gmra.mrb[116].mxu0 %vm763_vm1, %v11542_v32 }
0x1275   : > { %16344 = vmatprep.mubr.msk.bf16.mxu0 %vm18570_vm0, %v18569_v1 }
0x127c   : > { %16345 = vmatmul.mubr.msk.bf16.gmra.mrb[120].mxu0 %vm763_vm1, %v11543_v33 }
0x127d   : > { %16352 = vmatprep.mubr.msk.bf16.mxu0 %vm18570_vm0, %v18569_v1 }
0x1284   : > { %16353 = vmatmul.mubr.msk.bf16.vlgmr.msra.gmra.mrb[112].mxu0 %vm763_vm1, %v11636_v38  ;;  %v12137_v38 = vld [vmem:[%s22104_s3 + $0x10] sm:$0xff] }
0x1285   : > { %16365 = vmatpush3.bf16.msra.mxu0 %v18481_v37  ;;  %16356 = vmatprep.mubr.msk.bf16.mxu0 %vm18570_vm0, %v18569_v1 }
0x1286   : > { %16366 = vmatprep.subr.bf16.mxu0 %v18569_v1 }
0x1289   : > { %16367 = vmatpush3.bf16.msra.mxu0 %v18482_v31 }
0x128a   : > { %16380 = vmatprep.subr.bf16.mxu0 %v18569_v1 }
0x128c   : > { %16357 = vmatmul.mubr.msk.bf16.gmra.mrb[116].mxu0 %vm763_vm1, %v11637_v10 }
0x128d   : > { %16360 = vmatprep.mubr.msk.bf16.mxu0 %vm18570_vm0, %v18569_v1 }
0x1294   : > { %16361 = vmatmul.mubr.msk.bf16.gmra.mrb[120].mxu0 %vm763_vm1, %v11638_v20 }
0x1295   : > { %16368 = vmatprep.mubr.msk.bf16.mxu0 %vm18570_vm0, %v18569_v1 }
0x129c   : > { %16369 = vmatmul.mubr.msk.bf16.vlgmr.msra.gmra.mrb[112].mxu0 %vm763_vm1, %v11731_v47 }
0x129d   : > { %16381 = vmatpush3.bf16.msra.mxu0 %v18483_v12  ;;  %16372 = vmatprep.mubr.msk.bf16.mxu0 %vm18570_vm0, %v18569_v1 }
0x129e   : > { %16382 = vmatprep.subr.bf16.mxu0 %v18569_v1 }
0x12a1   : > { %16383 = vmatpush3.bf16.msra.mxu0 %v18484_v30 }
0x12a2   : > { %16396 = vmatprep.subr.bf16.mxu0 %v18569_v1 }
0x12a4   : > { %16373 = vmatmul.mubr.msk.bf16.gmra.mrb[116].mxu0 %vm763_vm1, %v11732_v35 }
0x12a5   : > { %16376 = vmatprep.mubr.msk.bf16.mxu0 %vm18570_vm0, %v18569_v1 }
0x12ac   : > { %16377 = vmatmul.mubr.msk.bf16.gmra.mrb[120].mxu0 %vm763_vm1, %v11733_v49  ;;  %v12139_v49 = vld [vmem:[%s22104_s3 + $0x20] sm:$0xf]  ;;  %s21997_s3 = scalar_lea.hbm %s22064_s25, %s13478_s26 }
0x12ad   : > { %16384 = vmatprep.mubr.msk.bf16.mxu0 %vm18570_vm0, %v18569_v1 }
0x12b4   : > { %16385 = vmatmul.mubr.msk.bf16.vlgmr.msra.gmra.mrb[112].mxu0 %vm763_vm1, %v11826_v63 }
0x12b5   : > { %16397 = vmatpush3.bf16.msra.mxu0 %v18485_v41  ;;  %16388 = vmatprep.mubr.msk.bf16.mxu0 %vm18570_vm0, %v18569_v1 }
0x12b6   : > { %16398 = vmatprep.subr.bf16.mxu0 %v18569_v1 }
0x12b9   : > { %16399 = vmatpush3.bf16.msra.mxu0 %v18486_v26 }
0x12ba   : > { %16412 = vmatprep.subr.bf16.mxu0 %v18569_v1 }
0x12bc   : > { %16389 = vmatmul.mubr.msk.bf16.gmra.mrb[116].mxu0 %vm763_vm1, %v11827_v53 }
0x12bd   : > { %16392 = vmatprep.mubr.msk.bf16.mxu0 %vm18570_vm0, %v18569_v1 }
0x12c4   : > { %16393 = vmatmul.mubr.msk.bf16.gmra.mrb[120].mxu0 %vm763_vm1, %v11828_v45 }
0x12c5   : > { %16400 = vmatprep.mubr.msk.bf16.mxu0 %vm18570_vm0, %v18569_v1 }
0x12cc   : > { %16401 = vmatmul.mubr.msk.bf16.vlgmr.msra.gmra.mrb[112].mxu0 %vm763_vm1, %v11921_v60 }
0x12cd   : > { %16413 = vmatpush3.bf16.msra.mxu0 %v18487_v59  ;;  %16404 = vmatprep.mubr.msk.bf16.mxu0 %vm18570_vm0, %v18569_v1  ;;  %v18492_v59 = vld [vmem:[%s22058_s19 + $0x8] sm:$0xff]  }
0x12ce   : > { %16414 = vmatprep.subr.bf16.mxu0 %v18569_v1 }
0x12d1   : > { %16415 = vmatpush3.bf16.msra.mxu0 %v18488_v0 }
0x12d4   : > { %16405 = vmatmul.mubr.msk.bf16.gmra.mrb[116].mxu0 %vm763_vm1, %v11922_v28 }
0x12d5   : > { %16408 = vmatprep.mubr.msk.bf16.mxu0 %vm18570_vm0, %v18569_v1 }
0x12dc   : > { %16409 = vmatmul.mubr.msk.bf16.gmra.mrb[120].mxu0 %vm763_vm1, %v11923_v39 }
0x12dd   : > { %16416 = vmatprep.mubr.msk.bf16.mxu0 %vm18570_vm0, %v18569_v1 }
0x12e4   : > { %16417 = vmatmul.mubr.msk.bf16.vlgmr.msra.gmra.mrb[112].mxu0 %vm763_vm1, %v12016_v27  ;;  %v18494_v27 = vld [vmem:[%s22058_s19 + $0x28] sm:$0xff]  }
0x12e5   : > { %16420 = vmatprep.mubr.msk.bf16.mxu0 %vm18570_vm0, %v18569_v1 }
0x12ec   : > { %16421 = vmatmul.mubr.msk.bf16.gmra.mrb[116].mxu0 %vm763_vm1, %v12017_v17  ;;  %v18495_v17 = vld [vmem:[%s22058_s19 + $0x30] sm:$0xff]  }
0x12ed   : > { %16424 = vmatprep.mubr.msk.bf16.mxu0 %vm18570_vm0, %v18569_v1 }
0x12f4   : > { %16425 = vmatmul.mubr.msk.bf16.gmra.mrb[120].mxu0 %vm763_vm1, %v12018_v44  ;;  %v18496_v44 = vld [vmem:[%s22058_s19 + $0x38] sm:$0xff]  }
0x13b7   : > { %v12079_v61 = vpop.f32.mrb[112].mxu0 }
0x13b8   : > { %v12113_v14 = vmul.f32 %v13442_v9, %v12079_v61  ;;  %v16418_v18 = vpop.f32.mrb[113].mxu0  ;;  %v18498_v61 = vld [vmem:[%s22060_s21 + $0x8] sm:$0xff]  }
0x13b9   : > { %v12082_v6 = vpop.f32.mrb[114].mxu0 }
0x13ba   : > { %v12125_v62 = vadd.f32 %v13443_v13, %v12113_v14  ;;  %v12114_v22 = vmul.f32 %v13442_v9, %v12082_v6  ;;  %v16419_v8 = vpop.f32.mrb[115].mxu0  ;;  %v18500_v14 = vld [vmem:[%s22060_s21 + $0x18] sm:$0xff]  }
0x13bc   : > { %v12130_v15 = vmax.f32 %v12125_v62, 0.0  ;;  %v12126_v29 = vadd.f32 %v13443_v13, %v12114_v22 }
0x13be   : > { %v12140_v11 = vmul.f32 %v12135_v25, %v12130_v15  ;;  %v12131_v57 = vmax.f32 %v12126_v29, 0.0 }
0x13bf   : > { %v12087_v4 = vpop.f32.mrb[116].mxu0 }
0x13c0   : > { %12145 = vst.msk [vmem:[#allocation4 + $0x7] sm:$0xff] %vm763_vm1, %v12140_v11  ;;  %v12141_v32 = vmul.f32 %v12136_v19, %v12131_v57  ;;  %v12115_v16 = vmul.f32 %v13442_v9, %v12087_v4  ;;  %v16422_v21 = vpop.f32.mrb[117].mxu0 }
0x13c1   : > { %v12090_v33 = vpop.f32.mrb[118].mxu0 }
0x13c2   : > { %12146 = vst.msk [vmem:[#allocation4 + $0xf] sm:$0xff] %vm763_vm1, %v12141_v32  ;;  %v12127_v34 = vadd.f32 %v13443_v13, %v12115_v16  ;;  %v12116_v23 = vmul.f32 %v13442_v9, %v12090_v33  ;;  %v16423_v37 = vpop.f32.mrb[119].mxu0  ;;  %v12419_v33 = vld [vmem:[%s22059_s20] sm:$0x1] }
0x13c4   : > { %v12132_v31 = vmax.f32 %v12127_v34, 0.0  ;;  %v12128_v42 = vadd.f32 %v13443_v13, %v12116_v23 }
0x13c6   : > { %v12142_v10 = vmul.f32 %v12137_v38, %v12132_v31  ;;  %v12133_v46 = vmax.f32 %v12128_v42, 0.0 }
0x13c7   : > { %v12095_v20 = vpop.f32.mrb[120].mxu0 }
0x13c8   : > { %12147 = vst.msk [vmem:[#allocation4 + $0x17] sm:$0xff] %vm763_vm1, %v12142_v10  ;;  %v12143_v12 = vmul.f32 %v12138_v43, %v12133_v46  ;;  %v12117_v47 = vmul.f32 %v13442_v9, %v12095_v20  ;;  %v16426_v30 = vpop.f32.mrb[121].mxu0  ;;  %v18497_v9 = vld [vmem:[%s22060_s21] sm:$0xff]   ;;  %v18502_v46 = vld [vmem:[%s22062_s23 + $0x8] sm:$0xff]   ;;  %v18503_v20 = vld [vmem:[%s22062_s23 + $0x10] sm:$0xff]  }
0x13c9   : > { %v12098_v48 = vpop.f32.mrb[122].mxu0  ;;  %v12151_v40 = vld [vmem:[#allocation4 + $0xe] ss:$2 sm:$0x3] }
0x13ca   : > { %12148 = vst.msk [vmem:[#allocation4 + $0x1f] sm:$0xff] %vm763_vm1, %v12143_v12  ;;  %v12129_v35 = vadd.f32 %v13443_v13, %v12117_v47  ;;  %v16427_v36 = vpop.f32.mrb[123].mxu0  ;;  %v12153_v41 = vld [vmem:[#allocation4 + $0xf] ss:$2 sm:$0x3]  ;;  %v18499_v13 = vld [vmem:[%s22060_s21 + $0x10] sm:$0xff]  }
0x13cb   : > { %v12155_v26 = vld [vmem:[#allocation4 + $0x14] ss:$2 sm:$0x3]  ;;  %v12158_v52 = vmax.f32 %v12151_v40, %v12153_v41  ;;  %v18504_v12 = vld [vmem:[%s22062_s23 + $0x18] sm:$0xff]   ;;  %v12431_v47 = vld [vmem:[%s22061_s22] sm:$0x1] }
0x13cc   : > { %v12134_v50 = vmax.f32 %v12129_v35, 0.0  ;;  %v18501_v43 = vld [vmem:[%s22062_s23] sm:$0xff]  }
0x13ce   : > { %v12144_v63 = vmul.f32 %v12139_v49, %v12134_v50 }
0x13cf   : > { %v12157_v51 = vld [vmem:[#allocation4 + $0x15] ss:$2 sm:$0x3]  ;;  %v12284_v24 = vld [vmem:[#allocation4 + $0x1a] ss:$2 sm:$0x3] }
0x13d0   : > { %12149 = vst.msk [vmem:[#allocation4 + $0x27] sm:$0xf] %vm876_vm3, %v12144_v63  ;;  %v12159_v53 = vmax.f32 %v12155_v26, %v12157_v51  ;;  %v12286_v28 = vld [vmem:[#allocation4 + $0x1b] ss:$2 sm:$0x3] }
0x13d1   : > { %v12288_v60 = vld [vmem:[#allocation4 + $0x20] ss:$2 sm:$0x3]  ;;  %v12290_v0 = vld [vmem:[#allocation4 + $0x21] ss:$2 sm:$0x3]  ;;  %v12291_v39 = vmax.f32 %v12284_v24, %v12286_v28 }
0x13d2   : > { %v12160_v58 = vmax.f32 %v12158_v52, %v12159_v53  ;;  %v12292_v3 = vmax.f32 %v12288_v60, %v12290_v0 }
0x13d4   : > { %v12161_v45 = vpack.c.bf16 %v12160_v58, %v12160_v58  ;;  %v12293_v55 = vmax.f32 %v12291_v39, %v12292_v3 }
0x13d6   : > { %v12172_v56 = vshrl.u32 %v12161_v45, 16  ;;  %v12294_v5 = vpack.c.bf16 %v12293_v55, %v12293_v55 }
0x13d8   : > { %16433 = vmatmul.mubr.msk.bf16.vlgmr.msra.gmra.mrb[148].mxu1 %vm763_vm1, %v12172_v56  ;;  %v12361_v7 = vshrl.u32 %v12294_v5, 16 }
0x13d9   : > { %16437 = vmatpush3.bf16.msra.mxu1 %v18491_v54  ;;  %16440 = vmatprep.mubr.msk.bf16.mxu1 %vm18570_vm0, %v18569_v1 }
0x13da   : > { %16438 = vmatprep.subr.bf16.mxu1 %v18569_v1 }
0x13dd   : > { %16439 = vmatpush3.bf16.msra.mxu1 %v18492_v59 }
0x13de   : > { %16444 = vmatprep.subr.bf16.mxu1 %v18569_v1 }
0x13e0   : > { %16441 = vmatmul.mubr.msk.bf16.vlgmr.msra.gmra.mrb[152].mxu1 %vm763_vm1, %v12161_v45 }
0x13e1   : > { %16445 = vmatpush3.bf16.msra.mxu1 %v18493_v2  ;;  %16448 = vmatprep.mubr.msk.bf16.mxu1 %vm18570_vm0, %v18569_v1 }
0x13e2   : > { %16446 = vmatprep.subr.bf16.mxu1 %v18569_v1 }
0x13e5   : > { %16447 = vmatpush3.bf16.msra.mxu1 %v18494_v27 }
0x13e6   : > { %16452 = vmatprep.subr.bf16.mxu1 %v18569_v1 }
0x13e8   : > { %16449 = vmatmul.mubr.msk.bf16.vlgmr.msra.gmra.mrb[156].mxu1 %vm763_vm1, %v12294_v5 }
0x13e9   : > { %16453 = vmatpush3.bf16.msra.mxu1 %v18495_v17  ;;  %16456 = vmatprep.mubr.msk.bf16.mxu1 %vm18570_vm0, %v18569_v1 }
0x13ea   : > { %16454 = vmatprep.subr.bf16.mxu1 %v18569_v1 }
0x13ed   : > { %16455 = vmatpush3.bf16.msra.mxu1 %v18496_v44 }
0x13ee   : > { %16460 = vmatprep.subr.bf16.mxu1 %v18569_v1 }
0x13f0   : > { %16457 = vmatmul.mubr.msk.bf16.vlgmr.msra.gmra.mrb[160].mxu1 %vm763_vm1, %v12361_v7 }
0x13f1   : > { %16468 = vmatprep.mubr.msk.bf16.mxu1 %vm18570_vm0, %v18569_v1  ;;  %16461 = vmatpush3.bf16.msra.mxu1 %v18497_v9 }
0x13f2   : > { %16462 = vmatprep.subr.bf16.mxu1 %v18569_v1 }
0x13f5   : > { %16463 = vmatpush3.bf16.msra.mxu1 %v18498_v61 }
0x13f6   : > { %16464 = vmatprep.subr.bf16.mxu1 %v18569_v1 }
0x13f9   : > { %16465 = vmatpush3.bf16.msra.mxu1 %v18499_v13 }
0x13fa   : > { %16466 = vmatprep.subr.bf16.mxu1 %v18569_v1 }
0x13fd   : > { %16467 = vmatpush3.bf16.msra.mxu1 %v18500_v14 }
0x13fe   : > { %16472 = vmatprep.subr.bf16.mxu1 %v18569_v1 }
0x14ab   : > { %v12223_v18 = vpop.f32.mrb[148].mxu1 }
0x14ac   : > { %v16434_v6 = vpop.f32.mrb[149].mxu1 }
0x14ad   : > { %v12226_v62 = vpop.f32.mrb[150].mxu1 }
0x14ae   : > { %v16435_v22 = vpop.f32.mrb[151].mxu1 }
0x14b3   : > { %v12277_v8 = vpop.f32.mrb[152].mxu1 }
0x14b4   : > { %v12278_v25 = vadd.f32 %v12277_v8, %v12223_v18  ;;  %v16442_v15 = vpop.f32.mrb[153].mxu1 }
0x14b5   : > { %v12280_v29 = vpop.f32.mrb[154].mxu1 }
0x14b6   : > { %v16443_v19 = vpop.f32.mrb[155].mxu1 }
0x14bb   : > { %v12349_v11 = vpop.f32.mrb[156].mxu1 }
0x14bc   : > { %v12355_v57 = vadd.f32 %v12349_v11, %v12278_v25  ;;  %v16450_v4 = vpop.f32.mrb[157].mxu1 }
0x14bd   : > { %v12352_v32 = vpop.f32.mrb[158].mxu1 }
0x14be   : > { %v16451_v16 = vpop.f32.mrb[159].mxu1 }
0x14c3   : > { %v12412_v21 = vpop.f32.mrb[160].mxu1 }
0x14c4   : > { %v12418_v34 = vadd.f32 %v12412_v21, %v12355_v57  ;;  %v16458_v23 = vpop.f32.mrb[161].mxu1 }
0x14c5   : > { %v12415_v37 = vpop.f32.mrb[162].mxu1 }
0x14c6   : > { %v12420_v38 = vadd.f32 %v12419_v33, %v12418_v34  ;;  %v16459_v31 = vpop.f32.mrb[163].mxu1 }
0x14c8   : > { %v12421_v42 = vmax.f32 %v12420_v38, 0.0 }
0x14ca   : > { %v12422_v10 = vpack.c.bf16 %v12421_v42, %v12421_v42 }
0x14cc   : > { %16469 = vmatmul.mubr.msk.bf16.vlgmr.msra.gmra.mrb[164].mxu1 %vm12456_vm5, %v12422_v10 }
0x14cd   : > { %16473 = vmatpush3.bf16.msra.mxu1 %v18501_v43  ;;  %16480 = vmatprep.mubr.msk.bf16.mxu1 %vm18570_vm0, %v18569_v1 }
0x14ce   : > { %16474 = vmatprep.subr.bf16.mxu1 %v18569_v1 }
0x14d1   : > { %16475 = vmatpush3.bf16.msra.mxu1 %v18502_v46 }
0x14d2   : > { %16476 = vmatprep.subr.bf16.mxu1 %v18569_v1 }
0x14d5   : > { %16477 = vmatpush3.bf16.msra.mxu1 %v18503_v20 }
0x14d6   : > { %16478 = vmatprep.subr.bf16.mxu1 %v18569_v1  ;;  %v12510_v1 = vld [vmem:[%s22063_s24] sm:$0x1] }
0x14d9   : > { %16479 = vmatpush3.bf16.msra.mxu1 %v18504_v12 }
0x159f   : > { %v12494_v30 = vpop.f32.mrb[164].mxu1 }
0x15a0   : > { %v12495_v48 = vadd.f32 %v12494_v30, %v12431_v47  ;;  %v16470_v35 = vpop.f32.mrb[165].mxu1 }
0x15a1   : > { %v12497_v36 = vpop.f32.mrb[166].mxu1 }
0x15a2   : > { %v12500_v49 = vmax.f32 %v12495_v48, 0.0  ;;  %v16471_v50 = vpop.f32.mrb[167].mxu1 }
0x15a4   : > { %v12501_v40 = vpack.c.bf16 %v12500_v49, %v12500_v49 }
0x15a6   : > { %16481 = vmatmul.mubr.msk.bf16.vlgmr.msra.gmra.mrb[168].mxu1 %vm12456_vm5, %v12501_v40 }
0x1679   : > { %v12572_v41 = vpop.f32.mrb[168].mxu1 }
0x167a   : > { %v12573_v63 = vadd.f32 %v12572_v41, %v12510_v1  ;;  %v16482_v26 = vpop.f32.mrb[169].mxu1 }
0x167b   : > { %v12575_v51 = vpop.f32.mrb[170].mxu1 }
0x167c   : > { %v16483_v52 = vpop.f32.mrb[171].mxu1  ;;  %12579 = vst.msk [vmem:[%s756_s6] sm:$0x1] %vm12578_vm6, %v12573_v63 }
0x167d   : > { %18518 = shalt.err (!%p18515_p3)
}
0x167e   : > { %s18519_s9 = scalar_lea.hbm %s21997_s3, 16  ;;  %s18523_s27 = scalar_lea.hbm %s22064_s25, 32 }
0x167f   : > { %p18520_p4 = scmp.ne.s32.totalorder %s21997_s3, %s18519_s9  ;;  %p18524_p9 = scmp.lt.u32.totalorder %s21997_s3, %s22064_s25 }
0x1680   : > { %p18525_p10 = scmp.lt.u32.totalorder %s18523_s27, %s18519_s9  ;;  %p18527_p12 = scmp.lt.u32.totalorder %s18519_s9, %s21997_s3 }
0x1681   : > { %p18521_p7 = pnand %p18520_p4, %p18740_p5 }
0x1682   : > { %p18526_p11 = por %p18525_p10, %p18524_p9 }
0x1683   : > { %p18522_p8 = pneg %p18521_p7 }
0x1684   : > { %p18528_p13 = por %p18527_p12, %p18526_p11 }
0x1686   : > { %p18529_p0 = pnand %p18528_p13, %p18522_p8 }
0x1688   : > { %18532 = shalt.err (!%p18529_p0)
}
0x1689   : > { %18358 = dma.vmem_to_hbm [thread:$0]  (%p18740_p5), %s21999_s0, 16, %s21997_s3, %s12581_s7  }
0x168a PF: > { %p18364_p1 = scmp.ge.s32.totalorder %s18567_s30, 2  ;;  %s12605_s5 = sand.u32 1, %s18555_s29  }
0x168b   : > { %s12606_s8 = scalar_lea.sflag [#allocation6], %s12605_s5 }
0x168c   : > { %p18361_p2 = pnand %p18364_p1, %p18744_p6 }
0x168e   : > { %18550 = dma.done.wait (!%p18361_p2), %s12606_s8, 16  }
0x168f   : > { %18552 = vsyncadd (!%p18361_p2), %s12606_s8, 4294967280  ;;  %s22105_s30 = sld [smem:[#allocation9_spill]]  ;;  %s22106_s9 = sld [smem:[#allocation8_spill]] }
0x1690   : > { %s22107_s6 = sld [smem:[#allocation10_spill]]  ;;  %s22108_s29 = smov %s18559_s2 }
0x1695   : > { %p35_p3 = scmp.ge.s32.totalorder %s22105_s30, 4   ;;  %s22109_s2 = smov %s22106_s9 }
0x1697   :  { %37 = sbr.rel (!%p35_p3) target bundleno = 15 (0xf), region = 254 }
0x169e   :  { %12610 = vsyncpa [#allocation6], 1 }
0x169f   :  { %12612 = vsyncpa [#allocation6 + $0x1], 1 }

</bundles_post_ra>
